<compile_context>
chip_gen: v7x
topology: tpu7x:2x2x1
jax: 0.10.0
libtpu: 0.0.40
codegen_flags: <defaults>
</compile_context>

<pallas_src>
import functools

import jax
import jax.numpy as jnp
from jax import lax
from jax.experimental import pallas as pl
from jax.experimental.pallas import tpu as pltpu


# ---------------------------------------------------------------------------
# In-kernel helpers (operate on VMEM values, NHWC with the batch dim squeezed).
# ---------------------------------------------------------------------------
def _sepconv_branch(x, dw_ref, pw_ref, b_ref, k):
    """Depthwise kxk (zero pad k//2, stride 1) -> pointwise 1x1 -> ReLU.
    Both BatchNorms are pre-folded into pw_ref / b_ref on the host.

    x      : (H, W, Cin) f32 value resident in VMEM/vregs
    dw_ref : (k*k, Cin)   depthwise weights (row = kh*k + kw)
    pw_ref : (Cin, Cout)  folded pointwise weights
    b_ref  : (1, Cout)    folded bias
    """
    h, w, cin = x.shape
    p = k // 2

    # Zero-pad along H once (leading-dim concat in VMEM is cheap); the W halo
    # is handled with XLU rolls + column masks (no unaligned sublane slices,
    # no host-side jnp.pad HBM round trip).
    zrows = jnp.zeros((p, w, cin), jnp.float32)
    xp = jnp.concatenate([zrows, x, zrows], axis=0)            # (H + 2p, W, Cin)

    col = lax.broadcasted_iota(jnp.int32, (1, w, 1), 1)
    acc = jnp.zeros((h, w, cin), jnp.float32)
    for kh in range(k):
        xh = xp[kh:kh + h]                                     # leading-dim slice
        for kw in range(k):
            d = kw - p                                         # column offset
            shift = (-d) % w
            xs = xh if shift == 0 else pltpu.roll(xh, shift, axis=1)
            row = kh * k + kw
            wgt = dw_ref[row:row + 1, :].reshape(1, 1, cin)
            tap = xs * wgt
            if d != 0:
                valid = jnp.logical_and(col + d >= 0, col + d < w)
                tap = jnp.where(valid, tap, 0.0)
            acc = acc + tap

    # Pointwise 1x1 conv == channel matmul on the MXU (BNs already folded).
    cout = pw_ref.shape[1]
    y = jnp.dot(acc.reshape(h * w, cin), pw_ref[...],
                preferred_element_type=jnp.float32)
    y = jnp.maximum(y + b_ref[...], 0.0)
    return y.reshape(h, w, cout)


def _bilinear_up2x(z):
    """x2 bilinear upsample, align_corners=False.  (H, W, C) -> (2H, 2W, C)."""
    h, w, c = z.shape

    # clamped vertical neighbours (leading-dim concats are cheap)
    z_up = jnp.concatenate([z[:1], z[:-1]], axis=0)            # z[h-1]
    z_dn = jnp.concatenate([z[1:], z[-1:]], axis=0)            # z[h+1]
    r_e = 0.25 * z_up + 0.75 * z                               # even output rows
    r_o = 0.75 * z + 0.25 * z_dn                               # odd output rows

    col = lax.broadcasted_iota(jnp.int32, (1, w, 1), 1)
    first = col == 0
    last = col == (w - 1)

    def cols(r):
        # clamped horizontal neighbours via XLU roll + boundary fixup
        r_lt = jnp.where(first, r, pltpu.roll(r, 1, axis=1))
        r_rt = jnp.where(last, r, pltpu.roll(r, (-1) % w, axis=1))
        return 0.25 * r_lt + 0.75 * r, 0.75 * r + 0.25 * r_rt

    ee, eo = cols(r_e)
    oe, oo = cols(r_o)

    # interleave all four phases in-kernel -> one dense (2H, 2W, C) value
    even = jnp.stack([ee, eo], axis=2).reshape(h, 2 * w, c)
    odd = jnp.stack([oe, oo], axis=2).reshape(h, 2 * w, c)
    return jnp.stack([even, odd], axis=1).reshape(2 * h, 2 * w, c)


# ---------------------------------------------------------------------------
# Fused FPN level kernel:
#   out[..., :C/2] = ReLU(BN(SepConv5(x_hi)))                       (lateral)
#   out[..., C/2:] = Upsample2x(ReLU(BN(SepConv3(x_lo)))
#                               + ReLU(BN(SepConv5(x_lo))))          (ComplexUpsample)
# One grid step per batch element.
# ---------------------------------------------------------------------------
def _fpn_level_kernel(k_lat, k_u1, k_u2,
                      xhi_ref, xlo_ref,
                      dwl_ref, pwl_ref, bl_ref,
                      dw1_ref, pw1_ref, b1_ref,
                      dw2_ref, pw2_ref, b2_ref,
                      out_ref):
    # lateral branch on the high-res input
    lat = _sepconv_branch(xhi_ref[0], dwl_ref, pwl_ref, bl_ref, k_lat)

    # ComplexUpsample: both branches reuse the same low-res VMEM tile
    xlo = xlo_ref[0]
    z = (_sepconv_branch(xlo, dw1_ref, pw1_ref, b1_ref, k_u1)
         + _sepconv_branch(xlo, dw2_ref, pw2_ref, b2_ref, k_u2))
    up = _bilinear_up2x(z)

    # fused channel concat: write the two halves of the output directly
    ch = lat.shape[-1]
    out_ref[0, :, :, 0:ch] = lat
    out_ref[0, :, :, ch:2 * ch] = up


def fpn_level(x_hi, x_lo, lat_p, up_p):
    """One FPN stage: concat([lateral(x_hi), ComplexUpsample(x_lo)], channels).
    x_hi: (N, H, W, C_hi) NHWC;  x_lo: (N, H/2, W/2, C_lo) NHWC."""
    n, h, w, c_hi = x_hi.shape
    nl, hl, wl, c_lo = x_lo.shape
    assert n == nl and h == 2 * hl and w == 2 * wl
    c_half = lat_p["pw"].shape[1]
    c_out = 2 * c_half
    k_lat, k1, k2 = lat_p["k"], up_p["c1"]["k"], up_p["c2"]["k"]

    weights = (lat_p["dw"], lat_p["pw"], lat_p["bias"],
               up_p["c1"]["dw"], up_p["c1"]["pw"], up_p["c1"]["bias"],
               up_p["c2"]["dw"], up_p["c2"]["pw"], up_p["c2"]["bias"])

    def full_spec(arr):
        nd = arr.ndim
        return pl.BlockSpec(arr.shape, lambda i, nd=nd: (0,) * nd)

    flops = int(
        2 * n * h * w * c_hi * (k_lat * k_lat + c_half)
        + 2 * n * hl * wl * c_lo * (k1 * k1 + k2 * k2 + 2 * c_half)
        + 12 * n * h * w * c_half)
    bytes_accessed = int(4 * (x_hi.size + x_lo.size + n * h * w * c_out
                              + sum(wt.size for wt in weights)))

    return pl.pallas_call(
        functools.partial(_fpn_level_kernel, k_lat, k1, k2),
        out_shape=jax.ShapeDtypeStruct((n, h, w, c_out), jnp.float32),
        grid_spec=pltpu.PrefetchScalarGridSpec(
            num_scalar_prefetch=0,
            grid=(n,),
            in_specs=[
                pl.BlockSpec((1, h, w, c_hi), lambda i: (i, 0, 0, 0)),
                pl.BlockSpec((1, hl, wl, c_lo), lambda i: (i, 0, 0, 0)),
            ] + [full_spec(wt) for wt in weights],
            out_specs=pl.BlockSpec((1, h, w, c_out), lambda i: (i, 0, 0, 0)),
        ),
        compiler_params=pltpu.CompilerParams(
            dimension_semantics=("parallel",),
            vmem_limit_bytes=64 * 1024 * 1024),
        cost_estimate=pl.CostEstimate(
            flops=flops, transcendentals=0, bytes_accessed=bytes_accessed),
    )(x_hi, x_lo, *weights)


# ---------------------------------------------------------------------------
# Deterministic parameter construction (synthetic). Both BatchNorms are folded
# (inference semantics, f32 on the host) into the pointwise weights + bias:
#   y = relu(((x_dw*s1 + t1) @ pw) * s2 + t2)
#     = relu(x_dw @ (s1[:,None]*pw*s2[None,:]) + ((t1 @ pw)*s2 + t2))
# ---------------------------------------------------------------------------
def make_sepconv_params(key, cin, cout, k, eps=1e-5):
    ks = jax.random.split(key, 10)
    dw = jax.random.normal(ks[0], (k * k, cin), jnp.float32) * (0.3 / (k * k))
    g1 = 1.0 + 0.1 * jax.random.normal(ks[1], (cin,), jnp.float32)
    b1 = 0.1 * jax.random.normal(ks[2], (cin,), jnp.float32)
    m1 = 0.1 * jax.random.normal(ks[3], (cin,), jnp.float32)
    v1 = 1.0 + 0.1 * jax.random.uniform(ks[4], (cin,), jnp.float32)
    pw = jax.random.normal(ks[5], (cin, cout), jnp.float32) * (1.0 / cin)
    g2 = 1.0 + 0.1 * jax.random.normal(ks[6], (cout,), jnp.float32)
    b2 = 0.1 * jax.random.normal(ks[7], (cout,), jnp.float32)
    m2 = 0.1 * jax.random.normal(ks[8], (cout,), jnp.float32)
    v2 = 1.0 + 0.1 * jax.random.uniform(ks[9], (cout,), jnp.float32)

    s1 = g1 / jnp.sqrt(v1 + eps)
    t1 = b1 - m1 * s1
    s2 = g2 / jnp.sqrt(v2 + eps)
    t2 = b2 - m2 * s2
    pw_fold = (s1[:, None] * pw) * s2[None, :]
    bias = (t1 @ pw) * s2 + t2
    return {"k": k, "dw": dw, "pw": pw_fold, "bias": bias.reshape(1, cout)}


def fpn_init(key, input_dims, head_dims):
    assert len(head_dims) >= 3
    ks = jax.random.split(key, 9)
    return {
        "lat2": make_sepconv_params(ks[0], input_dims[0], head_dims[0] // 2, 5),
        "lat3": make_sepconv_params(ks[1], input_dims[1], head_dims[1] // 2, 5),
        "lat4": make_sepconv_params(ks[2], input_dims[2], head_dims[2] // 2, 5),
        "up3": {"c1": make_sepconv_params(ks[3], head_dims[1], head_dims[0] // 2, 3),
                "c2": make_sepconv_params(ks[4], head_dims[1], head_dims[0] // 2, 5)},
        "up4": {"c1": make_sepconv_params(ks[5], head_dims[2], head_dims[1] // 2, 3),
                "c2": make_sepconv_params(ks[6], head_dims[2], head_dims[1] // 2, 5)},
        "up5": {"c1": make_sepconv_params(ks[7], input_dims[3], head_dims[2] // 2, 3),
                "c2": make_sepconv_params(ks[8], input_dims[3], head_dims[2] // 2, 5)},
    }


# ---------------------------------------------------------------------------
# Forward pass (mirrors Fpn.forward) — 3 fused pallas_calls total.
# ---------------------------------------------------------------------------
def fpn_forward_nhwc(inputs, params):
    c2, c3, c4, c5 = inputs
    p4 = fpn_level(c4, c5, params["lat4"], params["up5"])   # cat(lat4(c4), up5(c5))
    p3 = fpn_level(c3, p4, params["lat3"], params["up4"])   # cat(lat3(c3), up4(p4))
    p2 = fpn_level(c2, p3, params["lat2"], params["up3"])   # cat(lat2(c2), up3(p3))
    return p2


def fpn_forward_nchw(inputs_nchw, params):
    inputs = [jnp.transpose(x, (0, 2, 3, 1)) for x in inputs_nchw]   # NCHW->NHWC
    p2 = fpn_forward_nhwc(inputs, params)
    return jnp.transpose(p2, (0, 3, 1, 2))                            # NHWC->NCHW


# ---------------------------------------------------------------------------
if __name__ == "__main__":
    key = jax.random.PRNGKey(0)
    k_in, k_par = jax.random.split(key)

    # small, shape-consistent configuration of the module
    input_dims = [8, 8, 16, 16]
    head_dims = [16, 16, 16]
    n = 2
    s2 = 64            # c2 spatial; c3=32, c4=16, c5=8 (strides 4/8/16/32 style)

    kin = jax.random.split(k_in, 4)
    c2 = jax.random.normal(kin[0], (n, input_dims[0], s2, s2), jnp.float32)
    c3 = jax.random.normal(kin[1], (n, input_dims[1], s2 // 2, s2 // 2), jnp.float32)
    c4 = jax.random.normal(kin[2], (n, input_dims[2], s2 // 4, s2 // 4), jnp.float32)
    c5 = jax.random.normal(kin[3], (n, input_dims[3], s2 // 8, s2 // 8), jnp.float32)

    params = fpn_init(k_par, input_dims, head_dims)

    out = fpn_forward_nchw((c2, c3, c4, c5), params)
    out = jax.block_until_ready(out)
    assert out.shape == (n, head_dims[0], s2, s2), out.shape
    assert out.dtype == jnp.float32
    print("KERNEL_OK")
</pallas_src>

<mosaic_0001>
module attributes {stable_mosaic.version = 11 : i64} {
  func.func @_fpn_level_kernel(%arg0: i32, %arg1: memref<1x16x16x16xf32, #tpu.memory_space<vmem>>, %arg2: memref<1x8x8x16xf32, #tpu.memory_space<vmem>>, %arg3: memref<25x16xf32, #tpu.memory_space<vmem>>, %arg4: memref<16x8xf32, #tpu.memory_space<vmem>>, %arg5: memref<1x8xf32, #tpu.memory_space<vmem>>, %arg6: memref<9x16xf32, #tpu.memory_space<vmem>>, %arg7: memref<16x8xf32, #tpu.memory_space<vmem>>, %arg8: memref<1x8xf32, #tpu.memory_space<vmem>>, %arg9: memref<25x16xf32, #tpu.memory_space<vmem>>, %arg10: memref<16x8xf32, #tpu.memory_space<vmem>>, %arg11: memref<1x8xf32, #tpu.memory_space<vmem>>, %arg12: memref<1x16x16x16xf32, #tpu.memory_space<vmem>>) attributes {dimension_semantics = [#tpu.dimension_semantics<parallel>], iteration_bounds = array<i64: 2>, scalar_prefetch = 0 : i64, scratch_operands = 0 : i64, tpu.core_type = #tpu.core_type<tc>, window_params = [{transform_indices = @transform_0, window_bounds = array<i64: 1, 16, 16, 16>}, {transform_indices = @transform_1, window_bounds = array<i64: 1, 8, 8, 16>}, {pipeline_mode = #tpu.pipeline_mode<synchronous>, transform_indices = @transform_2, window_bounds = array<i64: 25, 16>}, {pipeline_mode = #tpu.pipeline_mode<synchronous>, transform_indices = @transform_3, window_bounds = array<i64: 16, 8>}, {pipeline_mode = #tpu.pipeline_mode<synchronous>, transform_indices = @transform_4, window_bounds = array<i64: 1, 8>}, {pipeline_mode = #tpu.pipeline_mode<synchronous>, transform_indices = @transform_5, window_bounds = array<i64: 9, 16>}, {pipeline_mode = #tpu.pipeline_mode<synchronous>, transform_indices = @transform_6, window_bounds = array<i64: 16, 8>}, {pipeline_mode = #tpu.pipeline_mode<synchronous>, transform_indices = @transform_7, window_bounds = array<i64: 1, 8>}, {pipeline_mode = #tpu.pipeline_mode<synchronous>, transform_indices = @transform_8, window_bounds = array<i64: 25, 16>}, {pipeline_mode = #tpu.pipeline_mode<synchronous>, transform_indices = @transform_9, window_bounds = array<i64: 16, 8>}, {pipeline_mode = #tpu.pipeline_mode<synchronous>, transform_indices = @transform_10, window_bounds = array<i64: 1, 8>}, {transform_indices = @transform_11, window_bounds = array<i64: 1, 16, 16, 16>}]} {
    %c0 = arith.constant 0 : index
    %c0_0 = arith.constant 0 : index
    %c0_1 = arith.constant 0 : index
    %c0_2 = arith.constant 0 : index
    %0 = vector.load %arg1[%c0, %c0_0, %c0_1, %c0_2] : memref<1x16x16x16xf32, #tpu.memory_space<vmem>>, vector<1x16x16x16xf32>
    %1 = vector.shape_cast %0 : vector<1x16x16x16xf32> to vector<16x16x16xf32>
    %cst = arith.constant 0.000000e+00 : f32
    %2 = vector.broadcast %cst : f32 to vector<2x16x16xf32>
    %3 = tpu.concatenate %2, %1, %2 in 0 : vector<2x16x16xf32>, vector<16x16x16xf32>, vector<2x16x16xf32> -> vector<20x16x16xf32>
    %4 = tpu.iota {dimensions = array<i32: 1>} : vector<1x16x1xi32>
    %cst_3 = arith.constant 0.000000e+00 : f32
    %5 = vector.broadcast %cst_3 : f32 to vector<16x16x16xf32>
    %6 = vector.extract_strided_slice %3 {offsets = [0, 0, 0], sizes = [16, 16, 16], strides = [1, 1, 1]} : vector<20x16x16xf32> to vector<16x16x16xf32>
    %c2_i32 = arith.constant 2 : i32
    %7 = tpu.dynamic_rotate %6 by %c2_i32 dim 1 : vector<16x16x16xf32>, i32 -> vector<16x16x16xf32>
    %c0_4 = arith.constant 0 : index
    %c0_5 = arith.constant 0 : index
    %8 = vector.load %arg3[%c0_4, %c0_5] : memref<25x16xf32, #tpu.memory_space<vmem>>, vector<1x16xf32>
    %9 = vector.shape_cast %8 : vector<1x16xf32> to vector<1x1x16xf32>
    %10 = vector.broadcast %9 : vector<1x1x16xf32> to vector<16x16x16xf32>
    %11 = arith.mulf %7, %10 : vector<16x16x16xf32>
    %c-2_i32 = arith.constant -2 : i32
    %12 = vector.broadcast %c-2_i32 : i32 to vector<1x16x1xi32>
    %13 = arith.addi %4, %12 : vector<1x16x1xi32>
    %c0_i32 = arith.constant 0 : i32
    %14 = vector.broadcast %c0_i32 : i32 to vector<1x16x1xi32>
    %15 = arith.cmpi sge, %13, %14 : vector<1x16x1xi32>
    %c-2_i32_6 = arith.constant -2 : i32
    %16 = vector.broadcast %c-2_i32_6 : i32 to vector<1x16x1xi32>
    %17 = arith.addi %4, %16 : vector<1x16x1xi32>
    %c16_i32 = arith.constant 16 : i32
    %18 = vector.broadcast %c16_i32 : i32 to vector<1x16x1xi32>
    %19 = arith.cmpi slt, %17, %18 : vector<1x16x1xi32>
    %20 = arith.andi %15, %19 : vector<1x16x1xi1>
    %cst_7 = arith.constant 0.000000e+00 : f32
    %21 = vector.shape_cast %20 : vector<1x16x1xi1> to vector<1x16x1xi1>
    %22 = vector.broadcast %21 : vector<1x16x1xi1> to vector<16x16x16xi1>
    %23 = vector.broadcast %cst_7 : f32 to vector<16x16x16xf32>
    %24 = arith.select %22, %11, %23 : vector<16x16x16xi1>, vector<16x16x16xf32>
    %25 = arith.addf %5, %24 : vector<16x16x16xf32>
    %c1_i32 = arith.constant 1 : i32
    %26 = tpu.dynamic_rotate %6 by %c1_i32 dim 1 : vector<16x16x16xf32>, i32 -> vector<16x16x16xf32>
    %c1 = arith.constant 1 : index
    %c0_8 = arith.constant 0 : index
    %27 = vector.load %arg3[%c1, %c0_8] : memref<25x16xf32, #tpu.memory_space<vmem>>, vector<1x16xf32>
    %28 = vector.shape_cast %27 : vector<1x16xf32> to vector<1x1x16xf32>
    %29 = vector.broadcast %28 : vector<1x1x16xf32> to vector<16x16x16xf32>
    %30 = arith.mulf %26, %29 : vector<16x16x16xf32>
    %c-1_i32 = arith.constant -1 : i32
    %31 = vector.broadcast %c-1_i32 : i32 to vector<1x16x1xi32>
    %32 = arith.addi %4, %31 : vector<1x16x1xi32>
    %c0_i32_9 = arith.constant 0 : i32
    %33 = vector.broadcast %c0_i32_9 : i32 to vector<1x16x1xi32>
    %34 = arith.cmpi sge, %32, %33 : vector<1x16x1xi32>
    %c-1_i32_10 = arith.constant -1 : i32
    %35 = vector.broadcast %c-1_i32_10 : i32 to vector<1x16x1xi32>
    %36 = arith.addi %4, %35 : vector<1x16x1xi32>
    %c16_i32_11 = arith.constant 16 : i32
    %37 = vector.broadcast %c16_i32_11 : i32 to vector<1x16x1xi32>
    %38 = arith.cmpi slt, %36, %37 : vector<1x16x1xi32>
    %39 = arith.andi %34, %38 : vector<1x16x1xi1>
    %cst_12 = arith.constant 0.000000e+00 : f32
    %40 = vector.shape_cast %39 : vector<1x16x1xi1> to vector<1x16x1xi1>
    %41 = vector.broadcast %40 : vector<1x16x1xi1> to vector<16x16x16xi1>
    %42 = vector.broadcast %cst_12 : f32 to vector<16x16x16xf32>
    %43 = arith.select %41, %30, %42 : vector<16x16x16xi1>, vector<16x16x16xf32>
    %44 = arith.addf %25, %43 : vector<16x16x16xf32>
    %c2 = arith.constant 2 : index
    %c0_13 = arith.constant 0 : index
    %45 = vector.load %arg3[%c2, %c0_13] : memref<25x16xf32, #tpu.memory_space<vmem>>, vector<1x16xf32>
    %46 = vector.shape_cast %45 : vector<1x16xf32> to vector<1x1x16xf32>
    %47 = vector.broadcast %46 : vector<1x1x16xf32> to vector<16x16x16xf32>
    %48 = arith.mulf %6, %47 : vector<16x16x16xf32>
    %49 = arith.addf %44, %48 : vector<16x16x16xf32>
    %c15_i32 = arith.constant 15 : i32
    %50 = tpu.dynamic_rotate %6 by %c15_i32 dim 1 : vector<16x16x16xf32>, i32 -> vector<16x16x16xf32>
    %c3 = arith.constant 3 : index
    %c0_14 = arith.constant 0 : index
    %51 = vector.load %arg3[%c3, %c0_14] : memref<25x16xf32, #tpu.memory_space<vmem>>, vector<1x16xf32>
    %52 = vector.shape_cast %51 : vector<1x16xf32> to vector<1x1x16xf32>
    %53 = vector.broadcast %52 : vector<1x1x16xf32> to vector<16x16x16xf32>
    %54 = arith.mulf %50, %53 : vector<16x16x16xf32>
    %c1_i32_15 = arith.constant 1 : i32
    %55 = vector.broadcast %c1_i32_15 : i32 to vector<1x16x1xi32>
    %56 = arith.addi %4, %55 : vector<1x16x1xi32>
    %c0_i32_16 = arith.constant 0 : i32
    %57 = vector.broadcast %c0_i32_16 : i32 to vector<1x16x1xi32>
    %58 = arith.cmpi sge, %56, %57 : vector<1x16x1xi32>
    %c1_i32_17 = arith.constant 1 : i32
    %59 = vector.broadcast %c1_i32_17 : i32 to vector<1x16x1xi32>
    %60 = arith.addi %4, %59 : vector<1x16x1xi32>
    %c16_i32_18 = arith.constant 16 : i32
    %61 = vector.broadcast %c16_i32_18 : i32 to vector<1x16x1xi32>
    %62 = arith.cmpi slt, %60, %61 : vector<1x16x1xi32>
    %63 = arith.andi %58, %62 : vector<1x16x1xi1>
    %cst_19 = arith.constant 0.000000e+00 : f32
    %64 = vector.shape_cast %63 : vector<1x16x1xi1> to vector<1x16x1xi1>
    %65 = vector.broadcast %64 : vector<1x16x1xi1> to vector<16x16x16xi1>
    %66 = vector.broadcast %cst_19 : f32 to vector<16x16x16xf32>
    %67 = arith.select %65, %54, %66 : vector<16x16x16xi1>, vector<16x16x16xf32>
    %68 = arith.addf %49, %67 : vector<16x16x16xf32>
    %c14_i32 = arith.constant 14 : i32
    %69 = tpu.dynamic_rotate %6 by %c14_i32 dim 1 : vector<16x16x16xf32>, i32 -> vector<16x16x16xf32>
    %c4 = arith.constant 4 : index
    %c0_20 = arith.constant 0 : index
    %70 = vector.load %arg3[%c4, %c0_20] : memref<25x16xf32, #tpu.memory_space<vmem>>, vector<1x16xf32>
    %71 = vector.shape_cast %70 : vector<1x16xf32> to vector<1x1x16xf32>
    %72 = vector.broadcast %71 : vector<1x1x16xf32> to vector<16x16x16xf32>
    %73 = arith.mulf %69, %72 : vector<16x16x16xf32>
    %c2_i32_21 = arith.constant 2 : i32
    %74 = vector.broadcast %c2_i32_21 : i32 to vector<1x16x1xi32>
    %75 = arith.addi %4, %74 : vector<1x16x1xi32>
    %c0_i32_22 = arith.constant 0 : i32
    %76 = vector.broadcast %c0_i32_22 : i32 to vector<1x16x1xi32>
    %77 = arith.cmpi sge, %75, %76 : vector<1x16x1xi32>
    %c2_i32_23 = arith.constant 2 : i32
    %78 = vector.broadcast %c2_i32_23 : i32 to vector<1x16x1xi32>
    %79 = arith.addi %4, %78 : vector<1x16x1xi32>
    %c16_i32_24 = arith.constant 16 : i32
    %80 = vector.broadcast %c16_i32_24 : i32 to vector<1x16x1xi32>
    %81 = arith.cmpi slt, %79, %80 : vector<1x16x1xi32>
    %82 = arith.andi %77, %81 : vector<1x16x1xi1>
    %cst_25 = arith.constant 0.000000e+00 : f32
    %83 = vector.shape_cast %82 : vector<1x16x1xi1> to vector<1x16x1xi1>
    %84 = vector.broadcast %83 : vector<1x16x1xi1> to vector<16x16x16xi1>
    %85 = vector.broadcast %cst_25 : f32 to vector<16x16x16xf32>
    %86 = arith.select %84, %73, %85 : vector<16x16x16xi1>, vector<16x16x16xf32>
    %87 = arith.addf %68, %86 : vector<16x16x16xf32>
    %88 = vector.extract_strided_slice %3 {offsets = [1, 0, 0], sizes = [16, 16, 16], strides = [1, 1, 1]} : vector<20x16x16xf32> to vector<16x16x16xf32>
    %c2_i32_26 = arith.constant 2 : i32
    %89 = tpu.dynamic_rotate %88 by %c2_i32_26 dim 1 : vector<16x16x16xf32>, i32 -> vector<16x16x16xf32>
    %c5 = arith.constant 5 : index
    %c0_27 = arith.constant 0 : index
    %90 = vector.load %arg3[%c5, %c0_27] : memref<25x16xf32, #tpu.memory_space<vmem>>, vector<1x16xf32>
    %91 = vector.shape_cast %90 : vector<1x16xf32> to vector<1x1x16xf32>
    %92 = vector.broadcast %91 : vector<1x1x16xf32> to vector<16x16x16xf32>
    %93 = arith.mulf %89, %92 : vector<16x16x16xf32>
    %c-2_i32_28 = arith.constant -2 : i32
    %94 = vector.broadcast %c-2_i32_28 : i32 to vector<1x16x1xi32>
    %95 = arith.addi %4, %94 : vector<1x16x1xi32>
    %c0_i32_29 = arith.constant 0 : i32
    %96 = vector.broadcast %c0_i32_29 : i32 to vector<1x16x1xi32>
    %97 = arith.cmpi sge, %95, %96 : vector<1x16x1xi32>
    %c-2_i32_30 = arith.constant -2 : i32
    %98 = vector.broadcast %c-2_i32_30 : i32 to vector<1x16x1xi32>
    %99 = arith.addi %4, %98 : vector<1x16x1xi32>
    %c16_i32_31 = arith.constant 16 : i32
    %100 = vector.broadcast %c16_i32_31 : i32 to vector<1x16x1xi32>
    %101 = arith.cmpi slt, %99, %100 : vector<1x16x1xi32>
    %102 = arith.andi %97, %101 : vector<1x16x1xi1>
    %cst_32 = arith.constant 0.000000e+00 : f32
    %103 = vector.shape_cast %102 : vector<1x16x1xi1> to vector<1x16x1xi1>
    %104 = vector.broadcast %103 : vector<1x16x1xi1> to vector<16x16x16xi1>
    %105 = vector.broadcast %cst_32 : f32 to vector<16x16x16xf32>
    %106 = arith.select %104, %93, %105 : vector<16x16x16xi1>, vector<16x16x16xf32>
    %107 = arith.addf %87, %106 : vector<16x16x16xf32>
    %c1_i32_33 = arith.constant 1 : i32
    %108 = tpu.dynamic_rotate %88 by %c1_i32_33 dim 1 : vector<16x16x16xf32>, i32 -> vector<16x16x16xf32>
    %c6 = arith.constant 6 : index
    %c0_34 = arith.constant 0 : index
    %109 = vector.load %arg3[%c6, %c0_34] : memref<25x16xf32, #tpu.memory_space<vmem>>, vector<1x16xf32>
    %110 = vector.shape_cast %109 : vector<1x16xf32> to vector<1x1x16xf32>
    %111 = vector.broadcast %110 : vector<1x1x16xf32> to vector<16x16x16xf32>
    %112 = arith.mulf %108, %111 : vector<16x16x16xf32>
    %c-1_i32_35 = arith.constant -1 : i32
    %113 = vector.broadcast %c-1_i32_35 : i32 to vector<1x16x1xi32>
    %114 = arith.addi %4, %113 : vector<1x16x1xi32>
    %c0_i32_36 = arith.constant 0 : i32
    %115 = vector.broadcast %c0_i32_36 : i32 to vector<1x16x1xi32>
    %116 = arith.cmpi sge, %114, %115 : vector<1x16x1xi32>
    %c-1_i32_37 = arith.constant -1 : i32
    %117 = vector.broadcast %c-1_i32_37 : i32 to vector<1x16x1xi32>
    %118 = arith.addi %4, %117 : vector<1x16x1xi32>
    %c16_i32_38 = arith.constant 16 : i32
    %119 = vector.broadcast %c16_i32_38 : i32 to vector<1x16x1xi32>
    %120 = arith.cmpi slt, %118, %119 : vector<1x16x1xi32>
    %121 = arith.andi %116, %120 : vector<1x16x1xi1>
    %cst_39 = arith.constant 0.000000e+00 : f32
    %122 = vector.shape_cast %121 : vector<1x16x1xi1> to vector<1x16x1xi1>
    %123 = vector.broadcast %122 : vector<1x16x1xi1> to vector<16x16x16xi1>
    %124 = vector.broadcast %cst_39 : f32 to vector<16x16x16xf32>
    %125 = arith.select %123, %112, %124 : vector<16x16x16xi1>, vector<16x16x16xf32>
    %126 = arith.addf %107, %125 : vector<16x16x16xf32>
    %c7 = arith.constant 7 : index
    %c0_40 = arith.constant 0 : index
    %127 = vector.load %arg3[%c7, %c0_40] : memref<25x16xf32, #tpu.memory_space<vmem>>, vector<1x16xf32>
    %128 = vector.shape_cast %127 : vector<1x16xf32> to vector<1x1x16xf32>
    %129 = vector.broadcast %128 : vector<1x1x16xf32> to vector<16x16x16xf32>
    %130 = arith.mulf %88, %129 : vector<16x16x16xf32>
    %131 = arith.addf %126, %130 : vector<16x16x16xf32>
    %c15_i32_41 = arith.constant 15 : i32
    %132 = tpu.dynamic_rotate %88 by %c15_i32_41 dim 1 : vector<16x16x16xf32>, i32 -> vector<16x16x16xf32>
    %c8 = arith.constant 8 : index
    %c0_42 = arith.constant 0 : index
    %133 = vector.load %arg3[%c8, %c0_42] : memref<25x16xf32, #tpu.memory_space<vmem>>, vector<1x16xf32>
    %134 = vector.shape_cast %133 : vector<1x16xf32> to vector<1x1x16xf32>
    %135 = vector.broadcast %134 : vector<1x1x16xf32> to vector<16x16x16xf32>
    %136 = arith.mulf %132, %135 : vector<16x16x16xf32>
    %c1_i32_43 = arith.constant 1 : i32
    %137 = vector.broadcast %c1_i32_43 : i32 to vector<1x16x1xi32>
    %138 = arith.addi %4, %137 : vector<1x16x1xi32>
    %c0_i32_44 = arith.constant 0 : i32
    %139 = vector.broadcast %c0_i32_44 : i32 to vector<1x16x1xi32>
    %140 = arith.cmpi sge, %138, %139 : vector<1x16x1xi32>
    %c1_i32_45 = arith.constant 1 : i32
    %141 = vector.broadcast %c1_i32_45 : i32 to vector<1x16x1xi32>
    %142 = arith.addi %4, %141 : vector<1x16x1xi32>
    %c16_i32_46 = arith.constant 16 : i32
    %143 = vector.broadcast %c16_i32_46 : i32 to vector<1x16x1xi32>
    %144 = arith.cmpi slt, %142, %143 : vector<1x16x1xi32>
    %145 = arith.andi %140, %144 : vector<1x16x1xi1>
    %cst_47 = arith.constant 0.000000e+00 : f32
    %146 = vector.shape_cast %145 : vector<1x16x1xi1> to vector<1x16x1xi1>
    %147 = vector.broadcast %146 : vector<1x16x1xi1> to vector<16x16x16xi1>
    %148 = vector.broadcast %cst_47 : f32 to vector<16x16x16xf32>
    %149 = arith.select %147, %136, %148 : vector<16x16x16xi1>, vector<16x16x16xf32>
    %150 = arith.addf %131, %149 : vector<16x16x16xf32>
    %c14_i32_48 = arith.constant 14 : i32
    %151 = tpu.dynamic_rotate %88 by %c14_i32_48 dim 1 : vector<16x16x16xf32>, i32 -> vector<16x16x16xf32>
    %c9 = arith.constant 9 : index
    %c0_49 = arith.constant 0 : index
    %152 = vector.load %arg3[%c9, %c0_49] : memref<25x16xf32, #tpu.memory_space<vmem>>, vector<1x16xf32>
    %153 = vector.shape_cast %152 : vector<1x16xf32> to vector<1x1x16xf32>
    %154 = vector.broadcast %153 : vector<1x1x16xf32> to vector<16x16x16xf32>
    %155 = arith.mulf %151, %154 : vector<16x16x16xf32>
    %c2_i32_50 = arith.constant 2 : i32
    %156 = vector.broadcast %c2_i32_50 : i32 to vector<1x16x1xi32>
    %157 = arith.addi %4, %156 : vector<1x16x1xi32>
    %c0_i32_51 = arith.constant 0 : i32
    %158 = vector.broadcast %c0_i32_51 : i32 to vector<1x16x1xi32>
    %159 = arith.cmpi sge, %157, %158 : vector<1x16x1xi32>
    %c2_i32_52 = arith.constant 2 : i32
    %160 = vector.broadcast %c2_i32_52 : i32 to vector<1x16x1xi32>
    %161 = arith.addi %4, %160 : vector<1x16x1xi32>
    %c16_i32_53 = arith.constant 16 : i32
    %162 = vector.broadcast %c16_i32_53 : i32 to vector<1x16x1xi32>
    %163 = arith.cmpi slt, %161, %162 : vector<1x16x1xi32>
    %164 = arith.andi %159, %163 : vector<1x16x1xi1>
    %cst_54 = arith.constant 0.000000e+00 : f32
    %165 = vector.shape_cast %164 : vector<1x16x1xi1> to vector<1x16x1xi1>
    %166 = vector.broadcast %165 : vector<1x16x1xi1> to vector<16x16x16xi1>
    %167 = vector.broadcast %cst_54 : f32 to vector<16x16x16xf32>
    %168 = arith.select %166, %155, %167 : vector<16x16x16xi1>, vector<16x16x16xf32>
    %169 = arith.addf %150, %168 : vector<16x16x16xf32>
    %170 = vector.extract_strided_slice %3 {offsets = [2, 0, 0], sizes = [16, 16, 16], strides = [1, 1, 1]} : vector<20x16x16xf32> to vector<16x16x16xf32>
    %c2_i32_55 = arith.constant 2 : i32
    %171 = tpu.dynamic_rotate %170 by %c2_i32_55 dim 1 : vector<16x16x16xf32>, i32 -> vector<16x16x16xf32>
    %c10 = arith.constant 10 : index
    %c0_56 = arith.constant 0 : index
    %172 = vector.load %arg3[%c10, %c0_56] : memref<25x16xf32, #tpu.memory_space<vmem>>, vector<1x16xf32>
    %173 = vector.shape_cast %172 : vector<1x16xf32> to vector<1x1x16xf32>
    %174 = vector.broadcast %173 : vector<1x1x16xf32> to vector<16x16x16xf32>
    %175 = arith.mulf %171, %174 : vector<16x16x16xf32>
    %c-2_i32_57 = arith.constant -2 : i32
    %176 = vector.broadcast %c-2_i32_57 : i32 to vector<1x16x1xi32>
    %177 = arith.addi %4, %176 : vector<1x16x1xi32>
    %c0_i32_58 = arith.constant 0 : i32
    %178 = vector.broadcast %c0_i32_58 : i32 to vector<1x16x1xi32>
    %179 = arith.cmpi sge, %177, %178 : vector<1x16x1xi32>
    %c-2_i32_59 = arith.constant -2 : i32
    %180 = vector.broadcast %c-2_i32_59 : i32 to vector<1x16x1xi32>
    %181 = arith.addi %4, %180 : vector<1x16x1xi32>
    %c16_i32_60 = arith.constant 16 : i32
    %182 = vector.broadcast %c16_i32_60 : i32 to vector<1x16x1xi32>
    %183 = arith.cmpi slt, %181, %182 : vector<1x16x1xi32>
    %184 = arith.andi %179, %183 : vector<1x16x1xi1>
    %cst_61 = arith.constant 0.000000e+00 : f32
    %185 = vector.shape_cast %184 : vector<1x16x1xi1> to vector<1x16x1xi1>
    %186 = vector.broadcast %185 : vector<1x16x1xi1> to vector<16x16x16xi1>
    %187 = vector.broadcast %cst_61 : f32 to vector<16x16x16xf32>
    %188 = arith.select %186, %175, %187 : vector<16x16x16xi1>, vector<16x16x16xf32>
    %189 = arith.addf %169, %188 : vector<16x16x16xf32>
    %c1_i32_62 = arith.constant 1 : i32
    %190 = tpu.dynamic_rotate %170 by %c1_i32_62 dim 1 : vector<16x16x16xf32>, i32 -> vector<16x16x16xf32>
    %c11 = arith.constant 11 : index
    %c0_63 = arith.constant 0 : index
    %191 = vector.load %arg3[%c11, %c0_63] : memref<25x16xf32, #tpu.memory_space<vmem>>, vector<1x16xf32>
    %192 = vector.shape_cast %191 : vector<1x16xf32> to vector<1x1x16xf32>
    %193 = vector.broadcast %192 : vector<1x1x16xf32> to vector<16x16x16xf32>
    %194 = arith.mulf %190, %193 : vector<16x16x16xf32>
    %c-1_i32_64 = arith.constant -1 : i32
    %195 = vector.broadcast %c-1_i32_64 : i32 to vector<1x16x1xi32>
    %196 = arith.addi %4, %195 : vector<1x16x1xi32>
    %c0_i32_65 = arith.constant 0 : i32
    %197 = vector.broadcast %c0_i32_65 : i32 to vector<1x16x1xi32>
    %198 = arith.cmpi sge, %196, %197 : vector<1x16x1xi32>
    %c-1_i32_66 = arith.constant -1 : i32
    %199 = vector.broadcast %c-1_i32_66 : i32 to vector<1x16x1xi32>
    %200 = arith.addi %4, %199 : vector<1x16x1xi32>
    %c16_i32_67 = arith.constant 16 : i32
    %201 = vector.broadcast %c16_i32_67 : i32 to vector<1x16x1xi32>
    %202 = arith.cmpi slt, %200, %201 : vector<1x16x1xi32>
    %203 = arith.andi %198, %202 : vector<1x16x1xi1>
    %cst_68 = arith.constant 0.000000e+00 : f32
    %204 = vector.shape_cast %203 : vector<1x16x1xi1> to vector<1x16x1xi1>
    %205 = vector.broadcast %204 : vector<1x16x1xi1> to vector<16x16x16xi1>
    %206 = vector.broadcast %cst_68 : f32 to vector<16x16x16xf32>
    %207 = arith.select %205, %194, %206 : vector<16x16x16xi1>, vector<16x16x16xf32>
    %208 = arith.addf %189, %207 : vector<16x16x16xf32>
    %c12 = arith.constant 12 : index
    %c0_69 = arith.constant 0 : index
    %209 = vector.load %arg3[%c12, %c0_69] : memref<25x16xf32, #tpu.memory_space<vmem>>, vector<1x16xf32>
    %210 = vector.shape_cast %209 : vector<1x16xf32> to vector<1x1x16xf32>
    %211 = vector.broadcast %210 : vector<1x1x16xf32> to vector<16x16x16xf32>
    %212 = arith.mulf %170, %211 : vector<16x16x16xf32>
    %213 = arith.addf %208, %212 : vector<16x16x16xf32>
    %c15_i32_70 = arith.constant 15 : i32
    %214 = tpu.dynamic_rotate %170 by %c15_i32_70 dim 1 : vector<16x16x16xf32>, i32 -> vector<16x16x16xf32>
    %c13 = arith.constant 13 : index
    %c0_71 = arith.constant 0 : index
    %215 = vector.load %arg3[%c13, %c0_71] : memref<25x16xf32, #tpu.memory_space<vmem>>, vector<1x16xf32>
    %216 = vector.shape_cast %215 : vector<1x16xf32> to vector<1x1x16xf32>
    %217 = vector.broadcast %216 : vector<1x1x16xf32> to vector<16x16x16xf32>
    %218 = arith.mulf %214, %217 : vector<16x16x16xf32>
    %c1_i32_72 = arith.constant 1 : i32
    %219 = vector.broadcast %c1_i32_72 : i32 to vector<1x16x1xi32>
    %220 = arith.addi %4, %219 : vector<1x16x1xi32>
    %c0_i32_73 = arith.constant 0 : i32
    %221 = vector.broadcast %c0_i32_73 : i32 to vector<1x16x1xi32>
    %222 = arith.cmpi sge, %220, %221 : vector<1x16x1xi32>
    %c1_i32_74 = arith.constant 1 : i32
    %223 = vector.broadcast %c1_i32_74 : i32 to vector<1x16x1xi32>
    %224 = arith.addi %4, %223 : vector<1x16x1xi32>
    %c16_i32_75 = arith.constant 16 : i32
    %225 = vector.broadcast %c16_i32_75 : i32 to vector<1x16x1xi32>
    %226 = arith.cmpi slt, %224, %225 : vector<1x16x1xi32>
    %227 = arith.andi %222, %226 : vector<1x16x1xi1>
    %cst_76 = arith.constant 0.000000e+00 : f32
    %228 = vector.shape_cast %227 : vector<1x16x1xi1> to vector<1x16x1xi1>
    %229 = vector.broadcast %228 : vector<1x16x1xi1> to vector<16x16x16xi1>
    %230 = vector.broadcast %cst_76 : f32 to vector<16x16x16xf32>
    %231 = arith.select %229, %218, %230 : vector<16x16x16xi1>, vector<16x16x16xf32>
    %232 = arith.addf %213, %231 : vector<16x16x16xf32>
    %c14_i32_77 = arith.constant 14 : i32
    %233 = tpu.dynamic_rotate %170 by %c14_i32_77 dim 1 : vector<16x16x16xf32>, i32 -> vector<16x16x16xf32>
    %c14 = arith.constant 14 : index
    %c0_78 = arith.constant 0 : index
    %234 = vector.load %arg3[%c14, %c0_78] : memref<25x16xf32, #tpu.memory_space<vmem>>, vector<1x16xf32>
    %235 = vector.shape_cast %234 : vector<1x16xf32> to vector<1x1x16xf32>
    %236 = vector.broadcast %235 : vector<1x1x16xf32> to vector<16x16x16xf32>
    %237 = arith.mulf %233, %236 : vector<16x16x16xf32>
    %c2_i32_79 = arith.constant 2 : i32
    %238 = vector.broadcast %c2_i32_79 : i32 to vector<1x16x1xi32>
    %239 = arith.addi %4, %238 : vector<1x16x1xi32>
    %c0_i32_80 = arith.constant 0 : i32
    %240 = vector.broadcast %c0_i32_80 : i32 to vector<1x16x1xi32>
    %241 = arith.cmpi sge, %239, %240 : vector<1x16x1xi32>
    %c2_i32_81 = arith.constant 2 : i32
    %242 = vector.broadcast %c2_i32_81 : i32 to vector<1x16x1xi32>
    %243 = arith.addi %4, %242 : vector<1x16x1xi32>
    %c16_i32_82 = arith.constant 16 : i32
    %244 = vector.broadcast %c16_i32_82 : i32 to vector<1x16x1xi32>
    %245 = arith.cmpi slt, %243, %244 : vector<1x16x1xi32>
    %246 = arith.andi %241, %245 : vector<1x16x1xi1>
    %cst_83 = arith.constant 0.000000e+00 : f32
    %247 = vector.shape_cast %246 : vector<1x16x1xi1> to vector<1x16x1xi1>
    %248 = vector.broadcast %247 : vector<1x16x1xi1> to vector<16x16x16xi1>
    %249 = vector.broadcast %cst_83 : f32 to vector<16x16x16xf32>
    %250 = arith.select %248, %237, %249 : vector<16x16x16xi1>, vector<16x16x16xf32>
    %251 = arith.addf %232, %250 : vector<16x16x16xf32>
    %252 = vector.extract_strided_slice %3 {offsets = [3, 0, 0], sizes = [16, 16, 16], strides = [1, 1, 1]} : vector<20x16x16xf32> to vector<16x16x16xf32>
    %c2_i32_84 = arith.constant 2 : i32
    %253 = tpu.dynamic_rotate %252 by %c2_i32_84 dim 1 : vector<16x16x16xf32>, i32 -> vector<16x16x16xf32>
    %c15 = arith.constant 15 : index
    %c0_85 = arith.constant 0 : index
    %254 = vector.load %arg3[%c15, %c0_85] : memref<25x16xf32, #tpu.memory_space<vmem>>, vector<1x16xf32>
    %255 = vector.shape_cast %254 : vector<1x16xf32> to vector<1x1x16xf32>
    %256 = vector.broadcast %255 : vector<1x1x16xf32> to vector<16x16x16xf32>
    %257 = arith.mulf %253, %256 : vector<16x16x16xf32>
    %c-2_i32_86 = arith.constant -2 : i32
    %258 = vector.broadcast %c-2_i32_86 : i32 to vector<1x16x1xi32>
    %259 = arith.addi %4, %258 : vector<1x16x1xi32>
    %c0_i32_87 = arith.constant 0 : i32
    %260 = vector.broadcast %c0_i32_87 : i32 to vector<1x16x1xi32>
    %261 = arith.cmpi sge, %259, %260 : vector<1x16x1xi32>
    %c-2_i32_88 = arith.constant -2 : i32
    %262 = vector.broadcast %c-2_i32_88 : i32 to vector<1x16x1xi32>
    %263 = arith.addi %4, %262 : vector<1x16x1xi32>
    %c16_i32_89 = arith.constant 16 : i32
    %264 = vector.broadcast %c16_i32_89 : i32 to vector<1x16x1xi32>
    %265 = arith.cmpi slt, %263, %264 : vector<1x16x1xi32>
    %266 = arith.andi %261, %265 : vector<1x16x1xi1>
    %cst_90 = arith.constant 0.000000e+00 : f32
    %267 = vector.shape_cast %266 : vector<1x16x1xi1> to vector<1x16x1xi1>
    %268 = vector.broadcast %267 : vector<1x16x1xi1> to vector<16x16x16xi1>
    %269 = vector.broadcast %cst_90 : f32 to vector<16x16x16xf32>
    %270 = arith.select %268, %257, %269 : vector<16x16x16xi1>, vector<16x16x16xf32>
    %271 = arith.addf %251, %270 : vector<16x16x16xf32>
    %c1_i32_91 = arith.constant 1 : i32
    %272 = tpu.dynamic_rotate %252 by %c1_i32_91 dim 1 : vector<16x16x16xf32>, i32 -> vector<16x16x16xf32>
    %c16 = arith.constant 16 : index
    %c0_92 = arith.constant 0 : index
    %273 = vector.load %arg3[%c16, %c0_92] : memref<25x16xf32, #tpu.memory_space<vmem>>, vector<1x16xf32>
    %274 = vector.shape_cast %273 : vector<1x16xf32> to vector<1x1x16xf32>
    %275 = vector.broadcast %274 : vector<1x1x16xf32> to vector<16x16x16xf32>
    %276 = arith.mulf %272, %275 : vector<16x16x16xf32>
    %c-1_i32_93 = arith.constant -1 : i32
    %277 = vector.broadcast %c-1_i32_93 : i32 to vector<1x16x1xi32>
    %278 = arith.addi %4, %277 : vector<1x16x1xi32>
    %c0_i32_94 = arith.constant 0 : i32
    %279 = vector.broadcast %c0_i32_94 : i32 to vector<1x16x1xi32>
    %280 = arith.cmpi sge, %278, %279 : vector<1x16x1xi32>
    %c-1_i32_95 = arith.constant -1 : i32
    %281 = vector.broadcast %c-1_i32_95 : i32 to vector<1x16x1xi32>
    %282 = arith.addi %4, %281 : vector<1x16x1xi32>
    %c16_i32_96 = arith.constant 16 : i32
    %283 = vector.broadcast %c16_i32_96 : i32 to vector<1x16x1xi32>
    %284 = arith.cmpi slt, %282, %283 : vector<1x16x1xi32>
    %285 = arith.andi %280, %284 : vector<1x16x1xi1>
    %cst_97 = arith.constant 0.000000e+00 : f32
    %286 = vector.shape_cast %285 : vector<1x16x1xi1> to vector<1x16x1xi1>
    %287 = vector.broadcast %286 : vector<1x16x1xi1> to vector<16x16x16xi1>
    %288 = vector.broadcast %cst_97 : f32 to vector<16x16x16xf32>
    %289 = arith.select %287, %276, %288 : vector<16x16x16xi1>, vector<16x16x16xf32>
    %290 = arith.addf %271, %289 : vector<16x16x16xf32>
    %c17 = arith.constant 17 : index
    %c0_98 = arith.constant 0 : index
    %291 = vector.load %arg3[%c17, %c0_98] : memref<25x16xf32, #tpu.memory_space<vmem>>, vector<1x16xf32>
    %292 = vector.shape_cast %291 : vector<1x16xf32> to vector<1x1x16xf32>
    %293 = vector.broadcast %292 : vector<1x1x16xf32> to vector<16x16x16xf32>
    %294 = arith.mulf %252, %293 : vector<16x16x16xf32>
    %295 = arith.addf %290, %294 : vector<16x16x16xf32>
    %c15_i32_99 = arith.constant 15 : i32
    %296 = tpu.dynamic_rotate %252 by %c15_i32_99 dim 1 : vector<16x16x16xf32>, i32 -> vector<16x16x16xf32>
    %c18 = arith.constant 18 : index
    %c0_100 = arith.constant 0 : index
    %297 = vector.load %arg3[%c18, %c0_100] : memref<25x16xf32, #tpu.memory_space<vmem>>, vector<1x16xf32>
    %298 = vector.shape_cast %297 : vector<1x16xf32> to vector<1x1x16xf32>
    %299 = vector.broadcast %298 : vector<1x1x16xf32> to vector<16x16x16xf32>
    %300 = arith.mulf %296, %299 : vector<16x16x16xf32>
    %c1_i32_101 = arith.constant 1 : i32
    %301 = vector.broadcast %c1_i32_101 : i32 to vector<1x16x1xi32>
    %302 = arith.addi %4, %301 : vector<1x16x1xi32>
    %c0_i32_102 = arith.constant 0 : i32
    %303 = vector.broadcast %c0_i32_102 : i32 to vector<1x16x1xi32>
    %304 = arith.cmpi sge, %302, %303 : vector<1x16x1xi32>
    %c1_i32_103 = arith.constant 1 : i32
    %305 = vector.broadcast %c1_i32_103 : i32 to vector<1x16x1xi32>
    %306 = arith.addi %4, %305 : vector<1x16x1xi32>
    %c16_i32_104 = arith.constant 16 : i32
    %307 = vector.broadcast %c16_i32_104 : i32 to vector<1x16x1xi32>
    %308 = arith.cmpi slt, %306, %307 : vector<1x16x1xi32>
    %309 = arith.andi %304, %308 : vector<1x16x1xi1>
    %cst_105 = arith.constant 0.000000e+00 : f32
    %310 = vector.shape_cast %309 : vector<1x16x1xi1> to vector<1x16x1xi1>
    %311 = vector.broadcast %310 : vector<1x16x1xi1> to vector<16x16x16xi1>
    %312 = vector.broadcast %cst_105 : f32 to vector<16x16x16xf32>
    %313 = arith.select %311, %300, %312 : vector<16x16x16xi1>, vector<16x16x16xf32>
    %314 = arith.addf %295, %313 : vector<16x16x16xf32>
    %c14_i32_106 = arith.constant 14 : i32
    %315 = tpu.dynamic_rotate %252 by %c14_i32_106 dim 1 : vector<16x16x16xf32>, i32 -> vector<16x16x16xf32>
    %c19 = arith.constant 19 : index
    %c0_107 = arith.constant 0 : index
    %316 = vector.load %arg3[%c19, %c0_107] : memref<25x16xf32, #tpu.memory_space<vmem>>, vector<1x16xf32>
    %317 = vector.shape_cast %316 : vector<1x16xf32> to vector<1x1x16xf32>
    %318 = vector.broadcast %317 : vector<1x1x16xf32> to vector<16x16x16xf32>
    %319 = arith.mulf %315, %318 : vector<16x16x16xf32>
    %c2_i32_108 = arith.constant 2 : i32
    %320 = vector.broadcast %c2_i32_108 : i32 to vector<1x16x1xi32>
    %321 = arith.addi %4, %320 : vector<1x16x1xi32>
    %c0_i32_109 = arith.constant 0 : i32
    %322 = vector.broadcast %c0_i32_109 : i32 to vector<1x16x1xi32>
    %323 = arith.cmpi sge, %321, %322 : vector<1x16x1xi32>
    %c2_i32_110 = arith.constant 2 : i32
    %324 = vector.broadcast %c2_i32_110 : i32 to vector<1x16x1xi32>
    %325 = arith.addi %4, %324 : vector<1x16x1xi32>
    %c16_i32_111 = arith.constant 16 : i32
    %326 = vector.broadcast %c16_i32_111 : i32 to vector<1x16x1xi32>
    %327 = arith.cmpi slt, %325, %326 : vector<1x16x1xi32>
    %328 = arith.andi %323, %327 : vector<1x16x1xi1>
    %cst_112 = arith.constant 0.000000e+00 : f32
    %329 = vector.shape_cast %328 : vector<1x16x1xi1> to vector<1x16x1xi1>
    %330 = vector.broadcast %329 : vector<1x16x1xi1> to vector<16x16x16xi1>
    %331 = vector.broadcast %cst_112 : f32 to vector<16x16x16xf32>
    %332 = arith.select %330, %319, %331 : vector<16x16x16xi1>, vector<16x16x16xf32>
    %333 = arith.addf %314, %332 : vector<16x16x16xf32>
    %334 = vector.extract_strided_slice %3 {offsets = [4, 0, 0], sizes = [16, 16, 16], strides = [1, 1, 1]} : vector<20x16x16xf32> to vector<16x16x16xf32>
    %c2_i32_113 = arith.constant 2 : i32
    %335 = tpu.dynamic_rotate %334 by %c2_i32_113 dim 1 : vector<16x16x16xf32>, i32 -> vector<16x16x16xf32>
    %c20 = arith.constant 20 : index
    %c0_114 = arith.constant 0 : index
    %336 = vector.load %arg3[%c20, %c0_114] : memref<25x16xf32, #tpu.memory_space<vmem>>, vector<1x16xf32>
    %337 = vector.shape_cast %336 : vector<1x16xf32> to vector<1x1x16xf32>
    %338 = vector.broadcast %337 : vector<1x1x16xf32> to vector<16x16x16xf32>
    %339 = arith.mulf %335, %338 : vector<16x16x16xf32>
    %c-2_i32_115 = arith.constant -2 : i32
    %340 = vector.broadcast %c-2_i32_115 : i32 to vector<1x16x1xi32>
    %341 = arith.addi %4, %340 : vector<1x16x1xi32>
    %c0_i32_116 = arith.constant 0 : i32
    %342 = vector.broadcast %c0_i32_116 : i32 to vector<1x16x1xi32>
    %343 = arith.cmpi sge, %341, %342 : vector<1x16x1xi32>
    %c-2_i32_117 = arith.constant -2 : i32
    %344 = vector.broadcast %c-2_i32_117 : i32 to vector<1x16x1xi32>
    %345 = arith.addi %4, %344 : vector<1x16x1xi32>
    %c16_i32_118 = arith.constant 16 : i32
    %346 = vector.broadcast %c16_i32_118 : i32 to vector<1x16x1xi32>
    %347 = arith.cmpi slt, %345, %346 : vector<1x16x1xi32>
    %348 = arith.andi %343, %347 : vector<1x16x1xi1>
    %cst_119 = arith.constant 0.000000e+00 : f32
    %349 = vector.shape_cast %348 : vector<1x16x1xi1> to vector<1x16x1xi1>
    %350 = vector.broadcast %349 : vector<1x16x1xi1> to vector<16x16x16xi1>
    %351 = vector.broadcast %cst_119 : f32 to vector<16x16x16xf32>
    %352 = arith.select %350, %339, %351 : vector<16x16x16xi1>, vector<16x16x16xf32>
    %353 = arith.addf %333, %352 : vector<16x16x16xf32>
    %c1_i32_120 = arith.constant 1 : i32
    %354 = tpu.dynamic_rotate %334 by %c1_i32_120 dim 1 : vector<16x16x16xf32>, i32 -> vector<16x16x16xf32>
    %c21 = arith.constant 21 : index
    %c0_121 = arith.constant 0 : index
    %355 = vector.load %arg3[%c21, %c0_121] : memref<25x16xf32, #tpu.memory_space<vmem>>, vector<1x16xf32>
    %356 = vector.shape_cast %355 : vector<1x16xf32> to vector<1x1x16xf32>
    %357 = vector.broadcast %356 : vector<1x1x16xf32> to vector<16x16x16xf32>
    %358 = arith.mulf %354, %357 : vector<16x16x16xf32>
    %c-1_i32_122 = arith.constant -1 : i32
    %359 = vector.broadcast %c-1_i32_122 : i32 to vector<1x16x1xi32>
    %360 = arith.addi %4, %359 : vector<1x16x1xi32>
    %c0_i32_123 = arith.constant 0 : i32
    %361 = vector.broadcast %c0_i32_123 : i32 to vector<1x16x1xi32>
    %362 = arith.cmpi sge, %360, %361 : vector<1x16x1xi32>
    %c-1_i32_124 = arith.constant -1 : i32
    %363 = vector.broadcast %c-1_i32_124 : i32 to vector<1x16x1xi32>
    %364 = arith.addi %4, %363 : vector<1x16x1xi32>
    %c16_i32_125 = arith.constant 16 : i32
    %365 = vector.broadcast %c16_i32_125 : i32 to vector<1x16x1xi32>
    %366 = arith.cmpi slt, %364, %365 : vector<1x16x1xi32>
    %367 = arith.andi %362, %366 : vector<1x16x1xi1>
    %cst_126 = arith.constant 0.000000e+00 : f32
    %368 = vector.shape_cast %367 : vector<1x16x1xi1> to vector<1x16x1xi1>
    %369 = vector.broadcast %368 : vector<1x16x1xi1> to vector<16x16x16xi1>
    %370 = vector.broadcast %cst_126 : f32 to vector<16x16x16xf32>
    %371 = arith.select %369, %358, %370 : vector<16x16x16xi1>, vector<16x16x16xf32>
    %372 = arith.addf %353, %371 : vector<16x16x16xf32>
    %c22 = arith.constant 22 : index
    %c0_127 = arith.constant 0 : index
    %373 = vector.load %arg3[%c22, %c0_127] : memref<25x16xf32, #tpu.memory_space<vmem>>, vector<1x16xf32>
    %374 = vector.shape_cast %373 : vector<1x16xf32> to vector<1x1x16xf32>
    %375 = vector.broadcast %374 : vector<1x1x16xf32> to vector<16x16x16xf32>
    %376 = arith.mulf %334, %375 : vector<16x16x16xf32>
    %377 = arith.addf %372, %376 : vector<16x16x16xf32>
    %c15_i32_128 = arith.constant 15 : i32
    %378 = tpu.dynamic_rotate %334 by %c15_i32_128 dim 1 : vector<16x16x16xf32>, i32 -> vector<16x16x16xf32>
    %c23 = arith.constant 23 : index
    %c0_129 = arith.constant 0 : index
    %379 = vector.load %arg3[%c23, %c0_129] : memref<25x16xf32, #tpu.memory_space<vmem>>, vector<1x16xf32>
    %380 = vector.shape_cast %379 : vector<1x16xf32> to vector<1x1x16xf32>
    %381 = vector.broadcast %380 : vector<1x1x16xf32> to vector<16x16x16xf32>
    %382 = arith.mulf %378, %381 : vector<16x16x16xf32>
    %c1_i32_130 = arith.constant 1 : i32
    %383 = vector.broadcast %c1_i32_130 : i32 to vector<1x16x1xi32>
    %384 = arith.addi %4, %383 : vector<1x16x1xi32>
    %c0_i32_131 = arith.constant 0 : i32
    %385 = vector.broadcast %c0_i32_131 : i32 to vector<1x16x1xi32>
    %386 = arith.cmpi sge, %384, %385 : vector<1x16x1xi32>
    %c1_i32_132 = arith.constant 1 : i32
    %387 = vector.broadcast %c1_i32_132 : i32 to vector<1x16x1xi32>
    %388 = arith.addi %4, %387 : vector<1x16x1xi32>
    %c16_i32_133 = arith.constant 16 : i32
    %389 = vector.broadcast %c16_i32_133 : i32 to vector<1x16x1xi32>
    %390 = arith.cmpi slt, %388, %389 : vector<1x16x1xi32>
    %391 = arith.andi %386, %390 : vector<1x16x1xi1>
    %cst_134 = arith.constant 0.000000e+00 : f32
    %392 = vector.shape_cast %391 : vector<1x16x1xi1> to vector<1x16x1xi1>
    %393 = vector.broadcast %392 : vector<1x16x1xi1> to vector<16x16x16xi1>
    %394 = vector.broadcast %cst_134 : f32 to vector<16x16x16xf32>
    %395 = arith.select %393, %382, %394 : vector<16x16x16xi1>, vector<16x16x16xf32>
    %396 = arith.addf %377, %395 : vector<16x16x16xf32>
    %c14_i32_135 = arith.constant 14 : i32
    %397 = tpu.dynamic_rotate %334 by %c14_i32_135 dim 1 : vector<16x16x16xf32>, i32 -> vector<16x16x16xf32>
    %c24 = arith.constant 24 : index
    %c0_136 = arith.constant 0 : index
    %398 = vector.load %arg3[%c24, %c0_136] : memref<25x16xf32, #tpu.memory_space<vmem>>, vector<1x16xf32>
    %399 = vector.shape_cast %398 : vector<1x16xf32> to vector<1x1x16xf32>
    %400 = vector.broadcast %399 : vector<1x1x16xf32> to vector<16x16x16xf32>
    %401 = arith.mulf %397, %400 : vector<16x16x16xf32>
    %c2_i32_137 = arith.constant 2 : i32
    %402 = vector.broadcast %c2_i32_137 : i32 to vector<1x16x1xi32>
    %403 = arith.addi %4, %402 : vector<1x16x1xi32>
    %c0_i32_138 = arith.constant 0 : i32
    %404 = vector.broadcast %c0_i32_138 : i32 to vector<1x16x1xi32>
    %405 = arith.cmpi sge, %403, %404 : vector<1x16x1xi32>
    %c2_i32_139 = arith.constant 2 : i32
    %406 = vector.broadcast %c2_i32_139 : i32 to vector<1x16x1xi32>
    %407 = arith.addi %4, %406 : vector<1x16x1xi32>
    %c16_i32_140 = arith.constant 16 : i32
    %408 = vector.broadcast %c16_i32_140 : i32 to vector<1x16x1xi32>
    %409 = arith.cmpi slt, %407, %408 : vector<1x16x1xi32>
    %410 = arith.andi %405, %409 : vector<1x16x1xi1>
    %cst_141 = arith.constant 0.000000e+00 : f32
    %411 = vector.shape_cast %410 : vector<1x16x1xi1> to vector<1x16x1xi1>
    %412 = vector.broadcast %411 : vector<1x16x1xi1> to vector<16x16x16xi1>
    %413 = vector.broadcast %cst_141 : f32 to vector<16x16x16xf32>
    %414 = arith.select %412, %401, %413 : vector<16x16x16xi1>, vector<16x16x16xf32>
    %415 = arith.addf %396, %414 : vector<16x16x16xf32>
    %416 = vector.shape_cast %415 : vector<16x16x16xf32> to vector<256x16xf32>
    %c0_142 = arith.constant 0 : index
    %c0_143 = arith.constant 0 : index
    %417 = vector.load %arg4[%c0_142, %c0_143] : memref<16x8xf32, #tpu.memory_space<vmem>>, vector<16x8xf32>
    %cst_144 = arith.constant dense<0.000000e+00> : vector<256x8xf32>
    %418 = tpu.matmul %416, %417, %cst_144 {dimension_numbers = #tpu.dot_dimension_numbers<[1], [0], [0], [1], [0, 0, 1, 1], [], []>} : vector<256x16xf32>, vector<16x8xf32>, vector<256x8xf32> -> vector<256x8xf32>
    %c0_145 = arith.constant 0 : index
    %c0_146 = arith.constant 0 : index
    %419 = vector.load %arg5[%c0_145, %c0_146] : memref<1x8xf32, #tpu.memory_space<vmem>>, vector<1x8xf32>
    %420 = vector.broadcast %419 : vector<1x8xf32> to vector<256x8xf32>
    %421 = arith.addf %418, %420 : vector<256x8xf32>
    %cst_147 = arith.constant 0.000000e+00 : f32
    %422 = vector.broadcast %cst_147 : f32 to vector<256x8xf32>
    %423 = arith.maximumf %421, %422 : vector<256x8xf32>
    %424 = vector.shape_cast %423 : vector<256x8xf32> to vector<16x16x8xf32>
    %c0_148 = arith.constant 0 : index
    %c0_149 = arith.constant 0 : index
    %c0_150 = arith.constant 0 : index
    %c0_151 = arith.constant 0 : index
    %425 = vector.load %arg2[%c0_148, %c0_149, %c0_150, %c0_151] : memref<1x8x8x16xf32, #tpu.memory_space<vmem>>, vector<1x8x8x16xf32>
    %426 = vector.shape_cast %425 : vector<1x8x8x16xf32> to vector<8x8x16xf32>
    %cst_152 = arith.constant 0.000000e+00 : f32
    %427 = vector.broadcast %cst_152 : f32 to vector<1x8x16xf32>
    %428 = tpu.concatenate %427, %426, %427 in 0 : vector<1x8x16xf32>, vector<8x8x16xf32>, vector<1x8x16xf32> -> vector<10x8x16xf32>
    %429 = tpu.iota {dimensions = array<i32: 1>} : vector<1x8x1xi32>
    %cst_153 = arith.constant 0.000000e+00 : f32
    %430 = vector.broadcast %cst_153 : f32 to vector<8x8x16xf32>
    %431 = vector.extract_strided_slice %428 {offsets = [0, 0, 0], sizes = [8, 8, 16], strides = [1, 1, 1]} : vector<10x8x16xf32> to vector<8x8x16xf32>
    %c1_i32_154 = arith.constant 1 : i32
    %432 = tpu.dynamic_rotate %431 by %c1_i32_154 dim 1 : vector<8x8x16xf32>, i32 -> vector<8x8x16xf32>
    %c0_155 = arith.constant 0 : index
    %c0_156 = arith.constant 0 : index
    %433 = vector.load %arg6[%c0_155, %c0_156] : memref<9x16xf32, #tpu.memory_space<vmem>>, vector<1x16xf32>
    %434 = vector.shape_cast %433 : vector<1x16xf32> to vector<1x1x16xf32>
    %435 = vector.broadcast %434 : vector<1x1x16xf32> to vector<8x8x16xf32>
    %436 = arith.mulf %432, %435 : vector<8x8x16xf32>
    %c-1_i32_157 = arith.constant -1 : i32
    %437 = vector.broadcast %c-1_i32_157 : i32 to vector<1x8x1xi32>
    %438 = arith.addi %429, %437 : vector<1x8x1xi32>
    %c0_i32_158 = arith.constant 0 : i32
    %439 = vector.broadcast %c0_i32_158 : i32 to vector<1x8x1xi32>
    %440 = arith.cmpi sge, %438, %439 : vector<1x8x1xi32>
    %c-1_i32_159 = arith.constant -1 : i32
    %441 = vector.broadcast %c-1_i32_159 : i32 to vector<1x8x1xi32>
    %442 = arith.addi %429, %441 : vector<1x8x1xi32>
    %c8_i32 = arith.constant 8 : i32
    %443 = vector.broadcast %c8_i32 : i32 to vector<1x8x1xi32>
    %444 = arith.cmpi slt, %442, %443 : vector<1x8x1xi32>
    %445 = arith.andi %440, %444 : vector<1x8x1xi1>
    %cst_160 = arith.constant 0.000000e+00 : f32
    %446 = vector.shape_cast %445 : vector<1x8x1xi1> to vector<1x8x1xi1>
    %447 = vector.broadcast %446 : vector<1x8x1xi1> to vector<8x8x16xi1>
    %448 = vector.broadcast %cst_160 : f32 to vector<8x8x16xf32>
    %449 = arith.select %447, %436, %448 : vector<8x8x16xi1>, vector<8x8x16xf32>
    %450 = arith.addf %430, %449 : vector<8x8x16xf32>
    %c1_161 = arith.constant 1 : index
    %c0_162 = arith.constant 0 : index
    %451 = vector.load %arg6[%c1_161, %c0_162] : memref<9x16xf32, #tpu.memory_space<vmem>>, vector<1x16xf32>
    %452 = vector.shape_cast %451 : vector<1x16xf32> to vector<1x1x16xf32>
    %453 = vector.broadcast %452 : vector<1x1x16xf32> to vector<8x8x16xf32>
    %454 = arith.mulf %431, %453 : vector<8x8x16xf32>
    %455 = arith.addf %450, %454 : vector<8x8x16xf32>
    %c7_i32 = arith.constant 7 : i32
    %456 = tpu.dynamic_rotate %431 by %c7_i32 dim 1 : vector<8x8x16xf32>, i32 -> vector<8x8x16xf32>
    %c2_163 = arith.constant 2 : index
    %c0_164 = arith.constant 0 : index
    %457 = vector.load %arg6[%c2_163, %c0_164] : memref<9x16xf32, #tpu.memory_space<vmem>>, vector<1x16xf32>
    %458 = vector.shape_cast %457 : vector<1x16xf32> to vector<1x1x16xf32>
    %459 = vector.broadcast %458 : vector<1x1x16xf32> to vector<8x8x16xf32>
    %460 = arith.mulf %456, %459 : vector<8x8x16xf32>
    %c1_i32_165 = arith.constant 1 : i32
    %461 = vector.broadcast %c1_i32_165 : i32 to vector<1x8x1xi32>
    %462 = arith.addi %429, %461 : vector<1x8x1xi32>
    %c0_i32_166 = arith.constant 0 : i32
    %463 = vector.broadcast %c0_i32_166 : i32 to vector<1x8x1xi32>
    %464 = arith.cmpi sge, %462, %463 : vector<1x8x1xi32>
    %c1_i32_167 = arith.constant 1 : i32
    %465 = vector.broadcast %c1_i32_167 : i32 to vector<1x8x1xi32>
    %466 = arith.addi %429, %465 : vector<1x8x1xi32>
    %c8_i32_168 = arith.constant 8 : i32
    %467 = vector.broadcast %c8_i32_168 : i32 to vector<1x8x1xi32>
    %468 = arith.cmpi slt, %466, %467 : vector<1x8x1xi32>
    %469 = arith.andi %464, %468 : vector<1x8x1xi1>
    %cst_169 = arith.constant 0.000000e+00 : f32
    %470 = vector.shape_cast %469 : vector<1x8x1xi1> to vector<1x8x1xi1>
    %471 = vector.broadcast %470 : vector<1x8x1xi1> to vector<8x8x16xi1>
    %472 = vector.broadcast %cst_169 : f32 to vector<8x8x16xf32>
    %473 = arith.select %471, %460, %472 : vector<8x8x16xi1>, vector<8x8x16xf32>
    %474 = arith.addf %455, %473 : vector<8x8x16xf32>
    %475 = vector.extract_strided_slice %428 {offsets = [1, 0, 0], sizes = [8, 8, 16], strides = [1, 1, 1]} : vector<10x8x16xf32> to vector<8x8x16xf32>
    %c1_i32_170 = arith.constant 1 : i32
    %476 = tpu.dynamic_rotate %475 by %c1_i32_170 dim 1 : vector<8x8x16xf32>, i32 -> vector<8x8x16xf32>
    %c3_171 = arith.constant 3 : index
    %c0_172 = arith.constant 0 : index
    %477 = vector.load %arg6[%c3_171, %c0_172] : memref<9x16xf32, #tpu.memory_space<vmem>>, vector<1x16xf32>
    %478 = vector.shape_cast %477 : vector<1x16xf32> to vector<1x1x16xf32>
    %479 = vector.broadcast %478 : vector<1x1x16xf32> to vector<8x8x16xf32>
    %480 = arith.mulf %476, %479 : vector<8x8x16xf32>
    %c-1_i32_173 = arith.constant -1 : i32
    %481 = vector.broadcast %c-1_i32_173 : i32 to vector<1x8x1xi32>
    %482 = arith.addi %429, %481 : vector<1x8x1xi32>
    %c0_i32_174 = arith.constant 0 : i32
    %483 = vector.broadcast %c0_i32_174 : i32 to vector<1x8x1xi32>
    %484 = arith.cmpi sge, %482, %483 : vector<1x8x1xi32>
    %c-1_i32_175 = arith.constant -1 : i32
    %485 = vector.broadcast %c-1_i32_175 : i32 to vector<1x8x1xi32>
    %486 = arith.addi %429, %485 : vector<1x8x1xi32>
    %c8_i32_176 = arith.constant 8 : i32
    %487 = vector.broadcast %c8_i32_176 : i32 to vector<1x8x1xi32>
    %488 = arith.cmpi slt, %486, %487 : vector<1x8x1xi32>
    %489 = arith.andi %484, %488 : vector<1x8x1xi1>
    %cst_177 = arith.constant 0.000000e+00 : f32
    %490 = vector.shape_cast %489 : vector<1x8x1xi1> to vector<1x8x1xi1>
    %491 = vector.broadcast %490 : vector<1x8x1xi1> to vector<8x8x16xi1>
    %492 = vector.broadcast %cst_177 : f32 to vector<8x8x16xf32>
    %493 = arith.select %491, %480, %492 : vector<8x8x16xi1>, vector<8x8x16xf32>
    %494 = arith.addf %474, %493 : vector<8x8x16xf32>
    %c4_178 = arith.constant 4 : index
    %c0_179 = arith.constant 0 : index
    %495 = vector.load %arg6[%c4_178, %c0_179] : memref<9x16xf32, #tpu.memory_space<vmem>>, vector<1x16xf32>
    %496 = vector.shape_cast %495 : vector<1x16xf32> to vector<1x1x16xf32>
    %497 = vector.broadcast %496 : vector<1x1x16xf32> to vector<8x8x16xf32>
    %498 = arith.mulf %475, %497 : vector<8x8x16xf32>
    %499 = arith.addf %494, %498 : vector<8x8x16xf32>
    %c7_i32_180 = arith.constant 7 : i32
    %500 = tpu.dynamic_rotate %475 by %c7_i32_180 dim 1 : vector<8x8x16xf32>, i32 -> vector<8x8x16xf32>
    %c5_181 = arith.constant 5 : index
    %c0_182 = arith.constant 0 : index
    %501 = vector.load %arg6[%c5_181, %c0_182] : memref<9x16xf32, #tpu.memory_space<vmem>>, vector<1x16xf32>
    %502 = vector.shape_cast %501 : vector<1x16xf32> to vector<1x1x16xf32>
    %503 = vector.broadcast %502 : vector<1x1x16xf32> to vector<8x8x16xf32>
    %504 = arith.mulf %500, %503 : vector<8x8x16xf32>
    %c1_i32_183 = arith.constant 1 : i32
    %505 = vector.broadcast %c1_i32_183 : i32 to vector<1x8x1xi32>
    %506 = arith.addi %429, %505 : vector<1x8x1xi32>
    %c0_i32_184 = arith.constant 0 : i32
    %507 = vector.broadcast %c0_i32_184 : i32 to vector<1x8x1xi32>
    %508 = arith.cmpi sge, %506, %507 : vector<1x8x1xi32>
    %c1_i32_185 = arith.constant 1 : i32
    %509 = vector.broadcast %c1_i32_185 : i32 to vector<1x8x1xi32>
    %510 = arith.addi %429, %509 : vector<1x8x1xi32>
    %c8_i32_186 = arith.constant 8 : i32
    %511 = vector.broadcast %c8_i32_186 : i32 to vector<1x8x1xi32>
    %512 = arith.cmpi slt, %510, %511 : vector<1x8x1xi32>
    %513 = arith.andi %508, %512 : vector<1x8x1xi1>
    %cst_187 = arith.constant 0.000000e+00 : f32
    %514 = vector.shape_cast %513 : vector<1x8x1xi1> to vector<1x8x1xi1>
    %515 = vector.broadcast %514 : vector<1x8x1xi1> to vector<8x8x16xi1>
    %516 = vector.broadcast %cst_187 : f32 to vector<8x8x16xf32>
    %517 = arith.select %515, %504, %516 : vector<8x8x16xi1>, vector<8x8x16xf32>
    %518 = arith.addf %499, %517 : vector<8x8x16xf32>
    %519 = vector.extract_strided_slice %428 {offsets = [2, 0, 0], sizes = [8, 8, 16], strides = [1, 1, 1]} : vector<10x8x16xf32> to vector<8x8x16xf32>
    %c1_i32_188 = arith.constant 1 : i32
    %520 = tpu.dynamic_rotate %519 by %c1_i32_188 dim 1 : vector<8x8x16xf32>, i32 -> vector<8x8x16xf32>
    %c6_189 = arith.constant 6 : index
    %c0_190 = arith.constant 0 : index
    %521 = vector.load %arg6[%c6_189, %c0_190] : memref<9x16xf32, #tpu.memory_space<vmem>>, vector<1x16xf32>
    %522 = vector.shape_cast %521 : vector<1x16xf32> to vector<1x1x16xf32>
    %523 = vector.broadcast %522 : vector<1x1x16xf32> to vector<8x8x16xf32>
    %524 = arith.mulf %520, %523 : vector<8x8x16xf32>
    %c-1_i32_191 = arith.constant -1 : i32
    %525 = vector.broadcast %c-1_i32_191 : i32 to vector<1x8x1xi32>
    %526 = arith.addi %429, %525 : vector<1x8x1xi32>
    %c0_i32_192 = arith.constant 0 : i32
    %527 = vector.broadcast %c0_i32_192 : i32 to vector<1x8x1xi32>
    %528 = arith.cmpi sge, %526, %527 : vector<1x8x1xi32>
    %c-1_i32_193 = arith.constant -1 : i32
    %529 = vector.broadcast %c-1_i32_193 : i32 to vector<1x8x1xi32>
    %530 = arith.addi %429, %529 : vector<1x8x1xi32>
    %c8_i32_194 = arith.constant 8 : i32
    %531 = vector.broadcast %c8_i32_194 : i32 to vector<1x8x1xi32>
    %532 = arith.cmpi slt, %530, %531 : vector<1x8x1xi32>
    %533 = arith.andi %528, %532 : vector<1x8x1xi1>
    %cst_195 = arith.constant 0.000000e+00 : f32
    %534 = vector.shape_cast %533 : vector<1x8x1xi1> to vector<1x8x1xi1>
    %535 = vector.broadcast %534 : vector<1x8x1xi1> to vector<8x8x16xi1>
    %536 = vector.broadcast %cst_195 : f32 to vector<8x8x16xf32>
    %537 = arith.select %535, %524, %536 : vector<8x8x16xi1>, vector<8x8x16xf32>
    %538 = arith.addf %518, %537 : vector<8x8x16xf32>
    %c7_196 = arith.constant 7 : index
    %c0_197 = arith.constant 0 : index
    %539 = vector.load %arg6[%c7_196, %c0_197] : memref<9x16xf32, #tpu.memory_space<vmem>>, vector<1x16xf32>
    %540 = vector.shape_cast %539 : vector<1x16xf32> to vector<1x1x16xf32>
    %541 = vector.broadcast %540 : vector<1x1x16xf32> to vector<8x8x16xf32>
    %542 = arith.mulf %519, %541 : vector<8x8x16xf32>
    %543 = arith.addf %538, %542 : vector<8x8x16xf32>
    %c7_i32_198 = arith.constant 7 : i32
    %544 = tpu.dynamic_rotate %519 by %c7_i32_198 dim 1 : vector<8x8x16xf32>, i32 -> vector<8x8x16xf32>
    %c8_199 = arith.constant 8 : index
    %c0_200 = arith.constant 0 : index
    %545 = vector.load %arg6[%c8_199, %c0_200] : memref<9x16xf32, #tpu.memory_space<vmem>>, vector<1x16xf32>
    %546 = vector.shape_cast %545 : vector<1x16xf32> to vector<1x1x16xf32>
    %547 = vector.broadcast %546 : vector<1x1x16xf32> to vector<8x8x16xf32>
    %548 = arith.mulf %544, %547 : vector<8x8x16xf32>
    %c1_i32_201 = arith.constant 1 : i32
    %549 = vector.broadcast %c1_i32_201 : i32 to vector<1x8x1xi32>
    %550 = arith.addi %429, %549 : vector<1x8x1xi32>
    %c0_i32_202 = arith.constant 0 : i32
    %551 = vector.broadcast %c0_i32_202 : i32 to vector<1x8x1xi32>
    %552 = arith.cmpi sge, %550, %551 : vector<1x8x1xi32>
    %c1_i32_203 = arith.constant 1 : i32
    %553 = vector.broadcast %c1_i32_203 : i32 to vector<1x8x1xi32>
    %554 = arith.addi %429, %553 : vector<1x8x1xi32>
    %c8_i32_204 = arith.constant 8 : i32
    %555 = vector.broadcast %c8_i32_204 : i32 to vector<1x8x1xi32>
    %556 = arith.cmpi slt, %554, %555 : vector<1x8x1xi32>
    %557 = arith.andi %552, %556 : vector<1x8x1xi1>
    %cst_205 = arith.constant 0.000000e+00 : f32
    %558 = vector.shape_cast %557 : vector<1x8x1xi1> to vector<1x8x1xi1>
    %559 = vector.broadcast %558 : vector<1x8x1xi1> to vector<8x8x16xi1>
    %560 = vector.broadcast %cst_205 : f32 to vector<8x8x16xf32>
    %561 = arith.select %559, %548, %560 : vector<8x8x16xi1>, vector<8x8x16xf32>
    %562 = arith.addf %543, %561 : vector<8x8x16xf32>
    %563 = vector.shape_cast %562 : vector<8x8x16xf32> to vector<64x16xf32>
    %c0_206 = arith.constant 0 : index
    %c0_207 = arith.constant 0 : index
    %564 = vector.load %arg7[%c0_206, %c0_207] : memref<16x8xf32, #tpu.memory_space<vmem>>, vector<16x8xf32>
    %cst_208 = arith.constant dense<0.000000e+00> : vector<64x8xf32>
    %565 = tpu.matmul %563, %564, %cst_208 {dimension_numbers = #tpu.dot_dimension_numbers<[1], [0], [0], [1], [0, 0, 1, 1], [], []>} : vector<64x16xf32>, vector<16x8xf32>, vector<64x8xf32> -> vector<64x8xf32>
    %c0_209 = arith.constant 0 : index
    %c0_210 = arith.constant 0 : index
    %566 = vector.load %arg8[%c0_209, %c0_210] : memref<1x8xf32, #tpu.memory_space<vmem>>, vector<1x8xf32>
    %567 = vector.broadcast %566 : vector<1x8xf32> to vector<64x8xf32>
    %568 = arith.addf %565, %567 : vector<64x8xf32>
    %cst_211 = arith.constant 0.000000e+00 : f32
    %569 = vector.broadcast %cst_211 : f32 to vector<64x8xf32>
    %570 = arith.maximumf %568, %569 : vector<64x8xf32>
    %571 = vector.shape_cast %570 : vector<64x8xf32> to vector<8x8x8xf32>
    %cst_212 = arith.constant 0.000000e+00 : f32
    %572 = vector.broadcast %cst_212 : f32 to vector<2x8x16xf32>
    %573 = tpu.concatenate %572, %426, %572 in 0 : vector<2x8x16xf32>, vector<8x8x16xf32>, vector<2x8x16xf32> -> vector<12x8x16xf32>
    %574 = tpu.iota {dimensions = array<i32: 1>} : vector<1x8x1xi32>
    %cst_213 = arith.constant 0.000000e+00 : f32
    %575 = vector.broadcast %cst_213 : f32 to vector<8x8x16xf32>
    %576 = vector.extract_strided_slice %573 {offsets = [0, 0, 0], sizes = [8, 8, 16], strides = [1, 1, 1]} : vector<12x8x16xf32> to vector<8x8x16xf32>
    %c2_i32_214 = arith.constant 2 : i32
    %577 = tpu.dynamic_rotate %576 by %c2_i32_214 dim 1 : vector<8x8x16xf32>, i32 -> vector<8x8x16xf32>
    %c0_215 = arith.constant 0 : index
    %c0_216 = arith.constant 0 : index
    %578 = vector.load %arg9[%c0_215, %c0_216] : memref<25x16xf32, #tpu.memory_space<vmem>>, vector<1x16xf32>
    %579 = vector.shape_cast %578 : vector<1x16xf32> to vector<1x1x16xf32>
    %580 = vector.broadcast %579 : vector<1x1x16xf32> to vector<8x8x16xf32>
    %581 = arith.mulf %577, %580 : vector<8x8x16xf32>
    %c-2_i32_217 = arith.constant -2 : i32
    %582 = vector.broadcast %c-2_i32_217 : i32 to vector<1x8x1xi32>
    %583 = arith.addi %574, %582 : vector<1x8x1xi32>
    %c0_i32_218 = arith.constant 0 : i32
    %584 = vector.broadcast %c0_i32_218 : i32 to vector<1x8x1xi32>
    %585 = arith.cmpi sge, %583, %584 : vector<1x8x1xi32>
    %c-2_i32_219 = arith.constant -2 : i32
    %586 = vector.broadcast %c-2_i32_219 : i32 to vector<1x8x1xi32>
    %587 = arith.addi %574, %586 : vector<1x8x1xi32>
    %c8_i32_220 = arith.constant 8 : i32
    %588 = vector.broadcast %c8_i32_220 : i32 to vector<1x8x1xi32>
    %589 = arith.cmpi slt, %587, %588 : vector<1x8x1xi32>
    %590 = arith.andi %585, %589 : vector<1x8x1xi1>
    %cst_221 = arith.constant 0.000000e+00 : f32
    %591 = vector.shape_cast %590 : vector<1x8x1xi1> to vector<1x8x1xi1>
    %592 = vector.broadcast %591 : vector<1x8x1xi1> to vector<8x8x16xi1>
    %593 = vector.broadcast %cst_221 : f32 to vector<8x8x16xf32>
    %594 = arith.select %592, %581, %593 : vector<8x8x16xi1>, vector<8x8x16xf32>
    %595 = arith.addf %575, %594 : vector<8x8x16xf32>
    %c1_i32_222 = arith.constant 1 : i32
    %596 = tpu.dynamic_rotate %576 by %c1_i32_222 dim 1 : vector<8x8x16xf32>, i32 -> vector<8x8x16xf32>
    %c1_223 = arith.constant 1 : index
    %c0_224 = arith.constant 0 : index
    %597 = vector.load %arg9[%c1_223, %c0_224] : memref<25x16xf32, #tpu.memory_space<vmem>>, vector<1x16xf32>
    %598 = vector.shape_cast %597 : vector<1x16xf32> to vector<1x1x16xf32>
    %599 = vector.broadcast %598 : vector<1x1x16xf32> to vector<8x8x16xf32>
    %600 = arith.mulf %596, %599 : vector<8x8x16xf32>
    %c-1_i32_225 = arith.constant -1 : i32
    %601 = vector.broadcast %c-1_i32_225 : i32 to vector<1x8x1xi32>
    %602 = arith.addi %574, %601 : vector<1x8x1xi32>
    %c0_i32_226 = arith.constant 0 : i32
    %603 = vector.broadcast %c0_i32_226 : i32 to vector<1x8x1xi32>
    %604 = arith.cmpi sge, %602, %603 : vector<1x8x1xi32>
    %c-1_i32_227 = arith.constant -1 : i32
    %605 = vector.broadcast %c-1_i32_227 : i32 to vector<1x8x1xi32>
    %606 = arith.addi %574, %605 : vector<1x8x1xi32>
    %c8_i32_228 = arith.constant 8 : i32
    %607 = vector.broadcast %c8_i32_228 : i32 to vector<1x8x1xi32>
    %608 = arith.cmpi slt, %606, %607 : vector<1x8x1xi32>
    %609 = arith.andi %604, %608 : vector<1x8x1xi1>
    %cst_229 = arith.constant 0.000000e+00 : f32
    %610 = vector.shape_cast %609 : vector<1x8x1xi1> to vector<1x8x1xi1>
    %611 = vector.broadcast %610 : vector<1x8x1xi1> to vector<8x8x16xi1>
    %612 = vector.broadcast %cst_229 : f32 to vector<8x8x16xf32>
    %613 = arith.select %611, %600, %612 : vector<8x8x16xi1>, vector<8x8x16xf32>
    %614 = arith.addf %595, %613 : vector<8x8x16xf32>
    %c2_230 = arith.constant 2 : index
    %c0_231 = arith.constant 0 : index
    %615 = vector.load %arg9[%c2_230, %c0_231] : memref<25x16xf32, #tpu.memory_space<vmem>>, vector<1x16xf32>
    %616 = vector.shape_cast %615 : vector<1x16xf32> to vector<1x1x16xf32>
    %617 = vector.broadcast %616 : vector<1x1x16xf32> to vector<8x8x16xf32>
    %618 = arith.mulf %576, %617 : vector<8x8x16xf32>
    %619 = arith.addf %614, %618 : vector<8x8x16xf32>
    %c7_i32_232 = arith.constant 7 : i32
    %620 = tpu.dynamic_rotate %576 by %c7_i32_232 dim 1 : vector<8x8x16xf32>, i32 -> vector<8x8x16xf32>
    %c3_233 = arith.constant 3 : index
    %c0_234 = arith.constant 0 : index
    %621 = vector.load %arg9[%c3_233, %c0_234] : memref<25x16xf32, #tpu.memory_space<vmem>>, vector<1x16xf32>
    %622 = vector.shape_cast %621 : vector<1x16xf32> to vector<1x1x16xf32>
    %623 = vector.broadcast %622 : vector<1x1x16xf32> to vector<8x8x16xf32>
    %624 = arith.mulf %620, %623 : vector<8x8x16xf32>
    %c1_i32_235 = arith.constant 1 : i32
    %625 = vector.broadcast %c1_i32_235 : i32 to vector<1x8x1xi32>
    %626 = arith.addi %574, %625 : vector<1x8x1xi32>
    %c0_i32_236 = arith.constant 0 : i32
    %627 = vector.broadcast %c0_i32_236 : i32 to vector<1x8x1xi32>
    %628 = arith.cmpi sge, %626, %627 : vector<1x8x1xi32>
    %c1_i32_237 = arith.constant 1 : i32
    %629 = vector.broadcast %c1_i32_237 : i32 to vector<1x8x1xi32>
    %630 = arith.addi %574, %629 : vector<1x8x1xi32>
    %c8_i32_238 = arith.constant 8 : i32
    %631 = vector.broadcast %c8_i32_238 : i32 to vector<1x8x1xi32>
    %632 = arith.cmpi slt, %630, %631 : vector<1x8x1xi32>
    %633 = arith.andi %628, %632 : vector<1x8x1xi1>
    %cst_239 = arith.constant 0.000000e+00 : f32
    %634 = vector.shape_cast %633 : vector<1x8x1xi1> to vector<1x8x1xi1>
    %635 = vector.broadcast %634 : vector<1x8x1xi1> to vector<8x8x16xi1>
    %636 = vector.broadcast %cst_239 : f32 to vector<8x8x16xf32>
    %637 = arith.select %635, %624, %636 : vector<8x8x16xi1>, vector<8x8x16xf32>
    %638 = arith.addf %619, %637 : vector<8x8x16xf32>
    %c6_i32 = arith.constant 6 : i32
    %639 = tpu.dynamic_rotate %576 by %c6_i32 dim 1 : vector<8x8x16xf32>, i32 -> vector<8x8x16xf32>
    %c4_240 = arith.constant 4 : index
    %c0_241 = arith.constant 0 : index
    %640 = vector.load %arg9[%c4_240, %c0_241] : memref<25x16xf32, #tpu.memory_space<vmem>>, vector<1x16xf32>
    %641 = vector.shape_cast %640 : vector<1x16xf32> to vector<1x1x16xf32>
    %642 = vector.broadcast %641 : vector<1x1x16xf32> to vector<8x8x16xf32>
    %643 = arith.mulf %639, %642 : vector<8x8x16xf32>
    %c2_i32_242 = arith.constant 2 : i32
    %644 = vector.broadcast %c2_i32_242 : i32 to vector<1x8x1xi32>
    %645 = arith.addi %574, %644 : vector<1x8x1xi32>
    %c0_i32_243 = arith.constant 0 : i32
    %646 = vector.broadcast %c0_i32_243 : i32 to vector<1x8x1xi32>
    %647 = arith.cmpi sge, %645, %646 : vector<1x8x1xi32>
    %c2_i32_244 = arith.constant 2 : i32
    %648 = vector.broadcast %c2_i32_244 : i32 to vector<1x8x1xi32>
    %649 = arith.addi %574, %648 : vector<1x8x1xi32>
    %c8_i32_245 = arith.constant 8 : i32
    %650 = vector.broadcast %c8_i32_245 : i32 to vector<1x8x1xi32>
    %651 = arith.cmpi slt, %649, %650 : vector<1x8x1xi32>
    %652 = arith.andi %647, %651 : vector<1x8x1xi1>
    %cst_246 = arith.constant 0.000000e+00 : f32
    %653 = vector.shape_cast %652 : vector<1x8x1xi1> to vector<1x8x1xi1>
    %654 = vector.broadcast %653 : vector<1x8x1xi1> to vector<8x8x16xi1>
    %655 = vector.broadcast %cst_246 : f32 to vector<8x8x16xf32>
    %656 = arith.select %654, %643, %655 : vector<8x8x16xi1>, vector<8x8x16xf32>
    %657 = arith.addf %638, %656 : vector<8x8x16xf32>
    %658 = vector.extract_strided_slice %573 {offsets = [1, 0, 0], sizes = [8, 8, 16], strides = [1, 1, 1]} : vector<12x8x16xf32> to vector<8x8x16xf32>
    %c2_i32_247 = arith.constant 2 : i32
    %659 = tpu.dynamic_rotate %658 by %c2_i32_247 dim 1 : vector<8x8x16xf32>, i32 -> vector<8x8x16xf32>
    %c5_248 = arith.constant 5 : index
    %c0_249 = arith.constant 0 : index
    %660 = vector.load %arg9[%c5_248, %c0_249] : memref<25x16xf32, #tpu.memory_space<vmem>>, vector<1x16xf32>
    %661 = vector.shape_cast %660 : vector<1x16xf32> to vector<1x1x16xf32>
    %662 = vector.broadcast %661 : vector<1x1x16xf32> to vector<8x8x16xf32>
    %663 = arith.mulf %659, %662 : vector<8x8x16xf32>
    %c-2_i32_250 = arith.constant -2 : i32
    %664 = vector.broadcast %c-2_i32_250 : i32 to vector<1x8x1xi32>
    %665 = arith.addi %574, %664 : vector<1x8x1xi32>
    %c0_i32_251 = arith.constant 0 : i32
    %666 = vector.broadcast %c0_i32_251 : i32 to vector<1x8x1xi32>
    %667 = arith.cmpi sge, %665, %666 : vector<1x8x1xi32>
    %c-2_i32_252 = arith.constant -2 : i32
    %668 = vector.broadcast %c-2_i32_252 : i32 to vector<1x8x1xi32>
    %669 = arith.addi %574, %668 : vector<1x8x1xi32>
    %c8_i32_253 = arith.constant 8 : i32
    %670 = vector.broadcast %c8_i32_253 : i32 to vector<1x8x1xi32>
    %671 = arith.cmpi slt, %669, %670 : vector<1x8x1xi32>
    %672 = arith.andi %667, %671 : vector<1x8x1xi1>
    %cst_254 = arith.constant 0.000000e+00 : f32
    %673 = vector.shape_cast %672 : vector<1x8x1xi1> to vector<1x8x1xi1>
    %674 = vector.broadcast %673 : vector<1x8x1xi1> to vector<8x8x16xi1>
    %675 = vector.broadcast %cst_254 : f32 to vector<8x8x16xf32>
    %676 = arith.select %674, %663, %675 : vector<8x8x16xi1>, vector<8x8x16xf32>
    %677 = arith.addf %657, %676 : vector<8x8x16xf32>
    %c1_i32_255 = arith.constant 1 : i32
    %678 = tpu.dynamic_rotate %658 by %c1_i32_255 dim 1 : vector<8x8x16xf32>, i32 -> vector<8x8x16xf32>
    %c6_256 = arith.constant 6 : index
    %c0_257 = arith.constant 0 : index
    %679 = vector.load %arg9[%c6_256, %c0_257] : memref<25x16xf32, #tpu.memory_space<vmem>>, vector<1x16xf32>
    %680 = vector.shape_cast %679 : vector<1x16xf32> to vector<1x1x16xf32>
    %681 = vector.broadcast %680 : vector<1x1x16xf32> to vector<8x8x16xf32>
    %682 = arith.mulf %678, %681 : vector<8x8x16xf32>
    %c-1_i32_258 = arith.constant -1 : i32
    %683 = vector.broadcast %c-1_i32_258 : i32 to vector<1x8x1xi32>
    %684 = arith.addi %574, %683 : vector<1x8x1xi32>
    %c0_i32_259 = arith.constant 0 : i32
    %685 = vector.broadcast %c0_i32_259 : i32 to vector<1x8x1xi32>
    %686 = arith.cmpi sge, %684, %685 : vector<1x8x1xi32>
    %c-1_i32_260 = arith.constant -1 : i32
    %687 = vector.broadcast %c-1_i32_260 : i32 to vector<1x8x1xi32>
    %688 = arith.addi %574, %687 : vector<1x8x1xi32>
    %c8_i32_261 = arith.constant 8 : i32
    %689 = vector.broadcast %c8_i32_261 : i32 to vector<1x8x1xi32>
    %690 = arith.cmpi slt, %688, %689 : vector<1x8x1xi32>
    %691 = arith.andi %686, %690 : vector<1x8x1xi1>
    %cst_262 = arith.constant 0.000000e+00 : f32
    %692 = vector.shape_cast %691 : vector<1x8x1xi1> to vector<1x8x1xi1>
    %693 = vector.broadcast %692 : vector<1x8x1xi1> to vector<8x8x16xi1>
    %694 = vector.broadcast %cst_262 : f32 to vector<8x8x16xf32>
    %695 = arith.select %693, %682, %694 : vector<8x8x16xi1>, vector<8x8x16xf32>
    %696 = arith.addf %677, %695 : vector<8x8x16xf32>
    %c7_263 = arith.constant 7 : index
    %c0_264 = arith.constant 0 : index
    %697 = vector.load %arg9[%c7_263, %c0_264] : memref<25x16xf32, #tpu.memory_space<vmem>>, vector<1x16xf32>
    %698 = vector.shape_cast %697 : vector<1x16xf32> to vector<1x1x16xf32>
    %699 = vector.broadcast %698 : vector<1x1x16xf32> to vector<8x8x16xf32>
    %700 = arith.mulf %658, %699 : vector<8x8x16xf32>
    %701 = arith.addf %696, %700 : vector<8x8x16xf32>
    %c7_i32_265 = arith.constant 7 : i32
    %702 = tpu.dynamic_rotate %658 by %c7_i32_265 dim 1 : vector<8x8x16xf32>, i32 -> vector<8x8x16xf32>
    %c8_266 = arith.constant 8 : index
    %c0_267 = arith.constant 0 : index
    %703 = vector.load %arg9[%c8_266, %c0_267] : memref<25x16xf32, #tpu.memory_space<vmem>>, vector<1x16xf32>
    %704 = vector.shape_cast %703 : vector<1x16xf32> to vector<1x1x16xf32>
    %705 = vector.broadcast %704 : vector<1x1x16xf32> to vector<8x8x16xf32>
    %706 = arith.mulf %702, %705 : vector<8x8x16xf32>
    %c1_i32_268 = arith.constant 1 : i32
    %707 = vector.broadcast %c1_i32_268 : i32 to vector<1x8x1xi32>
    %708 = arith.addi %574, %707 : vector<1x8x1xi32>
    %c0_i32_269 = arith.constant 0 : i32
    %709 = vector.broadcast %c0_i32_269 : i32 to vector<1x8x1xi32>
    %710 = arith.cmpi sge, %708, %709 : vector<1x8x1xi32>
    %c1_i32_270 = arith.constant 1 : i32
    %711 = vector.broadcast %c1_i32_270 : i32 to vector<1x8x1xi32>
    %712 = arith.addi %574, %711 : vector<1x8x1xi32>
    %c8_i32_271 = arith.constant 8 : i32
    %713 = vector.broadcast %c8_i32_271 : i32 to vector<1x8x1xi32>
    %714 = arith.cmpi slt, %712, %713 : vector<1x8x1xi32>
    %715 = arith.andi %710, %714 : vector<1x8x1xi1>
    %cst_272 = arith.constant 0.000000e+00 : f32
    %716 = vector.shape_cast %715 : vector<1x8x1xi1> to vector<1x8x1xi1>
    %717 = vector.broadcast %716 : vector<1x8x1xi1> to vector<8x8x16xi1>
    %718 = vector.broadcast %cst_272 : f32 to vector<8x8x16xf32>
    %719 = arith.select %717, %706, %718 : vector<8x8x16xi1>, vector<8x8x16xf32>
    %720 = arith.addf %701, %719 : vector<8x8x16xf32>
    %c6_i32_273 = arith.constant 6 : i32
    %721 = tpu.dynamic_rotate %658 by %c6_i32_273 dim 1 : vector<8x8x16xf32>, i32 -> vector<8x8x16xf32>
    %c9_274 = arith.constant 9 : index
    %c0_275 = arith.constant 0 : index
    %722 = vector.load %arg9[%c9_274, %c0_275] : memref<25x16xf32, #tpu.memory_space<vmem>>, vector<1x16xf32>
    %723 = vector.shape_cast %722 : vector<1x16xf32> to vector<1x1x16xf32>
    %724 = vector.broadcast %723 : vector<1x1x16xf32> to vector<8x8x16xf32>
    %725 = arith.mulf %721, %724 : vector<8x8x16xf32>
    %c2_i32_276 = arith.constant 2 : i32
    %726 = vector.broadcast %c2_i32_276 : i32 to vector<1x8x1xi32>
    %727 = arith.addi %574, %726 : vector<1x8x1xi32>
    %c0_i32_277 = arith.constant 0 : i32
    %728 = vector.broadcast %c0_i32_277 : i32 to vector<1x8x1xi32>
    %729 = arith.cmpi sge, %727, %728 : vector<1x8x1xi32>
    %c2_i32_278 = arith.constant 2 : i32
    %730 = vector.broadcast %c2_i32_278 : i32 to vector<1x8x1xi32>
    %731 = arith.addi %574, %730 : vector<1x8x1xi32>
    %c8_i32_279 = arith.constant 8 : i32
    %732 = vector.broadcast %c8_i32_279 : i32 to vector<1x8x1xi32>
    %733 = arith.cmpi slt, %731, %732 : vector<1x8x1xi32>
    %734 = arith.andi %729, %733 : vector<1x8x1xi1>
    %cst_280 = arith.constant 0.000000e+00 : f32
    %735 = vector.shape_cast %734 : vector<1x8x1xi1> to vector<1x8x1xi1>
    %736 = vector.broadcast %735 : vector<1x8x1xi1> to vector<8x8x16xi1>
    %737 = vector.broadcast %cst_280 : f32 to vector<8x8x16xf32>
    %738 = arith.select %736, %725, %737 : vector<8x8x16xi1>, vector<8x8x16xf32>
    %739 = arith.addf %720, %738 : vector<8x8x16xf32>
    %740 = vector.extract_strided_slice %573 {offsets = [2, 0, 0], sizes = [8, 8, 16], strides = [1, 1, 1]} : vector<12x8x16xf32> to vector<8x8x16xf32>
    %c2_i32_281 = arith.constant 2 : i32
    %741 = tpu.dynamic_rotate %740 by %c2_i32_281 dim 1 : vector<8x8x16xf32>, i32 -> vector<8x8x16xf32>
    %c10_282 = arith.constant 10 : index
    %c0_283 = arith.constant 0 : index
    %742 = vector.load %arg9[%c10_282, %c0_283] : memref<25x16xf32, #tpu.memory_space<vmem>>, vector<1x16xf32>
    %743 = vector.shape_cast %742 : vector<1x16xf32> to vector<1x1x16xf32>
    %744 = vector.broadcast %743 : vector<1x1x16xf32> to vector<8x8x16xf32>
    %745 = arith.mulf %741, %744 : vector<8x8x16xf32>
    %c-2_i32_284 = arith.constant -2 : i32
    %746 = vector.broadcast %c-2_i32_284 : i32 to vector<1x8x1xi32>
    %747 = arith.addi %574, %746 : vector<1x8x1xi32>
    %c0_i32_285 = arith.constant 0 : i32
    %748 = vector.broadcast %c0_i32_285 : i32 to vector<1x8x1xi32>
    %749 = arith.cmpi sge, %747, %748 : vector<1x8x1xi32>
    %c-2_i32_286 = arith.constant -2 : i32
    %750 = vector.broadcast %c-2_i32_286 : i32 to vector<1x8x1xi32>
    %751 = arith.addi %574, %750 : vector<1x8x1xi32>
    %c8_i32_287 = arith.constant 8 : i32
    %752 = vector.broadcast %c8_i32_287 : i32 to vector<1x8x1xi32>
    %753 = arith.cmpi slt, %751, %752 : vector<1x8x1xi32>
    %754 = arith.andi %749, %753 : vector<1x8x1xi1>
    %cst_288 = arith.constant 0.000000e+00 : f32
    %755 = vector.shape_cast %754 : vector<1x8x1xi1> to vector<1x8x1xi1>
    %756 = vector.broadcast %755 : vector<1x8x1xi1> to vector<8x8x16xi1>
    %757 = vector.broadcast %cst_288 : f32 to vector<8x8x16xf32>
    %758 = arith.select %756, %745, %757 : vector<8x8x16xi1>, vector<8x8x16xf32>
    %759 = arith.addf %739, %758 : vector<8x8x16xf32>
    %c1_i32_289 = arith.constant 1 : i32
    %760 = tpu.dynamic_rotate %740 by %c1_i32_289 dim 1 : vector<8x8x16xf32>, i32 -> vector<8x8x16xf32>
    %c11_290 = arith.constant 11 : index
    %c0_291 = arith.constant 0 : index
    %761 = vector.load %arg9[%c11_290, %c0_291] : memref<25x16xf32, #tpu.memory_space<vmem>>, vector<1x16xf32>
    %762 = vector.shape_cast %761 : vector<1x16xf32> to vector<1x1x16xf32>
    %763 = vector.broadcast %762 : vector<1x1x16xf32> to vector<8x8x16xf32>
    %764 = arith.mulf %760, %763 : vector<8x8x16xf32>
    %c-1_i32_292 = arith.constant -1 : i32
    %765 = vector.broadcast %c-1_i32_292 : i32 to vector<1x8x1xi32>
    %766 = arith.addi %574, %765 : vector<1x8x1xi32>
    %c0_i32_293 = arith.constant 0 : i32
    %767 = vector.broadcast %c0_i32_293 : i32 to vector<1x8x1xi32>
    %768 = arith.cmpi sge, %766, %767 : vector<1x8x1xi32>
    %c-1_i32_294 = arith.constant -1 : i32
    %769 = vector.broadcast %c-1_i32_294 : i32 to vector<1x8x1xi32>
    %770 = arith.addi %574, %769 : vector<1x8x1xi32>
    %c8_i32_295 = arith.constant 8 : i32
    %771 = vector.broadcast %c8_i32_295 : i32 to vector<1x8x1xi32>
    %772 = arith.cmpi slt, %770, %771 : vector<1x8x1xi32>
    %773 = arith.andi %768, %772 : vector<1x8x1xi1>
    %cst_296 = arith.constant 0.000000e+00 : f32
    %774 = vector.shape_cast %773 : vector<1x8x1xi1> to vector<1x8x1xi1>
    %775 = vector.broadcast %774 : vector<1x8x1xi1> to vector<8x8x16xi1>
    %776 = vector.broadcast %cst_296 : f32 to vector<8x8x16xf32>
    %777 = arith.select %775, %764, %776 : vector<8x8x16xi1>, vector<8x8x16xf32>
    %778 = arith.addf %759, %777 : vector<8x8x16xf32>
    %c12_297 = arith.constant 12 : index
    %c0_298 = arith.constant 0 : index
    %779 = vector.load %arg9[%c12_297, %c0_298] : memref<25x16xf32, #tpu.memory_space<vmem>>, vector<1x16xf32>
    %780 = vector.shape_cast %779 : vector<1x16xf32> to vector<1x1x16xf32>
    %781 = vector.broadcast %780 : vector<1x1x16xf32> to vector<8x8x16xf32>
    %782 = arith.mulf %740, %781 : vector<8x8x16xf32>
    %783 = arith.addf %778, %782 : vector<8x8x16xf32>
    %c7_i32_299 = arith.constant 7 : i32
    %784 = tpu.dynamic_rotate %740 by %c7_i32_299 dim 1 : vector<8x8x16xf32>, i32 -> vector<8x8x16xf32>
    %c13_300 = arith.constant 13 : index
    %c0_301 = arith.constant 0 : index
    %785 = vector.load %arg9[%c13_300, %c0_301] : memref<25x16xf32, #tpu.memory_space<vmem>>, vector<1x16xf32>
    %786 = vector.shape_cast %785 : vector<1x16xf32> to vector<1x1x16xf32>
    %787 = vector.broadcast %786 : vector<1x1x16xf32> to vector<8x8x16xf32>
    %788 = arith.mulf %784, %787 : vector<8x8x16xf32>
    %c1_i32_302 = arith.constant 1 : i32
    %789 = vector.broadcast %c1_i32_302 : i32 to vector<1x8x1xi32>
    %790 = arith.addi %574, %789 : vector<1x8x1xi32>
    %c0_i32_303 = arith.constant 0 : i32
    %791 = vector.broadcast %c0_i32_303 : i32 to vector<1x8x1xi32>
    %792 = arith.cmpi sge, %790, %791 : vector<1x8x1xi32>
    %c1_i32_304 = arith.constant 1 : i32
    %793 = vector.broadcast %c1_i32_304 : i32 to vector<1x8x1xi32>
    %794 = arith.addi %574, %793 : vector<1x8x1xi32>
    %c8_i32_305 = arith.constant 8 : i32
    %795 = vector.broadcast %c8_i32_305 : i32 to vector<1x8x1xi32>
    %796 = arith.cmpi slt, %794, %795 : vector<1x8x1xi32>
    %797 = arith.andi %792, %796 : vector<1x8x1xi1>
    %cst_306 = arith.constant 0.000000e+00 : f32
    %798 = vector.shape_cast %797 : vector<1x8x1xi1> to vector<1x8x1xi1>
    %799 = vector.broadcast %798 : vector<1x8x1xi1> to vector<8x8x16xi1>
    %800 = vector.broadcast %cst_306 : f32 to vector<8x8x16xf32>
    %801 = arith.select %799, %788, %800 : vector<8x8x16xi1>, vector<8x8x16xf32>
    %802 = arith.addf %783, %801 : vector<8x8x16xf32>
    %c6_i32_307 = arith.constant 6 : i32
    %803 = tpu.dynamic_rotate %740 by %c6_i32_307 dim 1 : vector<8x8x16xf32>, i32 -> vector<8x8x16xf32>
    %c14_308 = arith.constant 14 : index
    %c0_309 = arith.constant 0 : index
    %804 = vector.load %arg9[%c14_308, %c0_309] : memref<25x16xf32, #tpu.memory_space<vmem>>, vector<1x16xf32>
    %805 = vector.shape_cast %804 : vector<1x16xf32> to vector<1x1x16xf32>
    %806 = vector.broadcast %805 : vector<1x1x16xf32> to vector<8x8x16xf32>
    %807 = arith.mulf %803, %806 : vector<8x8x16xf32>
    %c2_i32_310 = arith.constant 2 : i32
    %808 = vector.broadcast %c2_i32_310 : i32 to vector<1x8x1xi32>
    %809 = arith.addi %574, %808 : vector<1x8x1xi32>
    %c0_i32_311 = arith.constant 0 : i32
    %810 = vector.broadcast %c0_i32_311 : i32 to vector<1x8x1xi32>
    %811 = arith.cmpi sge, %809, %810 : vector<1x8x1xi32>
    %c2_i32_312 = arith.constant 2 : i32
    %812 = vector.broadcast %c2_i32_312 : i32 to vector<1x8x1xi32>
    %813 = arith.addi %574, %812 : vector<1x8x1xi32>
    %c8_i32_313 = arith.constant 8 : i32
    %814 = vector.broadcast %c8_i32_313 : i32 to vector<1x8x1xi32>
    %815 = arith.cmpi slt, %813, %814 : vector<1x8x1xi32>
    %816 = arith.andi %811, %815 : vector<1x8x1xi1>
    %cst_314 = arith.constant 0.000000e+00 : f32
    %817 = vector.shape_cast %816 : vector<1x8x1xi1> to vector<1x8x1xi1>
    %818 = vector.broadcast %817 : vector<1x8x1xi1> to vector<8x8x16xi1>
    %819 = vector.broadcast %cst_314 : f32 to vector<8x8x16xf32>
    %820 = arith.select %818, %807, %819 : vector<8x8x16xi1>, vector<8x8x16xf32>
    %821 = arith.addf %802, %820 : vector<8x8x16xf32>
    %822 = vector.extract_strided_slice %573 {offsets = [3, 0, 0], sizes = [8, 8, 16], strides = [1, 1, 1]} : vector<12x8x16xf32> to vector<8x8x16xf32>
    %c2_i32_315 = arith.constant 2 : i32
    %823 = tpu.dynamic_rotate %822 by %c2_i32_315 dim 1 : vector<8x8x16xf32>, i32 -> vector<8x8x16xf32>
    %c15_316 = arith.constant 15 : index
    %c0_317 = arith.constant 0 : index
    %824 = vector.load %arg9[%c15_316, %c0_317] : memref<25x16xf32, #tpu.memory_space<vmem>>, vector<1x16xf32>
    %825 = vector.shape_cast %824 : vector<1x16xf32> to vector<1x1x16xf32>
    %826 = vector.broadcast %825 : vector<1x1x16xf32> to vector<8x8x16xf32>
    %827 = arith.mulf %823, %826 : vector<8x8x16xf32>
    %c-2_i32_318 = arith.constant -2 : i32
    %828 = vector.broadcast %c-2_i32_318 : i32 to vector<1x8x1xi32>
    %829 = arith.addi %574, %828 : vector<1x8x1xi32>
    %c0_i32_319 = arith.constant 0 : i32
    %830 = vector.broadcast %c0_i32_319 : i32 to vector<1x8x1xi32>
    %831 = arith.cmpi sge, %829, %830 : vector<1x8x1xi32>
    %c-2_i32_320 = arith.constant -2 : i32
    %832 = vector.broadcast %c-2_i32_320 : i32 to vector<1x8x1xi32>
    %833 = arith.addi %574, %832 : vector<1x8x1xi32>
    %c8_i32_321 = arith.constant 8 : i32
    %834 = vector.broadcast %c8_i32_321 : i32 to vector<1x8x1xi32>
    %835 = arith.cmpi slt, %833, %834 : vector<1x8x1xi32>
    %836 = arith.andi %831, %835 : vector<1x8x1xi1>
    %cst_322 = arith.constant 0.000000e+00 : f32
    %837 = vector.shape_cast %836 : vector<1x8x1xi1> to vector<1x8x1xi1>
    %838 = vector.broadcast %837 : vector<1x8x1xi1> to vector<8x8x16xi1>
    %839 = vector.broadcast %cst_322 : f32 to vector<8x8x16xf32>
    %840 = arith.select %838, %827, %839 : vector<8x8x16xi1>, vector<8x8x16xf32>
    %841 = arith.addf %821, %840 : vector<8x8x16xf32>
    %c1_i32_323 = arith.constant 1 : i32
    %842 = tpu.dynamic_rotate %822 by %c1_i32_323 dim 1 : vector<8x8x16xf32>, i32 -> vector<8x8x16xf32>
    %c16_324 = arith.constant 16 : index
    %c0_325 = arith.constant 0 : index
    %843 = vector.load %arg9[%c16_324, %c0_325] : memref<25x16xf32, #tpu.memory_space<vmem>>, vector<1x16xf32>
    %844 = vector.shape_cast %843 : vector<1x16xf32> to vector<1x1x16xf32>
    %845 = vector.broadcast %844 : vector<1x1x16xf32> to vector<8x8x16xf32>
    %846 = arith.mulf %842, %845 : vector<8x8x16xf32>
    %c-1_i32_326 = arith.constant -1 : i32
    %847 = vector.broadcast %c-1_i32_326 : i32 to vector<1x8x1xi32>
    %848 = arith.addi %574, %847 : vector<1x8x1xi32>
    %c0_i32_327 = arith.constant 0 : i32
    %849 = vector.broadcast %c0_i32_327 : i32 to vector<1x8x1xi32>
    %850 = arith.cmpi sge, %848, %849 : vector<1x8x1xi32>
    %c-1_i32_328 = arith.constant -1 : i32
    %851 = vector.broadcast %c-1_i32_328 : i32 to vector<1x8x1xi32>
    %852 = arith.addi %574, %851 : vector<1x8x1xi32>
    %c8_i32_329 = arith.constant 8 : i32
    %853 = vector.broadcast %c8_i32_329 : i32 to vector<1x8x1xi32>
    %854 = arith.cmpi slt, %852, %853 : vector<1x8x1xi32>
    %855 = arith.andi %850, %854 : vector<1x8x1xi1>
    %cst_330 = arith.constant 0.000000e+00 : f32
    %856 = vector.shape_cast %855 : vector<1x8x1xi1> to vector<1x8x1xi1>
    %857 = vector.broadcast %856 : vector<1x8x1xi1> to vector<8x8x16xi1>
    %858 = vector.broadcast %cst_330 : f32 to vector<8x8x16xf32>
    %859 = arith.select %857, %846, %858 : vector<8x8x16xi1>, vector<8x8x16xf32>
    %860 = arith.addf %841, %859 : vector<8x8x16xf32>
    %c17_331 = arith.constant 17 : index
    %c0_332 = arith.constant 0 : index
    %861 = vector.load %arg9[%c17_331, %c0_332] : memref<25x16xf32, #tpu.memory_space<vmem>>, vector<1x16xf32>
    %862 = vector.shape_cast %861 : vector<1x16xf32> to vector<1x1x16xf32>
    %863 = vector.broadcast %862 : vector<1x1x16xf32> to vector<8x8x16xf32>
    %864 = arith.mulf %822, %863 : vector<8x8x16xf32>
    %865 = arith.addf %860, %864 : vector<8x8x16xf32>
    %c7_i32_333 = arith.constant 7 : i32
    %866 = tpu.dynamic_rotate %822 by %c7_i32_333 dim 1 : vector<8x8x16xf32>, i32 -> vector<8x8x16xf32>
    %c18_334 = arith.constant 18 : index
    %c0_335 = arith.constant 0 : index
    %867 = vector.load %arg9[%c18_334, %c0_335] : memref<25x16xf32, #tpu.memory_space<vmem>>, vector<1x16xf32>
    %868 = vector.shape_cast %867 : vector<1x16xf32> to vector<1x1x16xf32>
    %869 = vector.broadcast %868 : vector<1x1x16xf32> to vector<8x8x16xf32>
    %870 = arith.mulf %866, %869 : vector<8x8x16xf32>
    %c1_i32_336 = arith.constant 1 : i32
    %871 = vector.broadcast %c1_i32_336 : i32 to vector<1x8x1xi32>
    %872 = arith.addi %574, %871 : vector<1x8x1xi32>
    %c0_i32_337 = arith.constant 0 : i32
    %873 = vector.broadcast %c0_i32_337 : i32 to vector<1x8x1xi32>
    %874 = arith.cmpi sge, %872, %873 : vector<1x8x1xi32>
    %c1_i32_338 = arith.constant 1 : i32
    %875 = vector.broadcast %c1_i32_338 : i32 to vector<1x8x1xi32>
    %876 = arith.addi %574, %875 : vector<1x8x1xi32>
    %c8_i32_339 = arith.constant 8 : i32
    %877 = vector.broadcast %c8_i32_339 : i32 to vector<1x8x1xi32>
    %878 = arith.cmpi slt, %876, %877 : vector<1x8x1xi32>
    %879 = arith.andi %874, %878 : vector<1x8x1xi1>
    %cst_340 = arith.constant 0.000000e+00 : f32
    %880 = vector.shape_cast %879 : vector<1x8x1xi1> to vector<1x8x1xi1>
    %881 = vector.broadcast %880 : vector<1x8x1xi1> to vector<8x8x16xi1>
    %882 = vector.broadcast %cst_340 : f32 to vector<8x8x16xf32>
    %883 = arith.select %881, %870, %882 : vector<8x8x16xi1>, vector<8x8x16xf32>
    %884 = arith.addf %865, %883 : vector<8x8x16xf32>
    %c6_i32_341 = arith.constant 6 : i32
    %885 = tpu.dynamic_rotate %822 by %c6_i32_341 dim 1 : vector<8x8x16xf32>, i32 -> vector<8x8x16xf32>
    %c19_342 = arith.constant 19 : index
    %c0_343 = arith.constant 0 : index
    %886 = vector.load %arg9[%c19_342, %c0_343] : memref<25x16xf32, #tpu.memory_space<vmem>>, vector<1x16xf32>
    %887 = vector.shape_cast %886 : vector<1x16xf32> to vector<1x1x16xf32>
    %888 = vector.broadcast %887 : vector<1x1x16xf32> to vector<8x8x16xf32>
    %889 = arith.mulf %885, %888 : vector<8x8x16xf32>
    %c2_i32_344 = arith.constant 2 : i32
    %890 = vector.broadcast %c2_i32_344 : i32 to vector<1x8x1xi32>
    %891 = arith.addi %574, %890 : vector<1x8x1xi32>
    %c0_i32_345 = arith.constant 0 : i32
    %892 = vector.broadcast %c0_i32_345 : i32 to vector<1x8x1xi32>
    %893 = arith.cmpi sge, %891, %892 : vector<1x8x1xi32>
    %c2_i32_346 = arith.constant 2 : i32
    %894 = vector.broadcast %c2_i32_346 : i32 to vector<1x8x1xi32>
    %895 = arith.addi %574, %894 : vector<1x8x1xi32>
    %c8_i32_347 = arith.constant 8 : i32
    %896 = vector.broadcast %c8_i32_347 : i32 to vector<1x8x1xi32>
    %897 = arith.cmpi slt, %895, %896 : vector<1x8x1xi32>
    %898 = arith.andi %893, %897 : vector<1x8x1xi1>
    %cst_348 = arith.constant 0.000000e+00 : f32
    %899 = vector.shape_cast %898 : vector<1x8x1xi1> to vector<1x8x1xi1>
    %900 = vector.broadcast %899 : vector<1x8x1xi1> to vector<8x8x16xi1>
    %901 = vector.broadcast %cst_348 : f32 to vector<8x8x16xf32>
    %902 = arith.select %900, %889, %901 : vector<8x8x16xi1>, vector<8x8x16xf32>
    %903 = arith.addf %884, %902 : vector<8x8x16xf32>
    %904 = vector.extract_strided_slice %573 {offsets = [4, 0, 0], sizes = [8, 8, 16], strides = [1, 1, 1]} : vector<12x8x16xf32> to vector<8x8x16xf32>
    %c2_i32_349 = arith.constant 2 : i32
    %905 = tpu.dynamic_rotate %904 by %c2_i32_349 dim 1 : vector<8x8x16xf32>, i32 -> vector<8x8x16xf32>
    %c20_350 = arith.constant 20 : index
    %c0_351 = arith.constant 0 : index
    %906 = vector.load %arg9[%c20_350, %c0_351] : memref<25x16xf32, #tpu.memory_space<vmem>>, vector<1x16xf32>
    %907 = vector.shape_cast %906 : vector<1x16xf32> to vector<1x1x16xf32>
    %908 = vector.broadcast %907 : vector<1x1x16xf32> to vector<8x8x16xf32>
    %909 = arith.mulf %905, %908 : vector<8x8x16xf32>
    %c-2_i32_352 = arith.constant -2 : i32
    %910 = vector.broadcast %c-2_i32_352 : i32 to vector<1x8x1xi32>
    %911 = arith.addi %574, %910 : vector<1x8x1xi32>
    %c0_i32_353 = arith.constant 0 : i32
    %912 = vector.broadcast %c0_i32_353 : i32 to vector<1x8x1xi32>
    %913 = arith.cmpi sge, %911, %912 : vector<1x8x1xi32>
    %c-2_i32_354 = arith.constant -2 : i32
    %914 = vector.broadcast %c-2_i32_354 : i32 to vector<1x8x1xi32>
    %915 = arith.addi %574, %914 : vector<1x8x1xi32>
    %c8_i32_355 = arith.constant 8 : i32
    %916 = vector.broadcast %c8_i32_355 : i32 to vector<1x8x1xi32>
    %917 = arith.cmpi slt, %915, %916 : vector<1x8x1xi32>
    %918 = arith.andi %913, %917 : vector<1x8x1xi1>
    %cst_356 = arith.constant 0.000000e+00 : f32
    %919 = vector.shape_cast %918 : vector<1x8x1xi1> to vector<1x8x1xi1>
    %920 = vector.broadcast %919 : vector<1x8x1xi1> to vector<8x8x16xi1>
    %921 = vector.broadcast %cst_356 : f32 to vector<8x8x16xf32>
    %922 = arith.select %920, %909, %921 : vector<8x8x16xi1>, vector<8x8x16xf32>
    %923 = arith.addf %903, %922 : vector<8x8x16xf32>
    %c1_i32_357 = arith.constant 1 : i32
    %924 = tpu.dynamic_rotate %904 by %c1_i32_357 dim 1 : vector<8x8x16xf32>, i32 -> vector<8x8x16xf32>
    %c21_358 = arith.constant 21 : index
    %c0_359 = arith.constant 0 : index
    %925 = vector.load %arg9[%c21_358, %c0_359] : memref<25x16xf32, #tpu.memory_space<vmem>>, vector<1x16xf32>
    %926 = vector.shape_cast %925 : vector<1x16xf32> to vector<1x1x16xf32>
    %927 = vector.broadcast %926 : vector<1x1x16xf32> to vector<8x8x16xf32>
    %928 = arith.mulf %924, %927 : vector<8x8x16xf32>
    %c-1_i32_360 = arith.constant -1 : i32
    %929 = vector.broadcast %c-1_i32_360 : i32 to vector<1x8x1xi32>
    %930 = arith.addi %574, %929 : vector<1x8x1xi32>
    %c0_i32_361 = arith.constant 0 : i32
    %931 = vector.broadcast %c0_i32_361 : i32 to vector<1x8x1xi32>
    %932 = arith.cmpi sge, %930, %931 : vector<1x8x1xi32>
    %c-1_i32_362 = arith.constant -1 : i32
    %933 = vector.broadcast %c-1_i32_362 : i32 to vector<1x8x1xi32>
    %934 = arith.addi %574, %933 : vector<1x8x1xi32>
    %c8_i32_363 = arith.constant 8 : i32
    %935 = vector.broadcast %c8_i32_363 : i32 to vector<1x8x1xi32>
    %936 = arith.cmpi slt, %934, %935 : vector<1x8x1xi32>
    %937 = arith.andi %932, %936 : vector<1x8x1xi1>
    %cst_364 = arith.constant 0.000000e+00 : f32
    %938 = vector.shape_cast %937 : vector<1x8x1xi1> to vector<1x8x1xi1>
    %939 = vector.broadcast %938 : vector<1x8x1xi1> to vector<8x8x16xi1>
    %940 = vector.broadcast %cst_364 : f32 to vector<8x8x16xf32>
    %941 = arith.select %939, %928, %940 : vector<8x8x16xi1>, vector<8x8x16xf32>
    %942 = arith.addf %923, %941 : vector<8x8x16xf32>
    %c22_365 = arith.constant 22 : index
    %c0_366 = arith.constant 0 : index
    %943 = vector.load %arg9[%c22_365, %c0_366] : memref<25x16xf32, #tpu.memory_space<vmem>>, vector<1x16xf32>
    %944 = vector.shape_cast %943 : vector<1x16xf32> to vector<1x1x16xf32>
    %945 = vector.broadcast %944 : vector<1x1x16xf32> to vector<8x8x16xf32>
    %946 = arith.mulf %904, %945 : vector<8x8x16xf32>
    %947 = arith.addf %942, %946 : vector<8x8x16xf32>
    %c7_i32_367 = arith.constant 7 : i32
    %948 = tpu.dynamic_rotate %904 by %c7_i32_367 dim 1 : vector<8x8x16xf32>, i32 -> vector<8x8x16xf32>
    %c23_368 = arith.constant 23 : index
    %c0_369 = arith.constant 0 : index
    %949 = vector.load %arg9[%c23_368, %c0_369] : memref<25x16xf32, #tpu.memory_space<vmem>>, vector<1x16xf32>
    %950 = vector.shape_cast %949 : vector<1x16xf32> to vector<1x1x16xf32>
    %951 = vector.broadcast %950 : vector<1x1x16xf32> to vector<8x8x16xf32>
    %952 = arith.mulf %948, %951 : vector<8x8x16xf32>
    %c1_i32_370 = arith.constant 1 : i32
    %953 = vector.broadcast %c1_i32_370 : i32 to vector<1x8x1xi32>
    %954 = arith.addi %574, %953 : vector<1x8x1xi32>
    %c0_i32_371 = arith.constant 0 : i32
    %955 = vector.broadcast %c0_i32_371 : i32 to vector<1x8x1xi32>
    %956 = arith.cmpi sge, %954, %955 : vector<1x8x1xi32>
    %c1_i32_372 = arith.constant 1 : i32
    %957 = vector.broadcast %c1_i32_372 : i32 to vector<1x8x1xi32>
    %958 = arith.addi %574, %957 : vector<1x8x1xi32>
    %c8_i32_373 = arith.constant 8 : i32
    %959 = vector.broadcast %c8_i32_373 : i32 to vector<1x8x1xi32>
    %960 = arith.cmpi slt, %958, %959 : vector<1x8x1xi32>
    %961 = arith.andi %956, %960 : vector<1x8x1xi1>
    %cst_374 = arith.constant 0.000000e+00 : f32
    %962 = vector.shape_cast %961 : vector<1x8x1xi1> to vector<1x8x1xi1>
    %963 = vector.broadcast %962 : vector<1x8x1xi1> to vector<8x8x16xi1>
    %964 = vector.broadcast %cst_374 : f32 to vector<8x8x16xf32>
    %965 = arith.select %963, %952, %964 : vector<8x8x16xi1>, vector<8x8x16xf32>
    %966 = arith.addf %947, %965 : vector<8x8x16xf32>
    %c6_i32_375 = arith.constant 6 : i32
    %967 = tpu.dynamic_rotate %904 by %c6_i32_375 dim 1 : vector<8x8x16xf32>, i32 -> vector<8x8x16xf32>
    %c24_376 = arith.constant 24 : index
    %c0_377 = arith.constant 0 : index
    %968 = vector.load %arg9[%c24_376, %c0_377] : memref<25x16xf32, #tpu.memory_space<vmem>>, vector<1x16xf32>
    %969 = vector.shape_cast %968 : vector<1x16xf32> to vector<1x1x16xf32>
    %970 = vector.broadcast %969 : vector<1x1x16xf32> to vector<8x8x16xf32>
    %971 = arith.mulf %967, %970 : vector<8x8x16xf32>
    %c2_i32_378 = arith.constant 2 : i32
    %972 = vector.broadcast %c2_i32_378 : i32 to vector<1x8x1xi32>
    %973 = arith.addi %574, %972 : vector<1x8x1xi32>
    %c0_i32_379 = arith.constant 0 : i32
    %974 = vector.broadcast %c0_i32_379 : i32 to vector<1x8x1xi32>
    %975 = arith.cmpi sge, %973, %974 : vector<1x8x1xi32>
    %c2_i32_380 = arith.constant 2 : i32
    %976 = vector.broadcast %c2_i32_380 : i32 to vector<1x8x1xi32>
    %977 = arith.addi %574, %976 : vector<1x8x1xi32>
    %c8_i32_381 = arith.constant 8 : i32
    %978 = vector.broadcast %c8_i32_381 : i32 to vector<1x8x1xi32>
    %979 = arith.cmpi slt, %977, %978 : vector<1x8x1xi32>
    %980 = arith.andi %975, %979 : vector<1x8x1xi1>
    %cst_382 = arith.constant 0.000000e+00 : f32
    %981 = vector.shape_cast %980 : vector<1x8x1xi1> to vector<1x8x1xi1>
    %982 = vector.broadcast %981 : vector<1x8x1xi1> to vector<8x8x16xi1>
    %983 = vector.broadcast %cst_382 : f32 to vector<8x8x16xf32>
    %984 = arith.select %982, %971, %983 : vector<8x8x16xi1>, vector<8x8x16xf32>
    %985 = arith.addf %966, %984 : vector<8x8x16xf32>
    %986 = vector.shape_cast %985 : vector<8x8x16xf32> to vector<64x16xf32>
    %c0_383 = arith.constant 0 : index
    %c0_384 = arith.constant 0 : index
    %987 = vector.load %arg10[%c0_383, %c0_384] : memref<16x8xf32, #tpu.memory_space<vmem>>, vector<16x8xf32>
    %cst_385 = arith.constant dense<0.000000e+00> : vector<64x8xf32>
    %988 = tpu.matmul %986, %987, %cst_385 {dimension_numbers = #tpu.dot_dimension_numbers<[1], [0], [0], [1], [0, 0, 1, 1], [], []>} : vector<64x16xf32>, vector<16x8xf32>, vector<64x8xf32> -> vector<64x8xf32>
    %c0_386 = arith.constant 0 : index
    %c0_387 = arith.constant 0 : index
    %989 = vector.load %arg11[%c0_386, %c0_387] : memref<1x8xf32, #tpu.memory_space<vmem>>, vector<1x8xf32>
    %990 = vector.broadcast %989 : vector<1x8xf32> to vector<64x8xf32>
    %991 = arith.addf %988, %990 : vector<64x8xf32>
    %cst_388 = arith.constant 0.000000e+00 : f32
    %992 = vector.broadcast %cst_388 : f32 to vector<64x8xf32>
    %993 = arith.maximumf %991, %992 : vector<64x8xf32>
    %994 = vector.shape_cast %993 : vector<64x8xf32> to vector<8x8x8xf32>
    %995 = arith.addf %571, %994 : vector<8x8x8xf32>
    %996 = vector.extract_strided_slice %995 {offsets = [0, 0, 0], sizes = [1, 8, 8], strides = [1, 1, 1]} : vector<8x8x8xf32> to vector<1x8x8xf32>
    %997 = vector.extract_strided_slice %995 {offsets = [0, 0, 0], sizes = [7, 8, 8], strides = [1, 1, 1]} : vector<8x8x8xf32> to vector<7x8x8xf32>
    %998 = tpu.concatenate %996, %997 in 0 : vector<1x8x8xf32>, vector<7x8x8xf32> -> vector<8x8x8xf32>
    %999 = vector.extract_strided_slice %995 {offsets = [1, 0, 0], sizes = [7, 8, 8], strides = [1, 1, 1]} : vector<8x8x8xf32> to vector<7x8x8xf32>
    %1000 = vector.extract_strided_slice %995 {offsets = [7, 0, 0], sizes = [1, 8, 8], strides = [1, 1, 1]} : vector<8x8x8xf32> to vector<1x8x8xf32>
    %1001 = tpu.concatenate %999, %1000 in 0 : vector<7x8x8xf32>, vector<1x8x8xf32> -> vector<8x8x8xf32>
    %cst_389 = arith.constant 2.500000e-01 : f32
    %1002 = vector.broadcast %cst_389 : f32 to vector<8x8x8xf32>
    %1003 = arith.mulf %1002, %998 : vector<8x8x8xf32>
    %cst_390 = arith.constant 7.500000e-01 : f32
    %1004 = vector.broadcast %cst_390 : f32 to vector<8x8x8xf32>
    %1005 = arith.mulf %1004, %995 : vector<8x8x8xf32>
    %1006 = arith.addf %1003, %1005 : vector<8x8x8xf32>
    %cst_391 = arith.constant 7.500000e-01 : f32
    %1007 = vector.broadcast %cst_391 : f32 to vector<8x8x8xf32>
    %1008 = arith.mulf %1007, %995 : vector<8x8x8xf32>
    %cst_392 = arith.constant 2.500000e-01 : f32
    %1009 = vector.broadcast %cst_392 : f32 to vector<8x8x8xf32>
    %1010 = arith.mulf %1009, %1001 : vector<8x8x8xf32>
    %1011 = arith.addf %1008, %1010 : vector<8x8x8xf32>
    %1012 = tpu.iota {dimensions = array<i32: 1>} : vector<1x8x1xi32>
    %c0_i32_393 = arith.constant 0 : i32
    %1013 = vector.broadcast %c0_i32_393 : i32 to vector<1x8x1xi32>
    %1014 = arith.cmpi eq, %1012, %1013 : vector<1x8x1xi32>
    %c7_i32_394 = arith.constant 7 : i32
    %1015 = vector.broadcast %c7_i32_394 : i32 to vector<1x8x1xi32>
    %1016 = arith.cmpi eq, %1012, %1015 : vector<1x8x1xi32>
    %c1_i32_395 = arith.constant 1 : i32
    %1017 = tpu.dynamic_rotate %1006 by %c1_i32_395 dim 1 : vector<8x8x8xf32>, i32 -> vector<8x8x8xf32>
    %1018 = vector.shape_cast %1014 : vector<1x8x1xi1> to vector<1x8x1xi1>
    %1019 = vector.broadcast %1018 : vector<1x8x1xi1> to vector<8x8x8xi1>
    %1020 = arith.select %1019, %1006, %1017 : vector<8x8x8xi1>, vector<8x8x8xf32>
    %c7_i32_396 = arith.constant 7 : i32
    %1021 = tpu.dynamic_rotate %1006 by %c7_i32_396 dim 1 : vector<8x8x8xf32>, i32 -> vector<8x8x8xf32>
    %1022 = vector.shape_cast %1016 : vector<1x8x1xi1> to vector<1x8x1xi1>
    %1023 = vector.broadcast %1022 : vector<1x8x1xi1> to vector<8x8x8xi1>
    %1024 = arith.select %1023, %1006, %1021 : vector<8x8x8xi1>, vector<8x8x8xf32>
    %cst_397 = arith.constant 2.500000e-01 : f32
    %1025 = vector.broadcast %cst_397 : f32 to vector<8x8x8xf32>
    %1026 = arith.mulf %1025, %1020 : vector<8x8x8xf32>
    %cst_398 = arith.constant 7.500000e-01 : f32
    %1027 = vector.broadcast %cst_398 : f32 to vector<8x8x8xf32>
    %1028 = arith.mulf %1027, %1006 : vector<8x8x8xf32>
    %1029 = arith.addf %1026, %1028 : vector<8x8x8xf32>
    %cst_399 = arith.constant 7.500000e-01 : f32
    %1030 = vector.broadcast %cst_399 : f32 to vector<8x8x8xf32>
    %1031 = arith.mulf %1030, %1006 : vector<8x8x8xf32>
    %cst_400 = arith.constant 2.500000e-01 : f32
    %1032 = vector.broadcast %cst_400 : f32 to vector<8x8x8xf32>
    %1033 = arith.mulf %1032, %1024 : vector<8x8x8xf32>
    %1034 = arith.addf %1031, %1033 : vector<8x8x8xf32>
    %c1_i32_401 = arith.constant 1 : i32
    %1035 = tpu.dynamic_rotate %1011 by %c1_i32_401 dim 1 : vector<8x8x8xf32>, i32 -> vector<8x8x8xf32>
    %1036 = vector.shape_cast %1014 : vector<1x8x1xi1> to vector<1x8x1xi1>
    %1037 = vector.broadcast %1036 : vector<1x8x1xi1> to vector<8x8x8xi1>
    %1038 = arith.select %1037, %1011, %1035 : vector<8x8x8xi1>, vector<8x8x8xf32>
    %c7_i32_402 = arith.constant 7 : i32
    %1039 = tpu.dynamic_rotate %1011 by %c7_i32_402 dim 1 : vector<8x8x8xf32>, i32 -> vector<8x8x8xf32>
    %1040 = vector.shape_cast %1016 : vector<1x8x1xi1> to vector<1x8x1xi1>
    %1041 = vector.broadcast %1040 : vector<1x8x1xi1> to vector<8x8x8xi1>
    %1042 = arith.select %1041, %1011, %1039 : vector<8x8x8xi1>, vector<8x8x8xf32>
    %cst_403 = arith.constant 2.500000e-01 : f32
    %1043 = vector.broadcast %cst_403 : f32 to vector<8x8x8xf32>
    %1044 = arith.mulf %1043, %1038 : vector<8x8x8xf32>
    %cst_404 = arith.constant 7.500000e-01 : f32
    %1045 = vector.broadcast %cst_404 : f32 to vector<8x8x8xf32>
    %1046 = arith.mulf %1045, %1011 : vector<8x8x8xf32>
    %1047 = arith.addf %1044, %1046 : vector<8x8x8xf32>
    %cst_405 = arith.constant 7.500000e-01 : f32
    %1048 = vector.broadcast %cst_405 : f32 to vector<8x8x8xf32>
    %1049 = arith.mulf %1048, %1011 : vector<8x8x8xf32>
    %cst_406 = arith.constant 2.500000e-01 : f32
    %1050 = vector.broadcast %cst_406 : f32 to vector<8x8x8xf32>
    %1051 = arith.mulf %1050, %1042 : vector<8x8x8xf32>
    %1052 = arith.addf %1049, %1051 : vector<8x8x8xf32>
    %1053 = vector.shape_cast %1029 : vector<8x8x8xf32> to vector<8x8x1x8xf32>
    %1054 = vector.shape_cast %1034 : vector<8x8x8xf32> to vector<8x8x1x8xf32>
    %1055 = tpu.concatenate %1053, %1054 in 2 : vector<8x8x1x8xf32>, vector<8x8x1x8xf32> -> vector<8x8x2x8xf32>
    %1056 = vector.shape_cast %1055 : vector<8x8x2x8xf32> to vector<8x16x8xf32>
    %1057 = vector.shape_cast %1047 : vector<8x8x8xf32> to vector<8x8x1x8xf32>
    %1058 = vector.shape_cast %1052 : vector<8x8x8xf32> to vector<8x8x1x8xf32>
    %1059 = tpu.concatenate %1057, %1058 in 2 : vector<8x8x1x8xf32>, vector<8x8x1x8xf32> -> vector<8x8x2x8xf32>
    %1060 = vector.shape_cast %1059 : vector<8x8x2x8xf32> to vector<8x16x8xf32>
    %1061 = vector.shape_cast %1056 : vector<8x16x8xf32> to vector<8x1x16x8xf32>
    %1062 = vector.shape_cast %1060 : vector<8x16x8xf32> to vector<8x1x16x8xf32>
    %1063 = tpu.concatenate %1061, %1062 in 1 : vector<8x1x16x8xf32>, vector<8x1x16x8xf32> -> vector<8x2x16x8xf32>
    %1064 = vector.shape_cast %1063 : vector<8x2x16x8xf32> to vector<16x16x8xf32>
    %c0_407 = arith.constant 0 : index
    %c0_408 = arith.constant 0 : index
    %c0_409 = arith.constant 0 : index
    %c0_410 = arith.constant 0 : index
    %1065 = vector.load %arg12[%c0_407, %c0_408, %c0_409, %c0_410] : memref<1x16x16x16xf32, #tpu.memory_space<vmem>>, vector<1x16x16x8xf32>
    %1066 = vector.shape_cast %1065 : vector<1x16x16x8xf32> to vector<16x16x8xf32>
    %1067 = vector.shape_cast %424 : vector<16x16x8xf32> to vector<1x16x16x8xf32>
    tpu.vector_store %arg12[%c0_407, %c0_408, %c0_409, %c0_410], %1067 {strides = array<i32>} : memref<1x16x16x16xf32, #tpu.memory_space<vmem>>, vector<1x16x16x8xf32>,
    %c0_411 = arith.constant 0 : index
    %c0_412 = arith.constant 0 : index
    %c0_413 = arith.constant 0 : index
    %c8_414 = arith.constant 8 : index
    %1068 = vector.load %arg12[%c0_411, %c0_412, %c0_413, %c8_414] : memref<1x16x16x16xf32, #tpu.memory_space<vmem>>, vector<1x16x16x8xf32>
    %1069 = vector.shape_cast %1068 : vector<1x16x16x8xf32> to vector<16x16x8xf32>
    %1070 = vector.shape_cast %1064 : vector<16x16x8xf32> to vector<1x16x16x8xf32>
    tpu.vector_store %arg12[%c0_411, %c0_412, %c0_413, %c8_414], %1070 {strides = array<i32>} : memref<1x16x16x16xf32, #tpu.memory_space<vmem>>, vector<1x16x16x8xf32>,
    return
  }
  func.func @transform_0(%arg0: i32) -> (i32, i32, i32, i32) {
    %c0_i32 = arith.constant 0 : i32
    %c0_i32_0 = arith.constant 0 : i32
    %c0_i32_1 = arith.constant 0 : i32
    %c0_i32_2 = arith.constant 0 : i32
    return %arg0, %c0_i32, %c0_i32_0, %c0_i32_1 : i32, i32, i32, i32
  }
  func.func @transform_1(%arg0: i32) -> (i32, i32, i32, i32) {
    %c0_i32 = arith.constant 0 : i32
    %c0_i32_0 = arith.constant 0 : i32
    %c0_i32_1 = arith.constant 0 : i32
    %c0_i32_2 = arith.constant 0 : i32
    return %arg0, %c0_i32, %c0_i32_0, %c0_i32_1 : i32, i32, i32, i32
  }
  func.func @transform_2(%arg0: i32) -> (i32, i32) {
    %c0_i32 = arith.constant 0 : i32
    %c0_i32_0 = arith.constant 0 : i32
    %c0_i32_1 = arith.constant 0 : i32
    return %c0_i32, %c0_i32_0 : i32, i32
  }
  func.func @transform_3(%arg0: i32) -> (i32, i32) {
    %c0_i32 = arith.constant 0 : i32
    %c0_i32_0 = arith.constant 0 : i32
    %c0_i32_1 = arith.constant 0 : i32
    return %c0_i32, %c0_i32_0 : i32, i32
  }
  func.func @transform_4(%arg0: i32) -> (i32, i32) {
    %c0_i32 = arith.constant 0 : i32
    %c0_i32_0 = arith.constant 0 : i32
    %c0_i32_1 = arith.constant 0 : i32
    return %c0_i32, %c0_i32_0 : i32, i32
  }
  func.func @transform_5(%arg0: i32) -> (i32, i32) {
    %c0_i32 = arith.constant 0 : i32
    %c0_i32_0 = arith.constant 0 : i32
    %c0_i32_1 = arith.constant 0 : i32
    return %c0_i32, %c0_i32_0 : i32, i32
  }
  func.func @transform_6(%arg0: i32) -> (i32, i32) {
    %c0_i32 = arith.constant 0 : i32
    %c0_i32_0 = arith.constant 0 : i32
    %c0_i32_1 = arith.constant 0 : i32
    return %c0_i32, %c0_i32_0 : i32, i32
  }
  func.func @transform_7(%arg0: i32) -> (i32, i32) {
    %c0_i32 = arith.constant 0 : i32
    %c0_i32_0 = arith.constant 0 : i32
    %c0_i32_1 = arith.constant 0 : i32
    return %c0_i32, %c0_i32_0 : i32, i32
  }
  func.func @transform_8(%arg0: i32) -> (i32, i32) {
    %c0_i32 = arith.constant 0 : i32
    %c0_i32_0 = arith.constant 0 : i32
    %c0_i32_1 = arith.constant 0 : i32
    return %c0_i32, %c0_i32_0 : i32, i32
  }
  func.func @transform_9(%arg0: i32) -> (i32, i32) {
    %c0_i32 = arith.constant 0 : i32
    %c0_i32_0 = arith.constant 0 : i32
    %c0_i32_1 = arith.constant 0 : i32
    return %c0_i32, %c0_i32_0 : i32, i32
  }
  func.func @transform_10(%arg0: i32) -> (i32, i32) {
    %c0_i32 = arith.constant 0 : i32
    %c0_i32_0 = arith.constant 0 : i32
    %c0_i32_1 = arith.constant 0 : i32
    return %c0_i32, %c0_i32_0 : i32, i32
  }
  func.func @transform_11(%arg0: i32) -> (i32, i32, i32, i32) {
    %c0_i32 = arith.constant 0 : i32
    %c0_i32_0 = arith.constant 0 : i32
    %c0_i32_1 = arith.constant 0 : i32
    %c0_i32_2 = arith.constant 0 : i32
    return %arg0, %c0_i32, %c0_i32_0, %c0_i32_1 : i32, i32, i32, i32
  }
}

</mosaic_0001>

<bundles_post_ra>
// kernel: tpu_custom_call.1
= control target key start
LH: loop header
LB: loop body
LE: loop exit
PB: predicated region body
PF: predicated region fallthrough
CT: control target
= control target key end

     0   :  { %s16568_s0 = inlined_call_operand.hbm [shape: f32[2,16,16,16], index: 0, kind: input, shape index: {}]   ;;  %s16569_s1 = inlined_call_operand.hbm [shape: f32[2,8,8,16], index: 1, kind: input, shape index: {}]   ;;  %s16570_s2 = inlined_call_operand.hbm [shape: f32[25,16], index: 2, kind: input, shape index: {}]   ;;  %s16571_s3 = inlined_call_operand.hbm [shape: f32[16,8], index: 3, kind: input, shape index: {}]   ;;  %s16572_s4 = inlined_call_operand.hbm [shape: f32[1,8], index: 4, kind: input, shape index: {}]   ;;  %s16573_s5 = inlined_call_operand.hbm [shape: f32[9,16], index: 5, kind: input, shape index: {}]   ;;  %s16574_s6 = inlined_call_operand.hbm [shape: f32[16,8], index: 6, kind: input, shape index: {}]   ;;  %s16575_s7 = inlined_call_operand.hbm [shape: f32[1,8], index: 7, kind: input, shape index: {}]   ;;  %s16576_s8 = inlined_call_operand.hbm [shape: f32[25,16], index: 8, kind: input, shape index: {}]   ;;  %s16577_s9 = inlined_call_operand.hbm [shape: f32[16,8], index: 9, kind: input, shape index: {}]   ;;  %s16578_s10 = inlined_call_operand.hbm [shape: f32[1,8], index: 10, kind: input, shape index: {}]   ;;  %s16579_s11 = inlined_call_operand.hbm [shape: f32[2,16,16,16], index: 11, kind: output, shape index: {}]  }
   0x1   :  { %16974 = sst [smem:[#allocation110_spill]] %s16568_s0 }
   0x2   :  { %16975 = sst [smem:[#allocation111_spill]] %s16569_s1 }
   0x3   :  { %16976 = sst [smem:[#allocation112_spill]] %s16570_s2 }
   0x4   :  { %16977 = sst [smem:[#allocation113_spill]] %s16571_s3 }
   0x5   :  { %16978 = sst [smem:[#allocation114_spill]] %s16572_s4 }
   0x6   :  { %16979 = sst [smem:[#allocation115_spill]] %s16573_s5 }
   0x7   :  { %16980 = sst [smem:[#allocation116_spill]] %s16574_s6 }
   0x8   :  { %16981 = sst [smem:[#allocation117_spill]] %s16575_s7 }
   0x9   :  { %16982 = sst [smem:[#allocation118_spill]] %s16579_s11 }
   0xa   :  { %16 = vsyncpa [#allocation3], 0 }
   0xb   :  { %18 = vsyncpa [#allocation3 + $0x1], 0 }
   0xc   :  { %19 = vsyncpa [#allocation6], 0 }
   0xd   :  { %21 = vsyncpa [#allocation6 + $0x1], 0 }
   0xe   :  { %22 = vsyncpa [#allocation9], 0 }
   0xf   :  { %23 = vsyncpa [#allocation12], 0 }
  0x10   :  { %24 = vsyncpa [#allocation15], 0 }
  0x11   :  { %25 = vsyncpa [#allocation18], 0 }
  0x12   :  { %26 = vsyncpa [#allocation4], 0 }
  0x13   :  { %28 = vsyncpa [#allocation4 + $0x1], 0  ;;  %s9563_s17 = smov 0   ;;  %s9565_s18 = smov 0  }
  0x14   :  { %s9567_s19 = smov 0   ;;  %s9569_s20 = smov 0  }
  0x15 LB: > { %s9485_s21 = smov [#allocation7]   ;;  %s9584_s23 = sadd.s32 4294967295, %s9483_s20   ;;  %s9483_s20 = sphi %s9569_s20, %s17734_s20   ;;  %s9479_s19 = sphi %s9567_s19, %s17733_s19   ;;  %s9475_s18 = sphi %s9565_s18, %s17732_s18   ;;  %s9471_s17 = sphi %s9563_s17, %s17731_s17  }
  0x16   : > { %s318_s22 = sshll.u32 %s9485_s21, 4  ;;  %p8538_p0 = scmp.ge.s32.totalorder %s9483_s20, 1  ;;  %s9589_s22 = int_to_ptr.vmem [resolvable:$true] %s318_s22 }
  0x17   : > { %p16583_p1 = scmp.eq.s32.totalorder %s9584_s23, 0  ;;  %p306_p2 = scmp.lt.s32.totalorder %s9483_s20, 3 }
  0x18   : > { %s9486_s25 = smov [#allocation8]   ;;  %s9487_s28 = smov [#allocation11]  }
  0x19   : > { %p9591_p3 = pnand %p8538_p0, %p306_p2  ;;  %s331_s26 = sshll.u32 %s9486_s25, 4  ;;  %s9604_s26 = int_to_ptr.vmem [resolvable:$true] %s331_s26 }
  0x1a   : > { %s355_s29 = sshll.u32 %s9487_s28, 4  ;;  %s16986_s2 = sld [smem:[#allocation112_spill]]  ;;  %s9606_s29 = int_to_ptr.vmem [resolvable:$true] %s355_s29 }
  0x1b   : > { %s16983_s24 = scalar_select %p9591_p3, 1, 0 }
  0x1c   : > { %p8880_p5 = pneg %p9591_p3 }
  0x1d   : > { %16984 = sst [smem:[#allocation29_spill]] %s16983_s24 }
  0x1e   : > { %p9600_p6 = pnand %p8880_p5, %p16583_p1 }
  0x20   : > { %s9081_s13 = scalar_lea.hbm %s16986_s2, 512  ;;  %p9616_p8 = pneg %p9600_p6 }
  0x21   : > { %p9082_p7 = scmp.ne.s32.totalorder %s16986_s2, %s9081_s13  ;;  %p9088_p11 = scmp.lt.u32.totalorder %s9081_s13, %s16986_s2 }
  0x23   : > { %p9084_p9 = pnand %p9616_p8, %p9082_p7 }
  0x25   : > { %p9085_p10 = pneg %p9084_p9 }
  0x27   : > { %p9090_p12 = pnand %p9088_p11, %p9085_p10 }
  0x29   : > { %9093 = shalt.err (!%p9090_p12)
}
  0x2a   : > { %s9094_s28 = scalar_lea.vmem %s9589_s22, 512  ;;  %p9102_p5 = scmp.lt.s32.totalorder %s9589_s22, %s9589_s22 }
  0x2b   : > { %p9095_p13 = scmp.ne.s32.totalorder %s9589_s22, %s9094_s28  ;;  %p9103_p4 = scmp.lt.s32.totalorder %s9094_s28, %s9094_s28 }
  0x2d   : > { %p9097_p0 = pnand %p9095_p13, %p9616_p8  ;;  %p9104_p7 = por %p9103_p4, %p9102_p5 }
  0x2f   : > { %p9098_p2 = pneg %p9097_p0 }
  0x31   : > { %p9105_p9 = pnand %p9104_p7, %p9098_p2 }
  0x33   : > { %9108 = shalt.err (!%p9105_p9)
}
  0x34   : > { %s16585_s30 = smov 128   ;;  %s16587_s12 = smov 8  }
  0x35   : > { %8883 = dma.hbm_to_vmem [thread:$0]  (!%p9600_p6), %s16986_s2, 512, %s9589_s22, [#allocation6], %s16585_s30, %s16585_s30, %s16587_s12  }
  0x36   : > { %s16988_s3 = sld [smem:[#allocation113_spill]] }
  0x3c   : > { %s9109_s25 = scalar_lea.hbm %s16988_s3, 256 }
  0x3d   : > { %p9110_p4 = scmp.ne.s32.totalorder %s16988_s3, %s9109_s25  ;;  %p9116_p12 = scmp.lt.u32.totalorder %s9109_s25, %s16988_s3 }
  0x3f   : > { %p9112_p10 = pnand %p9110_p4, %p9616_p8 }
  0x41   : > { %p9113_p11 = pneg %p9112_p10 }
  0x43   : > { %p9118_p13 = pnand %p9116_p12, %p9113_p11 }
  0x45   : > { %9121 = shalt.err (!%p9118_p13)
}
  0x46   : > { %s9122_s22 = scalar_lea.vmem %s9604_s26, 256  ;;  %p9130_p7 = scmp.lt.s32.totalorder %s9604_s26, %s9604_s26 }
  0x47   : > { %p9123_p0 = scmp.ne.s32.totalorder %s9604_s26, %s9122_s22  ;;  %p9131_p9 = scmp.lt.s32.totalorder %s9122_s22, %s9122_s22 }
  0x49   : > { %p9125_p2 = pnand %p9123_p0, %p9616_p8  ;;  %p9132_p4 = por %p9131_p9, %p9130_p7 }
  0x4b   : > { %p9126_p5 = pneg %p9125_p2 }
  0x4d   : > { %p9133_p10 = pnand %p9132_p4, %p9126_p5 }
  0x4f   : > { %9136 = shalt.err (!%p9133_p10)
}
  0x50   : > { %8886 = dma.hbm_to_vmem [thread:$0]  (!%p9600_p6), %s16988_s3, 256, %s9604_s26, [#allocation9], %s16585_s30, %s16585_s30, %s16587_s12  }
  0x51   : > { %s16989_s5 = sld [smem:[#allocation115_spill]] }
  0x57   : > { %s9137_s14 = scalar_lea.hbm %s16989_s5, 256 }
  0x58   : > { %p9138_p11 = scmp.ne.s32.totalorder %s16989_s5, %s9137_s14  ;;  %p9144_p0 = scmp.lt.u32.totalorder %s9137_s14, %s16989_s5 }
  0x5a   : > { %p9140_p12 = pnand %p9138_p11, %p9616_p8 }
  0x5c   : > { %p9141_p13 = pneg %p9140_p12 }
  0x5e   : > { %p9146_p2 = pnand %p9144_p0, %p9141_p13 }
  0x60   : > { %9149 = shalt.err (!%p9146_p2)
}
  0x61   : > { %s9150_s26 = scalar_lea.vmem %s9606_s29, 256  ;;  %p9158_p4 = scmp.lt.s32.totalorder %s9606_s29, %s9606_s29 }
  0x62   : > { %p9151_p5 = scmp.ne.s32.totalorder %s9606_s29, %s9150_s26  ;;  %p9159_p10 = scmp.lt.s32.totalorder %s9150_s26, %s9150_s26 }
  0x64   : > { %p9153_p7 = pnand %p9151_p5, %p9616_p8  ;;  %p9160_p11 = por %p9159_p10, %p9158_p4 }
  0x66   : > { %p9154_p9 = pneg %p9153_p7 }
  0x68   : > { %p9161_p12 = pnand %p9160_p11, %p9154_p9 }
  0x6a   : > { %9164 = shalt.err (!%p9161_p12)
}
  0x6b   : > { %8892 = dma.hbm_to_vmem [thread:$0]  (!%p9600_p6), %s16989_s5, 256, %s9606_s29, [#allocation12], %s16585_s30, %s16585_s30, %s16587_s12  }
  0x6c   : > { %s9490_s11 = smov [#allocation14]   ;;  %s9491_s13 = smov [#allocation17]  }
  0x6d   : > { %s382_s24 = sshll.u32 %s9490_s11, 4  ;;  %s405_s14 = sshll.u32 %s9491_s13, 4  ;;  %s383_s24 = int_to_ptr.vmem [resolvable:$true] %s382_s24  ;;  %s406_s14 = int_to_ptr.vmem [resolvable:$true] %s405_s14 }
  0x6e   : > { %s16990_s7 = sld [smem:[#allocation117_spill]] }
  0x74   : > { %s9165_s25 = scalar_lea.hbm %s16990_s7, 16 }
  0x75   : > { %p9166_p13 = scmp.ne.s32.totalorder %s16990_s7, %s9165_s25  ;;  %p9172_p5 = scmp.lt.u32.totalorder %s9165_s25, %s16990_s7 }
  0x77   : > { %p9168_p0 = pnand %p9166_p13, %p9616_p8 }
  0x79   : > { %p9169_p2 = pneg %p9168_p0 }
  0x7b   : > { %p9174_p7 = pnand %p9172_p5, %p9169_p2 }
  0x7d   : > { %9177 = shalt.err (!%p9174_p7)
}
  0x7e   : > { %s9178_s29 = scalar_lea.vmem %s383_s24, 16  ;;  %s9185_s1 = scalar_lea.vmem %s383_s24, 32 }
  0x7f   : > { %p9179_p9 = scmp.ne.s32.totalorder %s383_s24, %s9178_s29  ;;  %p9186_p11 = scmp.lt.s32.totalorder %s383_s24, %s383_s24 }
  0x80   : > { %p9187_p12 = scmp.lt.s32.totalorder %s9185_s1, %s9178_s29 }
  0x81   : > { %p9181_p4 = pnand %p9179_p9, %p9616_p8 }
  0x82   : > { %p9188_p1 = por %p9187_p12, %p9186_p11 }
  0x83   : > { %p9182_p10 = pneg %p9181_p4 }
  0x85   : > { %p9189_p3 = pnand %p9188_p1, %p9182_p10 }
  0x87   : > { %9192 = shalt.err (!%p9189_p3)
}
  0x88   : > { %8898 = dma.hbm_to_vmem [thread:$0]  (!%p9600_p6), %s16990_s7, 16, %s383_s24, [#allocation15]  }
  0x89   : > { %s9193_s21 = scalar_lea.hbm %s16577_s9, 256 }
  0x8a   : > { %p9194_p13 = scmp.ne.s32.totalorder %s16577_s9, %s9193_s21  ;;  %p9200_p3 = scmp.lt.u32.totalorder %s9193_s21, %s16577_s9 }
  0x8c   : > { %p9196_p0 = pnand %p9194_p13, %p9616_p8 }
  0x8e   : > { %p9197_p1 = pneg %p9196_p0 }
  0x90   : > { %p9202_p2 = pnand %p9200_p3, %p9197_p1 }
  0x92   : > { %9205 = shalt.err (!%p9202_p2)
}
  0x93   : > { %s9206_s29 = scalar_lea.vmem %s406_s14, 256  ;;  %p9214_p4 = scmp.lt.s32.totalorder %s406_s14, %s406_s14 }
  0x94   : > { %p9207_p5 = scmp.ne.s32.totalorder %s406_s14, %s9206_s29  ;;  %p9215_p10 = scmp.lt.s32.totalorder %s9206_s29, %s9206_s29 }
  0x96   : > { %p9209_p7 = pnand %p9207_p5, %p9616_p8  ;;  %p9216_p11 = por %p9215_p10, %p9214_p4 }
  0x98   : > { %p9210_p9 = pneg %p9209_p7 }
  0x9a   : > { %p9217_p12 = pnand %p9216_p11, %p9210_p9 }
  0x9c   : > { %9220 = shalt.err (!%p9217_p12)
}
  0x9d   : > { %8904 = dma.hbm_to_vmem [thread:$0]  (!%p9600_p6), %s16577_s9, 256, %s406_s14, [#allocation18], %s16585_s30, %s16585_s30, %s16587_s12  }
  0x9e   : > { %s9492_s11 = smov [#allocation10]   ;;  %s9493_s2 = smov [#allocation13]  }
  0x9f   : > { %s345_s13 = sshll.u32 %s9492_s11, 4  ;;  %s368_s15 = sshll.u32 %s9493_s2, 4  ;;  %s346_s13 = int_to_ptr.vmem [resolvable:$true] %s345_s13  ;;  %s369_s15 = int_to_ptr.vmem [resolvable:$true] %s368_s15 }
  0xa0   : > { %s16991_s4 = sld [smem:[#allocation114_spill]] }
  0xa6   : > { %s9221_s28 = scalar_lea.hbm %s16991_s4, 16 }
  0xa7   : > { %p9222_p13 = scmp.ne.s32.totalorder %s16991_s4, %s9221_s28  ;;  %p9228_p3 = scmp.lt.u32.totalorder %s9221_s28, %s16991_s4 }
  0xa9   : > { %p9224_p0 = pnand %p9222_p13, %p9616_p8 }
  0xab   : > { %p9225_p1 = pneg %p9224_p0 }
  0xad   : > { %p9230_p2 = pnand %p9228_p3, %p9225_p1 }
  0xaf   : > { %9233 = shalt.err (!%p9230_p2)
}
  0xb0   : > { %s9234_s14 = scalar_lea.vmem %s346_s13, 16  ;;  %s9241_s1 = scalar_lea.vmem %s346_s13, 32 }
  0xb1   : > { %p9235_p5 = scmp.ne.s32.totalorder %s346_s13, %s9234_s14  ;;  %p9242_p4 = scmp.lt.s32.totalorder %s346_s13, %s346_s13 }
  0xb2   : > { %p9243_p10 = scmp.lt.s32.totalorder %s9241_s1, %s9234_s14 }
  0xb3   : > { %p9237_p7 = pnand %p9235_p5, %p9616_p8 }
  0xb4   : > { %p9244_p11 = por %p9243_p10, %p9242_p4 }
  0xb5   : > { %p9238_p9 = pneg %p9237_p7 }
  0xb7   : > { %p9245_p12 = pnand %p9244_p11, %p9238_p9 }
  0xb9   : > { %9248 = shalt.err (!%p9245_p12)
}
  0xba   : > { %8889 = dma.hbm_to_vmem [thread:$0]  (!%p9600_p6), %s16991_s4, 16, %s346_s13, [#allocation9]  }
  0xbb   : > { %s16992_s6 = sld [smem:[#allocation116_spill]] }
  0xc1   : > { %s9249_s28 = scalar_lea.hbm %s16992_s6, 256 }
  0xc2   : > { %p9250_p13 = scmp.ne.s32.totalorder %s16992_s6, %s9249_s28  ;;  %p9256_p3 = scmp.lt.u32.totalorder %s9249_s28, %s16992_s6 }
  0xc4   : > { %p9252_p0 = pnand %p9250_p13, %p9616_p8 }
  0xc6   : > { %p9253_p1 = pneg %p9252_p0 }
  0xc8   : > { %p9258_p2 = pnand %p9256_p3, %p9253_p1 }
  0xca   : > { %9261 = shalt.err (!%p9258_p2)
}
  0xcb   : > { %s9262_s14 = scalar_lea.vmem %s369_s15, 256  ;;  %p9270_p4 = scmp.lt.s32.totalorder %s369_s15, %s369_s15 }
  0xcc   : > { %p9263_p5 = scmp.ne.s32.totalorder %s369_s15, %s9262_s14  ;;  %p9271_p10 = scmp.lt.s32.totalorder %s9262_s14, %s9262_s14 }
  0xce   : > { %p9265_p7 = pnand %p9263_p5, %p9616_p8  ;;  %p9272_p11 = por %p9271_p10, %p9270_p4 }
  0xd0   : > { %p9266_p9 = pneg %p9265_p7 }
  0xd2   : > { %p9273_p12 = pnand %p9272_p11, %p9266_p9 }
  0xd4   : > { %9276 = shalt.err (!%p9273_p12)
}
  0xd5   : > { %8895 = dma.hbm_to_vmem [thread:$0]  (!%p9600_p6), %s16992_s6, 256, %s369_s15, [#allocation12], %s16585_s30, %s16585_s30, %s16587_s12  }
  0xd6   : > { %s9494_s11 = smov [#allocation16]   ;;  %s9495_s21 = smov [#allocation19]  }
  0xd7   : > { %s392_s2 = sshll.u32 %s9494_s11, 4  ;;  %s419_s25 = sshll.u32 %s9495_s21, 4  ;;  %s393_s2 = int_to_ptr.vmem [resolvable:$true] %s392_s2  ;;  %s420_s25 = int_to_ptr.vmem [resolvable:$true] %s419_s25 }
  0xd8   : > { %s9277_s22 = scalar_lea.hbm %s16576_s8, 512 }
  0xd9   : > { %p9278_p13 = scmp.ne.s32.totalorder %s16576_s8, %s9277_s22  ;;  %p9284_p3 = scmp.lt.u32.totalorder %s9277_s22, %s16576_s8 }
  0xdb   : > { %p9280_p0 = pnand %p9278_p13, %p9616_p8 }
  0xdd   : > { %p9281_p1 = pneg %p9280_p0 }
  0xdf   : > { %p9286_p2 = pnand %p9284_p3, %p9281_p1 }
  0xe1   : > { %9289 = shalt.err (!%p9286_p2)
}
  0xe2   : > { %s9290_s15 = scalar_lea.vmem %s393_s2, 512  ;;  %p9298_p4 = scmp.lt.s32.totalorder %s393_s2, %s393_s2 }
  0xe3   : > { %p9291_p5 = scmp.ne.s32.totalorder %s393_s2, %s9290_s15  ;;  %p9299_p10 = scmp.lt.s32.totalorder %s9290_s15, %s9290_s15 }
  0xe5   : > { %p9293_p7 = pnand %p9291_p5, %p9616_p8  ;;  %p9300_p11 = por %p9299_p10, %p9298_p4 }
  0xe7   : > { %p9294_p9 = pneg %p9293_p7 }
  0xe9   : > { %p9301_p12 = pnand %p9300_p11, %p9294_p9 }
  0xeb   : > { %9304 = shalt.err (!%p9301_p12)
}
  0xec   : > { %8901 = dma.hbm_to_vmem [thread:$0]  (!%p9600_p6), %s16576_s8, 512, %s393_s2, [#allocation15], %s16585_s30, %s16585_s30, %s16587_s12  }
  0xed   : > { %s9305_s26 = scalar_lea.hbm %s16578_s10, 16 }
  0xee   : > { %p9306_p13 = scmp.ne.s32.totalorder %s16578_s10, %s9305_s26  ;;  %p9312_p3 = scmp.lt.u32.totalorder %s9305_s26, %s16578_s10 }
  0xf0   : > { %p9308_p0 = pnand %p9306_p13, %p9616_p8 }
  0xf2   : > { %p9309_p1 = pneg %p9308_p0 }
  0xf4   : > { %p9314_p2 = pnand %p9312_p3, %p9309_p1 }
  0xf6   : > { %9317 = shalt.err (!%p9314_p2)
}
  0xf7   : > { %s9318_s13 = scalar_lea.vmem %s420_s25, 16  ;;  %s9325_s2 = scalar_lea.vmem %s420_s25, 32 }
  0xf8   : > { %p9319_p5 = scmp.ne.s32.totalorder %s420_s25, %s9318_s13  ;;  %p9326_p4 = scmp.lt.s32.totalorder %s420_s25, %s420_s25 }
  0xf9   : > { %p9327_p10 = scmp.lt.s32.totalorder %s9325_s2, %s9318_s13 }
  0xfa   : > { %p9321_p7 = pnand %p9319_p5, %p9616_p8 }
  0xfb   : > { %p9328_p11 = por %p9327_p10, %p9326_p4 }
  0xfc   : > { %p9322_p9 = pneg %p9321_p7 }
  0xfe   : > { %p9329_p12 = pnand %p9328_p11, %p9322_p9 }
 0x100   : > { %9332 = shalt.err (!%p9329_p12)
}
 0x101   : > { %8907 = dma.hbm_to_vmem [thread:$0]  (!%p9600_p6), %s16578_s10, 16, %s420_s25, [#allocation18]  }
 0x102   : > { %s8537_s16 = sadd.s32 4294967294, %s9483_s20   ;;  %s9811_s27 = sadd.s32 1, %s9483_s20  }
 0x103   : > { %s41_s11 = sadd.s32 1, %s9479_s19  ;;  %s38_s21 = ssub.s32 %s9483_s20, %s9811_s27 }
 0x104   : > { %p48_p8 = scmp.ne.s32.totalorder %s9479_s19, %s9475_s18  ;;  %p39_p13 = scmp.eq.s32.totalorder %s38_s21, 0 }
 0x105   : > { %p49_p0 = scmp.eq.s32.totalorder %s9483_s20, 0  ;;  %p54_p1 = scmp.ne.s32.totalorder %s9475_s18, %s9471_s17 }
 0x106   : > { %p293_p3 = scmp.eq.s32.totalorder %s9584_s23, 1  ;;  %p16993_p5 = scmp.eq.s32.totalorder %s9584_s23, 0 }
 0x107   : > { %s9823_s28 = scalar_select %p39_p13, %s9479_s19, %s41_s11  }
 0x108   : > { %p50_p2 = por %p49_p0, %p48_p8  ;;  %p9827_p7 = por %p16993_p5, %p54_p1 }
 0x109   : > { %p9831_p6 = por %p293_p3, %p48_p8  ;;  %p299_p9 = scmp.eq.s32.totalorder %s8537_s16, 1 }
 0x10a   : > { %p8928_p4 = scmp.lt.s32.totalorder %s9483_s20, 2  ;;  %s9837_s22 = sand.u32 1, %s9479_s19  }
 0x10b   : > { %s16995_s26 = scalar_select %p9831_p6, 1, 0 }
 0x10c   : > { %p9839_p10 = por %p299_p9, %p54_p1  ;;  %s8549_s24 = sshll.u32 %s9837_s22, 8 }
 0x10d   : > { %s8683_s14 = sshll.u32 %s9483_s20, 12  ;;  %s16997_s0 = sld [smem:[#allocation110_spill]] }
 0x10e   : > { %s16996_s29 = scalar_select %p9839_p10, 1, 0 }
 0x10f   : > { %s434_s1 = scalar_lea.vmem [#allocation2], %s8549_s24  ;;  %p9850_p11 = pnand %p8928_p4, %p50_p2 }
 0x110   : > { %s441_s16 = sshll.u32 %s434_s1, 4  ;;  %s431_s30 = scalar_lea.sflag [#allocation3], %s9837_s22  ;;  %s9854_s16 = int_to_ptr.vmem [resolvable:$true] %s441_s16 }
 0x111   : > { %p9335_p8 = pneg %p9850_p11 }
 0x113   : > { %s9848_s15 = scalar_lea.hbm %s16997_s0, %s8683_s14  ;;  %s9338_s13 = scalar_lea.hbm %s16997_s0, 8192 }
 0x114   : > { %s9333_s12 = scalar_lea.hbm %s9848_s15, 4096  ;;  %p9339_p1 = scmp.lt.u32.totalorder %s9848_s15, %s16997_s0 }
 0x115   : > { %p9334_p12 = scmp.ne.s32.totalorder %s9848_s15, %s9333_s12  ;;  %p9340_p3 = scmp.lt.u32.totalorder %s9338_s13, %s9333_s12 }
 0x116   : > { %p9342_p5 = scmp.lt.u32.totalorder %s9333_s12, %s9848_s15 }
 0x117   : > { %p9336_p13 = pnand %p9335_p8, %p9334_p12  ;;  %p9341_p2 = por %p9340_p3, %p9339_p1 }
 0x119   : > { %p9337_p0 = pneg %p9336_p13  ;;  %p9343_p9 = por %p9342_p5, %p9341_p2 }
 0x11b   : > { %p9344_p4 = pnand %p9343_p9, %p9337_p0 }
 0x11d   : > { %9347 = shalt.err (!%p9344_p4)
}
 0x11e   : > { %s9348_s21 = scalar_lea.vmem %s9854_s16, 4096  ;;  %s9496_s24 = smov [#allocation2]  }
 0x11f   : > { %p9349_p12 = scmp.ne.s32.totalorder %s9854_s16, %s9348_s21  ;;  %s9353_s14 = sshll.u32 %s9496_s24, 4  ;;  %s9354_s14 = int_to_ptr.vmem [resolvable:$false] %s9353_s14 }
 0x120   : > { %s9355_s2 = scalar_lea.vmem %s9354_s14, 8192  ;;  %p9356_p6 = scmp.lt.s32.totalorder %s9854_s16, %s9354_s14 }
 0x121   : > { %p9351_p13 = pnand %p9349_p12, %p9335_p8  ;;  %p9357_p1 = scmp.lt.s32.totalorder %s9355_s2, %s9348_s21 }
 0x123   : > { %p9352_p10 = pneg %p9351_p13  ;;  %p9358_p3 = por %p9357_p1, %p9356_p6 }
 0x125   : > { %p9359_p2 = pnand %p9358_p3, %p9352_p10 }
 0x127   : > { %9362 = shalt.err (!%p9359_p2)
}
 0x128   : > { %s16999_s12 = smov 8   ;;  %s17000_s13 = smov 128  }
 0x129   : > { %8911 = dma.hbm_to_vmem [thread:$0]  (!%p9850_p11), %s9848_s15, 4096, %s9854_s16, %s431_s30, %s17000_s13, %s17000_s13, %s16999_s12  }
 0x12a   : > { %s8552_s1 = sshll.u32 %s9837_s22, 6  ;;  %s8684_s24 = sshll.u32 %s9483_s20, 10 }
 0x12b   : > { %s17001_s2 = sld [smem:[#allocation111_spill]]  ;;  %s455_s3 = scalar_lea.vmem [#allocation5], %s8552_s1 }
 0x12c   : > { %s462_s4 = sshll.u32 %s455_s3, 4  ;;  %s17002_s5 = sand.u32 1, %s9483_s20   ;;  %s9895_s4 = int_to_ptr.vmem [resolvable:$true] %s462_s4 }
 0x12d   : > { %s9899_s6 = scalar_lea.sflag [#allocation6], %s17002_s5 }
 0x131   : > { %s9893_s0 = scalar_lea.hbm %s17001_s2, %s8684_s24  ;;  %s9368_s15 = scalar_lea.hbm %s17001_s2, 2048 }
 0x132   : > { %s9363_s7 = scalar_lea.hbm %s9893_s0, 1024  ;;  %p9369_p5 = scmp.lt.u32.totalorder %s9893_s0, %s17001_s2 }
 0x133   : > { %p9364_p6 = scmp.ne.s32.totalorder %s9893_s0, %s9363_s7  ;;  %p9370_p9 = scmp.lt.u32.totalorder %s9368_s15, %s9363_s7 }
 0x134   : > { %p9372_p12 = scmp.lt.u32.totalorder %s9363_s7, %s9893_s0 }
 0x135   : > { %p9366_p10 = pnand %p9364_p6, %p9335_p8  ;;  %p9371_p4 = por %p9370_p9, %p9369_p5 }
 0x137   : > { %p9367_p0 = pneg %p9366_p10  ;;  %p9373_p13 = por %p9372_p12, %p9371_p4 }
 0x139   : > { %p9374_p1 = pnand %p9373_p13, %p9367_p0 }
 0x13b   : > { %9377 = shalt.err (!%p9374_p1)
}
 0x13c   : > { %s9378_s3 = scalar_lea.vmem %s9895_s4, 1024  ;;  %s9497_s5 = smov [#allocation5]  }
 0x13d   : > { %p9379_p3 = scmp.ne.s32.totalorder %s9895_s4, %s9378_s3  ;;  %s9383_s1 = sshll.u32 %s9497_s5, 4  ;;  %s9384_s1 = int_to_ptr.vmem [resolvable:$false] %s9383_s1 }
 0x13e   : > { %s9385_s21 = scalar_lea.vmem %s9384_s1, 2048  ;;  %p9386_p10 = scmp.lt.s32.totalorder %s9895_s4, %s9384_s1 }
 0x13f   : > { %p9381_p2 = pnand %p9379_p3, %p9335_p8  ;;  %p9387_p5 = scmp.lt.s32.totalorder %s9385_s21, %s9378_s3 }
 0x141   : > { %p9382_p6 = pneg %p9381_p2  ;;  %p9388_p9 = por %p9387_p5, %p9386_p10 }
 0x143   : > { %p9389_p4 = pnand %p9388_p9, %p9382_p6 }
 0x145   : > { %9392 = shalt.err (!%p9389_p4)
}
 0x146   : > { %8914 = dma.hbm_to_vmem [thread:$0]  (!%p9850_p11), %s9893_s0, 1024, %s9895_s4, %s9899_s6, %s17000_s13, %s17000_s13, %s16999_s12  }
 0x147   : > { %s17003_s7 = sld [smem:[#allocation29_spill]] }
 0x14d   : > { %p17004_p8 = scmp.ne.s32.totalorder %s17003_s7, 0 }
 0x14f   : > { %474 = sbr.rel (%p17004_p8) target bundleno = 1520 (0x5f0), region = 64 }
 0x156   : > { %s9931_s14 = sand.u32 1, %s9475_s18  }
 0x157   : > { %s8556_s30 = sshll.u32 %s9931_s14, 8  ;;  %s477_s22 = scalar_lea.sflag [#allocation3], %s9931_s14 }
 0x158   : > { %s9937_s11 = scalar_lea.vmem [#allocation2], %s8556_s30 }
 0x159   : > { %9438 = dma.done.wait (%p9827_p7), %s477_s22, 4096  }
 0x15a   : > { %9440 = vsyncadd (%p9827_p7), %s477_s22, 4294963200  ;;  %s485_s0 = sand.u32 1, %s9584_s23   ;;  %s8557_s4 = sshll.u32 %s9931_s14, 6 }
 0x15b   : > { %s486_s6 = scalar_lea.sflag [#allocation6], %s485_s0  ;;  %s9945_s12 = scalar_lea.vmem [#allocation5], %s8557_s4 }
 0x15c   : > { %9442 = dma.done.wait (%p9827_p7), %s486_s6, 1024  }
 0x15d   : > { %9444 = vsyncadd (%p9827_p7), %s486_s6, 4294966272  ;;  %p17005_p11 = scmp.eq.s32.totalorder %s9584_s23, 0 }
 0x15f   : > { %9446 = dma.done.wait (%p17005_p11), [#allocation6], 512   ;;  %p17006_p0 = pmov %p17005_p11 }
 0x161   : > { %9448 = vsyncadd (%p17006_p0), [#allocation6], 4294966784  ;;  %p17007_p12 = pmov %p17006_p0 }
 0x162   : > { %p17008_p13 = pmov %p17006_p0 }
 0x163   : > { %9450 = dma.done.wait (%p17007_p12), [#allocation9], 272  }
 0x164   : > { %9452 = vsyncadd (%p17008_p13), [#allocation9], 4294967024  ;;  %p17009_p1 = pmov %p17006_p0 }
 0x165   : > { %p17010_p3 = pmov %p17006_p0 }
 0x166   : > { %9454 = dma.done.wait (%p17009_p1), [#allocation12], 512  }
 0x167   : > { %9456 = vsyncadd (%p17010_p3), [#allocation12], 4294966784  ;;  %p17011_p7 = pmov %p17006_p0 }
 0x168   : > { %p17012_p2 = pmov %p17006_p0 }
 0x169   : > { %9458 = dma.done.wait (%p17011_p7), [#allocation15], 528  }
 0x16a   : > { %9460 = vsyncadd (%p17012_p2), [#allocation15], 4294966768  ;;  %p17013_p6 = pmov %p17006_p0 }
 0x16b   : > { %p17014_p10 = pmov %p17006_p0 }
 0x16c   : > { %9462 = dma.done.wait (%p17013_p6), [#allocation18], 272  }
 0x16d   : > { %9464 = vsyncadd (%p17014_p10), [#allocation18], 4294967024  ;;  %v601_v0 = vlaneseq  ;;  %v9498_v5 = vmov 1966171168   ;;  %v3211_v7 = vld [vmem:[#allocation8] sm:$0xff]  ;;  %v3212_v8 = vld [vmem:[#allocation8 + $0x8] sm:$0xff] }
 0x16e   : > { %v9982_v6 = vunpack.c.l.s4 %v9498_v5  ;;  %v9987_v9 = vld [vmem:[%s9937_s11 + $0xa0] sm:$0xff]  ;;  %v9499_v12 = vmov 1983009808   ;;  %v8824_v14 = vpack.c.bf16 %v3212_v8, %v3211_v7  ;;  %v9999_v15 = vld [vmem:[%s9937_s11 + $0xa8] sm:$0xff]  ;;  %v10002_v16 = vld [vmem:[%s9937_s11 + $0xb0] sm:$0xff]  ;;  %vm3220_vm7 = vcmask 130048  }
 0x16f   : > { %v9971_v1 = vshrl.u32 %v601_v0, 7  ;;  %v9996_v13 = vunpack.c.l.s4 %v9499_v12  ;;  %v10005_v17 = vld [vmem:[%s9937_s11 + $0xb8] sm:$0xff]  ;;  %v16622_v18 = vrot.slane %v9987_v9, 6  ;;  %v16604_v19 = vrot.slane %v9987_v9, 7  ;;  %v10011_v20 = vld [vmem:[%s9937_s11 + $0xc0] sm:$0xff]  ;;  %v10014_v21 = vld [vmem:[%s9937_s11 + $0xc8] sm:$0xff] }
 0x170   : > { %v10017_v22 = vld [vmem:[%s9937_s11 + $0xd0] sm:$0xff]  ;;  %v16620_v23 = vrot.slane %v10002_v16, 6  ;;  %v16625_v24 = vrot.slane %v9999_v15, 6  ;;  %v16621_v25 = vrot.slane %v10005_v17, 6  ;;  %v5022_v26 = vunpack.c.0.s8 %v9982_v6  ;;  %8836 = vmatprep.subr.bf16.mxu1 %v8824_v14  ;;  %v10024_v27 = vld [vmem:[%s9937_s11 + $0xd8] sm:$0xff]  ;;  %8825 = vmatprep.subr.bf16.mxu0 %v8824_v14  ;;  %s15169_s25 = scalar_lea.vmem [#allocation20], %s8556_s30 }
 0x171   : > { %17015 = vst [vmem:[#allocation30_spill] sm:$0xff] %v9971_v1  ;;  %v9974_v2 = vadd.s32 8, %v9971_v1  ;;  %v9977_v3 = vadd.s32 4294967294, %v9971_v1  ;;  %v9980_v4 = vadd.s32 4294967295, %v9971_v1  ;;  %vm632_vm0 = vcmp.lt.s32.totalorder %v9971_v1, 2  ;;  %17020 = vst [vmem:[#allocation35_spill] sm:$0xff] %v9996_v13  ;;  %8837 = vmatpush3.bf16.msra.mxu1 %v8824_v14  ;;  %8827 = vmatpush3.bf16.msra.mxu0 %v8824_v14 }
 0x172   : > { %vm795_vm1 = vcmp.lt.s32.totalorder %v9971_v1, 1  ;;  %v9991_v10 = vadd.s32 1, %v9971_v1  ;;  %v16616_v28 = vrot.slane %v10011_v20, 6  ;;  %v16606_v29 = vrot.slane %v10017_v22, 6  ;;  %v10047_v35 = vld [vmem:[#allocation7] ss:$0 sm:$0xff] }
 0x173   : > { %17016 = vst [vmem:[#allocation31_spill] sm:$0xff] %v9977_v3  ;;  %17017 = vst [vmem:[#allocation32_spill] sm:$0xff] %v9980_v4  ;;  %vm697_vm2 = vcmp.ge.s32.totalorder %v9977_v3, 0  ;;  %v9994_v11 = vadd.s32 1, %v9974_v2  ;;  %vm860_vm3 = vcmp.ge.s32.totalorder %v9980_v4, 0  ;;  %v16617_v30 = vrot.slane %v10014_v21, 6 }
 0x174   : > { %17018 = vst [vmem:[#allocation33_spill] sm:$0xff] %v9991_v10  ;;  %v16601_v31 = vrot.slane %v9987_v9, 1  ;;  %v16615_v32 = vrot.slane %v10024_v27, 6  ;;  %v10037_v33 = vsel %vm632_vm0, %v16625_v24, %v16622_v18  ;;  %v10045_v34 = vsel %vm632_vm0, %v16621_v25, %v16620_v23  ;;  %17023 = vst [vmem:[#allocation38_spill] sm:$0xff] %v10047_v35  ;;  %v10075_v45 = vld [vmem:[#allocation7 + $0x1] ss:$0 sm:$0xff] }
 0x175   : > { %17019 = vst [vmem:[#allocation34_spill] sm:$0xff] %v9994_v11  ;;  %17021 = vst [vmem:[#allocation36_spill] sm:$0xff] %v10037_v33  ;;  %v16602_v36 = vrot.slane %v10002_v16, 7  ;;  %v10056_v37 = vsel %vm632_vm0, %v16617_v30, %v16616_v28  ;;  %v687_v38 = vmul.f32 %v10047_v35, %v10037_v33  ;;  %v689_v39 = vmul.f32 %v10047_v35, %v10045_v34  ;;  %v10077_v46 = vld [vmem:[#allocation7 + $0x2] ss:$0 sm:$0xff]  ;;  %s9500_s13 = smov 8  }
 0x176   : > { %17022 = vst [vmem:[#allocation37_spill] sm:$0xff] %v10045_v34  ;;  %17024 = vst [vmem:[#allocation39_spill] sm:$0xff] %v10056_v37  ;;  %v16592_v40 = vrot.slane %v10011_v20, 7  ;;  %v10069_v41 = vsel %vm632_vm0, %v16615_v32, %v16606_v29  ;;  %v691_v42 = vmul.f32 %v10047_v35, %v10056_v37  ;;  %v16590_v43 = vrot.slane %v10017_v22, 7  ;;  %v10283_v30 = vld [vmem:[#allocation7 + $0x6] ss:$0 sm:$0xff] }
 0x177   : > { %17025 = vst [vmem:[#allocation40_spill] sm:$0xff] %v10069_v41  ;;  %v16605_v44 = vrot.slane %v9999_v15, 7  ;;  %17026 = vst [vmem:[#allocation41_spill] sm:$0xff] %v10075_v45  ;;  %vm1022_vm4 = vcmp.lt.s32.totalorder %v9971_v1, 7  ;;  %v693_v47 = vmul.f32 %v10047_v35, %v10069_v41  ;;  %v729_v48 = vsel %vm697_vm2, %v687_v38, 0.0  ;;  %s8685_s15 = sshll.u32 %s9584_s23, 12 }
 0x178   : > { %17027 = vst [vmem:[#allocation42_spill] sm:$0xff] %v10077_v46  ;;  %v731_v49 = vsel %vm697_vm2, %v689_v39, 0.0  ;;  %v16603_v50 = vrot.slane %v10005_v17, 7  ;;  %v733_v51 = vsel %vm697_vm2, %v691_v42, 0.0  ;;  %v16593_v52 = vrot.slane %v10014_v21, 7  ;;  %17043 = vst [vmem:[#allocation58_spill] sm:$0xff] %v10283_v30 }
 0x179   : > { %v16591_v53 = vrot.slane %v10024_v27, 7  ;;  %v10097_v54 = vsel %vm795_vm1, %v16605_v44, %v16604_v19  ;;  %v735_v55 = vsel %vm697_vm2, %v693_v47, 0.0  ;;  %v956_v58 = vmul.f32 %v10077_v46, %v9987_v9  ;;  %v10292_v23 = vld [vmem:[#allocation7 + $0x7] ss:$0 sm:$0xff]  ;;  %v10445_v13 = vld [vmem:[#allocation7 + $0xf] ss:$0 sm:$0xff] }
 0x17a   : > { %17028 = vst [vmem:[#allocation43_spill] sm:$0xff] %v10097_v54  ;;  %v10107_v56 = vsel %vm795_vm1, %v16603_v50, %v16602_v36  ;;  %v850_v57 = vmul.f32 %v10075_v45, %v10097_v54  ;;  %v10119_v59 = vsel %vm795_vm1, %v16593_v52, %v16592_v40  ;;  %v958_v62 = vmul.f32 %v10077_v46, %v10002_v16  ;;  %s8356_s16 = sshll.u32 %s15169_s25, 4  ;;  %s17727_s5 = sld [smem:[#allocation118_spill]]  ;;  %s16519_s16 = int_to_ptr.vmem [resolvable:$true] %s8356_s16 }
 0x17b   : > { %17029 = vst [vmem:[#allocation44_spill] sm:$0xff] %v10107_v56  ;;  %17030 = vst [vmem:[#allocation45_spill] sm:$0xff] %v10119_v59  ;;  %v10127_v60 = vsel %vm795_vm1, %v16591_v53, %v16590_v43  ;;  %v852_v61 = vmul.f32 %v10075_v45, %v10107_v56  ;;  %v854_v63 = vmul.f32 %v10075_v45, %v10119_v59  ;;  %vm1185_vm5 = vcmp.lt.s32.totalorder %v9971_v1, 6  ;;  %s8343_s21 = scalar_lea.sflag [#allocation4], %s9931_s14  ;;  %s9393_s7 = scalar_lea.vmem %s16519_s16, 4096 }
 0x17c   : > { %17031 = vst [vmem:[#allocation46_spill] sm:$0xff] %v10127_v60  ;;  %v856_v0 = vmul.f32 %v10075_v45, %v10127_v60  ;;  %v892_v5 = vsel %vm860_vm3, %v850_v57, 0.0  ;;  %v960_v7 = vmul.f32 %v10077_v46, %v10011_v20  ;;  %v962_v14 = vmul.f32 %v10077_v46, %v10017_v22  ;;  %17044 = vst [vmem:[#allocation59_spill] sm:$0xff] %v10292_v23  ;;  %p9394_p5 = scmp.ne.s32.totalorder %s16519_s16, %s9393_s7  ;;  %p17728_p9 = scmp.ne.s32.totalorder %s16995_s26, 0 }
 0x17d   : > { %v894_v8 = vsel %vm860_vm3, %v852_v61, 0.0  ;;  %v922_v12 = vadd.f32 %v892_v5, %v729_v48  ;;  %v16599_v38 = vrot.slane %v10002_v16, 1  ;;  %v896_v39 = vsel %vm860_vm3, %v854_v63, 0.0  ;;  %17051 = vst [vmem:[#allocation66_spill] sm:$0xff] %v10445_v13  ;;  %s9501_s23 = smov [#allocation20]  }
 0x17e   : > { %v898_v42 = vsel %vm860_vm3, %v856_v0, 0.0  ;;  %v924_v47 = vadd.f32 %v894_v8, %v731_v49  ;;  %v16597_v57 = vrot.slane %v10011_v20, 1  ;;  %v926_v43 = vadd.f32 %v896_v39, %v733_v51  ;;  %v10159_v0 = vld [vmem:[#allocation7 + $0x3] ss:$0 sm:$0xff]  ;;  %p9395_p4 = pnand %p9394_p5, %p17728_p9  ;;  %s9397_s30 = sshll.u32 %s9501_s23, 4  ;;  %s9398_s30 = int_to_ptr.vmem [resolvable:$false] %s9397_s30 }
 0x17f   : > { %v928_v53 = vadd.f32 %v898_v42, %v735_v55  ;;  %v16596_v40 = vrot.slane %v10017_v22, 1  ;;  %v10154_v48 = vadd.s32 2, %v9974_v2  ;;  %v986_v61 = vadd.f32 %v956_v58, %v922_v12  ;;  %v10202_v39 = vld [vmem:[%s9937_s11 + $0xe0] sm:$0xff]  ;;  %v10205_v42 = vld [vmem:[%s9937_s11 + $0xe8] sm:$0xff]  ;;  %s9399_s22 = scalar_lea.vmem %s9398_s30, 8192  ;;  %p9400_p11 = scmp.lt.s32.totalorder %s16519_s16, %s9398_s30 }
 0x180   : > { %v16600_v5 = vrot.slane %v9999_v15, 1  ;;  %v16598_v52 = vrot.slane %v10005_v17, 1  ;;  %v16594_v63 = vrot.slane %v10014_v21, 1  ;;  %v988_v49 = vadd.f32 %v958_v62, %v924_v47  ;;  %17037 = vst [vmem:[#allocation52_spill] sm:$0xff] %v10205_v42  ;;  %s16517_s1 = scalar_lea.hbm %s17727_s5, %s8685_s15  ;;  %p9396_p8 = pneg %p9395_p4 }
 0x181   : > { %17032 = vst [vmem:[#allocation47_spill] sm:$0xff] %v10154_v48  ;;  %v990_v8 = vadd.f32 %v960_v7, %v926_v43  ;;  %v992_v51 = vadd.f32 %v962_v14, %v928_v53  ;;  %v16595_v55 = vrot.slane %v10024_v27, 1  ;;  %v16614_v53 = vrot.slane %v9987_v9, 2  ;;  %p9401_p0 = scmp.lt.s32.totalorder %s9399_s22, %s9393_s7 }
 0x182   : > { %v10168_v2 = vsel %vm1022_vm4, %v16601_v31, %v16600_v5  ;;  %v10176_v58 = vsel %vm1022_vm4, %v16599_v38, %v16598_v52  ;;  %v10184_v43 = vsel %vm1022_vm4, %v16597_v57, %v16594_v63  ;;  %v16612_v63 = vrot.slane %v10002_v16, 2  ;;  %v10213_v5 = vld [vmem:[#allocation7 + $0x4] ss:$0 sm:$0xff] }
 0x183   : > { %17033 = vst [vmem:[#allocation48_spill] sm:$0xff] %v10168_v2  ;;  %17034 = vst [vmem:[#allocation49_spill] sm:$0xff] %v10176_v58  ;;  %v10193_v62 = vsel %vm1022_vm4, %v16596_v40, %v16595_v55  ;;  %v1077_v7 = vmul.f32 %v10159_v0, %v10168_v2  ;;  %v1079_v12 = vmul.f32 %v10159_v0, %v10176_v58  ;;  %v16610_v55 = vrot.slane %v10011_v20, 2  ;;  %v10337_v2 = vld [vmem:[#allocation7 + $0x9] ss:$0 sm:$0xff]  ;;  %p9402_p12 = por %p9401_p0, %p9400_p11 }
 0x184   : > { %17035 = vst [vmem:[#allocation50_spill] sm:$0xff] %v10184_v43  ;;  %17036 = vst [vmem:[#allocation51_spill] sm:$0xff] %v10193_v62  ;;  %v1081_v14 = vmul.f32 %v10159_v0, %v10184_v43  ;;  %v1083_v47 = vmul.f32 %v10159_v0, %v10193_v62  ;;  %v16609_v40 = vrot.slane %v10017_v22, 2  ;;  %v16613_v38 = vrot.slane %v9999_v15, 2 }
 0x185   : > { %v1149_v57 = vadd.f32 %v1077_v7, %v986_v61  ;;  %v1151_v52 = vadd.f32 %v1079_v12, %v988_v49  ;;  %v10218_v31 = vsub.s32 %v5022_v26, %v9971_v1  ;;  %v16611_v50 = vrot.slane %v10005_v17, 2  ;;  %v10233_v49 = vld [vmem:[#allocation7 + $0x5] ss:$0 sm:$0xff]  ;;  %p9403_p13 = pnand %p9402_p12, %p9396_p8 }
 0x186   : > { %v1153_v36 = vadd.f32 %v1081_v14, %v990_v8  ;;  %v16607_v19 = vrot.slane %v10014_v21, 2  ;;  %v16608_v44 = vrot.slane %v10024_v27, 2  ;;  %v1155_v29 = vadd.f32 %v1083_v47, %v992_v51 }
 0x187   : > { %17038 = vst [vmem:[#allocation53_spill] sm:$0xff] %v10218_v31  ;;  %v10229_v61 = vsel %vm1185_vm5, %v16614_v53, %v16613_v38  ;;  %v16618_v6 = vrot.slane %v10202_v39, 6  ;;  %v16619_v26 = vrot.slane %v10205_v42, 6  ;;  %v10241_v8 = vsel %vm1185_vm5, %v16612_v63, %v16611_v50 }
 0x188   : > { %17039 = vst [vmem:[#allocation54_spill] sm:$0xff] %v10229_v61  ;;  %17040 = vst [vmem:[#allocation55_spill] sm:$0xff] %v10241_v8  ;;  %v10249_v51 = vsel %vm1185_vm5, %v16610_v55, %v16607_v19  ;;  %v10257_v7 = vsel %vm1185_vm5, %v16609_v40, %v16608_v44  ;;  %v1240_v12 = vmul.f32 %v10213_v5, %v10229_v61  ;;  %v16636_v24 = vrot.slane %v10202_v39, 1 }
 0x189   : > { %17041 = vst [vmem:[#allocation56_spill] sm:$0xff] %v10249_v51  ;;  %17042 = vst [vmem:[#allocation57_spill] sm:$0xff] %v10257_v7  ;;  %v1242_v14 = vmul.f32 %v10213_v5, %v10241_v8  ;;  %v1244_v47 = vmul.f32 %v10213_v5, %v10249_v51  ;;  %v1246_v19 = vmul.f32 %v10213_v5, %v10257_v7  ;;  %vm1090_vm6 = vcmp.lt.s32.totalorder %v9994_v11, 16 }
 0x18a   : > { %v10273_v44 = vsel %vm632_vm0, %v16619_v26, %v16618_v6  ;;  %v1312_v40 = vadd.f32 %v1240_v12, %v1149_v57  ;;  %v1352_v55 = vmul.f32 %v10233_v49, %v10045_v34  ;;  %v1354_v50 = vmul.f32 %v10233_v49, %v10056_v37 }
 0x18b   : > { %v1356_v63 = vmul.f32 %v10233_v49, %v10069_v41  ;;  %v1314_v38 = vadd.f32 %v1242_v14, %v1151_v52  ;;  %v1316_v53 = vadd.f32 %v1244_v47, %v1153_v36  ;;  %v1318_v32 = vadd.f32 %v1246_v19, %v1155_v29 }
 0x18c   : > { %v1358_v28 = vmul.f32 %v10233_v49, %v10273_v44  ;;  %v1384_v57 = vsel %vm697_vm2, %v1352_v55, 0.0  ;;  %v1386_v12 = vsel %vm697_vm2, %v1354_v50, 0.0  ;;  %v16623_v26 = vrot.slane %v10202_v39, 7 }
 0x18d   : > { %v1388_v6 = vsel %vm697_vm2, %v1356_v63, 0.0  ;;  %v1416_v29 = vadd.f32 %v1384_v57, %v1312_v40  ;;  %v1418_v36 = vadd.f32 %v1386_v12, %v1314_v38  ;;  %v16624_v47 = vrot.slane %v10205_v42, 7  ;;  %v10309_v40 = vld [vmem:[#allocation7 + $0x8] ss:$0 sm:$0xff] }
 0x18e   : > { %v1390_v19 = vsel %vm697_vm2, %v1358_v28, 0.0  ;;  %v1420_v52 = vadd.f32 %v1388_v6, %v1316_v53  ;;  %v1456_v55 = vmul.f32 %v10283_v30, %v10107_v56  ;;  %v1458_v50 = vmul.f32 %v10283_v30, %v10119_v59  ;;  %17045 = vst [vmem:[#allocation60_spill] sm:$0xff] %v10309_v40 }
 0x18f   : > { %v1422_v14 = vadd.f32 %v1390_v19, %v1318_v32  ;;  %v1460_v63 = vmul.f32 %v10283_v30, %v10127_v60  ;;  %v1556_v25 = vmul.f32 %v10292_v23, %v10002_v16  ;;  %v1558_v28 = vmul.f32 %v10292_v23, %v10011_v20 }
 0x190   : > { %v1560_v32 = vmul.f32 %v10292_v23, %v10017_v22  ;;  %v10317_v38 = vsel %vm795_vm1, %v16624_v47, %v16623_v26  ;;  %v1488_v53 = vsel %vm860_vm3, %v1456_v55, 0.0  ;;  %v1490_v6 = vsel %vm860_vm3, %v1458_v50, 0.0 }
 0x191   : > { %v1562_v57 = vmul.f32 %v10292_v23, %v10202_v39  ;;  %v1462_v12 = vmul.f32 %v10283_v30, %v10317_v38  ;;  %v1492_v19 = vsel %vm860_vm3, %v1460_v63, 0.0  ;;  %v1520_v18 = vadd.f32 %v1488_v53, %v1416_v29  ;;  %v10340_v29 = vld [vmem:[%s9937_s11 + $0xf0] sm:$0xff] }
 0x192   : > { %v1522_v26 = vadd.f32 %v1490_v6, %v1418_v36  ;;  %v1524_v47 = vadd.f32 %v1492_v19, %v1420_v52  ;;  %v16635_v55 = vrot.slane %v10205_v42, 1  ;;  %v1628_v50 = vmul.f32 %v10309_v40, %v10176_v58  ;;  %17046 = vst [vmem:[#allocation61_spill] sm:$0xff] %v10340_v29  ;;  %v10343_v36 = vld [vmem:[%s9937_s11 + $0xf8] sm:$0xff]  ;;  %v10409_v58 = vld [vmem:[#allocation7 + $0xc] ss:$0 sm:$0xff] }
 0x193   : > { %v1494_v31 = vsel %vm860_vm3, %v1462_v12, 0.0  ;;  %v1588_v56 = vadd.f32 %v1556_v25, %v1520_v18  ;;  %v1630_v61 = vmul.f32 %v10309_v40, %v10184_v43  ;;  %17047 = vst [vmem:[#allocation62_spill] sm:$0xff] %v10343_v36  ;;  %v1632_v18 = vmul.f32 %v10309_v40, %v10193_v62 }
 0x194   : > { %v1590_v34 = vadd.f32 %v1558_v28, %v1522_v26  ;;  %v1526_v52 = vadd.f32 %v1494_v31, %v1422_v14  ;;  %v1592_v63 = vadd.f32 %v1560_v32, %v1524_v47  ;;  %v10351_v53 = vsel %vm1022_vm4, %v16636_v24, %v16635_v55  ;;  %v10358_v31 = vld [vmem:[#allocation7 + $0xa] ss:$0 sm:$0xff] }
 0x195   : > { %v1634_v25 = vmul.f32 %v10309_v40, %v10351_v53  ;;  %v1692_v26 = vadd.f32 %v1628_v50, %v1588_v56  ;;  %v16640_v6 = vrot.slane %v10202_v39, 2  ;;  %v16637_v32 = vrot.slane %v10205_v42, 2 }
 0x196   : > { %v1694_v28 = vadd.f32 %v1630_v61, %v1590_v34  ;;  %v1594_v14 = vadd.f32 %v1562_v57, %v1526_v52  ;;  %v1696_v47 = vadd.f32 %v1632_v18, %v1592_v63  ;;  %v1732_v12 = vmul.f32 %v10337_v2, %v10241_v8 }
 0x197   : > { %v1734_v19 = vmul.f32 %v10337_v2, %v10249_v51  ;;  %v1736_v55 = vmul.f32 %v10337_v2, %v10257_v7  ;;  %v16638_v56 = vrot.slane %v10340_v29, 6  ;;  %v16639_v34 = vrot.slane %v10343_v36, 6 }
 0x198   : > { %v1698_v61 = vadd.f32 %v1634_v25, %v1594_v14  ;;  %v10375_v57 = vsel %vm1185_vm5, %v16640_v6, %v16637_v32  ;;  %v1796_v50 = vadd.f32 %v1732_v12, %v1692_v26  ;;  %v1837_v52 = vmul.f32 %v10358_v31, %v10056_v37  ;;  %v10389_v14 = vld [vmem:[#allocation7 + $0xb] ss:$0 sm:$0xff] }
 0x199   : > { %v1738_v63 = vmul.f32 %v10337_v2, %v10375_v57  ;;  %v1798_v18 = vadd.f32 %v1734_v19, %v1694_v28  ;;  %v1800_v24 = vadd.f32 %v1736_v55, %v1696_v47  ;;  %v10387_v25 = vsel %vm632_vm0, %v16639_v34, %v16638_v56 }
 0x19a   : > { %17048 = vst [vmem:[#allocation63_spill] sm:$0xff] %v10387_v25  ;;  %v1839_v26 = vmul.f32 %v10358_v31, %v10069_v41  ;;  %v1841_v12 = vmul.f32 %v10358_v31, %v10273_v44  ;;  %v1843_v28 = vmul.f32 %v10358_v31, %v10387_v25  ;;  %v1869_v55 = vsel %vm697_vm2, %v1837_v52, 0.0 }
 0x19b   : > { %v1802_v47 = vadd.f32 %v1738_v63, %v1698_v61  ;;  %v1901_v19 = vadd.f32 %v1869_v55, %v1796_v50  ;;  %v16647_v32 = vrot.slane %v10340_v29, 7  ;;  %v16648_v56 = vrot.slane %v10343_v36, 7  ;;  %v10433_v55 = vld [vmem:[#allocation7 + $0xd] ss:$0 sm:$0xff]  ;;  %v10455_v36 = vld [vmem:[#allocation7 + $0x10] ss:$0 sm:$0xff] }
 0x19c   : > { %v1871_v34 = vsel %vm697_vm2, %v1839_v26, 0.0  ;;  %v1873_v6 = vsel %vm697_vm2, %v1841_v12, 0.0  ;;  %v1875_v37 = vsel %vm697_vm2, %v1843_v28, 0.0  ;;  %v1942_v8 = vmul.f32 %v10389_v14, %v10119_v59  ;;  %17052 = vst [vmem:[#allocation67_spill] sm:$0xff] %v10455_v36 }
 0x19d   : > { %v1903_v61 = vadd.f32 %v1871_v34, %v1798_v18  ;;  %v1905_v50 = vadd.f32 %v1873_v6, %v1800_v24  ;;  %v1907_v52 = vadd.f32 %v1875_v37, %v1802_v47  ;;  %v10417_v63 = vsel %vm795_vm1, %v16648_v56, %v16647_v32  ;;  %v10435_v47 = vld [vmem:[#allocation7 + $0xe] ss:$0 sm:$0xff] }
 0x19e   : > { %17049 = vst [vmem:[#allocation64_spill] sm:$0xff] %v10417_v63  ;;  %v1944_v26 = vmul.f32 %v10389_v14, %v10127_v60  ;;  %v1946_v12 = vmul.f32 %v10389_v14, %v10317_v38  ;;  %v1948_v28 = vmul.f32 %v10389_v14, %v10417_v63  ;;  %v1974_v24 = vsel %vm860_vm3, %v1942_v8, 0.0  ;;  %17050 = vst [vmem:[#allocation65_spill] sm:$0xff] %v10435_v47 }
 0x19f   : > { %v2006_v37 = vadd.f32 %v1974_v24, %v1901_v19  ;;  %v2043_v6 = vmul.f32 %v10409_v58, %v10011_v20  ;;  %v2045_v34 = vmul.f32 %v10409_v58, %v10017_v22  ;;  %v2047_v18 = vmul.f32 %v10409_v58, %v10202_v39 }
 0x1a0   : > { %v1976_v32 = vsel %vm860_vm3, %v1944_v26, 0.0  ;;  %v1978_v8 = vsel %vm860_vm3, %v1946_v12, 0.0  ;;  %v1980_v19 = vsel %vm860_vm3, %v1948_v28, 0.0  ;;  %v2049_v24 = vmul.f32 %v10409_v58, %v10340_v29 }
 0x1a1   : > { %v2008_v56 = vadd.f32 %v1976_v32, %v1903_v61  ;;  %v2010_v59 = vadd.f32 %v1978_v8, %v1905_v50  ;;  %v2012_v54 = vadd.f32 %v1980_v19, %v1907_v52  ;;  %v2075_v33 = vadd.f32 %v2043_v6, %v2006_v37 }
 0x1a2   : > { %v2116_v10 = vmul.f32 %v10433_v55, %v10184_v43  ;;  %v2118_v26 = vmul.f32 %v10433_v55, %v10193_v62  ;;  %v2120_v12 = vmul.f32 %v10433_v55, %v10351_v53  ;;  %v2221_v28 = vmul.f32 %v10435_v47, %v10249_v51 }
 0x1a3   : > { %v2077_v32 = vadd.f32 %v2045_v34, %v2008_v56  ;;  %v2079_v61 = vadd.f32 %v2047_v18, %v2010_v59  ;;  %v10457_v50 = vadd.f32 %v2049_v24, %v2012_v54  ;;  %v2223_v52 = vmul.f32 %v10435_v47, %v10257_v7  ;;  %v10471_v56 = vld [vmem:[#allocation7 + $0x11] ss:$0 sm:$0xff] }
 0x1a4   : > { %v2180_v37 = vadd.f32 %v2116_v10, %v2075_v33  ;;  %v2225_v6 = vmul.f32 %v10435_v47, %v10375_v57  ;;  %v2322_v8 = vmul.f32 %v10445_v13, %v10069_v41  ;;  %v2324_v19 = vmul.f32 %v10445_v13, %v10273_v44  ;;  %17054 = vst [vmem:[#allocation69_spill] sm:$0xff] %v10471_v56 }
 0x1a5   : > { %17053 = vst [vmem:[#allocation68_spill] sm:$0xff] %v10457_v50  ;;  %v2182_v51 = vadd.f32 %v2118_v26, %v2077_v32  ;;  %v2184_v43 = vadd.f32 %v2120_v12, %v2079_v61  ;;  %v2326_v59 = vmul.f32 %v10445_v13, %v10387_v25  ;;  %v2422_v54 = vmul.f32 %v10455_v36, %v10127_v60  ;;  %v10483_v61 = vld [vmem:[#allocation7 + $0x12] ss:$0 sm:$0xff]  ;;  %v3844_v50 = vld [vmem:[#allocation13 + $0x8] sm:$0xff] }
 0x1a6   : > { %v2285_v10 = vadd.f32 %v2221_v28, %v2180_v37  ;;  %v2353_v33 = vsel %vm697_vm2, %v2322_v8, 0.0  ;;  %v2355_v34 = vsel %vm697_vm2, %v2324_v19, 0.0  ;;  %v2424_v18 = vmul.f32 %v10455_v36, %v10317_v38  ;;  %17055 = vst [vmem:[#allocation70_spill] sm:$0xff] %v10483_v61 }
 0x1a7   : > { %v2287_v24 = vadd.f32 %v2223_v52, %v2182_v51  ;;  %v2289_v26 = vadd.f32 %v2225_v6, %v2184_v43  ;;  %v2357_v12 = vsel %vm697_vm2, %v2326_v59, 0.0  ;;  %v2426_v32 = vmul.f32 %v10455_v36, %v10417_v63  ;;  %v10491_v51 = vld [vmem:[#allocation7 + $0x13] ss:$0 sm:$0xff]  ;;  %v10493_v43 = vld [vmem:[#allocation7 + $0x14] ss:$0 sm:$0xff] }
 0x1a8   : > { %v2385_v28 = vadd.f32 %v2353_v33, %v2285_v10  ;;  %v2453_v37 = vsel %vm860_vm3, %v2422_v54, 0.0  ;;  %v2455_v8 = vsel %vm860_vm3, %v2424_v18, 0.0  ;;  %v2522_v19 = vmul.f32 %v10471_v56, %v10017_v22  ;;  %17056 = vst [vmem:[#allocation71_spill] sm:$0xff] %v10491_v51  ;;  %17057 = vst [vmem:[#allocation72_spill] sm:$0xff] %v10493_v43  ;;  %v10499_v33 = vld [vmem:[#allocation7 + $0x15] ss:$0 sm:$0xff] }
 0x1a9   : > { %v2387_v52 = vadd.f32 %v2355_v34, %v2287_v24  ;;  %v2389_v6 = vadd.f32 %v2357_v12, %v2289_v26  ;;  %v2457_v59 = vsel %vm860_vm3, %v2426_v32, 0.0  ;;  %v2524_v10 = vmul.f32 %v10471_v56, %v10202_v39  ;;  %v10501_v54 = vld [vmem:[#allocation7 + $0x16] ss:$0 sm:$0xff]  ;;  %v10509_v24 = vld [vmem:[#allocation7 + $0x17] ss:$0 sm:$0xff] }
 0x1aa   : > { %v2485_v18 = vadd.f32 %v2453_v37, %v2385_v28  ;;  %v2526_v60 = vmul.f32 %v10471_v56, %v10340_v29  ;;  %v2590_v41 = vmul.f32 %v10483_v61, %v10193_v62  ;;  %v2592_v34 = vmul.f32 %v10483_v61, %v10351_v53  ;;  %v10511_v26 = vld [vmem:[#allocation7 + $0x18] ss:$0 sm:$0xff]  ;;  %v3843_v37 = vld [vmem:[#allocation13] sm:$0xff] }
 0x1ab   : > { %v2487_v12 = vadd.f32 %v2455_v8, %v2387_v52  ;;  %v2489_v32 = vadd.f32 %v2457_v59, %v2389_v6  ;;  %v2690_v63 = vmul.f32 %v10491_v51, %v10257_v7  ;;  %v2692_v28 = vmul.f32 %v10491_v51, %v10375_v57 }
 0x1ac   : > { %v2553_v25 = vadd.f32 %v2522_v19, %v2485_v18  ;;  %v2790_v62 = vmul.f32 %v10493_v43, %v10273_v44  ;;  %v2886_v29 = vmul.f32 %v10499_v33, %v10317_v38  ;;  %v2982_v61 = vmul.f32 %v10501_v54, %v10202_v39 }
 0x1ad   : > { %v2555_v8 = vadd.f32 %v2524_v10, %v2487_v12  ;;  %v10524_v52 = vadd.f32 %v2526_v60, %v2489_v32  ;;  %v3048_v6 = vmul.f32 %v10509_v24, %v10351_v53  ;;  %v3144_v19 = vmul.f32 %v10511_v26, %v10375_v57 }
 0x1ae   : > { %v2653_v59 = vadd.f32 %v2590_v41, %v2553_v25  ;;  %v2819_v44 = vsel %vm697_vm2, %v2790_v62, 0.0  ;;  %v2915_v38 = vsel %vm860_vm3, %v2886_v29, 0.0  ;;  %v10534_v18 = vpack.c.bf16 %v3844_v50, %v3843_v37 }
 0x1af   : > { %17058 = vst [vmem:[#allocation73_spill] sm:$0xff] %v10524_v52  ;;  %v2655_v7 = vadd.f32 %v2592_v34, %v2555_v8  ;;  %v17060_v10 = vrot.slane %v9999_v15, 6  ;;  %v17061_v60 = vrot.slane %v9987_v9, 6  ;;  %v17063_v57 = vrot.slane %v10005_v17, 6 }
 0x1b0   : > { %17059 = vst [vmem:[#allocation74_spill] sm:$0xff] %v10534_v18  ;;  %v17064_v41 = vrot.slane %v10002_v16, 6  ;;  %v17066_v29 = vrot.slane %v10014_v21, 6  ;;  %v17067_v25 = vrot.slane %v10011_v20, 6  ;;  %v2753_v34 = vadd.f32 %v2690_v63, %v2653_v59  ;;  %8829 = vmatprep.subr.bf16.mxu1 %v10534_v18 }
 0x1b1   : > { %v10542_v53 = vsel %vm632_vm0, %v17061_v60, %v17060_v10  ;;  %v17069_v12 = vrot.slane %v10024_v27, 6  ;;  %v17070_v32 = vrot.slane %v10017_v22, 6  ;;  %v10573_v60 = vadd.f32 %v2692_v28, %v2655_v7 }
 0x1b2   : > { %17062 = vst [vmem:[#allocation75_spill] sm:$0xff] %v10542_v53  ;;  %v10550_v62 = vsel %vm632_vm0, %v17064_v41, %v17063_v57  ;;  %v10558_v50 = vsel %vm632_vm0, %v17067_v25, %v17066_v29  ;;  %v688_v8 = vmul.f32 %v10047_v35, %v10542_v53  ;;  %v17073_v59 = vrot.slane %v9999_v15, 7 }
 0x1b3   : > { %17065 = vst [vmem:[#allocation76_spill] sm:$0xff] %v10550_v62  ;;  %17068 = vst [vmem:[#allocation77_spill] sm:$0xff] %v10558_v50  ;;  %v10567_v37 = vsel %vm632_vm0, %v17070_v32, %v17069_v12  ;;  %v692_v10 = vmul.f32 %v10047_v35, %v10558_v50  ;;  %v17074_v57 = vrot.slane %v9987_v9, 7  ;;  %v17076_v29 = vrot.slane %v10005_v17, 7 }
 0x1b4   : > { %17071 = vst [vmem:[#allocation78_spill] sm:$0xff] %v10567_v37  ;;  %17072 = vst [vmem:[#allocation79_spill] sm:$0xff] %v10573_v60  ;;  %v694_v63 = vmul.f32 %v10047_v35, %v10567_v37  ;;  %v17077_v25 = vrot.slane %v10002_v16, 7  ;;  %vm1253_vm8 = vcmp.lt.s32.totalorder %v10154_v48, 16  ;;  %v2849_v28 = vadd.f32 %v2819_v44, %v2753_v34  ;;  %v11384_v48 = vld [vmem:[%s9945_s12 + $0x30] sm:$0xff] }
 0x1b5   : > { %v10583_v41 = vsel %vm795_vm1, %v17074_v57, %v17073_v59  ;;  %v17079_v12 = vrot.slane %v10014_v21, 7  ;;  %v17080_v32 = vrot.slane %v10011_v20, 7  ;;  %v17082_v59 = vrot.slane %v10024_v27, 7 }
 0x1b6   : > { %17075 = vst [vmem:[#allocation80_spill] sm:$0xff] %v10583_v41  ;;  %v10591_v7 = vsel %vm795_vm1, %v17077_v25, %v17076_v29  ;;  %v17083_v57 = vrot.slane %v10017_v22, 7  ;;  %v851_v29 = vmul.f32 %v10075_v45, %v10583_v41  ;;  %v957_v25 = vmul.f32 %v10077_v46, %v9999_v15 }
 0x1b7   : > { %17078 = vst [vmem:[#allocation81_spill] sm:$0xff] %v10591_v7  ;;  %v10600_v53 = vsel %vm795_vm1, %v17080_v32, %v17079_v12  ;;  %v961_v12 = vmul.f32 %v10077_v46, %v10014_v21  ;;  %v2945_v32 = vadd.f32 %v2915_v38, %v2849_v28  ;;  %v17086_v41 = vrot.slane %v9999_v15, 1 }
 0x1b8   : > { %17081 = vst [vmem:[#allocation82_spill] sm:$0xff] %v10600_v53  ;;  %v10608_v18 = vsel %vm795_vm1, %v17083_v57, %v17082_v59  ;;  %v855_v44 = vmul.f32 %v10075_v45, %v10600_v53  ;;  %v923_v35 = vadd.f32 %v851_v29, %v688_v8  ;;  %v963_v59 = vmul.f32 %v10077_v46, %v10024_v27 }
 0x1b9   : > { %17084 = vst [vmem:[#allocation83_spill] sm:$0xff] %v10608_v18  ;;  %v857_v34 = vmul.f32 %v10075_v45, %v10608_v18  ;;  %v17085_v57 = vrot.slane %v9987_v9, 1  ;;  %v17088_v4 = vrot.slane %v10002_v16, 1  ;;  %v17089_v3 = vrot.slane %v10005_v17, 1 }
 0x1ba   : > { %v927_v45 = vadd.f32 %v855_v44, %v692_v10  ;;  %v17091_v8 = vrot.slane %v10011_v20, 1  ;;  %v17092_v28 = vrot.slane %v10014_v21, 1  ;;  %v17094_v10 = vrot.slane %v10017_v22, 1 }
 0x1bb   : > { %v10628_v52 = vsel %vm1022_vm4, %v17086_v41, %v17085_v57  ;;  %v929_v60 = vadd.f32 %v857_v34, %v694_v63  ;;  %v10636_v38 = vsel %vm1022_vm4, %v17089_v3, %v17088_v4  ;;  %v3011_v41 = vadd.f32 %v2982_v61, %v2945_v32 }
 0x1bc   : > { %17087 = vst [vmem:[#allocation84_spill] sm:$0xff] %v10628_v52  ;;  %17090 = vst [vmem:[#allocation85_spill] sm:$0xff] %v10636_v38  ;;  %v10644_v29 = vsel %vm1022_vm4, %v17092_v28, %v17091_v8  ;;  %v987_v57 = vadd.f32 %v957_v25, %v923_v35  ;;  %v17095_v63 = vrot.slane %v10024_v27, 1  ;;  %v1078_v3 = vmul.f32 %v10159_v0, %v10628_v52 }
 0x1bd   : > { %17093 = vst [vmem:[#allocation86_spill] sm:$0xff] %v10644_v29  ;;  %v991_v4 = vadd.f32 %v961_v12, %v927_v45  ;;  %v993_v34 = vadd.f32 %v963_v59, %v929_v60  ;;  %v1082_v46 = vmul.f32 %v10159_v0, %v10644_v29  ;;  %v3107_v35 = vadd.f32 %v3048_v6, %v3011_v41 }
 0x1be   : > { %v10652_v44 = vsel %vm1022_vm4, %v17095_v63, %v17094_v10  ;;  %v1120_v25 = vsel %vm1090_vm6, %v1078_v3, 0.0  ;;  %v17097_v32 = vrot.slane %v9987_v9, 2  ;;  %v17098_v8 = vrot.slane %v9999_v15, 2 }
 0x1bf   : > { %17096 = vst [vmem:[#allocation87_spill] sm:$0xff] %v10652_v44  ;;  %v1084_v61 = vmul.f32 %v10159_v0, %v10652_v44  ;;  %v17100_v45 = vrot.slane %v10002_v16, 2  ;;  %v17101_v60 = vrot.slane %v10005_v17, 2  ;;  %v1124_v6 = vsel %vm1090_vm6, %v1082_v46, 0.0 }
 0x1c0   : > { %v10668_v28 = vsel %vm1185_vm5, %v17098_v8, %v17097_v32  ;;  %v1150_v59 = vadd.f32 %v1120_v25, %v987_v57  ;;  %v17103_v15 = vrot.slane %v10011_v20, 2  ;;  %v17104_v41 = vrot.slane %v10014_v21, 2 }
 0x1c1   : > { %17099 = vst [vmem:[#allocation88_spill] sm:$0xff] %v10668_v28  ;;  %v10676_v12 = vsel %vm1185_vm5, %v17101_v60, %v17100_v45  ;;  %v1126_v9 = vsel %vm1090_vm6, %v1084_v61, 0.0  ;;  %v3203_v10 = vadd.f32 %v3144_v19, %v3107_v35  ;;  %v1154_v63 = vadd.f32 %v1124_v6, %v991_v4 }
 0x1c2   : > { %17102 = vst [vmem:[#allocation89_spill] sm:$0xff] %v10676_v12  ;;  %v10688_v16 = vsel %vm1185_vm5, %v17104_v41, %v17103_v15  ;;  %v1156_v3 = vadd.f32 %v1126_v9, %v993_v34  ;;  %v17106_v32 = vrot.slane %v10017_v22, 2  ;;  %v17107_v8 = vrot.slane %v10024_v27, 2 }
 0x1c3   : > { %17105 = vst [vmem:[#allocation90_spill] sm:$0xff] %v10688_v16  ;;  %v1241_v20 = vmul.f32 %v10213_v5, %v10668_v28  ;;  %v1245_v57 = vmul.f32 %v10213_v5, %v10688_v16  ;;  %v17109_v19 = vrot.slane %v10205_v42, 6  ;;  %v17110_v4 = vrot.slane %v10202_v39, 6  ;;  %8780 = vmatprep.mubr.msk.f32.mxu1 %vm3220_vm7, %v3203_v10 }
 0x1c4   : > { %v10696_v46 = vsel %vm1185_vm5, %v17107_v8, %v17106_v32  ;;  %v1353_v34 = vmul.f32 %v10233_v49, %v10550_v62  ;;  %v1357_v35 = vmul.f32 %v10233_v49, %v10567_v37  ;;  %v17111_v45 = vrot.slane %v10205_v42, 7 }
 0x1c5   : > { %17108 = vst [vmem:[#allocation91_spill] sm:$0xff] %v10696_v46  ;;  %v1247_v61 = vmul.f32 %v10213_v5, %v10696_v46  ;;  %v10710_v22 = vsel %vm632_vm0, %v17110_v4, %v17109_v19  ;;  %v17112_v60 = vrot.slane %v10202_v39, 7  ;;  %v1283_v9 = vsel %vm1253_vm8, %v1241_v20, 0.0 }
 0x1c6   : > { %v1359_v25 = vmul.f32 %v10233_v49, %v10710_v22  ;;  %v1287_v15 = vsel %vm1253_vm8, %v1245_v57, 0.0  ;;  %v1457_v10 = vmul.f32 %v10283_v30, %v10591_v7  ;;  %v1313_v32 = vadd.f32 %v1283_v9, %v1150_v59 }
 0x1c7   : > { %v10725_v6 = vsel %vm795_vm1, %v17112_v60, %v17111_v45  ;;  %v1289_v41 = vsel %vm1253_vm8, %v1247_v61, 0.0  ;;  %v1317_v8 = vadd.f32 %v1287_v15, %v1154_v63  ;;  %v1461_v4 = vmul.f32 %v10283_v30, %v10608_v18 }
 0x1c8   : > { %v1319_v19 = vadd.f32 %v1289_v41, %v1156_v3  ;;  %v1463_v45 = vmul.f32 %v10283_v30, %v10725_v6  ;;  %v1557_v20 = vmul.f32 %v10292_v23, %v10005_v17  ;;  %v1561_v57 = vmul.f32 %v10292_v23, %v10024_v27 }
 0x1c9   : > { %v1563_v61 = vmul.f32 %v10292_v23, %v10205_v42  ;;  %v1417_v60 = vadd.f32 %v1353_v34, %v1313_v32  ;;  %v1421_v28 = vadd.f32 %v1357_v35, %v1317_v8  ;;  %v17113_v63 = vrot.slane %v10202_v39, 1 }
 0x1ca   : > { %v1423_v59 = vadd.f32 %v1359_v25, %v1319_v19  ;;  %v17114_v3 = vrot.slane %v10205_v42, 1  ;;  %v1629_v15 = vmul.f32 %v10309_v40, %v10636_v38  ;;  %v1633_v41 = vmul.f32 %v10309_v40, %v10652_v44 }
 0x1cb   : > { %v17115_v23 = vrot.slane %v10202_v39, 2  ;;  %v17116_v34 = vrot.slane %v10205_v42, 2  ;;  %v1521_v25 = vadd.f32 %v1457_v10, %v1417_v60  ;;  %v1525_v32 = vadd.f32 %v1461_v4, %v1421_v28 }
 0x1cc   : > { %v1599_v9 = vsel %vm1022_vm4, %v17114_v3, %v17113_v63  ;;  %v1527_v8 = vadd.f32 %v1463_v45, %v1423_v59  ;;  %v1733_v19 = vmul.f32 %v10337_v2, %v10676_v12  ;;  %v1661_v63 = vsel %vm1090_vm6, %v1629_v15, 0.0 }
 0x1cd   : > { %v1635_v52 = vmul.f32 %v10309_v40, %v1599_v9  ;;  %v1703_v35 = vsel %vm1185_vm5, %v17116_v34, %v17115_v23  ;;  %v1665_v3 = vsel %vm1090_vm6, %v1633_v41, 0.0  ;;  %v1737_v40 = vmul.f32 %v10337_v2, %v10696_v46 }
 0x1ce   : > { %v1589_v30 = vadd.f32 %v1557_v20, %v1521_v25  ;;  %v1593_v23 = vadd.f32 %v1561_v57, %v1525_v32  ;;  %v1595_v10 = vadd.f32 %v1563_v61, %v1527_v8  ;;  %v1739_v28 = vmul.f32 %v10337_v2, %v1703_v35 }
 0x1cf   : > { %v1667_v39 = vsel %vm1090_vm6, %v1635_v52, 0.0  ;;  %v1765_v4 = vsel %vm1253_vm8, %v1733_v19, 0.0  ;;  %v1769_v45 = vsel %vm1253_vm8, %v1737_v40, 0.0  ;;  %v1838_v60 = vmul.f32 %v10358_v31, %v10558_v50 }
 0x1d0   : > { %v1842_v52 = vmul.f32 %v10358_v31, %v10710_v22  ;;  %v1693_v59 = vadd.f32 %v1661_v63, %v1589_v30  ;;  %v1697_v15 = vadd.f32 %v1665_v3, %v1593_v23  ;;  %v1699_v41 = vadd.f32 %v1667_v39, %v1595_v10 }
 0x1d1   : > { %v1771_v20 = vsel %vm1253_vm8, %v1739_v28, 0.0  ;;  %v1943_v57 = vmul.f32 %v10389_v14, %v10600_v53  ;;  %v1947_v61 = vmul.f32 %v10389_v14, %v10725_v6  ;;  %v2044_v40 = vmul.f32 %v10409_v58, %v10014_v21 }
 0x1d2   : > { %v2048_v34 = vmul.f32 %v10409_v58, %v10205_v42  ;;  %v1797_v25 = vadd.f32 %v1765_v4, %v1693_v59  ;;  %v1801_v32 = vadd.f32 %v1769_v45, %v1697_v15  ;;  %v10791_v30 = vadd.f32 %v1771_v20, %v1699_v41 }
 0x1d3   : > { %v2117_v8 = vmul.f32 %v10433_v55, %v10644_v29  ;;  %v2121_v19 = vmul.f32 %v10433_v55, %v1599_v9  ;;  %v2222_v63 = vmul.f32 %v10435_v47, %v10688_v16  ;;  %v2226_v3 = vmul.f32 %v10435_v47, %v1703_v35 }
 0x1d4   : > { %v2323_v39 = vmul.f32 %v10445_v13, %v10567_v37  ;;  %v1902_v23 = vadd.f32 %v1838_v60, %v1797_v25  ;;  %v1906_v10 = vadd.f32 %v1842_v52, %v1801_v32  ;;  %v10805_v4 = vmul.f32 %v10445_v13, %v10710_v22  ;;  %v17119_v32 = vld [vmem:[#allocation70_spill] sm:$0xff] }
 0x1d5   : > { %v2149_v28 = vsel %vm1090_vm6, %v2117_v8, 0.0  ;;  %v2153_v45 = vsel %vm1090_vm6, %v2121_v19, 0.0  ;;  %v2254_v59 = vsel %vm1253_vm8, %v2222_v63, 0.0  ;;  %v2258_v15 = vsel %vm1253_vm8, %v2226_v3, 0.0 }
 0x1d6   : > { %17117 = vst [vmem:[#allocation92_spill] sm:$0xff] %v10805_v4  ;;  %v2423_v60 = vmul.f32 %v10455_v36, %v10608_v18  ;;  %v2007_v52 = vadd.f32 %v1943_v57, %v1902_v23  ;;  %v2011_v41 = vadd.f32 %v1947_v61, %v1906_v10  ;;  %v10817_v20 = vmul.f32 %v10455_v36, %v10725_v6 }
 0x1d7   : > { %v2523_v25 = vmul.f32 %v10471_v56, %v10024_v27  ;;  %v2591_v8 = vmul.f32 %v17119_v32, %v10652_v44  ;;  %v10824_v19 = vmul.f32 %v17119_v32, %v1599_v9  ;;  %v2691_v63 = vmul.f32 %v10491_v51, %v10696_v46 }
 0x1d8   : > { %17118 = vst [vmem:[#allocation93_spill] sm:$0xff] %v10817_v20  ;;  %v10829_v3 = vmul.f32 %v10491_v51, %v1703_v35  ;;  %v2076_v57 = vadd.f32 %v2044_v40, %v2007_v52  ;;  %v2080_v61 = vadd.f32 %v2048_v34, %v2011_v41  ;;  %v2791_v23 = vmul.f32 %v10493_v43, %v10710_v22  ;;  %v17122_v41 = vld [vmem:[#allocation61_spill] sm:$0xff] }
 0x1d9   : > { %17120 = vst [vmem:[#allocation94_spill] sm:$0xff] %v10824_v19  ;;  %v10835_v10 = vmul.f32 %v10499_v33, %v10725_v6  ;;  %v2622_v20 = vsel %vm1090_vm6, %v2591_v8, 0.0  ;;  %v2722_v4 = vsel %vm1253_vm8, %v2691_v63, 0.0  ;;  %v10843_v19 = vmul.f32 %v10501_v54, %v10205_v42  ;;  %v17124_v8 = vld [vmem:[#allocation62_spill] sm:$0xff] }
 0x1da   : > { %17121 = vst [vmem:[#allocation95_spill] sm:$0xff] %v10829_v3  ;;  %v3049_v40 = vmul.f32 %v10509_v24, %v1599_v9  ;;  %v2181_v34 = vadd.f32 %v2149_v28, %v2076_v57  ;;  %v2185_v52 = vadd.f32 %v2153_v45, %v2080_v61  ;;  %v3145_v22 = vmul.f32 %v10511_v26, %v1703_v35 }
 0x1db   : > { %v16700_v3 = vrot.slane %v17122_v41, 1  ;;  %v16699_v56 = vrot.slane %v17124_v8, 1  ;;  %v16702_v63 = vrot.slane %v17122_v41, 2  ;;  %v16701_v46 = vrot.slane %v17124_v8, 2 }
 0x1dc   : > { %v10850_v6 = vsel %vm1090_vm6, %v3049_v40, 0.0  ;;  %v2286_v42 = vadd.f32 %v2254_v59, %v2181_v34  ;;  %v10855_v44 = vadd.f32 %v2258_v15, %v2185_v52  ;;  %v10859_v9 = vsel %vm1253_vm8, %v3145_v22, 0.0  ;;  %v17129_v15 = vld [vmem:[#allocation63_spill] sm:$0xff] }
 0x1dd   : > { %17123 = vst [vmem:[#allocation61_spill] sm:$0xff] %v10850_v6  ;;  %17126 = vst [vmem:[#allocation96_spill] sm:$0xff] %v10859_v9  ;;  %v10862_v35 = vmul.f32 0.0, %v10445_v13  ;;  %v2085_v28 = vsel %vm1022_vm4, %v16700_v3, %v16699_v56  ;;  %v2190_v45 = vsel %vm1185_vm5, %v16702_v63, %v16701_v46  ;;  %v10877_v59 = vmul.f32 0.0, %v10455_v36  ;;  %v17134_v9 = vld [vmem:[#allocation64_spill] sm:$0xff] }
 0x1de   : > { %17125 = vst [vmem:[#allocation62_spill] sm:$0xff] %v10855_v44  ;;  %v2792_v57 = vmul.f32 %v10493_v43, %v17129_v15  ;;  %v2386_v61 = vadd.f32 %v2323_v39, %v2286_v42  ;;  %v2122_v40 = vmul.f32 %v10433_v55, %v2085_v28  ;;  %v2227_v34 = vmul.f32 %v10435_v47, %v2190_v45  ;;  %v17132_v39 = vld [vmem:[#allocation68_spill] sm:$0xff]  ;;  %v17133_v44 = vld [vmem:[#allocation79_spill] sm:$0xff] }
 0x1df   : > { %17127 = vst [vmem:[#allocation97_spill] sm:$0xff] %v10862_v35  ;;  %17128 = vst [vmem:[#allocation98_spill] sm:$0xff] %v10877_v59  ;;  %v2359_v22 = vsel %vm697_vm2, %v10862_v35, 0.0  ;;  %v2459_v3 = vsel %vm860_vm3, %v10877_v59, 0.0  ;;  %v2594_v46 = vmul.f32 %v17119_v32, %v2085_v28  ;;  %v2694_v63 = vmul.f32 %v10491_v51, %v2190_v45  ;;  %v17135_v35 = vld [vmem:[#allocation73_spill] sm:$0xff] }
 0x1e0   : > { %v2821_v15 = vsel %vm697_vm2, %v2792_v57, 0.0  ;;  %v2486_v42 = vadd.f32 %v2423_v60, %v2386_v61  ;;  %v2186_v43 = vadd.f32 %v2122_v40, %v17132_v39  ;;  %v2888_v13 = vmul.f32 %v10499_v33, %v17134_v9  ;;  %v17136_v57 = vld [vmem:[#allocation38_spill] sm:$0xff] }
 0x1e1   : > { %v2851_v36 = vadd.f32 %v2821_v15, %v17133_v44  ;;  %v2657_v47 = vadd.f32 %v2594_v46, %v17135_v35  ;;  %v2984_v59 = vmul.f32 %v10501_v54, %v17122_v41  ;;  %v3050_v32 = vmul.f32 %v10509_v24, %v2085_v28  ;;  %v17137_v46 = vld [vmem:[#allocation41_spill] sm:$0xff]  ;;  %v17138_v40 = vld [vmem:[#allocation42_spill] sm:$0xff] }
 0x1e2   : > { %v3146_v51 = vmul.f32 %v10511_v26, %v2190_v45  ;;  %v2554_v6 = vadd.f32 %v2523_v25, %v2486_v42  ;;  %v2291_v52 = vadd.f32 %v2227_v34, %v2186_v43  ;;  %v2917_v60 = vsel %vm860_vm3, %v2888_v13, 0.0  ;;  %17179 = vst [vmem:[#allocation42_spill] sm:$0xff] %v11384_v48 }
 0x1e3   : > { %v690_v44 = vmul.f32 %v17136_v57, %v10550_v62  ;;  %v10906_v61 = vadd.f32 %v2694_v63, %v2657_v47  ;;  %v2947_v9 = vadd.f32 %v2917_v60, %v2851_v36  ;;  %v853_v35 = vmul.f32 %v17137_v46, %v10591_v7  ;;  %v17139_v36 = vld [vmem:[#allocation58_spill] sm:$0xff] }
 0x1e4   : > { %v959_v15 = vmul.f32 %v17138_v40, %v10005_v17  ;;  %v2654_v28 = vadd.f32 %v2622_v20, %v2554_v6  ;;  %v2391_v39 = vadd.f32 %v2359_v22, %v2291_v52  ;;  %v1080_v43 = vmul.f32 %v10159_v0, %v10636_v38  ;;  %v17141_v52 = vld [vmem:[#allocation60_spill] sm:$0xff]  ;;  %v11330_v38 = vld [vmem:[%s9945_s12 + $0x28] sm:$0xff] }
 0x1e5   : > { %v1243_v13 = vmul.f32 %v10213_v5, %v10676_v12  ;;  %v3013_v25 = vadd.f32 %v2984_v59, %v2947_v9  ;;  %v925_v45 = vadd.f32 %v853_v35, %v690_v44  ;;  %v1355_v47 = vmul.f32 %v10233_v49, %v10558_v50  ;;  %v17140_v5 = vld [vmem:[#allocation59_spill] sm:$0xff]  ;;  %17176 = vst [vmem:[#allocation73_spill] sm:$0xff] %v11330_v38 }
 0x1e6   : > { %v1459_v63 = vmul.f32 %v17139_v36, %v10600_v53  ;;  %v2754_v34 = vadd.f32 %v2722_v4, %v2654_v28  ;;  %v10920_v42 = vadd.f32 %v2459_v3, %v2391_v39  ;;  %v1122_v17 = vsel %vm1090_vm6, %v1080_v43, 0.0 }
 0x1e7   : > { %v1285_v0 = vsel %vm1253_vm8, %v1243_v13, 0.0  ;;  %v3109_v20 = vadd.f32 %v3050_v32, %v3013_v25  ;;  %v989_v6 = vadd.f32 %v959_v15, %v925_v45  ;;  %v1559_v59 = vmul.f32 %v17140_v5, %v10014_v21 }
 0x1e8   : > { %v1631_v49 = vmul.f32 %v17141_v52, %v10644_v29  ;;  %v2850_v22 = vadd.f32 %v2791_v23, %v2754_v34  ;;  %v1735_v4 = vmul.f32 %v10337_v2, %v10688_v16  ;;  %v17142_v3 = vrot.slane %v17124_v8, 6  ;;  %v17148_v34 = vld [vmem:[#allocation87_spill] sm:$0xff] }
 0x1e9   : > { %v17143_v60 = vrot.slane %v17122_v41, 6  ;;  %v1840_v32 = vmul.f32 %v10358_v31, %v10567_v37  ;;  %v3205_v44 = vadd.f32 %v3146_v51, %v3109_v20  ;;  %v1152_v9 = vadd.f32 %v1122_v17, %v989_v6  ;;  %v17151_v20 = vld [vmem:[#allocation61_spill] sm:$0xff]  ;;  %v17152_v52 = vld [vmem:[#allocation91_spill] sm:$0xff] }
 0x1ea   : > { %v1663_v21 = vsel %vm1090_vm6, %v1631_v49, 0.0  ;;  %v2946_v46 = vadd.f32 %v10835_v10, %v2850_v22  ;;  %v1767_v2 = vsel %vm1253_vm8, %v1735_v4, 0.0  ;;  %v17144_v35 = vrot.slane %v17124_v8, 7  ;;  %v17153_v49 = vld [vmem:[#allocation65_spill] sm:$0xff] }
 0x1eb   : > { %v1806_v57 = vsel %vm632_vm0, %v17143_v60, %v17142_v3  ;;  %v17145_v40 = vrot.slane %v17122_v41, 7  ;;  %v1945_v51 = vmul.f32 %v10389_v14, %v10608_v18  ;;  %v1315_v28 = vadd.f32 %v1285_v0, %v1152_v9  ;;  %v17154_v3 = vld [vmem:[#allocation66_spill] sm:$0xff]  ;;  %v17155_v9 = vld [vmem:[#allocation96_spill] sm:$0xff] }
 0x1ec   : > { %v1844_v23 = vmul.f32 %v10358_v31, %v1806_v57  ;;  %v10958_v10 = vmul.f32 %v10409_v58, %v10024_v27  ;;  %v3012_v43 = vadd.f32 %v10843_v19, %v2946_v46  ;;  %v2050_v13 = vmul.f32 %v10409_v58, %v17124_v8 }
 0x1ed   : > { %v1911_v15 = vsel %vm795_vm1, %v17145_v40, %v17144_v35  ;;  %v17146_v25 = vrot.slane %v17122_v41, 1  ;;  %v17147_v45 = vrot.slane %v17124_v8, 1  ;;  %v17149_v0 = vrot.slane %v17122_v41, 2  ;;  %v17156_v40 = vld [vmem:[#allocation67_spill] sm:$0xff] }
 0x1ee   : > { %v1908_v39 = vadd.f32 %v1844_v23, %v10791_v30  ;;  %v1949_v31 = vmul.f32 %v10389_v14, %v1911_v15  ;;  %v2119_v30 = vmul.f32 %v10433_v55, %v17148_v34  ;;  %v1419_v14 = vadd.f32 %v1355_v47, %v1315_v28 }
 0x1ef   : > { %v2086_v36 = vsel %vm1022_vm4, %v17147_v45, %v17146_v25  ;;  %v17150_v19 = vrot.slane %v17124_v8, 2  ;;  %v3108_v6 = vadd.f32 %v17151_v20, %v3012_v43  ;;  %v2224_v22 = vmul.f32 %v17153_v49, %v17152_v52  ;;  %v17159_v25 = vld [vmem:[#allocation69_spill] sm:$0xff]  ;;  %v17163_v20 = vld [vmem:[#allocation95_spill] sm:$0xff] }
 0x1f0   : > { %v2013_v17 = vadd.f32 %v1949_v31, %v1908_v39  ;;  %v2123_v27 = vmul.f32 %v10433_v55, %v2086_v36  ;;  %v10981_v5 = vsel %vm1090_vm6, %v2119_v30, 0.0  ;;  %v1523_v4 = vadd.f32 %v1459_v63, %v1419_v14  ;;  %v17157_v63 = vld [vmem:[#allocation62_spill] sm:$0xff] }
 0x1f1   : > { %v2191_v58 = vsel %vm1185_vm5, %v17150_v19, %v17149_v0  ;;  %v2327_v60 = vmul.f32 %v17154_v3, %v1806_v57  ;;  %v3204_v23 = vadd.f32 %v17155_v9, %v3108_v6  ;;  %v10992_v46 = vsel %vm1253_vm8, %v2224_v22, 0.0  ;;  %v17160_v30 = vld [vmem:[#allocation70_spill] sm:$0xff]  ;;  %v17162_v0 = vld [vmem:[#allocation71_spill] sm:$0xff] }
 0x1f2   : > { %v2228_v47 = vmul.f32 %v17153_v49, %v2191_v58  ;;  %v2082_v55 = vadd.f32 %v2050_v13, %v2013_v17  ;;  %v2155_v41 = vsel %vm1090_vm6, %v2123_v27, 0.0  ;;  %v2427_v28 = vmul.f32 %v17156_v40, %v1911_v15  ;;  %v17158_v13 = vld [vmem:[#allocation52_spill] sm:$0xff]  ;;  %v17161_v17 = vld [vmem:[#allocation94_spill] sm:$0xff] }
 0x1f3   : > { %v1591_v39 = vadd.f32 %v1559_v59, %v1523_v4  ;;  %v2390_v43 = vadd.f32 %v2327_v60, %v17157_v63  ;;  %v11000_v45 = vmul.f32 %v17159_v25, %v17158_v13  ;;  %8781 = vmatmul.mubr.msk.f32.vlgmr.msra.gmra.mrb[0].mxu1 %vm3220_vm7, %v3204_v23  ;;  %v2595_v14 = vmul.f32 %v17160_v30, %v2086_v36  ;;  %v17164_v6 = vld [vmem:[#allocation74_spill] sm:$0xff]  ;;  %v17165_v4 = vld [vmem:[#allocation72_spill] sm:$0xff] }
 0x1f4   : > { %v2260_v35 = vsel %vm1253_vm8, %v2228_v47, 0.0  ;;  %v2187_v31 = vadd.f32 %v2155_v41, %v2082_v55  ;;  %v11007_v27 = vsel %vm1090_vm6, %v17161_v17, 0.0  ;;  %v2695_v19 = vmul.f32 %v17162_v0, %v2191_v58  ;;  %8831 = vmatpush3.bf16.msra.mxu1 %v17164_v6  ;;  %8783 = vmatprep.mubr.msk.f32.mxu1 %vm3220_vm7, %v3205_v44  ;;  %v17166_v44 = vld [vmem:[#allocation97_spill] sm:$0xff]  ;;  %v17168_v63 = vld [vmem:[#allocation98_spill] sm:$0xff] }
 0x1f5   : > { %v11013_v59 = vsel %vm1253_vm8, %v17163_v20, 0.0  ;;  %v1695_v49 = vadd.f32 %v1663_v21, %v1591_v39  ;;  %v2490_v47 = vadd.f32 %v2427_v28, %v2390_v43  ;;  %v11018_v55 = vmul.f32 0.0, %v17165_v4  ;;  %v11069_v20 = vld [vmem:[%s9945_s12] sm:$0xff] }
 0x1f6   : > { %v2292_v22 = vadd.f32 %v2260_v35, %v2187_v31  ;;  %v2626_v41 = vsel %vm1090_vm6, %v2595_v14, 0.0  ;;  %v2726_v3 = vsel %vm1253_vm8, %v2695_v19, 0.0  ;;  %v11025_v60 = vmul.f32 %v17165_v4, %v1806_v57 }
 0x1f7   : > { %v11028_v9 = vmul.f32 %v10499_v33, %v1911_v15  ;;  %v1799_v23 = vadd.f32 %v1767_v2, %v1695_v49  ;;  %v11033_v35 = vmul.f32 %v10501_v54, %v17124_v8  ;;  %v3051_v40 = vmul.f32 %v10509_v24, %v2086_v36  ;;  %v17169_v49 = vld [vmem:[#allocation33_spill] sm:$0xff] }
 0x1f8   : > { %v2392_v21 = vadd.f32 %v17166_v44, %v2292_v22  ;;  %v3147_v28 = vmul.f32 %v10511_v26, %v2191_v58  ;;  %v2823_v57 = vsel %vm697_vm2, %v11018_v55, 0.0  ;;  %v11041_v31 = vmul.f32 0.0, %v10499_v33  ;;  %v11090_v44 = vld [vmem:[#allocation11] ss:$0 sm:$0xff] }
 0x1f9   : > { %v11044_v2 = vmul.f32 0.0, %v10501_v54  ;;  %v1904_v15 = vadd.f32 %v1840_v32, %v1799_v23  ;;  %v11049_v13 = vsel %vm1090_vm6, %v3051_v40, 0.0  ;;  %v2853_v36 = vadd.f32 %v2823_v57, %v10906_v61  ;;  %v11088_v23 = vld [vmem:[%s9945_s12 + $0x8] sm:$0xff] }
 0x1fa   : > { %v2492_v43 = vadd.f32 %v17168_v63, %v2392_v21  ;;  %v11054_v58 = vsel %vm1253_vm8, %v3147_v28, 0.0  ;;  %v2919_v33 = vsel %vm860_vm3, %v11041_v31, 0.0  ;;  %v11060_v54 = vmul.f32 0.0, %v10509_v24  ;;  %v11092_v21 = vld [vmem:[#allocation11 + $0x1] ss:$0 sm:$0xff] }
 0x1fb   : > { %v11063_v32 = vmul.f32 0.0, %v10511_v26  ;;  %v2009_v14 = vadd.f32 %v1945_v51, %v1904_v15  ;;  %v2949_v17 = vadd.f32 %v2919_v33, %v2853_v36  ;;  %v2527_v61 = vmul.f32 %v17159_v25, %v17124_v8 }
 0x1fc   : > { %v2528_v19 = vmul.f32 0.0, %v17159_v25  ;;  %v11074_v6 = vsel %vm1090_vm6, %v11060_v54, 0.0  ;;  %v2596_v26 = vmul.f32 0.0, %v17160_v30  ;;  %v2696_v51 = vmul.f32 0.0, %v17162_v0 }
 0x1fd   : > { %v11079_v24 = vsel %vm1253_vm8, %v11063_v32, 0.0  ;;  %vm3663_vm9 = vcmp.lt.s32.totalorder %v17169_v49, 8  ;;  %v2078_v8 = vadd.f32 %v10958_v10, %v2009_v14  ;;  %v3015_v25 = vadd.f32 %v11044_v2, %v2949_v17 }
 0x1fe   : > { %v2558_v22 = vadd.f32 %v2527_v61, %v2490_v47  ;;  %v2559_v4 = vadd.f32 %v2528_v19, %v10920_v42  ;;  %v2560_v40 = vadd.f32 %v2528_v19, %v2492_v43  ;;  %v2628_v30 = vsel %vm1090_vm6, %v2596_v26, 0.0 }
 0x1ff   : > { %v2728_v0 = vsel %vm1253_vm8, %v2696_v51, 0.0  ;;  %v11099_v10 = vrot.slane %v11069_v20, 7  ;;  %v2183_v47 = vadd.f32 %v10981_v5, %v2078_v8  ;;  %v3111_v42 = vadd.f32 %v11060_v54, %v3015_v25  ;;  %v11112_v5 = vld [vmem:[#allocation11 + $0x2] ss:$0 sm:$0xff]  ;;  %v11114_v8 = vld [vmem:[#allocation11 + $0x3] ss:$0 sm:$0xff] }
 0x200   : > { %v2658_v28 = vadd.f32 %v2626_v41, %v2558_v22  ;;  %v2659_v15 = vadd.f32 %v2596_v26, %v2559_v4  ;;  %v2660_v63 = vadd.f32 %v2628_v30, %v2560_v40  ;;  %v11104_v36 = vrot.slane %v11088_v23, 7  ;;  %v11116_v41 = vld [vmem:[#allocation11 + $0x4] ss:$0 sm:$0xff]  ;;  %v11126_v4 = vld [vmem:[#allocation11 + $0x5] ss:$0 sm:$0xff] }
 0x201   : > { %v3594_v43 = vmul.f32 0.0, %v11090_v44  ;;  %v3627_v14 = vmul.f32 0.0, %v11092_v21  ;;  %v2288_v17 = vadd.f32 %v10992_v46, %v2183_v47  ;;  %v11110_v61 = vadd.f32 %v11063_v32, %v3111_v42  ;;  %v11130_v42 = vld [vmem:[#allocation11 + $0x6] ss:$0 sm:$0xff] }
 0x202   : > { %v2758_v19 = vadd.f32 %v2726_v3, %v2658_v28  ;;  %v2759_v52 = vadd.f32 %v2696_v51, %v2659_v15  ;;  %v2760_v26 = vadd.f32 %v2728_v0, %v2660_v63  ;;  %v11121_v22 = vrot.slane %v11069_v20, 1  ;;  %v17170_v3 = vld [vmem:[#allocation92_spill] sm:$0xff] }
 0x203   : > { %v3606_v25 = vsel %vm860_vm3, %v3594_v43, 0.0  ;;  %v11124_v46 = vrot.slane %v11088_v23, 1  ;;  %v2388_v51 = vadd.f32 %v17170_v3, %v2288_v17  ;;  %v3655_v28 = vmul.f32 0.0, %v11112_v5  ;;  %v17171_v43 = vld [vmem:[#allocation93_spill] sm:$0xff] }
 0x204   : > { %v2854_v40 = vadd.f32 %v11018_v55, %v2758_v19  ;;  %v2855_v30 = vadd.f32 %v2823_v57, %v2759_v52  ;;  %v3635_v47 = vadd.f32 %v3627_v14, %v3606_v25  ;;  %v2856_v0 = vadd.f32 %v11018_v55, %v2760_v26  ;;  %v11142_v57 = vld [vmem:[#allocation11 + $0x7] ss:$0 sm:$0xff] }
 0x205   : > { %v3689_v15 = vmul.f32 %v11114_v8, %v11099_v10  ;;  %v3718_v63 = vmul.f32 %v11116_v41, %v11069_v20  ;;  %v2488_v34 = vadd.f32 %v17171_v43, %v2388_v51  ;;  %v3740_v52 = vmul.f32 %v11126_v4, %v11121_v22 }
 0x206   : > { %v2950_v17 = vadd.f32 %v11041_v31, %v2854_v40  ;;  %v2951_v3 = vadd.f32 %v2919_v33, %v2855_v30  ;;  %v2952_v55 = vadd.f32 %v11041_v31, %v2856_v0  ;;  %v3667_v14 = vsel %vm3663_vm9, %v3655_v28, 0.0  ;;  %v11154_v30 = vld [vmem:[#allocation11 + $0x8] ss:$0 sm:$0xff] }
 0x207   : > { %v3697_v19 = vsel %vm860_vm3, %v3689_v15, 0.0  ;;  %v3769_v26 = vmul.f32 %v11130_v42, %v11104_v36  ;;  %v2556_v25 = vadd.f32 %v11000_v45, %v2488_v34  ;;  %v3675_v40 = vadd.f32 %v3667_v14, %v3635_v47  ;;  %v11177_v14 = vld [vmem:[#allocation16 + $0x6] ss:$0 sm:$0xff] }
 0x208   : > { %v3016_v33 = vadd.f32 %v11044_v2, %v2950_v17  ;;  %v3017_v51 = vadd.f32 %v11044_v2, %v2951_v3  ;;  %v3018_v31 = vadd.f32 %v11044_v2, %v2952_v55  ;;  %v3748_v0 = vsel %vm3663_vm9, %v3740_v52, 0.0  ;;  %v11166_v17 = vld [vmem:[#allocation16 + $0x1] ss:$0 sm:$0xff]  ;;  %v11168_v2 = vld [vmem:[#allocation16 + $0x3] ss:$0 sm:$0xff] }
 0x209   : > { %v3777_v28 = vsel %vm860_vm3, %v3769_v26, 0.0  ;;  %v3798_v15 = vmul.f32 %v11142_v57, %v11088_v23  ;;  %v2656_v34 = vadd.f32 %v11007_v27, %v2556_v25  ;;  %v3705_v47 = vadd.f32 %v3697_v19, %v3675_v40  ;;  %17172 = vst [vmem:[#allocation63_spill] sm:$0xff] %v11166_v17  ;;  %17173 = vst [vmem:[#allocation68_spill] sm:$0xff] %v11168_v2  ;;  %v11189_v40 = vld [vmem:[%s9945_s12 + $0x10] sm:$0xff] }
 0x20a   : > { %v3112_v45 = vadd.f32 %v11074_v6, %v3016_v33  ;;  %v3113_v43 = vadd.f32 %v11060_v54, %v3017_v51  ;;  %v3114_v3 = vadd.f32 %v11074_v6, %v3018_v31  ;;  %v3819_v52 = vmul.f32 %v11154_v30, %v11124_v46  ;;  %v11179_v54 = vld [vmem:[#allocation16 + $0x8] ss:$0 sm:$0xff]  ;;  %v4675_v33 = vld [vmem:[#allocation17] sm:$0xff] }
 0x20b   : > { %v4031_v55 = vmul.f32 %v11166_v17, %v11099_v10  ;;  %v4076_v27 = vmul.f32 %v11168_v2, %v11121_v22  ;;  %v2756_v19 = vadd.f32 %v11013_v59, %v2656_v34  ;;  %v3726_v25 = vadd.f32 %v3718_v63, %v3705_v47  ;;  %v4676_v51 = vld [vmem:[#allocation17 + $0x8] sm:$0xff] }
 0x20c   : > { %v11183_v26 = vadd.f32 %v11079_v24, %v3112_v45  ;;  %v11186_v6 = vadd.f32 %v11063_v32, %v3113_v43  ;;  %v11192_v31 = vadd.f32 %v11079_v24, %v3114_v3  ;;  %v3827_v18 = vsel %vm3663_vm9, %v3819_v52, 0.0 }
 0x20d   : > { %v11198_v59 = vsel %vm860_vm3, %v4031_v55, 0.0  ;;  %v11202_v34 = vsel %vm3663_vm9, %v4076_v27, 0.0  ;;  %v2852_v32 = vadd.f32 %v11025_v60, %v2756_v19  ;;  %v3756_v63 = vadd.f32 %v3748_v0, %v3726_v25 }
 0x20e   : > { %v4168_v45 = vmul.f32 %v11177_v14, %v11099_v10  ;;  %v4218_v24 = vmul.f32 %v11179_v54, %v11121_v22  ;;  %v11209_v43 = vpack.c.bf16 %v4676_v51, %v4675_v33  ;;  %v11212_v47 = vrot.slane %v11189_v40, 7 }
 0x20f   : > { %v3595_v3 = vmul.f32 %v11090_v44, %v11099_v10  ;;  %v3628_v52 = vmul.f32 %v11092_v21, %v11069_v20  ;;  %v2948_v60 = vadd.f32 %v11028_v9, %v2852_v32  ;;  %v3785_v0 = vadd.f32 %v3777_v28, %v3756_v63 }
 0x210   : > { %v11221_v55 = vsel %vm860_vm3, %v4168_v45, 0.0  ;;  %v11225_v27 = vsel %vm3663_vm9, %v4218_v24, 0.0  ;;  %8833 = vmatprep.subr.bf16.mxu1 %v11209_v43  ;;  %v11231_v25 = vrot.slane %v11189_v40, 1  ;;  %v3656_v9 = vmul.f32 %v11112_v5, %v11121_v22  ;;  %v11241_v45 = vld [vmem:[%s9945_s12 + $0x18] sm:$0xff] }
 0x211   : > { %v3607_v19 = vsel %vm860_vm3, %v3595_v3, 0.0  ;;  %v3690_v28 = vmul.f32 %v11114_v8, %v11104_v36  ;;  %v3014_v33 = vadd.f32 %v11033_v35, %v2948_v60  ;;  %v3806_v51 = vadd.f32 %v3798_v15, %v3785_v0 }
 0x212   : > { %v3636_v32 = vadd.f32 %v3628_v52, %v3607_v19  ;;  %v3719_v63 = vmul.f32 %v11116_v41, %v11088_v23  ;;  %v3668_v24 = vsel %vm3663_vm9, %v3656_v9, 0.0  ;;  %v3741_v37 = vmul.f32 %v11126_v4, %v11124_v46 }
 0x213   : > { %v3698_v3 = vsel %vm860_vm3, %v3690_v28, 0.0  ;;  %v3770_v53 = vmul.f32 %v11130_v42, %v11212_v47  ;;  %v3110_v35 = vadd.f32 %v11049_v13, %v3014_v33  ;;  %v3835_v15 = vadd.f32 %v3827_v18, %v3806_v51 }
 0x214   : > { %v3676_v52 = vadd.f32 %v3668_v24, %v3636_v32  ;;  %v3799_v60 = vmul.f32 %v11142_v57, %v11189_v40  ;;  %v3749_v0 = vsel %vm3663_vm9, %v3741_v37, 0.0  ;;  %v3820_v9 = vmul.f32 %v11154_v30, %v11231_v25 }
 0x215   : > { %v3778_v19 = vsel %vm860_vm3, %v3770_v53, 0.0  ;;  %v11261_v28 = vrot.slane %v11241_v45, 7  ;;  %v3206_v13 = vadd.f32 %v11054_v58, %v3110_v35  ;;  %v3596_v33 = vmul.f32 %v11090_v44, %v11104_v36 }
 0x216   : > { %v3706_v18 = vadd.f32 %v3698_v3, %v3676_v52  ;;  %v3629_v51 = vmul.f32 %v11092_v21, %v11088_v23  ;;  %v3828_v37 = vsel %vm3663_vm9, %v3820_v9, 0.0  ;;  %v11271_v53 = vrot.slane %v11241_v45, 1  ;;  %v11285_v9 = vld [vmem:[%s9945_s12 + $0x20] sm:$0xff] }
 0x217   : > { %v3657_v32 = vmul.f32 %v11112_v5, %v11124_v46  ;;  %v3691_v24 = vmul.f32 %v11114_v8, %v11212_v47  ;;  %8784 = vmatmul.mubr.msk.f32.gmra.mrb[2].mxu1 %vm3220_vm7, %v3206_v13  ;;  %v3608_v3 = vsel %vm860_vm3, %v3596_v33, 0.0  ;;  %v3720_v35 = vmul.f32 %v11116_v41, %v11189_v40 }
 0x218   : > { %17174 = vst [vmem:[#allocation79_spill] sm:$0xff] %v11271_v53  ;;  %v3727_v58 = vadd.f32 %v3719_v63, %v3706_v18  ;;  %v3742_v52 = vmul.f32 %v11126_v4, %v11231_v25  ;;  %8786 = vmatprep.mubr.msk.f32.mxu1 %vm3220_vm7, %v11110_v61  ;;  %v3637_v16 = vadd.f32 %v3629_v51, %v3608_v3  ;;  %v11304_v3 = vrot.slane %v11285_v9, 7 }
 0x219   : > { %v3669_v29 = vsel %vm3663_vm9, %v3657_v32, 0.0  ;;  %v3699_v63 = vsel %vm860_vm3, %v3691_v24, 0.0  ;;  %v3771_v13 = vmul.f32 %v11130_v42, %v11261_v28  ;;  %v3800_v50 = vmul.f32 %v11142_v57, %v11241_v45 }
 0x21a   : > { %v3757_v18 = vadd.f32 %v3749_v0, %v3727_v58  ;;  %v3750_v33 = vsel %vm3663_vm9, %v3742_v52, 0.0  ;;  %v3821_v61 = vmul.f32 %v11154_v30, %v11271_v53  ;;  %v3677_v51 = vadd.f32 %v3669_v29, %v3637_v16 }
 0x21b   : > { %v3779_v32 = vsel %vm860_vm3, %v3771_v13, 0.0  ;;  %v3597_v0 = vmul.f32 %v11090_v44, %v11212_v47  ;;  %8787 = vmatmul.mubr.msk.f32.gmra.mrb[4].mxu1 %vm3220_vm7, %v11183_v26  ;;  %v3630_v29 = vmul.f32 %v11092_v21, %v11189_v40  ;;  %v11315_v16 = vrot.slane %v11285_v9, 1 }
 0x21c   : > { %v3786_v24 = vadd.f32 %v3778_v19, %v3757_v18  ;;  %v3829_v58 = vsel %vm3663_vm9, %v3821_v61, 0.0  ;;  %8789 = vmatprep.mubr.msk.f32.mxu1 %vm3220_vm7, %v11186_v6  ;;  %v3707_v52 = vadd.f32 %v3699_v63, %v3677_v51  ;;  %v3658_v26 = vmul.f32 %v11112_v5, %v11231_v25 }
 0x21d   : > { %17175 = vst [vmem:[#allocation64_spill] sm:$0xff] %v11315_v16  ;;  %v3609_v13 = vsel %vm860_vm3, %v3597_v0, 0.0  ;;  %v3692_v19 = vmul.f32 %v11114_v8, %v11261_v28  ;;  %v3721_v7 = vmul.f32 %v11116_v41, %v11241_v45  ;;  %v3743_v12 = vmul.f32 %v11126_v4, %v11271_v53 }
 0x21e   : > { %v3807_v18 = vadd.f32 %v3799_v60, %v3786_v24  ;;  %v3638_v61 = vadd.f32 %v3630_v29, %v3609_v13  ;;  %v3728_v6 = vadd.f32 %v3720_v35, %v3707_v52  ;;  %v3670_v63 = vsel %vm3663_vm9, %v3658_v26, 0.0 }
 0x21f   : > { %v3700_v51 = vsel %vm860_vm3, %v3692_v19, 0.0  ;;  %v3772_v0 = vmul.f32 %v11130_v42, %v11304_v3  ;;  %8790 = vmatmul.mubr.msk.f32.gmra.mrb[6].mxu1 %vm3220_vm7, %v11192_v31  ;;  %v3751_v29 = vsel %vm3663_vm9, %v3743_v12, 0.0  ;;  %v3801_v35 = vmul.f32 %v11142_v57, %v11285_v9 }
 0x220   : > { %v3836_v60 = vadd.f32 %v3828_v37, %v3807_v18  ;;  %v3678_v24 = vadd.f32 %v3670_v63, %v3638_v61  ;;  %8796 = vmatprep.mubr.msk.f32.mxu1 %vm3220_vm7, %v3835_v15  ;;  %v3758_v52 = vadd.f32 %v3750_v33, %v3728_v6  ;;  %v3822_v26 = vmul.f32 %v11154_v30, %v11315_v16 }
 0x221   : > { %v3780_v13 = vsel %vm860_vm3, %v3772_v0, 0.0  ;;  %v11350_v19 = vrot.slane %v11330_v38, 7  ;;  %v3598_v37 = vmul.f32 %v11090_v44, %v11261_v28  ;;  %v3631_v12 = vmul.f32 %v11092_v21, %v11241_v45 }
 0x222   : > { %v3708_v31 = vadd.f32 %v3700_v51, %v3678_v24  ;;  %v11357_v18 = vrot.slane %v11330_v38, 1  ;;  %v3787_v15 = vadd.f32 %v3779_v32, %v3758_v52  ;;  %v3830_v33 = vsel %vm3663_vm9, %v3822_v26, 0.0 }
 0x223   : > { %17177 = vst [vmem:[#allocation38_spill] sm:$0xff] %v11350_v19  ;;  %v3659_v61 = vmul.f32 %v11112_v5, %v11271_v53  ;;  %v3693_v6 = vmul.f32 %v11114_v8, %v11304_v3  ;;  %8797 = vmatmul.mubr.msk.f32.vlgmr.msra.gmra.mrb[8].mxu1 %vm3220_vm7, %v3836_v60  ;;  %v3610_v51 = vsel %vm860_vm3, %v3598_v37, 0.0  ;;  %v3722_v0 = vmul.f32 %v11116_v41, %v11285_v9 }
 0x224   : > { %17178 = vst [vmem:[#allocation41_spill] sm:$0xff] %v11357_v18  ;;  %v3729_v63 = vadd.f32 %v3721_v7, %v3708_v31  ;;  %v3744_v32 = vmul.f32 %v11126_v4, %v11315_v16  ;;  %8835 = vmatpush3.bf16.msra.mxu1 %v11209_v43  ;;  %v3808_v24 = vadd.f32 %v3800_v50, %v3787_v15  ;;  %v11389_v15 = vrot.slane %v11384_v48, 7 }
 0x225   : > { %v3639_v52 = vadd.f32 %v3631_v12, %v3610_v51  ;;  %v3671_v26 = vsel %vm3663_vm9, %v3659_v61, 0.0  ;;  %v3701_v60 = vsel %vm860_vm3, %v3693_v6, 0.0  ;;  %v3773_v37 = vmul.f32 %v11130_v42, %v11350_v19 }
 0x226   : > { %v3759_v7 = vadd.f32 %v3751_v29, %v3729_v63  ;;  %v3752_v31 = vsel %vm3663_vm9, %v3744_v32, 0.0  ;;  %v3802_v62 = vmul.f32 %v11142_v57, %v11330_v38  ;;  %v3837_v50 = vadd.f32 %v3829_v58, %v3808_v24  ;;  %17180 = vst [vmem:[#allocation58_spill] sm:$0xff] %v11389_v15 }
 0x227   : > { %v3679_v43 = vadd.f32 %v3671_v26, %v3639_v52  ;;  %v3823_v12 = vmul.f32 %v11154_v30, %v11357_v18  ;;  %v3781_v61 = vsel %vm860_vm3, %v3773_v37, 0.0  ;;  %v3599_v6 = vmul.f32 %v11090_v44, %v11304_v3 }
 0x228   : > { %v3788_v29 = vadd.f32 %v3780_v13, %v3759_v7  ;;  %v3632_v63 = vmul.f32 %v11092_v21, %v11285_v9  ;;  %8799 = vmatprep.mubr.msk.f32.mxu1 %vm3220_vm7, %v3837_v50  ;;  %v11401_v32 = vrot.slane %v11384_v48, 1  ;;  %v3660_v13 = vmul.f32 %v11112_v5, %v11315_v16 }
 0x229   : > { %v3709_v58 = vadd.f32 %v3701_v60, %v3679_v43  ;;  %v3831_v51 = vsel %vm3663_vm9, %v3823_v12, 0.0  ;;  %v3611_v52 = vsel %vm860_vm3, %v3599_v6, 0.0  ;;  %v3694_v26 = vmul.f32 %v11114_v8, %v11350_v19 }
 0x22a   : > { %17181 = vst [vmem:[#allocation59_spill] sm:$0xff] %v11401_v32  ;;  %v3809_v24 = vadd.f32 %v3801_v35, %v3788_v29  ;;  %v3723_v60 = vmul.f32 %v11116_v41, %v11330_v38  ;;  %v3640_v37 = vadd.f32 %v3632_v63, %v3611_v52  ;;  %v3672_v50 = vsel %vm3663_vm9, %v3660_v13, 0.0 }
 0x22b   : > { %v3730_v7 = vadd.f32 %v3722_v0, %v3709_v58  ;;  %v3745_v43 = vmul.f32 %v11126_v4, %v11357_v18  ;;  %v3702_v35 = vsel %vm860_vm3, %v3694_v26, 0.0  ;;  %v3774_v29 = vmul.f32 %v11130_v42, %v11389_v15  ;;  %v11429_v58 = vld [vmem:[%s9945_s12 + $0x38] sm:$0xff] }
 0x22c   : > { %v3838_v12 = vadd.f32 %v3830_v33, %v3809_v24  ;;  %v3803_v6 = vmul.f32 %v11142_v57, %v11384_v48  ;;  %v3680_v16 = vadd.f32 %v3672_v50, %v3640_v37  ;;  %v3824_v63 = vmul.f32 %v11154_v30, %v11401_v32  ;;  %17182 = vst [vmem:[#allocation60_spill] sm:$0xff] %v11429_v58 }
 0x22d   : > { %v3760_v11 = vadd.f32 %v3752_v31, %v3730_v7  ;;  %v3753_v0 = vsel %vm3663_vm9, %v3745_v43, 0.0  ;;  %v3782_v33 = vsel %vm860_vm3, %v3774_v29, 0.0  ;;  %v3600_v13 = vmul.f32 %v11090_v44, %v11350_v19 }
 0x22e   : > { %8800 = vmatmul.mubr.msk.f32.gmra.mrb[10].mxu1 %vm3220_vm7, %v3838_v12  ;;  %v3633_v31 = vmul.f32 %v11092_v21, %v11330_v38  ;;  %v3661_v24 = vmul.f32 %v11112_v5, %v11357_v18  ;;  %v3710_v26 = vadd.f32 %v3702_v35, %v3680_v16  ;;  %v3832_v7 = vsel %vm3663_vm9, %v3824_v63, 0.0 }
 0x22f   : > { %v3789_v52 = vadd.f32 %v3781_v61, %v3760_v11  ;;  %v11440_v37 = vrot.slane %v11429_v58, 7  ;;  %v3612_v50 = vsel %vm860_vm3, %v3600_v13, 0.0  ;;  %v3695_v12 = vmul.f32 %v11114_v8, %v11389_v15 }
 0x230   : > { %v3673_v43 = vsel %vm3663_vm9, %v3661_v24, 0.0  ;;  %v3724_v29 = vmul.f32 %v11116_v41, %v11384_v48  ;;  %v3731_v16 = vadd.f32 %v3723_v60, %v3710_v26  ;;  %v3641_v61 = vadd.f32 %v3633_v31, %v3612_v50 }
 0x231   : > { %17183 = vst [vmem:[#allocation61_spill] sm:$0xff] %v11440_v37  ;;  %v3810_v11 = vadd.f32 %v3802_v62, %v3789_v52  ;;  %v11451_v35 = vrot.slane %v11429_v58, 1  ;;  %v3703_v63 = vsel %vm860_vm3, %v3695_v12, 0.0  ;;  %v3746_v13 = vmul.f32 %v11126_v4, %v11401_v32 }
 0x232   : > { %v3775_v24 = vmul.f32 %v11130_v42, %v11440_v37  ;;  %v3804_v18 = vmul.f32 %v11142_v57, %v11429_v58  ;;  %v3761_v38 = vadd.f32 %v3753_v0, %v3731_v16  ;;  %v3681_v62 = vadd.f32 %v3673_v43, %v3641_v61 }
 0x233   : > { %17184 = vst [vmem:[#allocation65_spill] sm:$0xff] %v11451_v35  ;;  %v3839_v19 = vadd.f32 %v3831_v51, %v3810_v11  ;;  %v3825_v60 = vmul.f32 %v11154_v30, %v11451_v35  ;;  %v3754_v31 = vsel %vm3663_vm9, %v3746_v13, 0.0  ;;  %v3601_v26 = vmul.f32 %v11090_v44, %v11389_v15 }
 0x234   : > { %v3783_v52 = vsel %vm860_vm3, %v3775_v24, 0.0  ;;  %v3634_v50 = vmul.f32 %v11092_v21, %v11384_v48  ;;  %v3790_v51 = vadd.f32 %v3782_v33, %v3761_v38  ;;  %v3711_v0 = vadd.f32 %v3703_v63, %v3681_v62  ;;  %v11721_v48 = vld [vmem:[#allocation16 + $0x18] ss:$0 sm:$0xff] }
 0x235   : > { %8802 = vmatprep.mubr.msk.f32.mxu1 %vm3220_vm7, %v3839_v19  ;;  %v3833_v43 = vsel %vm3663_vm9, %v3825_v60, 0.0  ;;  %v3662_v12 = vmul.f32 %v11112_v5, %v11401_v32  ;;  %v3613_v11 = vsel %vm860_vm3, %v3601_v26, 0.0  ;;  %v3696_v16 = vmul.f32 %v11114_v8, %v11440_v37  ;;  %v11681_v37 = vld [vmem:[#allocation16 + $0x11] ss:$0 sm:$0xff]  ;;  %17198 = vst [vmem:[#allocation98_spill] sm:$0xff] %v11721_v48 }
 0x236   : > { %v3725_v44 = vmul.f32 %v11116_v41, %v11429_v58  ;;  %v3747_v21 = vmul.f32 %v11126_v4, %v11451_v35  ;;  %v3811_v38 = vadd.f32 %v3803_v6, %v3790_v51  ;;  %v3732_v19 = vadd.f32 %v3724_v29, %v3711_v0  ;;  %v11493_v6 = vld [vmem:[#allocation16] ss:$0 sm:$0xff]  ;;  %v11683_v58 = vld [vmem:[#allocation16 + $0x12] ss:$0 sm:$0xff] }
 0x237   : > { %v3642_v33 = vadd.f32 %v3634_v50, %v3613_v11  ;;  %v3674_v61 = vsel %vm3663_vm9, %v3662_v12, 0.0  ;;  %v3704_v5 = vsel %vm860_vm3, %v3696_v16, 0.0  ;;  %v3776_v8 = vmul.f32 0.0, %v11130_v42  ;;  %17185 = vst [vmem:[#allocation66_spill] sm:$0xff] %v11493_v6  ;;  %17196 = vst [vmem:[#allocation72_spill] sm:$0xff] %v11683_v58 }
 0x238   : > { %v3755_v63 = vsel %vm3663_vm9, %v3747_v21, 0.0  ;;  %v3805_v13 = vmul.f32 0.0, %v11142_v57  ;;  %v3840_v41 = vadd.f32 %v3832_v7, %v3811_v38  ;;  %v3762_v24 = vadd.f32 %v3754_v31, %v3732_v19  ;;  %v11523_v38 = vld [vmem:[#allocation16 + $0x2] ss:$0 sm:$0xff] }
 0x239   : > { %v3682_v62 = vadd.f32 %v3674_v61, %v3642_v33  ;;  %v3826_v4 = vmul.f32 0.0, %v11154_v30  ;;  %v3784_v29 = vsel %vm860_vm3, %v3776_v8, 0.0  ;;  %v11498_v60 = vadd.s32 2, %v9971_v1  ;;  %17186 = vst [vmem:[#allocation96_spill] sm:$0xff] %v11523_v38 }
 0x23a   : > { %v11501_v26 = vrot.slane %v11069_v20, 6  ;;  %v11504_v42 = vrot.slane %v11088_v23, 6  ;;  %8803 = vmatmul.mubr.msk.f32.gmra.mrb[12].mxu1 %vm3220_vm7, %v3840_v41  ;;  %v3791_v57 = vadd.f32 %v3783_v52, %v3762_v24  ;;  %v11510_v31 = vrot.slane %v11189_v40, 6 }
 0x23b   : > { %v3712_v7 = vadd.f32 %v3704_v5, %v3682_v62  ;;  %v3834_v30 = vsel %vm3663_vm9, %v3826_v4, 0.0  ;;  %v11513_v50 = vrot.slane %v11241_v45, 6  ;;  %v4000_v51 = vmul.f32 0.0, %v11493_v6 }
 0x23c   : > { %v4001_v0 = vmul.f32 %v11493_v6, %v11501_v26  ;;  %v4002_v12 = vmul.f32 %v11493_v6, %v11504_v42  ;;  %v3812_v11 = vadd.f32 %v3804_v18, %v3791_v57  ;;  %v4003_v16 = vmul.f32 %v11493_v6, %v11510_v31 }
 0x23d   : > { %v3733_v52 = vadd.f32 %v3725_v44, %v3712_v7  ;;  %v4030_v21 = vmul.f32 0.0, %v11166_v17  ;;  %v4011_v19 = vsel %vm697_vm2, %v4000_v51, 0.0  ;;  %v4032_v18 = vmul.f32 %v11166_v17, %v11104_v36 }
 0x23e   : > { %v4012_v33 = vsel %vm697_vm2, %v4001_v0, 0.0  ;;  %v4013_v61 = vsel %vm697_vm2, %v4002_v12, 0.0  ;;  %v3841_v44 = vadd.f32 %v3833_v43, %v3812_v11  ;;  %v4014_v8 = vsel %vm697_vm2, %v4003_v16, 0.0 }
 0x23f   : > { %v3763_v5 = vadd.f32 %v3755_v63, %v3733_v52  ;;  %v4033_v41 = vmul.f32 %v11166_v17, %v11212_v47  ;;  %v4037_v24 = vsel %vm860_vm3, %v4030_v21, 0.0  ;;  %v4039_v62 = vsel %vm860_vm3, %v4032_v18, 0.0 }
 0x240   : > { %v4045_v4 = vadd.f32 %v11198_v59, %v4012_v33  ;;  %v4056_v57 = vmul.f32 0.0, %v11523_v38  ;;  %8805 = vmatprep.mubr.msk.f32.mxu1 %vm3220_vm7, %v3841_v44  ;;  %v4044_v7 = vadd.f32 %v4037_v24, %v4011_v19  ;;  %v4046_v51 = vadd.f32 %v4039_v62, %v4013_v61  ;;  %v11557_v44 = vld [vmem:[#allocation16 + $0x4] ss:$0 sm:$0xff]  ;;  %v11566_v24 = vld [vmem:[#allocation16 + $0x5] ss:$0 sm:$0xff] }
 0x241   : > { %v3792_v43 = vadd.f32 %v3784_v29, %v3763_v5  ;;  %v4040_v63 = vsel %vm860_vm3, %v4033_v41, 0.0  ;;  %v4057_v12 = vmul.f32 %v11523_v38, %v11069_v20  ;;  %v4058_v11 = vmul.f32 %v11523_v38, %v11088_v23  ;;  %17187 = vst [vmem:[#allocation67_spill] sm:$0xff] %v11566_v24 }
 0x242   : > { %v4047_v0 = vadd.f32 %v4040_v63, %v4014_v8  ;;  %v4059_v59 = vmul.f32 %v11523_v38, %v11189_v40  ;;  %v4063_v16 = vadd.f32 %v4056_v57, %v4044_v7  ;;  %v4075_v21 = vmul.f32 0.0, %v11168_v2 }
 0x243   : > { %v3813_v52 = vadd.f32 %v3805_v13, %v3792_v43  ;;  %v4077_v29 = vmul.f32 %v11168_v2, %v11124_v46  ;;  %v4064_v33 = vadd.f32 %v4057_v12, %v4045_v4  ;;  %v4065_v19 = vadd.f32 %v4058_v11, %v4046_v51 }
 0x244   : > { %v4066_v61 = vadd.f32 %v4059_v59, %v4047_v0  ;;  %v4078_v18 = vmul.f32 %v11168_v2, %v11231_v25  ;;  %v4082_v8 = vsel %vm3663_vm9, %v4075_v21, 0.0  ;;  %v11564_v41 = vrot.slane %v11069_v20, 2 }
 0x245   : > { %v3842_v5 = vadd.f32 %v3834_v30, %v3813_v52  ;;  %v4084_v13 = vsel %vm3663_vm9, %v4077_v29, 0.0  ;;  %v4089_v4 = vadd.f32 %v4082_v8, %v4063_v16  ;;  %v4090_v57 = vadd.f32 %v11202_v34, %v4064_v33 }
 0x246   : > { %v4085_v62 = vsel %vm3663_vm9, %v4078_v18, 0.0  ;;  %v4091_v43 = vadd.f32 %v4084_v13, %v4065_v19  ;;  %v11573_v63 = vrot.slane %v11088_v23, 2  ;;  %v11576_v7 = vrot.slane %v11189_v40, 2 }
 0x247   : > { %8806 = vmatmul.mubr.msk.f32.gmra.mrb[14].mxu1 %vm3220_vm7, %v3842_v5  ;;  %v4092_v30 = vadd.f32 %v4085_v62, %v4066_v61  ;;  %v4107_v51 = vmul.f32 0.0, %v11557_v44  ;;  %v4108_v0 = vmul.f32 %v11557_v44, %v11564_v41  ;;  %vm4114_vm10 = vcmp.lt.s32.totalorder %v11498_v60, 8 }
 0x248   : > { %v4138_v12 = vmul.f32 0.0, %v11566_v24  ;;  %v4139_v34 = vmul.f32 %v11566_v24, %v11501_v26  ;;  %v4109_v11 = vmul.f32 %v11557_v44, %v11573_v63  ;;  %v4110_v59 = vmul.f32 %v11557_v44, %v11576_v7 }
 0x249   : > { %v4118_v52 = vsel %vm4114_vm10, %v4107_v51, 0.0  ;;  %v4140_v16 = vmul.f32 %v11566_v24, %v11504_v42  ;;  %v4119_v21 = vsel %vm4114_vm10, %v4108_v0, 0.0  ;;  %v4141_v33 = vmul.f32 %v11566_v24, %v11510_v31  ;;  %v11609_v0 = vld [vmem:[#allocation16 + $0x7] ss:$0 sm:$0xff] }
 0x24a   : > { %v4125_v29 = vadd.f32 %v4118_v52, %v4089_v4  ;;  %v4142_v19 = vmul.f32 %v11566_v24, %v11513_v50  ;;  %v4120_v61 = vsel %vm4114_vm10, %v4109_v11, 0.0  ;;  %v4121_v18 = vsel %vm4114_vm10, %v4110_v59, 0.0  ;;  %17188 = vst [vmem:[#allocation62_spill] sm:$0xff] %v11609_v0 }
 0x24b   : > { %v4126_v5 = vadd.f32 %v4119_v21, %v4090_v57  ;;  %v4146_v8 = vsel %vm697_vm2, %v4138_v12, 0.0  ;;  %v4127_v13 = vadd.f32 %v4120_v61, %v4091_v43  ;;  %v4128_v62 = vadd.f32 %v4121_v18, %v4092_v30  ;;  %v11615_v21 = vld [vmem:[#allocation16 + $0x9] ss:$0 sm:$0xff] }
 0x24c   : > { %v4147_v4 = vsel %vm697_vm2, %v4139_v34, 0.0  ;;  %v4148_v51 = vsel %vm697_vm2, %v4140_v16, 0.0  ;;  %v4149_v11 = vsel %vm697_vm2, %v4141_v33, 0.0  ;;  %v4150_v59 = vsel %vm697_vm2, %v4142_v19, 0.0 }
 0x24d   : > { %v4154_v57 = vadd.f32 %v4146_v8, %v4125_v29  ;;  %v4155_v52 = vadd.f32 %v4147_v4, %v4125_v29  ;;  %v11617_v43 = vadd.f32 %v4148_v51, %v4126_v5  ;;  %v11619_v30 = vadd.f32 %v4149_v11, %v4127_v13  ;;  %v11634_v13 = vld [vmem:[#allocation16 + $0xa] ss:$0 sm:$0xff]  ;;  %v11642_v11 = vld [vmem:[#allocation16 + $0xb] ss:$0 sm:$0xff] }
 0x24e   : > { %v4158_v12 = vadd.f32 %v4150_v59, %v4128_v62  ;;  %v4167_v34 = vmul.f32 0.0, %v11177_v14  ;;  %v4171_v16 = vmul.f32 %v11177_v14, %v11261_v28  ;;  %v4196_v33 = vmul.f32 0.0, %v11609_v0  ;;  %17190 = vst [vmem:[#allocation69_spill] sm:$0xff] %v11634_v13  ;;  %v11644_v59 = vld [vmem:[#allocation16 + $0xc] ss:$0 sm:$0xff] }
 0x24f   : > { %17189 = vst [vmem:[#allocation52_spill] sm:$0xff] %v11619_v30  ;;  %v4184_v61 = vadd.f32 %v11221_v55, %v4155_v52  ;;  %v4197_v19 = vmul.f32 %v11609_v0, %v11069_v20  ;;  %v4217_v18 = vmul.f32 0.0, %v11179_v54  ;;  %v4247_v5 = vmul.f32 0.0, %v11615_v21  ;;  %17191 = vst [vmem:[#allocation70_spill] sm:$0xff] %v11644_v59 }
 0x250   : > { %v4175_v29 = vsel %vm860_vm3, %v4167_v34, 0.0  ;;  %v4248_v8 = vmul.f32 %v11615_v21, %v11564_v41  ;;  %v4179_v55 = vsel %vm860_vm3, %v4171_v16, 0.0  ;;  %v11640_v51 = vmul.f32 %v11615_v21, %v11573_v63  ;;  %v11654_v16 = vld [vmem:[#allocation16 + $0xd] ss:$0 sm:$0xff] }
 0x251   : > { %v4183_v62 = vadd.f32 %v4175_v29, %v4154_v57  ;;  %v4205_v4 = vadd.f32 %v4197_v19, %v4184_v61  ;;  %v11646_v52 = vadd.f32 %v4179_v55, %v4158_v12  ;;  %v4225_v34 = vsel %vm3663_vm9, %v4217_v18, 0.0  ;;  %17193 = vst [vmem:[#allocation71_spill] sm:$0xff] %v11654_v16  ;;  %v11661_v55 = vld [vmem:[#allocation16 + $0xe] ss:$0 sm:$0xff] }
 0x252   : > { %v4250_v1 = vmul.f32 %v11615_v21, %v11576_v7  ;;  %v4255_v57 = vsel %vm4114_vm10, %v4247_v5, 0.0  ;;  %v4256_v29 = vsel %vm4114_vm10, %v4248_v8, 0.0  ;;  %v4277_v12 = vmul.f32 %v11634_v13, %v11501_v26  ;;  %17194 = vst [vmem:[#allocation95_spill] sm:$0xff] %v11661_v55  ;;  %v11675_v8 = vld [vmem:[#allocation16 + $0x10] ss:$0 sm:$0xff] }
 0x253   : > { %17192 = vst [vmem:[#allocation94_spill] sm:$0xff] %v11646_v52  ;;  %v4204_v61 = vadd.f32 %v4196_v33, %v4183_v62  ;;  %v4234_v19 = vadd.f32 %v11225_v27, %v4205_v4  ;;  %v4278_v5 = vmul.f32 %v11634_v13, %v11504_v42  ;;  %v4306_v33 = vmul.f32 %v11642_v11, %v11099_v10  ;;  %v11673_v62 = vld [vmem:[#allocation16 + $0xf] ss:$0 sm:$0xff]  ;;  %v11701_v52 = vld [vmem:[#allocation16 + $0x15] ss:$0 sm:$0xff] }
 0x254   : > { %v11665_v18 = vsel %vm4114_vm10, %v4250_v1, 0.0  ;;  %v4335_v27 = vmul.f32 %v11644_v59, %v11069_v20  ;;  %v4285_v35 = vsel %vm697_vm2, %v4277_v12, 0.0  ;;  %v4356_v1 = vmul.f32 %v11654_v16, %v11121_v22 }
 0x255   : > { %17195 = vst [vmem:[#allocation74_spill] sm:$0xff] %v11665_v18  ;;  %v4233_v26 = vadd.f32 %v4225_v34, %v4204_v61  ;;  %v4264_v4 = vadd.f32 %v4256_v29, %v4234_v19  ;;  %v4286_v10 = vsel %vm697_vm2, %v4278_v5, 0.0  ;;  %v4314_v20 = vsel %vm860_vm3, %v4306_v33, 0.0  ;;  %v11693_v19 = vld [vmem:[#allocation16 + $0x13] ss:$0 sm:$0xff] }
 0x256   : > { %v4386_v34 = vmul.f32 %v11661_v55, %v11564_v41  ;;  %v4387_v61 = vmul.f32 %v11661_v55, %v11573_v63  ;;  %v11695_v29 = vld [vmem:[#allocation16 + $0x14] ss:$0 sm:$0xff]  ;;  %v4364_v32 = vsel %vm3663_vm9, %v4356_v1, 0.0  ;;  %v4415_v5 = vmul.f32 %v11673_v62, %v11504_v42  ;;  %v11703_v33 = vld [vmem:[#allocation16 + $0x16] ss:$0 sm:$0xff] }
 0x257   : > { %v4263_v22 = vadd.f32 %v4255_v57, %v4233_v26  ;;  %v4294_v12 = vadd.f32 %v4286_v10, %v4264_v4  ;;  %v4444_v15 = vmul.f32 %v11675_v8, %v11104_v36  ;;  %v4473_v57 = vmul.f32 %v11681_v37, %v11088_v23  ;;  %v11713_v4 = vld [vmem:[#allocation16 + $0x17] ss:$0 sm:$0xff] }
 0x258   : > { %v4394_v41 = vsel %vm4114_vm10, %v4386_v34, 0.0  ;;  %v4494_v26 = vmul.f32 %v11683_v58, %v11124_v46  ;;  %17197 = vst [vmem:[#allocation97_spill] sm:$0xff] %v11713_v4  ;;  %v4423_v42 = vsel %vm697_vm2, %v4415_v5, 0.0  ;;  %v4523_v10 = vmul.f32 %v11693_v19, %v11573_v63 }
 0x259   : > { %v4293_v1 = vadd.f32 %v4285_v35, %v4263_v22  ;;  %v4552_v34 = vmul.f32 %v11695_v29, %v11510_v31  ;;  %v4452_v18 = vsel %vm860_vm3, %v4444_v15, 0.0  ;;  %v4579_v35 = vmul.f32 %v11701_v52, %v11212_v47 }
 0x25a   : > { %v4502_v30 = vsel %vm3663_vm9, %v4494_v26, 0.0  ;;  %v11731_v22 = vmul.f32 %v11703_v33, %v11189_v40  ;;  %v11735_v63 = vsel %vm4114_vm10, %v4523_v10, 0.0  ;;  %v4626_v15 = vmul.f32 %v11713_v4, %v11231_v25 }
 0x25b   : > { %v4322_v5 = vadd.f32 %v4314_v20, %v4293_v1  ;;  %v11739_v55 = vsel %vm697_vm2, %v4552_v34, 0.0  ;;  %v11745_v26 = vsel %vm860_vm3, %v4579_v35, 0.0  ;;  %v4653_v13 = vmul.f32 %v11721_v48, %v11576_v7 }
 0x25c   : > { %17199 = vst [vmem:[#allocation33_spill] sm:$0xff] %v11731_v22  ;;  %17200 = vst [vmem:[#allocation92_spill] sm:$0xff] %v11739_v55  ;;  %v11750_v20 = vrot.slane %v11241_v45, 2  ;;  %v4307_v1 = vmul.f32 %v11642_v11, %v11104_v36  ;;  %v11756_v34 = vsel %vm3663_vm9, %v4626_v15, 0.0  ;;  %v4336_v22 = vmul.f32 %v11644_v59, %v11088_v23 }
 0x25d   : > { %17201 = vst [vmem:[#allocation93_spill] sm:$0xff] %v11745_v26  ;;  %v4343_v10 = vadd.f32 %v4335_v27, %v4322_v5  ;;  %17202 = vst [vmem:[#allocation99_spill] sm:$0xff] %v11756_v34  ;;  %v4357_v35 = vmul.f32 %v11654_v16, %v11124_v46  ;;  %v11764_v26 = vsel %vm4114_vm10, %v4653_v13, 0.0  ;;  %v4395_v5 = vsel %vm4114_vm10, %v4387_v61, 0.0 }
 0x25e   : > { %17203 = vst [vmem:[#allocation100_spill] sm:$0xff] %v11764_v26  ;;  %v4111_v55 = vmul.f32 %v11557_v44, %v11750_v20  ;;  %v4315_v27 = vsel %vm860_vm3, %v4307_v1, 0.0  ;;  %v4416_v16 = vmul.f32 %v11673_v62, %v11510_v31  ;;  %v4445_v26 = vmul.f32 %v11675_v8, %v11212_v47 }
 0x25f   : > { %v4372_v15 = vadd.f32 %v4364_v32, %v4343_v10  ;;  %v4323_v34 = vadd.f32 %v4315_v27, %v4294_v12  ;;  %v4365_v59 = vsel %vm3663_vm9, %v4357_v35, 0.0  ;;  %v4474_v1 = vmul.f32 %v11681_v37, %v11189_v40 }
 0x260   : > { %v11778_v13 = vsel %vm4114_vm10, %v4111_v55, 0.0  ;;  %v4495_v32 = vmul.f32 %v11683_v58, %v11231_v25  ;;  %v4424_v10 = vsel %vm697_vm2, %v4416_v16, 0.0  ;;  %v4524_v35 = vmul.f32 %v11693_v19, %v11576_v7 }
 0x261   : > { %17204 = vst [vmem:[#allocation101_spill] sm:$0xff] %v11778_v13  ;;  %v4402_v61 = vadd.f32 %v4394_v41, %v4372_v15  ;;  %v4344_v12 = vadd.f32 %v4336_v22, %v4323_v34  ;;  %v4453_v55 = vsel %vm860_vm3, %v4445_v26, 0.0  ;;  %v4553_v13 = vmul.f32 %v11695_v29, %v11513_v50 }
 0x262   : > { %v4503_v27 = vsel %vm3663_vm9, %v4495_v32, 0.0  ;;  %v4580_v58 = vmul.f32 %v11701_v52, %v11261_v28  ;;  %v4532_v16 = vsel %vm4114_vm10, %v4524_v35, 0.0  ;;  %v11802_v34 = vmul.f32 %v11703_v33, %v11241_v45 }
 0x263   : > { %v4431_v41 = vadd.f32 %v4423_v42, %v4402_v61  ;;  %v4373_v22 = vadd.f32 %v4365_v59, %v4344_v12  ;;  %v4560_v26 = vsel %vm697_vm2, %v4553_v13, 0.0  ;;  %v4627_v32 = vmul.f32 %v11713_v4, %v11271_v53 }
 0x264   : > { %v4587_v15 = vsel %vm860_vm3, %v4580_v58, 0.0  ;;  %v4654_v42 = vmul.f32 %v11721_v48, %v11750_v20  ;;  %v11813_v12 = vrot.slane %v11285_v9, 6  ;;  %v4035_v35 = vmul.f32 %v11166_v17, %v11304_v3  ;;  %v17205_v48 = vld [vmem:[#allocation64_spill] sm:$0xff] }
 0x265   : > { %v4460_v59 = vadd.f32 %v4452_v18, %v4431_v41  ;;  %v4403_v61 = vadd.f32 %v4395_v5, %v4373_v22  ;;  %v11819_v13 = vsel %vm3663_vm9, %v4627_v32, 0.0  ;;  %v4061_v4 = vmul.f32 %v11523_v38, %v11285_v9 }
 0x266   : > { %v11823_v58 = vsel %vm4114_vm10, %v4654_v42, 0.0  ;;  %v4080_v18 = vmul.f32 %v11168_v2, %v17205_v48  ;;  %v4005_v22 = vmul.f32 %v11493_v6, %v11813_v12  ;;  %v4042_v17 = vsel %vm860_vm3, %v4035_v35, 0.0 }
 0x267   : > { %v4481_v5 = vadd.f32 %v4473_v57, %v4460_v59  ;;  %v4432_v41 = vadd.f32 %v4424_v10, %v4403_v61  ;;  %v11836_v42 = vrot.slane %v11285_v9, 2  ;;  %v4143_v38 = vmul.f32 %v11566_v24, %v11813_v12 }
 0x268   : > { %v4087_v32 = vsel %vm3663_vm9, %v4080_v18, 0.0  ;;  %v4169_v2 = vmul.f32 %v11177_v14, %v11104_v36  ;;  %v4016_v59 = vsel %vm697_vm2, %v4005_v22, 0.0  ;;  %v4198_v61 = vmul.f32 %v11609_v0, %v11088_v23 }
 0x269   : > { %v4510_v57 = vadd.f32 %v4502_v30, %v4481_v5  ;;  %v4461_v10 = vadd.f32 %v4453_v55, %v4432_v41  ;;  %v4049_v35 = vadd.f32 %v4042_v17, %v4016_v59  ;;  %v4112_v18 = vmul.f32 %v11557_v44, %v11836_v42  ;;  %v17210_v59 = vld [vmem:[#allocation93_spill] sm:$0xff] }
 0x26a   : > { %v11850_v6 = vsel %vm697_vm2, %v4143_v38, 0.0  ;;  %v4177_v24 = vsel %vm860_vm3, %v4169_v2, 0.0  ;;  %v4219_v5 = vmul.f32 %v11179_v54, %v11124_v46  ;;  %v4252_v41 = vmul.f32 %v11615_v21, %v11836_v42  ;;  %v17207_v2 = vld [vmem:[#allocation92_spill] sm:$0xff] }
 0x26b   : > { %17206 = vst [vmem:[#allocation64_spill] sm:$0xff] %v11850_v6  ;;  %v4539_v36 = vadd.f32 %v11735_v63, %v4510_v57  ;;  %v4482_v30 = vadd.f32 %v4474_v1, %v4461_v10  ;;  %v4185_v55 = vadd.f32 %v4177_v24, %v11617_v43  ;;  %v4068_v23 = vadd.f32 %v4061_v4, %v4049_v35  ;;  %v17209_v4 = vld [vmem:[#allocation69_spill] sm:$0xff]  ;;  %v17228_v6 = vld [vmem:[#allocation66_spill] sm:$0xff] }
 0x26c   : > { %v4123_v17 = vsel %vm4114_vm10, %v4112_v18, 0.0  ;;  %v4257_v38 = vsel %vm4114_vm10, %v11640_v51, 0.0  ;;  %v4227_v24 = vsel %vm3663_vm9, %v4219_v5, 0.0  ;;  %v11870_v46 = vsel %vm4114_vm10, %v4252_v41, 0.0  ;;  %v17214_v5 = vld [vmem:[#allocation33_spill] sm:$0xff] }
 0x26d   : > { %v4566_v22 = vadd.f32 %v17207_v2, %v4539_v36  ;;  %v4511_v63 = vadd.f32 %v4503_v27, %v4482_v30  ;;  %v4206_v1 = vadd.f32 %v4198_v61, %v4185_v55  ;;  %v4094_v43 = vadd.f32 %v4087_v32, %v4068_v23  ;;  %17208 = vst [vmem:[#allocation92_spill] sm:$0xff] %v11870_v46  ;;  %v17211_v27 = vld [vmem:[#allocation70_spill] sm:$0xff] }
 0x26e   : > { %v4279_v57 = vmul.f32 %v17209_v4, %v11510_v31  ;;  %v4308_v10 = vmul.f32 %v11642_v11, %v11212_v47  ;;  %v4337_v61 = vmul.f32 %v17211_v27, %v11189_v40  ;;  %v17213_v31 = vld [vmem:[#allocation71_spill] sm:$0xff]  ;;  %vm7508_vm11 = vcmask 64512  }
 0x26f   : > { %v4593_v51 = vadd.f32 %v17210_v59, %v4566_v22  ;;  %v4540_v35 = vadd.f32 %v4532_v16, %v4511_v63  ;;  %v4235_v18 = vadd.f32 %v4227_v24, %v4206_v1  ;;  %v11879_v36 = vadd.f32 %v4123_v17, %v4094_v43  ;;  %v17215_v16 = vld [vmem:[#allocation95_spill] sm:$0xff] }
 0x270   : > { %v4287_v32 = vsel %vm697_vm2, %v4279_v57, 0.0  ;;  %v4316_v30 = vsel %vm860_vm3, %v4308_v10, 0.0  ;;  %v4358_v55 = vmul.f32 %v17213_v31, %v11231_v25  ;;  %v4388_v22 = vmul.f32 %v17215_v16, %v11576_v7  ;;  %v17216_v43 = vld [vmem:[#allocation99_spill] sm:$0xff] }
 0x271   : > { %17212 = vst [vmem:[#allocation69_spill] sm:$0xff] %v11879_v36  ;;  %v4613_v23 = vadd.f32 %v17214_v5, %v4593_v51  ;;  %v4567_v41 = vadd.f32 %v4560_v26, %v4540_v35  ;;  %v4265_v2 = vadd.f32 %v4257_v38, %v4235_v18  ;;  %v4417_v63 = vmul.f32 %v11673_v62, %v11513_v50  ;;  %v17217_v51 = vld [vmem:[#allocation72_spill] sm:$0xff] }
 0x272   : > { %v4366_v17 = vsel %vm3663_vm9, %v4358_v55, 0.0  ;;  %v4446_v1 = vmul.f32 %v11675_v8, %v11261_v28  ;;  %v4475_v24 = vmul.f32 %v11681_v37, %v11241_v45  ;;  %v4396_v38 = vsel %vm4114_vm10, %v4388_v22, 0.0  ;;  %v17218_v55 = vld [vmem:[#allocation100_spill] sm:$0xff] }
 0x273   : > { %v4640_v57 = vadd.f32 %v17216_v43, %v4613_v23  ;;  %v4594_v10 = vadd.f32 %v4587_v15, %v4567_v41  ;;  %v4295_v26 = vadd.f32 %v4287_v32, %v4265_v2  ;;  %v4425_v7 = vsel %vm697_vm2, %v4417_v63, 0.0  ;;  %v17220_v43 = vld [vmem:[#allocation97_spill] sm:$0xff]  ;;  %v17226_v36 = vld [vmem:[#allocation96_spill] sm:$0xff] }
 0x274   : > { %v4454_v59 = vsel %vm860_vm3, %v4446_v1, 0.0  ;;  %v4496_v35 = vmul.f32 %v17217_v51, %v11271_v53  ;;  %v4525_v18 = vmul.f32 %v11693_v19, %v11750_v20  ;;  %v4554_v23 = vmul.f32 %v11695_v29, %v11813_v12 }
 0x275   : > { %v4667_v5 = vadd.f32 %v17218_v55, %v4640_v57  ;;  %v4614_v15 = vadd.f32 %v11802_v34, %v4594_v10  ;;  %v4324_v32 = vadd.f32 %v4316_v30, %v4295_v26  ;;  %v4581_v22 = vmul.f32 %v11701_v52, %v11304_v3  ;;  %v17222_v26 = vld [vmem:[#allocation98_spill] sm:$0xff] }
 0x276   : > { %v4504_v41 = vsel %vm3663_vm9, %v4496_v35, 0.0  ;;  %v4533_v2 = vsel %vm4114_vm10, %v4525_v18, 0.0  ;;  %v11921_v63 = vmul.f32 %v11703_v33, %v11285_v9  ;;  %v11927_v1 = vsel %vm697_vm2, %v4554_v23, 0.0  ;;  %v17223_v18 = vld [vmem:[#allocation73_spill] sm:$0xff] }
 0x277   : > { %8812 = vmatprep.mubr.msk.f32.mxu1 %vm3220_vm7, %v4667_v5  ;;  %v4641_v34 = vadd.f32 %v11819_v13, %v4614_v15  ;;  %v4345_v30 = vadd.f32 %v4337_v61, %v4324_v32  ;;  %v4628_v57 = vmul.f32 %v17220_v43, %v17205_v48  ;;  %v11933_v10 = vsel %vm860_vm3, %v4581_v22, 0.0  ;;  %v17224_v5 = vld [vmem:[#allocation38_spill] sm:$0xff]  ;;  %v17225_v13 = vld [vmem:[#allocation63_spill] sm:$0xff] }
 0x278   : > { %17219 = vst [vmem:[#allocation93_spill] sm:$0xff] %v11921_v63  ;;  %17221 = vst [vmem:[#allocation70_spill] sm:$0xff] %v11933_v10  ;;  %v4655_v35 = vmul.f32 %v17222_v26, %v11836_v42  ;;  %v11938_v55 = vrot.slane %v17223_v18, 6  ;;  %v4036_v61 = vmul.f32 %v17225_v13, %v17224_v5  ;;  %v4062_v22 = vmul.f32 %v17226_v36, %v17223_v18  ;;  %v17229_v10 = vld [vmem:[#allocation41_spill] sm:$0xff] }
 0x279   : > { %v4668_v15 = vadd.f32 %v11823_v58, %v4641_v34  ;;  %v4374_v32 = vadd.f32 %v4366_v17, %v4345_v30  ;;  %v11945_v23 = vsel %vm3663_vm9, %v4628_v57, 0.0  ;;  %v17230_v58 = vld [vmem:[#allocation68_spill] sm:$0xff]  ;;  %v11961_v30 = vrot.slane %v17223_v18, 2  ;;  %v17231_v57 = vld [vmem:[#allocation67_spill] sm:$0xff] }
 0x27a   : > { %v11951_v46 = vsel %vm4114_vm10, %v4655_v35, 0.0  ;;  %v4006_v63 = vmul.f32 %v17228_v6, %v11938_v55  ;;  %v4043_v13 = vsel %vm860_vm3, %v4036_v61, 0.0  ;;  %v4081_v17 = vmul.f32 %v17230_v58, %v17229_v10 }
 0x27b   : > { %17227 = vst [vmem:[#allocation71_spill] sm:$0xff] %v11951_v46  ;;  %8813 = vmatmul.mubr.msk.f32.vlgmr.msra.gmra.mrb[16].mxu1 %vm3220_vm7, %v4668_v15  ;;  %v4404_v34 = vadd.f32 %v4396_v38, %v4374_v32  ;;  %v4144_v36 = vmul.f32 %v17231_v57, %v11938_v55  ;;  %v4170_v35 = vmul.f32 %v11177_v14, %v11212_v47  ;;  %vm6195_vm14 = vcmask 1040384  }
 0x27c   : > { %v4017_v6 = vsel %vm697_vm2, %v4006_v63, 0.0  ;;  %v4088_v61 = vsel %vm3663_vm9, %v4081_v17, 0.0  ;;  %v4199_v58 = vmul.f32 %v11609_v0, %v11189_v40  ;;  %v4220_v38 = vmul.f32 %v11179_v54, %v11231_v25 }
 0x27d   : > { %v4433_v15 = vadd.f32 %v4425_v7, %v4404_v34  ;;  %v4050_v32 = vadd.f32 %v4043_v13, %v4017_v6  ;;  %v4113_v46 = vmul.f32 %v11557_v44, %v11961_v30  ;;  %v11979_v14 = vsel %vm697_vm2, %v4144_v36, 0.0  ;;  %v17233_v7 = vld [vmem:[#allocation52_spill] sm:$0xff] }
 0x27e   : > { %17232 = vst [vmem:[#allocation33_spill] sm:$0xff] %v11979_v14  ;;  %v4178_v47 = vsel %vm860_vm3, %v4170_v35, 0.0  ;;  %v4228_v63 = vsel %vm3663_vm9, %v4220_v38, 0.0  ;;  %v4253_v40 = vmul.f32 %v11615_v21, %v11961_v30  ;;  %v4280_v54 = vmul.f32 %v17209_v4, %v11513_v50 }
 0x27f   : > { %v4462_v25 = vadd.f32 %v4454_v59, %v4433_v15  ;;  %v4069_v6 = vadd.f32 %v4062_v22, %v4050_v32  ;;  %v4124_v44 = vsel %vm4114_vm10, %v4113_v46, 0.0  ;;  %v4186_v36 = vadd.f32 %v4178_v47, %v17233_v7 }
 0x280   : > { %v11994_v13 = vsel %vm4114_vm10, %v4253_v40, 0.0  ;;  %v4288_v17 = vsel %vm697_vm2, %v4280_v54, 0.0  ;;  %v4309_v34 = vmul.f32 %v11642_v11, %v11261_v28  ;;  %v4338_v35 = vmul.f32 %v17211_v27, %v11241_v45 }
 0x281   : > { %17234 = vst [vmem:[#allocation95_spill] sm:$0xff] %v11994_v13  ;;  %v4483_v59 = vadd.f32 %v4475_v24, %v4462_v25  ;;  %v4095_v22 = vadd.f32 %v4088_v61, %v4069_v6  ;;  %v4207_v38 = vadd.f32 %v4199_v58, %v4186_v36  ;;  %v4359_v46 = vmul.f32 %v17213_v31, %v11271_v53 }
 0x282   : > { %v4317_v15 = vsel %vm860_vm3, %v4309_v34, 0.0  ;;  %v4389_v32 = vmul.f32 %v17215_v16, %v11750_v20  ;;  %v4418_v47 = vmul.f32 %v11673_v62, %v11813_v12  ;;  %v4447_v40 = vmul.f32 %v11675_v8, %v11304_v3 }
 0x283   : > { %v4512_v54 = vadd.f32 %v4504_v41, %v4483_v59  ;;  %v4131_v45 = vadd.f32 %v4124_v44, %v4095_v22  ;;  %v4236_v24 = vadd.f32 %v4228_v63, %v4207_v38  ;;  %v4367_v61 = vsel %vm3663_vm9, %v4359_v46, 0.0  ;;  %v17235_v44 = vld [vmem:[#allocation74_spill] sm:$0xff] }
 0x284   : > { %v4397_v58 = vsel %vm4114_vm10, %v4389_v32, 0.0  ;;  %v4426_v25 = vsel %vm697_vm2, %v4418_v47, 0.0  ;;  %v12020_v6 = vsel %vm860_vm3, %v4447_v40, 0.0  ;;  %v12024_v7 = vmul.f32 %v11681_v37, %v11285_v9 }
 0x285   : > { %v4541_v41 = vadd.f32 %v4533_v2, %v4512_v54  ;;  %v4266_v63 = vadd.f32 %v17235_v44, %v4236_v24  ;;  %v4497_v36 = vmul.f32 %v17217_v51, %v17205_v48  ;;  %v4526_v34 = vmul.f32 %v11693_v19, %v11836_v42  ;;  %v17240_v54 = vld [vmem:[#allocation70_spill] sm:$0xff] }
 0x286   : > { %v4555_v59 = vmul.f32 %v11695_v29, %v11938_v55  ;;  %v4582_v22 = vmul.f32 %v11701_v52, %v17224_v5  ;;  %v12037_v38 = vmul.f32 %v11703_v33, %v17223_v18  ;;  %v4629_v9 = vmul.f32 %v17220_v43, %v17229_v10  ;;  %v17241_v44 = vld [vmem:[#allocation42_spill] sm:$0xff] }
 0x287   : > { %v4568_v2 = vadd.f32 %v11927_v1, %v4541_v41  ;;  %v4296_v46 = vadd.f32 %v4288_v17, %v4266_v63  ;;  %v12044_v32 = vsel %vm3663_vm9, %v4497_v36, 0.0  ;;  %v12048_v47 = vsel %vm4114_vm10, %v4526_v34, 0.0  ;;  %v12068_v36 = vld [vmem:[#allocation16 + $0x6] ss:$0 sm:$0xff]  ;;  %v17243_v34 = vld [vmem:[#allocation58_spill] sm:$0xff] }
 0x288   : > { %17236 = vst [vmem:[#allocation99_spill] sm:$0xff] %v12037_v38  ;;  %v12052_v40 = vsel %vm697_vm2, %v4555_v59, 0.0  ;;  %v12056_v18 = vsel %vm860_vm3, %v4582_v22, 0.0  ;;  %v12060_v1 = vsel %vm3663_vm9, %v4629_v9, 0.0  ;;  %v4656_v17 = vmul.f32 %v17222_v26, %v11961_v30  ;;  %17242 = vst [vmem:[#allocation98_spill] sm:$0xff] %v12068_v36  ;;  %v12077_v9 = vld [vmem:[%s9945_s12 + $0x18] sm:$0xff] }
 0x289   : > { %17237 = vst [vmem:[#allocation72_spill] sm:$0xff] %v12052_v40  ;;  %17238 = vst [vmem:[#allocation100_spill] sm:$0xff] %v12056_v18  ;;  %v4595_v24 = vadd.f32 %v17240_v54, %v4568_v2  ;;  %v4325_v41 = vadd.f32 %v4317_v15, %v4296_v46  ;;  %v12066_v63 = vrot.slane %v17241_v44, 6  ;;  %v4174_v59 = vmul.f32 %v12068_v36, %v17243_v34  ;;  %v12083_v2 = vld [vmem:[#allocation16 + $0x8] ss:$0 sm:$0xff]  ;;  %v17247_v54 = vld [vmem:[#allocation93_spill] sm:$0xff] }
 0x28a   : > { %17239 = vst [vmem:[#allocation97_spill] sm:$0xff] %v12060_v1  ;;  %v12074_v22 = vsel %vm4114_vm10, %v4656_v17, 0.0  ;;  %17245 = vst [vmem:[#allocation38_spill] sm:$0xff] %v12077_v9  ;;  %v4200_v13 = vmul.f32 %v12077_v9, %v11609_v0  ;;  %v4203_v15 = vmul.f32 %v11609_v0, %v17241_v44  ;;  %v4221_v46 = vmul.f32 %v12083_v2, %v11271_v53  ;;  %v17248_v38 = vld [vmem:[#allocation94_spill] sm:$0xff]  ;;  %v17249_v18 = vld [vmem:[#allocation59_spill] sm:$0xff] }
 0x28b   : > { %17244 = vst [vmem:[#allocation73_spill] sm:$0xff] %v12074_v22  ;;  %17246 = vst [vmem:[#allocation63_spill] sm:$0xff] %v12083_v2  ;;  %v4615_v14 = vadd.f32 %v17247_v54, %v4595_v24  ;;  %v4346_v1 = vadd.f32 %v4338_v35, %v4325_v41  ;;  %v4145_v17 = vmul.f32 %v17231_v57, %v12066_v63  ;;  %v4182_v22 = vsel %vm860_vm3, %v4174_v59, 0.0  ;;  %v17250_v54 = vld [vmem:[#allocation71_spill] sm:$0xff] }
 0x28c   : > { %v4208_v36 = vadd.f32 %v4200_v13, %v17248_v38  ;;  %v4224_v9 = vmul.f32 %v12083_v2, %v17249_v18  ;;  %v4229_v0 = vsel %vm3663_vm9, %v4221_v46, 0.0  ;;  %v12098_v40 = vrot.slane %v17241_v44, 2 }
 0x28d   : > { %v4642_v24 = vadd.f32 %v11945_v23, %v4615_v14  ;;  %v4375_v35 = vadd.f32 %v4367_v61, %v4346_v1  ;;  %v4153_v57 = vsel %vm697_vm2, %v4145_v17, 0.0  ;;  %v4251_v41 = vmul.f32 %v11615_v21, %v11750_v20 }
 0x28e   : > { %v4161_v59 = vadd.f32 %v4153_v57, %v4131_v45  ;;  %v4232_v13 = vsel %vm3663_vm9, %v4224_v9, 0.0  ;;  %v4237_v38 = vadd.f32 %v4229_v0, %v4208_v36  ;;  %v4254_v46 = vmul.f32 %v11615_v21, %v12098_v40  ;;  %v8989_v36 = vld [vmem:[%s9945_s12 + $0x20] sm:$0xff] }
 0x28f   : > { %v4669_v2 = vadd.f32 %v17250_v54, %v4642_v24  ;;  %v4405_v53 = vadd.f32 %v4397_v58, %v4375_v35  ;;  %v4259_v23 = vsel %vm4114_vm10, %v4251_v41, 0.0  ;;  %v4281_v14 = vmul.f32 %v17209_v4, %v11813_v12 }
 0x290   : > { %v4190_v61 = vadd.f32 %v4182_v22, %v4161_v59  ;;  %v4262_v20 = vsel %vm4114_vm10, %v4254_v46, 0.0  ;;  %v4267_v45 = vadd.f32 %v4259_v23, %v4237_v38  ;;  %v12118_v0 = vmul.f32 %v17209_v4, %v12066_v63  ;;  %v12150_v46 = vld [vmem:[%s9945_s12 + $0x28] sm:$0xff] }
 0x291   : > { %8815 = vmatprep.mubr.msk.f32.mxu1 %vm3220_vm7, %v4669_v2  ;;  %v4434_v21 = vadd.f32 %v4426_v25, %v4405_v53  ;;  %v4289_v58 = vsel %vm697_vm2, %v4281_v14, 0.0  ;;  %v4310_v1 = vmul.f32 %v11642_v11, %v11304_v3  ;;  %v4339_v12 = vmul.f32 %v8989_v36, %v17211_v27 }
 0x292   : > { %v4211_v22 = vadd.f32 %v4203_v15, %v4190_v61  ;;  %v4297_v9 = vadd.f32 %v4289_v58, %v4267_v45  ;;  %v4360_v17 = vmul.f32 %v17213_v31, %v17205_v48  ;;  %v4390_v24 = vmul.f32 %v17215_v16, %v11836_v42 }
 0x293   : > { %v4463_v53 = vadd.f32 %v12020_v6, %v4434_v21  ;;  %v4318_v25 = vsel %vm860_vm3, %v4310_v1, 0.0  ;;  %v12136_v2 = vmul.f32 %v17215_v16, %v12098_v40  ;;  %v4419_v35 = vmul.f32 %v11673_v62, %v11938_v55 }
 0x294   : > { %v4240_v15 = vadd.f32 %v4232_v13, %v4211_v22  ;;  %v4326_v57 = vadd.f32 %v4318_v25, %v4297_v9  ;;  %v4368_v41 = vsel %vm3663_vm9, %v4360_v17, 0.0  ;;  %v4398_v42 = vsel %vm4114_vm10, %v4390_v24, 0.0 }
 0x295   : > { %17251 = vst [vmem:[#allocation41_spill] sm:$0xff] %v12136_v2  ;;  %v4484_v6 = vadd.f32 %v12024_v7, %v4463_v53  ;;  %v4427_v59 = vsel %vm697_vm2, %v4419_v35, 0.0  ;;  %v4448_v38 = vmul.f32 %v11675_v8, %v17224_v5  ;;  %v4477_v13 = vmul.f32 %v12150_v46, %v11681_v37  ;;  %v17252_v35 = vld [vmem:[#allocation66_spill] sm:$0xff] }
 0x296   : > { %v4270_v54 = vadd.f32 %v4262_v20, %v4240_v15  ;;  %v4347_v23 = vadd.f32 %v4339_v12, %v4326_v57  ;;  %v4498_v14 = vmul.f32 %v17217_v51, %v17229_v10  ;;  %v4527_v61 = vmul.f32 %v11693_v19, %v11961_v30 }
 0x297   : > { %v4513_v7 = vadd.f32 %v12044_v32, %v4484_v6  ;;  %v4456_v45 = vsel %vm860_vm3, %v4448_v38, 0.0  ;;  %v4556_v21 = vmul.f32 %v11695_v29, %v12066_v63  ;;  %v4583_v58 = vmul.f32 %v11701_v52, %v17243_v34  ;;  %v17254_v38 = vld [vmem:[#allocation96_spill] sm:$0xff] }
 0x298   : > { %v4376_v1 = vadd.f32 %v4368_v41, %v4347_v23  ;;  %v4506_v20 = vsel %vm3663_vm9, %v4498_v14, 0.0  ;;  %v4535_v12 = vsel %vm4114_vm10, %v4527_v61, 0.0  ;;  %v12171_v22 = vmul.f32 %v11703_v33, %v17241_v44  ;;  %v8991_v44 = vld [vmem:[#allocation16 + $0x1] ss:$0 sm:$0xff]  ;;  %v17255_v23 = vld [vmem:[#allocation38_spill] sm:$0xff] }
 0x299   : > { %v4542_v32 = vadd.f32 %v12048_v47, %v4513_v7  ;;  %v4563_v9 = vsel %vm697_vm2, %v4556_v21, 0.0  ;;  %v4590_v17 = vsel %vm860_vm3, %v4583_v58, 0.0  ;;  %v4630_v24 = vmul.f32 %v17220_v43, %v17249_v18  ;;  %v17253_v47 = vld [vmem:[#allocation72_spill] sm:$0xff] }
 0x29a   : > { %v4406_v53 = vadd.f32 %v4398_v42, %v4376_v1  ;;  %v4657_v25 = vmul.f32 %v17222_v26, %v12098_v40  ;;  %v4004_v15 = vmul.f32 %v17252_v35, %v11513_v50  ;;  %v4034_v57 = vmul.f32 %v8991_v44, %v11261_v28  ;;  %v8992_v61 = vld [vmem:[#allocation16 + $0x3] ss:$0 sm:$0xff]  ;;  %v17256_v42 = vld [vmem:[#allocation79_spill] sm:$0xff]  ;;  %v17258_v44 = vld [vmem:[#allocation98_spill] sm:$0xff] }
 0x29b   : > { %v4569_v41 = vadd.f32 %v17253_v47, %v4542_v32  ;;  %v12188_v6 = vsel %vm3663_vm9, %v4630_v24, 0.0  ;;  %v4060_v14 = vmul.f32 %v17255_v23, %v17254_v38  ;;  %v4079_v7 = vmul.f32 %v8992_v61, %v17256_v42  ;;  %v17257_v1 = vld [vmem:[#allocation100_spill] sm:$0xff]  ;;  %v17262_v42 = vld [vmem:[#allocation99_spill] sm:$0xff] }
 0x29c   : > { %v4435_v21 = vadd.f32 %v4427_v59, %v4406_v53  ;;  %v12195_v58 = vsel %vm4114_vm10, %v4657_v25, 0.0  ;;  %v4015_v28 = vsel %vm697_vm2, %v4004_v15, 0.0  ;;  %v4041_v50 = vsel %vm860_vm3, %v4034_v57, 0.0  ;;  %v17259_v53 = vld [vmem:[#allocation62_spill] sm:$0xff]  ;;  %v17260_v25 = vld [vmem:[#allocation63_spill] sm:$0xff]  ;;  %v17261_v61 = vld [vmem:[#allocation60_spill] sm:$0xff] }
 0x29d   : > { %v4596_v32 = vadd.f32 %v17257_v1, %v4569_v41  ;;  %v4048_v24 = vadd.f32 %v4041_v50, %v4015_v28  ;;  %v4086_v35 = vsel %vm3663_vm9, %v4079_v7, 0.0  ;;  %v4172_v47 = vmul.f32 %v17258_v44, %v11304_v3  ;;  %v17264_v1 = vld [vmem:[#allocation61_spill] sm:$0xff] }
 0x29e   : > { %v4464_v59 = vadd.f32 %v4456_v45, %v4435_v21  ;;  %v4201_v38 = vmul.f32 %v8989_v36, %v17259_v53  ;;  %v4222_v23 = vmul.f32 %v17260_v25, %v17205_v48  ;;  %v4271_v15 = vrot.slane %v17261_v61, 6  ;;  %v17263_v45 = vld [vmem:[#allocation97_spill] sm:$0xff] }
 0x29f   : > { %v4616_v2 = vadd.f32 %v17262_v42, %v4596_v32  ;;  %v4067_v57 = vadd.f32 %v4060_v14, %v4048_v24  ;;  %v4180_v41 = vsel %vm860_vm3, %v4172_v47, 0.0  ;;  %v4282_v7 = vmul.f32 %v17209_v4, %v11938_v55  ;;  %v17265_v47 = vld [vmem:[#allocation73_spill] sm:$0xff] }
 0x2a0   : > { %v4485_v28 = vadd.f32 %v4477_v13, %v4464_v59  ;;  %v4230_v3 = vsel %vm3663_vm9, %v4222_v23, 0.0  ;;  %v4284_v36 = vmul.f32 %v17209_v4, %v4271_v15  ;;  %v4311_v48 = vmul.f32 %v11642_v11, %v17224_v5 }
 0x2a1   : > { %v4643_v21 = vadd.f32 %v17263_v45, %v4616_v2  ;;  %v4093_v50 = vadd.f32 %v4086_v35, %v4067_v57  ;;  %v4290_v14 = vsel %vm697_vm2, %v4282_v7, 0.0  ;;  %v4313_v32 = vmul.f32 %v11642_v11, %v17264_v1  ;;  %v17266_v35 = vld [vmem:[#allocation101_spill] sm:$0xff] }
 0x2a2   : > { %v4514_v24 = vadd.f32 %v4506_v20, %v4485_v28  ;;  %v4292_v55 = vsel %vm697_vm2, %v4284_v36, 0.0  ;;  %v4319_v13 = vsel %vm860_vm3, %v4311_v48, 0.0  ;;  %v12231_v4 = vmul.f32 %v12150_v46, %v17211_v27  ;;  %v17267_v28 = vld [vmem:[#allocation65_spill] sm:$0xff]  ;;  %v17268_v48 = vld [vmem:[#allocation64_spill] sm:$0xff] }
 0x2a3   : > { %v4670_v2 = vadd.f32 %v17265_v47, %v4643_v21  ;;  %v4129_v59 = vadd.f32 %v17266_v35, %v4093_v50  ;;  %v4300_v23 = vadd.f32 %v4292_v55, %v4270_v54  ;;  %v4321_v42 = vsel %vm860_vm3, %v4313_v32, 0.0 }
 0x2a4   : > { %v4543_v57 = vadd.f32 %v4535_v12, %v4514_v24  ;;  %v4342_v20 = vmul.f32 %v17211_v27, %v17261_v61  ;;  %v4361_v7 = vmul.f32 %v17213_v31, %v17229_v10  ;;  %v4363_v36 = vmul.f32 %v17213_v31, %v17267_v28 }
 0x2a5   : > { %8816 = vmatmul.mubr.msk.f32.gmra.mrb[18].mxu1 %vm3220_vm7, %v4670_v2  ;;  %v4159_v45 = vadd.f32 %v17268_v48, %v4129_v59  ;;  %v4329_v21 = vadd.f32 %v4321_v42, %v4300_v23  ;;  %v4380_v54 = vrot.slane %v17261_v61, 2  ;;  %v4391_v50 = vmul.f32 %v17215_v16, %v11961_v30 }
 0x2a6   : > { %v4570_v12 = vadd.f32 %v4563_v9, %v4543_v57  ;;  %v4369_v32 = vsel %vm3663_vm9, %v4361_v7, 0.0  ;;  %v4371_v24 = vsel %vm3663_vm9, %v4363_v36, 0.0  ;;  %v4420_v55 = vmul.f32 %v11673_v62, %v12066_v63 }
 0x2a7   : > { %v4188_v47 = vadd.f32 %v4180_v41, %v4159_v45  ;;  %v4350_v2 = vadd.f32 %v4342_v20, %v4329_v21  ;;  %v4393_v35 = vmul.f32 %v17215_v16, %v4380_v54  ;;  %v12257_v61 = vsel %vm4114_vm10, %v4391_v50, 0.0  ;;  %v8993_v20 = vld [vmem:[%s9945_s12 + $0x30] sm:$0xff] }
 0x2a8   : > { %v4597_v30 = vadd.f32 %v4590_v17, %v4570_v12  ;;  %v4421_v9 = vmul.f32 %v11673_v62, %v4271_v15  ;;  %v4422_v59 = vmul.f32 0.0, %v11673_v62  ;;  %v12263_v23 = vsel %vm697_vm2, %v4420_v55, 0.0 }
 0x2a9   : > { %v4209_v42 = vadd.f32 %v4201_v38, %v4188_v47  ;;  %v4379_v57 = vadd.f32 %v4371_v24, %v4350_v2  ;;  %v4401_v63 = vsel %vm4114_vm10, %v4393_v35, 0.0  ;;  %v4449_v16 = vmul.f32 %v11675_v8, %v17243_v34  ;;  %v17269_v24 = vld [vmem:[#allocation92_spill] sm:$0xff] }
 0x2aa   : > { %v4617_v41 = vadd.f32 %v12171_v22, %v4597_v30  ;;  %v4430_v17 = vsel %vm697_vm2, %v4422_v59, 0.0  ;;  %v12274_v62 = vmul.f32 %v8993_v20, %v11681_v37  ;;  %v4499_v38 = vmul.f32 %v17217_v51, %v17249_v18  ;;  %v8994_v35 = vld [vmem:[%s9945_s12 + $0x38] sm:$0xff] }
 0x2ab   : > { %v4238_v7 = vadd.f32 %v4230_v3, %v4209_v42  ;;  %v4409_v36 = vadd.f32 %v4401_v63, %v4379_v57  ;;  %v12280_v48 = vsel %vm860_vm3, %v4449_v16, 0.0  ;;  %v4528_v22 = vmul.f32 %v11693_v19, %v12098_v40  ;;  %v17270_v63 = vld [vmem:[#allocation69_spill] sm:$0xff] }
 0x2ac   : > { %v4644_v45 = vadd.f32 %v12188_v6, %v4617_v41  ;;  %v12287_v21 = vsel %vm3663_vm9, %v4499_v38, 0.0  ;;  %v4529_v50 = vmul.f32 %v11693_v19, %v4380_v54  ;;  %v4557_v12 = vmul.f32 %v11695_v29, %v4271_v15 }
 0x2ad   : > { %v4268_v3 = vadd.f32 %v17269_v24, %v4238_v7  ;;  %v12292_v55 = vadd.f32 %v4430_v17, %v4409_v36  ;;  %v12296_v47 = vsel %vm4114_vm10, %v4528_v22, 0.0  ;;  %v4584_v40 = vmul.f32 %v11701_v52, %v17264_v1 }
 0x2ae   : > { %v4671_v6 = vadd.f32 %v12195_v58, %v4644_v45  ;;  %v12303_v2 = vsel %vm697_vm2, %v4557_v12, 0.0  ;;  %v12307_v15 = vmul.f32 %v8994_v35, %v11703_v33  ;;  %v4631_v30 = vmul.f32 %v17220_v43, %v17267_v28  ;;  %v17271_v58 = vld [vmem:[#allocation33_spill] sm:$0xff] }
 0x2af   : > { %v4298_v59 = vadd.f32 %v4290_v14, %v4268_v3  ;;  %v12313_v42 = vsel %vm860_vm3, %v4584_v40, 0.0  ;;  %v4658_v57 = vmul.f32 %v17222_v26, %v4380_v54  ;;  %v4160_v16 = vadd.f32 %v17271_v58, %v17270_v63  ;;  %v12406_v63 = vld [vmem:[%s9937_s11 + $0x10] sm:$0xff] }
 0x2b0   : > { %8818 = vmatprep.mubr.msk.f32.mxu1 %vm3220_vm7, %v4671_v6  ;;  %v12321_v41 = vsel %vm3663_vm9, %v4631_v30, 0.0  ;;  %v4173_v17 = vmul.f32 %v17258_v44, %v17224_v5  ;;  %v4202_v14 = vmul.f32 %v12150_v46, %v17259_v53  ;;  %v4223_v38 = vmul.f32 %v17260_v25, %v17229_v10  ;;  %v12396_v6 = vld [vmem:[%s9937_s11] sm:$0xff] }
 0x2b1   : > { %v4327_v7 = vadd.f32 %v4319_v13, %v4298_v59  ;;  %v12331_v54 = vsel %vm4114_vm10, %v4658_v57, 0.0  ;;  %v4291_v36 = vsel %vm697_vm2, %v12118_v0, 0.0  ;;  %v4312_v22 = vmul.f32 %v11642_v11, %v17243_v34  ;;  %v17272_v13 = vld [vmem:[#allocation41_spill] sm:$0xff] }
 0x2b2   : > { %v4181_v5 = vsel %vm860_vm3, %v4173_v17, 0.0  ;;  %v4231_v46 = vsel %vm3663_vm9, %v4223_v38, 0.0  ;;  %v4341_v10 = vmul.f32 %v8993_v20, %v17211_v27  ;;  %v4362_v44 = vmul.f32 %v17213_v31, %v17249_v18  ;;  %v12420_v17 = vld [vmem:[%s9937_s11 + $0x8] sm:$0xff] }
 0x2b3   : > { %v4348_v53 = vadd.f32 %v12231_v4, %v4327_v7  ;;  %v4189_v25 = vadd.f32 %v4181_v5, %v4160_v16  ;;  %v4320_v0 = vsel %vm860_vm3, %v4312_v22, 0.0  ;;  %v12351_v11 = vsel %vm4114_vm10, %v17272_v13, 0.0  ;;  %v12428_v22 = vld [vmem:[%s9937_s11 + $0x18] sm:$0xff]  ;;  %v12431_v5 = vld [vmem:[%s9937_s11 + $0x28] sm:$0xff] }
 0x2b4   : > { %v4370_v34 = vsel %vm3663_vm9, %v4362_v44, 0.0  ;;  %v12357_v27 = vsel %vm697_vm2, %v4421_v9, 0.0  ;;  %v4450_v31 = vmul.f32 %v11675_v8, %v17264_v1  ;;  %v12362_v18 = vmul.f32 %v8994_v35, %v11681_v37  ;;  %17275 = vst [vmem:[#allocation67_spill] sm:$0xff] %v12428_v22  ;;  %17276 = vst [vmem:[#allocation52_spill] sm:$0xff] %v12431_v5 }
 0x2b5   : > { %v4377_v4 = vadd.f32 %v4369_v32, %v4348_v53  ;;  %v4210_v20 = vadd.f32 %v4202_v14, %v4189_v25  ;;  %v4500_v45 = vmul.f32 %v17217_v51, %v17267_v28  ;;  %v12368_v12 = vsel %vm4114_vm10, %v4529_v50, 0.0  ;;  %v12423_v14 = vld [vmem:[%s9937_s11 + $0x30] sm:$0xff] }
 0x2b6   : > { %v12372_v9 = vsel %vm860_vm3, %v4450_v31, 0.0  ;;  %v4558_v24 = vmul.f32 0.0, %v11695_v29  ;;  %v4585_v1 = vmul.f32 0.0, %v11701_v52  ;;  %v12377_v32 = vmul.f32 0.0, %v11703_v33  ;;  %17274 = vst [vmem:[#allocation68_spill] sm:$0xff] %v12423_v14 }
 0x2b7   : > { %v4407_v3 = vadd.f32 %v12257_v61, %v4377_v4  ;;  %v4239_v28 = vadd.f32 %v4231_v46, %v4210_v20  ;;  %v12382_v50 = vsel %vm3663_vm9, %v4500_v45, 0.0  ;;  %v4632_v40 = vmul.f32 0.0, %v17220_v43  ;;  %v17273_v43 = vld [vmem:[#allocation95_spill] sm:$0xff]  ;;  %v12434_v46 = vld [vmem:[%s9937_s11 + $0x38] sm:$0xff] }
 0x2b8   : > { %v12387_v29 = vsel %vm697_vm2, %v4558_v24, 0.0  ;;  %v12391_v52 = vsel %vm860_vm3, %v4585_v1, 0.0  ;;  %v4659_v33 = vmul.f32 0.0, %v17222_v26  ;;  %v4451_v61 = vmul.f32 0.0, %v11675_v8  ;;  %v12409_v26 = vld [vmem:[%s9937_s11 + $0x20] sm:$0xff]  ;;  %17277 = vst [vmem:[#allocation74_spill] sm:$0xff] %v12434_v46 }
 0x2b9   : > { %v4436_v35 = vadd.f32 %v12263_v23, %v4407_v3  ;;  %v4269_v30 = vadd.f32 %v17273_v43, %v4239_v28  ;;  %v12402_v59 = vsel %vm3663_vm9, %v4632_v40, 0.0  ;;  %v4480_v57 = vmul.f32 0.0, %v11681_v37  ;;  %v12450_v1 = vld [vmem:[#allocation7] ss:$0 sm:$0xff] }
 0x2ba   : > { %v12413_v8 = vsel %vm4114_vm10, %v4659_v33, 0.0  ;;  %v4459_v23 = vsel %vm860_vm3, %v4451_v61, 0.0  ;;  %v4501_v58 = vmul.f32 0.0, %v17217_v51  ;;  %v4530_v16 = vmul.f32 0.0, %v11693_v19  ;;  %17278 = vst [vmem:[#allocation70_spill] sm:$0xff] %v12450_v1 }
 0x2bb   : > { %v4465_v37 = vadd.f32 %v12280_v48, %v4436_v35  ;;  %v4299_v38 = vadd.f32 %v4291_v36, %v4269_v30  ;;  %v4467_v7 = vadd.f32 %v4459_v23, %v12292_v55  ;;  %v16815_v44 = vrot.slane %v12396_v6, 6 }
 0x2bc   : > { %v4509_v19 = vsel %vm3663_vm9, %v4501_v58, 0.0  ;;  %v4538_v51 = vsel %vm4114_vm10, %v4530_v16, 0.0  ;;  %v16813_v53 = vrot.slane %v12406_v63, 6  ;;  %v16811_v48 = vrot.slane %v12409_v26, 6 }
 0x2bd   : > { %v4486_v55 = vadd.f32 %v12274_v62, %v4465_v37  ;;  %v4328_v36 = vadd.f32 %v4320_v0, %v4299_v38  ;;  %v4488_v25 = vadd.f32 %v4480_v57, %v4467_v7  ;;  %v16791_v13 = vrot.slane %v12423_v14, 6  ;;  %v17279_v0 = vld [vmem:[#allocation30_spill] sm:$0xff] }
 0x2be   : > { %v16816_v31 = vrot.slane %v12420_v17, 6  ;;  %v16814_v4 = vrot.slane %v12428_v22, 6  ;;  %v16812_v49 = vrot.slane %v12431_v5, 6  ;;  %v16792_v20 = vrot.slane %v12434_v46, 6 }
 0x2bf   : > { %v4515_v60 = vadd.f32 %v12287_v21, %v4486_v55  ;;  %v4349_v45 = vadd.f32 %v4341_v10, %v4328_v36  ;;  %v4517_v24 = vadd.f32 %v4509_v19, %v4488_v25  ;;  %v666_v62 = vmul.f32 0.0, %v12450_v1 }
 0x2c0   : > { %v12459_v3 = vsel %vm632_vm0, %v16816_v31, %v16815_v44  ;;  %v12467_v21 = vsel %vm632_vm0, %v16814_v4, %v16813_v53  ;;  %v12475_v10 = vsel %vm632_vm0, %v16812_v49, %v16811_v48  ;;  %v12483_v28 = vsel %vm632_vm0, %v16792_v20, %v16791_v13  ;;  %v12593_v20 = vld [vmem:[#allocation7 + $0x3] ss:$0 sm:$0xff]  ;;  %v17287_v48 = vld [vmem:[#allocation35_spill] sm:$0xff]  ;;  %v12757_v44 = vld [vmem:[#allocation7 + $0xa] ss:$0 sm:$0xff] }
 0x2c1   : > { %17280 = vst [vmem:[#allocation42_spill] sm:$0xff] %v12483_v28  ;;  %v4544_v40 = vadd.f32 %v12296_v47, %v4515_v60  ;;  %v4378_v33 = vadd.f32 %v4370_v34, %v4349_v45  ;;  %v4546_v61 = vadd.f32 %v4538_v51, %v4517_v24  ;;  %v667_v35 = vmul.f32 %v12450_v1, %v12459_v3 }
 0x2c2   : > { %v669_v43 = vmul.f32 %v12450_v1, %v12467_v21  ;;  %v671_v30 = vmul.f32 %v12450_v1, %v12475_v10  ;;  %v707_v57 = vsel %vm697_vm2, %v666_v62, 0.0  ;;  %v16809_v23 = vrot.slane %v12396_v6, 7  ;;  %17288 = vst [vmem:[#allocation71_spill] sm:$0xff] %v12757_v44 }
 0x2c3   : > { %v4571_v58 = vadd.f32 %v12303_v2, %v4544_v40  ;;  %v4408_v47 = vadd.f32 %v12351_v11, %v4378_v33  ;;  %v4573_v34 = vadd.f32 %v12387_v29, %v4546_v61  ;;  %v709_v16 = vsel %vm697_vm2, %v667_v35, 0.0  ;;  %v12517_v33 = vld [vmem:[#allocation7 + $0x1] ss:$0 sm:$0xff] }
 0x2c4   : > { %v711_v37 = vsel %vm697_vm2, %v669_v43, 0.0  ;;  %v713_v38 = vsel %vm697_vm2, %v671_v30, 0.0  ;;  %v16807_v7 = vrot.slane %v12406_v63, 7  ;;  %v16799_v19 = vrot.slane %v12409_v26, 7  ;;  %17281 = vst [vmem:[#allocation58_spill] sm:$0xff] %v12517_v33 }
 0x2c5   : > { %v4598_v51 = vadd.f32 %v12313_v42, %v4571_v58  ;;  %v4437_v2 = vadd.f32 %v12357_v27, %v4408_v47  ;;  %v4600_v11 = vadd.f32 %v12391_v52, %v4573_v34  ;;  %v16789_v55 = vrot.slane %v12423_v14, 7 }
 0x2c6   : > { %v16810_v36 = vrot.slane %v12420_v17, 7  ;;  %v16808_v25 = vrot.slane %v12428_v22, 7  ;;  %v16800_v60 = vrot.slane %v12431_v5, 7  ;;  %v16790_v45 = vrot.slane %v12434_v46, 7 }
 0x2c7   : > { %v4618_v24 = vadd.f32 %v12307_v15, %v4598_v51  ;;  %v4466_v40 = vadd.f32 %v12372_v9, %v4437_v2  ;;  %v4620_v42 = vadd.f32 %v12377_v32, %v4600_v11  ;;  %v829_v27 = vmul.f32 0.0, %v12517_v33 }
 0x2c8   : > { %v12526_v61 = vsel %vm795_vm1, %v16810_v36, %v16809_v23  ;;  %v12534_v15 = vsel %vm795_vm1, %v16808_v25, %v16807_v7  ;;  %v12542_v9 = vsel %vm795_vm1, %v16800_v60, %v16799_v19  ;;  %v12550_v35 = vsel %vm795_vm1, %v16790_v45, %v16789_v55 }
 0x2c9   : > { %17282 = vst [vmem:[#allocation93_spill] sm:$0xff] %v12550_v35  ;;  %v4645_v43 = vadd.f32 %v12321_v41, %v4618_v24  ;;  %v4487_v30 = vadd.f32 %v12362_v18, %v4466_v40  ;;  %v4647_v58 = vadd.f32 %v12402_v59, %v4620_v42  ;;  %v830_v47 = vmul.f32 %v12517_v33, %v12526_v61 }
 0x2ca   : > { %v832_v34 = vmul.f32 %v12517_v33, %v12534_v15  ;;  %v834_v51 = vmul.f32 %v12517_v33, %v12542_v9  ;;  %v870_v2 = vsel %vm860_vm3, %v829_v27, 0.0  ;;  %v901_v11 = vadd.f32 %v829_v27, %v666_v62  ;;  %v12576_v27 = vld [vmem:[#allocation7 + $0x2] ss:$0 sm:$0xff] }
 0x2cb   : > { %v4672_v55 = vadd.f32 %v12331_v54, %v4645_v43  ;;  %v4516_v41 = vadd.f32 %v12382_v50, %v4487_v30  ;;  %v12566_v18 = vadd.f32 %v12413_v8, %v4647_v58  ;;  %v872_v24 = vsel %vm860_vm3, %v830_v47, 0.0  ;;  %17283 = vst [vmem:[#allocation94_spill] sm:$0xff] %v12576_v27 }
 0x2cc   : > { %v874_v40 = vsel %vm860_vm3, %v832_v34, 0.0  ;;  %v876_v42 = vsel %vm860_vm3, %v834_v51, 0.0  ;;  %v900_v45 = vadd.f32 %v870_v2, %v707_v57  ;;  %v902_v13 = vadd.f32 %v872_v24, %v709_v16 }
 0x2cd   : > { %8819 = vmatmul.mubr.msk.f32.gmra.mrb[20].mxu1 %vm3220_vm7, %v4672_v55  ;;  %v4545_v54 = vadd.f32 %v12368_v12, %v4516_v41  ;;  %v904_v62 = vadd.f32 %v874_v40, %v711_v37  ;;  %v906_v50 = vadd.f32 %v876_v42, %v713_v38  ;;  %v935_v43 = vmul.f32 0.0, %v12576_v27 }
 0x2ce   : > { %v936_v30 = vmul.f32 %v12576_v27, %v12396_v6  ;;  %v938_v58 = vmul.f32 %v12576_v27, %v12406_v63  ;;  %v940_v57 = vmul.f32 %v12576_v27, %v12409_v26  ;;  %v16798_v16 = vrot.slane %v12396_v6, 1 }
 0x2cf   : > { %v4572_v55 = vadd.f32 %v12387_v29, %v4545_v54  ;;  %v964_v12 = vadd.f32 %v935_v43, %v900_v45  ;;  %v965_v37 = vadd.f32 %v935_v43, %v901_v11  ;;  %v16794_v38 = vrot.slane %v12406_v63, 1 }
 0x2d0   : > { %v966_v47 = vadd.f32 %v936_v30, %v902_v13  ;;  %v968_v34 = vadd.f32 %v938_v58, %v904_v62  ;;  %v970_v51 = vadd.f32 %v940_v57, %v906_v50  ;;  %v16796_v2 = vrot.slane %v12409_v26, 1 }
 0x2d1   : > { %v4599_v41 = vadd.f32 %v12391_v52, %v4572_v55  ;;  %v16797_v24 = vrot.slane %v12420_v17, 1  ;;  %v16793_v40 = vrot.slane %v12428_v22, 1  ;;  %v16795_v42 = vrot.slane %v12431_v5, 1 }
 0x2d2   : > { %v1056_v29 = vmul.f32 0.0, %v12593_v20  ;;  %v16806_v45 = vrot.slane %v12396_v6, 2  ;;  %v16804_v13 = vrot.slane %v12406_v63, 2  ;;  %v16803_v11 = vrot.slane %v12409_v26, 2 }
 0x2d3   : > { %v4619_v54 = vadd.f32 %v12377_v32, %v4599_v41  ;;  %v12606_v52 = vsel %vm1022_vm4, %v16798_v16, %v16797_v24  ;;  %v12614_v62 = vsel %vm1022_vm4, %v16794_v38, %v16793_v40  ;;  %v12622_v32 = vsel %vm1022_vm4, %v16796_v2, %v16795_v42 }
 0x2d4   : > { %v1057_v50 = vmul.f32 %v12593_v20, %v12606_v52  ;;  %v1059_v43 = vmul.f32 %v12593_v20, %v12614_v62  ;;  %v1061_v30 = vmul.f32 %v12593_v20, %v12622_v32  ;;  %v1098_v57 = vsel %vm1090_vm6, %v1056_v29, 0.0 }
 0x2d5   : > { %v4646_v55 = vadd.f32 %v12402_v59, %v4619_v54  ;;  %v1127_v41 = vadd.f32 %v1056_v29, %v964_v12  ;;  %v1128_v40 = vadd.f32 %v1098_v57, %v965_v37  ;;  %v16805_v38 = vrot.slane %v12420_v17, 2  ;;  %v12645_v12 = vld [vmem:[#allocation7 + $0x4] ss:$0 sm:$0xff] }
 0x2d6   : > { %v1129_v42 = vadd.f32 %v1057_v50, %v966_v47  ;;  %v1131_v2 = vadd.f32 %v1059_v43, %v968_v34  ;;  %v1133_v24 = vadd.f32 %v1061_v30, %v970_v51  ;;  %v16801_v16 = vrot.slane %v12428_v22, 2  ;;  %v12658_v34 = vld [vmem:[#allocation7 + $0x5] ss:$0 sm:$0xff] }
 0x2d7   : > { %v4673_v19 = vadd.f32 %v12413_v8, %v4646_v55  ;;  %v16802_v60 = vrot.slane %v12431_v5, 2  ;;  %v12643_v59 = vsel %vm1185_vm5, %v16806_v45, %v16805_v38  ;;  %v1219_v37 = vmul.f32 0.0, %v12645_v12 }
 0x2d8   : > { %v12654_v8 = vsel %vm1185_vm5, %v16804_v13, %v16801_v16  ;;  %v1220_v47 = vmul.f32 %v12645_v12, %v12643_v59  ;;  %v1329_v51 = vmul.f32 0.0, %v12658_v34  ;;  %v1330_v29 = vmul.f32 %v12658_v34, %v12459_v3 }
 0x2d9   : > { %8821 = vmatprep.mubr.msk.f32.mxu1 %vm3220_vm7, %v4673_v19  ;;  %v12670_v54 = vsel %vm1185_vm5, %v16803_v11, %v16802_v60  ;;  %v1222_v50 = vmul.f32 %v12645_v12, %v12654_v8  ;;  %v1261_v30 = vsel %vm1253_vm8, %v1219_v37, 0.0  ;;  %v1290_v57 = vadd.f32 %v1219_v37, %v1127_v41 }
 0x2da   : > { %8822 = vmatmul.mubr.msk.f32.gmra.mrb[22].mxu1 %vm3220_vm7, %v12566_v18  ;;  %v1224_v19 = vmul.f32 %v12645_v12, %v12670_v54  ;;  %v12680_v55 = vadd.f32 %v1261_v30, %v1128_v40  ;;  %v1292_v16 = vadd.f32 %v1220_v47, %v1129_v42  ;;  %v1332_v60 = vmul.f32 %v12658_v34, %v12467_v21 }
 0x2db   : > { %v1294_v11 = vadd.f32 %v1222_v50, %v1131_v2  ;;  %v1334_v13 = vmul.f32 %v12658_v34, %v12475_v10  ;;  %v1336_v38 = vmul.f32 %v12658_v34, %v12483_v28  ;;  %v1360_v41 = vsel %vm697_vm2, %v1329_v51, 0.0 }
 0x2dc   : > { %v1296_v18 = vadd.f32 %v1224_v19, %v1133_v24  ;;  %v1362_v37 = vsel %vm697_vm2, %v1330_v29, 0.0  ;;  %v1364_v40 = vsel %vm697_vm2, %v1332_v60, 0.0  ;;  %v1392_v42 = vadd.f32 %v1360_v41, %v1290_v57  ;;  %v12699_v24 = vld [vmem:[#allocation7 + $0x6] ss:$0 sm:$0xff] }
 0x2dd   : > { %v1366_v2 = vsel %vm697_vm2, %v1334_v13, 0.0  ;;  %v1368_v47 = vsel %vm697_vm2, %v1336_v38, 0.0  ;;  %v1393_v50 = vadd.f32 %v1329_v51, %v12680_v55  ;;  %v1394_v30 = vadd.f32 %v1362_v37, %v1290_v57  ;;  %v12712_v51 = vld [vmem:[#allocation7 + $0x7] ss:$0 sm:$0xff] }
 0x2de   : > { %v1396_v45 = vadd.f32 %v1364_v40, %v1292_v16  ;;  %v1398_v7 = vadd.f32 %v1366_v2, %v1294_v11  ;;  %v1400_v25 = vadd.f32 %v1368_v47, %v1296_v18  ;;  %v1433_v29 = vmul.f32 0.0, %v12699_v24 }
 0x2df   : > { %v1434_v60 = vmul.f32 %v12699_v24, %v12526_v61  ;;  %v1436_v19 = vmul.f32 %v12699_v24, %v12534_v15  ;;  %v1438_v13 = vmul.f32 %v12699_v24, %v12542_v9  ;;  %v1440_v38 = vmul.f32 %v12699_v24, %v12550_v35 }
 0x2e0   : > { %v1464_v16 = vsel %vm860_vm3, %v1433_v29, 0.0  ;;  %v1497_v11 = vadd.f32 %v1433_v29, %v1393_v50  ;;  %v1533_v57 = vmul.f32 0.0, %v12712_v51  ;;  %v1534_v41 = vmul.f32 %v12712_v51, %v12396_v6 }
 0x2e1   : > { %v1466_v18 = vsel %vm860_vm3, %v1434_v60, 0.0  ;;  %v1468_v37 = vsel %vm860_vm3, %v1436_v19, 0.0  ;;  %v1470_v40 = vsel %vm860_vm3, %v1438_v13, 0.0  ;;  %v1472_v2 = vsel %vm860_vm3, %v1440_v38, 0.0  ;;  %v12735_v38 = vld [vmem:[#allocation7 + $0x8] ss:$0 sm:$0xff] }
 0x2e2   : > { %v1496_v47 = vadd.f32 %v1464_v16, %v1392_v42  ;;  %v1498_v50 = vadd.f32 %v1466_v18, %v1394_v30  ;;  %v1500_v29 = vadd.f32 %v1468_v37, %v1396_v45  ;;  %v1502_v23 = vadd.f32 %v1470_v40, %v1398_v7 }
 0x2e3   : > { %v12726_v36 = vsub.s32 0, %v17279_v0  ;;  %v1536_v60 = vmul.f32 %v12712_v51, %v12406_v63  ;;  %v1538_v19 = vmul.f32 %v12712_v51, %v12409_v26  ;;  %v12733_v53 = vadd.f32 %v1472_v2, %v1400_v25 }
 0x2e4   : > { %v1564_v13 = vadd.f32 %v1533_v57, %v1496_v47  ;;  %v1566_v4 = vadd.f32 %v1534_v41, %v1498_v50  ;;  %v1605_v45 = vmul.f32 0.0, %v12735_v38  ;;  %v1565_v7 = vadd.f32 %v1533_v57, %v1497_v11  ;;  %v12748_v11 = vld [vmem:[#allocation7 + $0x9] ss:$0 sm:$0xff] }
 0x2e5   : > { %17286 = vst [vmem:[#allocation59_spill] sm:$0xff] %v12726_v36  ;;  %v1568_v42 = vadd.f32 %v1536_v60, %v1500_v29  ;;  %v1570_v30 = vadd.f32 %v1538_v19, %v1502_v23  ;;  %v1606_v16 = vmul.f32 %v12735_v38, %v12606_v52  ;;  %v1608_v18 = vmul.f32 %v12735_v38, %v12614_v62  ;;  %v12795_v36 = vld [vmem:[#allocation7 + $0xc] ss:$0 sm:$0xff] }
 0x2e6   : > { %v1610_v37 = vmul.f32 %v12735_v38, %v12622_v32  ;;  %v1637_v25 = vsel %vm1090_vm6, %v1605_v45, 0.0  ;;  %v1668_v41 = vadd.f32 %v1605_v45, %v1564_v13  ;;  %v1540_v40 = vmul.f32 %v12712_v51, %v12423_v14  ;;  %17290 = vst [vmem:[#allocation72_spill] sm:$0xff] %v12795_v36 }
 0x2e7   : > { %v1670_v2 = vadd.f32 %v1606_v16, %v1566_v4  ;;  %v1709_v23 = vmul.f32 0.0, %v12748_v11  ;;  %v1710_v57 = vmul.f32 %v12748_v11, %v12643_v59  ;;  %v1672_v47 = vadd.f32 %v1608_v18, %v1568_v42 }
 0x2e8   : > { %v1674_v50 = vadd.f32 %v1610_v37, %v1570_v30  ;;  %v1712_v29 = vmul.f32 %v12748_v11, %v12654_v8  ;;  %v1714_v60 = vmul.f32 %v12748_v11, %v12670_v54  ;;  %v1669_v19 = vadd.f32 %v1637_v25, %v1565_v7  ;;  %v12771_v25 = vld [vmem:[#allocation7 + $0xb] ss:$0 sm:$0xff] }
 0x2e9   : > { %v1772_v13 = vadd.f32 %v1709_v23, %v1668_v41  ;;  %v1774_v45 = vadd.f32 %v1710_v57, %v1670_v2  ;;  %v1813_v4 = vmul.f32 %v12757_v44, %v12459_v3  ;;  %v1741_v16 = vsel %vm1253_vm8, %v1709_v23, 0.0  ;;  %17289 = vst [vmem:[#allocation66_spill] sm:$0xff] %v12771_v25 }
 0x2ea   : > { %v1776_v31 = vadd.f32 %v1712_v29, %v1672_v47  ;;  %v1778_v42 = vadd.f32 %v1714_v60, %v1674_v50  ;;  %v1815_v30 = vmul.f32 %v12757_v44, %v12467_v21  ;;  %v1817_v18 = vmul.f32 %v12757_v44, %v12475_v10 }
 0x2eb   : > { %v1819_v7 = vmul.f32 %v12757_v44, %v12483_v28  ;;  %v1845_v37 = vsel %vm697_vm2, %v1813_v4, 0.0  ;;  %v1918_v3 = vmul.f32 %v12771_v25, %v12526_v61  ;;  %v1920_v23 = vmul.f32 %v12771_v25, %v12534_v15 }
 0x2ec   : > { %v1847_v41 = vsel %vm697_vm2, %v1815_v30, 0.0  ;;  %v1877_v2 = vadd.f32 %v1845_v37, %v1772_v13  ;;  %v1922_v57 = vmul.f32 %v12771_v25, %v12542_v9  ;;  %v1849_v47 = vsel %vm697_vm2, %v1817_v18, 0.0 }
 0x2ed   : > { %v1851_v50 = vsel %vm697_vm2, %v1819_v7, 0.0  ;;  %v1879_v29 = vadd.f32 %v1847_v41, %v1774_v45  ;;  %v1924_v61 = vmul.f32 %v12771_v25, %v12550_v35  ;;  %v1881_v60 = vadd.f32 %v1849_v47, %v1776_v31 }
 0x2ee   : > { %v1883_v4 = vadd.f32 %v1851_v50, %v1778_v42  ;;  %v1950_v13 = vsel %vm860_vm3, %v1918_v3, 0.0  ;;  %v1952_v30 = vsel %vm860_vm3, %v1920_v23, 0.0  ;;  %v1954_v37 = vsel %vm860_vm3, %v1922_v57, 0.0  ;;  %v12805_v57 = vld [vmem:[#allocation7 + $0xd] ss:$0 sm:$0xff] }
 0x2ef   : > { %v1956_v18 = vsel %vm860_vm3, %v1924_v61, 0.0  ;;  %v1982_v49 = vadd.f32 %v1950_v13, %v1877_v2  ;;  %v1984_v7 = vadd.f32 %v1952_v30, %v1879_v29  ;;  %v1986_v45 = vadd.f32 %v1954_v37, %v1881_v60  ;;  %v12813_v60 = vld [vmem:[#allocation7 + $0xe] ss:$0 sm:$0xff] }
 0x2f0   : > { %v1988_v41 = vadd.f32 %v1956_v18, %v1883_v4  ;;  %v2019_v31 = vmul.f32 %v12795_v36, %v12396_v6  ;;  %v2021_v42 = vmul.f32 %v12795_v36, %v12406_v63  ;;  %v2023_v3 = vmul.f32 %v12795_v36, %v12409_v26  ;;  %17291 = vst [vmem:[#allocation96_spill] sm:$0xff] %v12813_v60 }
 0x2f1   : > { %v2025_v23 = vmul.f32 %v12795_v36, %v12423_v14  ;;  %v2092_v2 = vmul.f32 %v12805_v57, %v12606_v52  ;;  %v2094_v47 = vmul.f32 %v12805_v57, %v12614_v62  ;;  %v2096_v61 = vmul.f32 %v12805_v57, %v12622_v32 }
 0x2f2   : > { %v2051_v50 = vadd.f32 %v2019_v31, %v1982_v49  ;;  %v2053_v29 = vadd.f32 %v2021_v42, %v1984_v7  ;;  %v2197_v4 = vmul.f32 %v12813_v60, %v12643_v59  ;;  %v17292_v13 = vunpack.c.0.s8 %v17287_v48  ;;  %v12829_v42 = vld [vmem:[#allocation7 + $0xf] ss:$0 sm:$0xff] }
 0x2f3   : > { %v12823_v52 = vadd.f32 %v1540_v40, %v12733_v53  ;;  %v2055_v37 = vadd.f32 %v2023_v3, %v1986_v45  ;;  %v2199_v49 = vmul.f32 %v12813_v60, %v12654_v8  ;;  %v2201_v31 = vmul.f32 %v12813_v60, %v12670_v54  ;;  %17295 = vst [vmem:[#allocation100_spill] sm:$0xff] %v12829_v42  ;;  %v12837_v40 = vld [vmem:[#allocation7 + $0x10] ss:$0 sm:$0xff] }
 0x2f4   : > { %v12820_v30 = vsub.s32 %v17292_v13, %v17279_v0  ;;  %v2156_v18 = vadd.f32 %v2092_v2, %v2051_v50  ;;  %v2158_v7 = vadd.f32 %v2094_v47, %v2053_v29  ;;  %v2298_v59 = vmul.f32 %v12829_v42, %v12467_v21  ;;  %17296 = vst [vmem:[#allocation98_spill] sm:$0xff] %v12837_v40 }
 0x2f5   : > { %17294 = vst [vmem:[#allocation79_spill] sm:$0xff] %v12823_v52  ;;  %v12833_v48 = vadd.f32 %v1741_v16, %v1669_v19  ;;  %v2160_v13 = vadd.f32 %v2096_v61, %v2055_v37  ;;  %v2302_v53 = vmul.f32 %v12829_v42, %v12483_v28  ;;  %v2398_v45 = vmul.f32 %v12837_v40, %v12534_v15  ;;  %v12865_v61 = vld [vmem:[#allocation7 + $0x11] ss:$0 sm:$0xff] }
 0x2f6   : > { %17293 = vst [vmem:[#allocation38_spill] sm:$0xff] %v12820_v30  ;;  %v12841_v3 = vadd.f32 %v2025_v23, %v1988_v41  ;;  %v2261_v2 = vadd.f32 %v2197_v4, %v2156_v18  ;;  %v2329_v47 = vsel %vm697_vm2, %v2298_v59, 0.0  ;;  %v2402_v21 = vmul.f32 %v12837_v40, %v12550_v35  ;;  %17301 = vst [vmem:[#allocation97_spill] sm:$0xff] %v12865_v61 }
 0x2f7   : > { %v12847_v19 = vadd.f32 %v2199_v49, %v2158_v7  ;;  %v12851_v16 = vmul.f32 %v12829_v42, %v12475_v10  ;;  %v12855_v50 = vmul.f32 %v12837_v40, %v12542_v9  ;;  %v2429_v15 = vsel %vm860_vm3, %v2398_v45, 0.0  ;;  %v12873_v49 = vld [vmem:[#allocation7 + $0x12] ss:$0 sm:$0xff] }
 0x2f8   : > { %17297 = vst [vmem:[#allocation62_spill] sm:$0xff] %v12841_v3  ;;  %v12859_v41 = vadd.f32 %v2201_v31, %v2160_v13  ;;  %v12863_v23 = vsel %vm697_vm2, %v2302_v53, 0.0  ;;  %v2361_v29 = vadd.f32 %v2329_v47, %v2261_v2  ;;  %v2498_v4 = vmul.f32 %v12865_v61, %v12406_v63  ;;  %17302 = vst [vmem:[#allocation61_spill] sm:$0xff] %v12873_v49  ;;  %v12881_v31 = vld [vmem:[#allocation7 + $0x14] ss:$0 sm:$0xff] }
 0x2f9   : > { %17298 = vst [vmem:[#allocation63_spill] sm:$0xff] %v12847_v19  ;;  %17299 = vst [vmem:[#allocation60_spill] sm:$0xff] %v12851_v16  ;;  %v12871_v37 = vsel %vm860_vm3, %v2402_v21, 0.0  ;;  %v2566_v18 = vmul.f32 %v12873_v49, %v12614_v62  ;;  %v12879_v7 = vmul.f32 %v12873_v49, %v12622_v32  ;;  %v2766_v59 = vmul.f32 %v12881_v31, %v12475_v10  ;;  %v12885_v53 = vld [vmem:[#allocation7 + $0x13] ss:$0 sm:$0xff] }
 0x2fa   : > { %17300 = vst [vmem:[#allocation99_spill] sm:$0xff] %v12855_v50  ;;  %17304 = vst [vmem:[#allocation101_spill] sm:$0xff] %v12881_v31  ;;  %v2461_v13 = vadd.f32 %v2429_v15, %v2361_v29  ;;  %v2666_v45 = vmul.f32 %v12885_v53, %v12654_v8  ;;  %v12889_v2 = vld [vmem:[#allocation7 + $0x15] ss:$0 sm:$0xff]  ;;  %v12893_v47 = vld [vmem:[#allocation7 + $0x16] ss:$0 sm:$0xff] }
 0x2fb   : > { %17303 = vst [vmem:[#allocation73_spill] sm:$0xff] %v12879_v7  ;;  %17305 = vst [vmem:[#allocation65_spill] sm:$0xff] %v12885_v53  ;;  %v2862_v62 = vmul.f32 %v12889_v2, %v12542_v9  ;;  %v2958_v21 = vmul.f32 %v12893_v47, %v12409_v26  ;;  %v2795_v30 = vsel %vm697_vm2, %v2766_v59, 0.0  ;;  %v12899_v10 = vld [vmem:[#allocation7 + $0x17] ss:$0 sm:$0xff]  ;;  %v17310_v9 = vrot.slane %v12420_v17, 6 }
 0x2fc   : > { %17306 = vst [vmem:[#allocation64_spill] sm:$0xff] %v12889_v2  ;;  %17307 = vst [vmem:[#allocation92_spill] sm:$0xff] %v12893_v47  ;;  %v3024_v15 = vmul.f32 %v12899_v10, %v12622_v32  ;;  %v12903_v29 = vld [vmem:[#allocation7 + $0x18] ss:$0 sm:$0xff]  ;;  %v17311_v3 = vrot.slane %v12396_v6, 6  ;;  %v2529_v52 = vadd.f32 %v2498_v4, %v2461_v13  ;;  %v17312_v50 = vrot.slane %v12428_v22, 6 }
 0x2fd   : > { %17308 = vst [vmem:[#allocation69_spill] sm:$0xff] %v12899_v10  ;;  %17309 = vst [vmem:[#allocation33_spill] sm:$0xff] %v12903_v29  ;;  %v3120_v8 = vmul.f32 %v12903_v29, %v12670_v54  ;;  %v2891_v59 = vsel %vm860_vm3, %v2862_v62, 0.0  ;;  %v17313_v32 = vrot.slane %v12406_v63, 6  ;;  %v17314_v16 = vrot.slane %v12431_v5, 6 }
 0x2fe   : > { %v12913_v7 = vsel %vm632_vm0, %v17311_v3, %v17310_v9  ;;  %v17315_v46 = vrot.slane %v12409_v26, 6  ;;  %v17318_v9 = vrot.slane %v12396_v6, 7  ;;  %v2629_v56 = vadd.f32 %v2566_v18, %v2529_v52 }
 0x2ff   : > { %v12923_v19 = vsel %vm632_vm0, %v17313_v32, %v17312_v50  ;;  %v668_v4 = vmul.f32 %v12450_v1, %v12913_v7  ;;  %v17317_v50 = vrot.slane %v12420_v17, 7  ;;  %v17321_v39 = vrot.slane %v12431_v5, 7 }
 0x300   : > { %v12931_v3 = vsel %vm632_vm0, %v17315_v46, %v17314_v16  ;;  %v670_v13 = vmul.f32 %v12450_v1, %v12923_v19  ;;  %v17319_v46 = vrot.slane %v12428_v22, 7  ;;  %v17320_v16 = vrot.slane %v12406_v63, 7 }
 0x301   : > { %17316 = vst [vmem:[#allocation41_spill] sm:$0xff] %v12931_v3  ;;  %v672_v62 = vmul.f32 %v12450_v1, %v12931_v3  ;;  %v12945_v32 = vsel %vm795_vm1, %v17318_v9, %v17317_v50  ;;  %v17322_v35 = vrot.slane %v12409_v26, 7  ;;  %v937_v9 = vmul.f32 %v12576_v27, %v12420_v17 }
 0x302   : > { %v12953_v14 = vsel %vm795_vm1, %v17320_v16, %v17319_v46  ;;  %v831_v50 = vmul.f32 %v12517_v33, %v12945_v32  ;;  %v939_v46 = vmul.f32 %v12576_v27, %v12428_v22  ;;  %v2729_v16 = vadd.f32 %v2666_v45, %v2629_v56 }
 0x303   : > { %v12961_v29 = vsel %vm795_vm1, %v17322_v35, %v17321_v39  ;;  %v833_v52 = vmul.f32 %v12517_v33, %v12953_v14  ;;  %v941_v39 = vmul.f32 %v12576_v27, %v12431_v5  ;;  %v17324_v35 = vrot.slane %v12396_v6, 1 }
 0x304   : > { %17323 = vst [vmem:[#allocation95_spill] sm:$0xff] %v12961_v29  ;;  %v835_v18 = vmul.f32 %v12517_v33, %v12961_v29  ;;  %v903_v10 = vadd.f32 %v831_v50, %v668_v4  ;;  %v17325_v1 = vrot.slane %v12420_v17, 1  ;;  %v17326_v2 = vrot.slane %v12406_v63, 1 }
 0x305   : > { %v905_v33 = vadd.f32 %v833_v52, %v670_v13  ;;  %v17327_v31 = vrot.slane %v12428_v22, 1  ;;  %v17328_v45 = vrot.slane %v12409_v26, 1  ;;  %v17329_v4 = vrot.slane %v12431_v5, 1 }
 0x306   : > { %v12981_v28 = vsel %vm1022_vm4, %v17325_v1, %v17324_v35  ;;  %v907_v47 = vadd.f32 %v835_v18, %v672_v62  ;;  %v2825_v1 = vadd.f32 %v2795_v30, %v2729_v16  ;;  %v967_v35 = vadd.f32 %v937_v9, %v903_v10 }
 0x307   : > { %v12989_v56 = vsel %vm1022_vm4, %v17327_v31, %v17326_v2  ;;  %v12997_v50 = vsel %vm1022_vm4, %v17329_v4, %v17328_v45  ;;  %v1058_v13 = vmul.f32 %v12593_v20, %v12981_v28  ;;  %v969_v52 = vadd.f32 %v939_v46, %v905_v33 }
 0x308   : > { %17330 = vst [vmem:[#allocation34_spill] sm:$0xff] %v12997_v50  ;;  %v1060_v62 = vmul.f32 %v12593_v20, %v12989_v56  ;;  %v971_v18 = vadd.f32 %v941_v39, %v907_v47  ;;  %v1062_v31 = vmul.f32 %v12593_v20, %v12997_v50  ;;  %v17331_v2 = vrot.slane %v12396_v6, 2 }
 0x309   : > { %v17332_v27 = vrot.slane %v12420_v17, 2  ;;  %v2921_v30 = vadd.f32 %v2891_v59, %v2825_v1  ;;  %v1100_v10 = vsel %vm1090_vm6, %v1058_v13, 0.0  ;;  %v17333_v33 = vrot.slane %v12406_v63, 2 }
 0x30a   : > { %v1102_v9 = vsel %vm1090_vm6, %v1060_v62, 0.0  ;;  %v17334_v47 = vrot.slane %v12428_v22, 2  ;;  %v1104_v46 = vsel %vm1090_vm6, %v1062_v31, 0.0  ;;  %v17335_v59 = vrot.slane %v12409_v26, 2 }
 0x30b   : > { %v13011_v45 = vsel %vm1185_vm5, %v17332_v27, %v17331_v2  ;;  %v1130_v27 = vadd.f32 %v1100_v10, %v967_v35  ;;  %v1132_v16 = vadd.f32 %v1102_v9, %v969_v52  ;;  %v17336_v39 = vrot.slane %v12431_v5, 2 }
 0x30c   : > { %v13023_v6 = vsel %vm1185_vm5, %v17334_v47, %v17333_v33  ;;  %v2987_v63 = vadd.f32 %v2958_v21, %v2921_v30  ;;  %v1134_v1 = vadd.f32 %v1104_v46, %v971_v18  ;;  %v1221_v13 = vmul.f32 %v12645_v12, %v13011_v45 }
 0x30d   : > { %v13033_v4 = vsel %vm1185_vm5, %v17336_v39, %v17335_v59  ;;  %v1223_v62 = vmul.f32 %v12645_v12, %v13023_v6  ;;  %v1331_v52 = vmul.f32 %v12658_v34, %v12913_v7  ;;  %v1333_v31 = vmul.f32 %v12658_v34, %v12923_v19 }
 0x30e   : > { %17337 = vst [vmem:[#allocation35_spill] sm:$0xff] %v13033_v4  ;;  %v1225_v35 = vmul.f32 %v12645_v12, %v13033_v4  ;;  %v1335_v2 = vmul.f32 %v12658_v34, %v12931_v3  ;;  %v2365_v21 = vadd.f32 %v12863_v23, %v12859_v41  ;;  %v3083_v18 = vadd.f32 %v3024_v15, %v2987_v63 }
 0x30f   : > { %v1263_v30 = vsel %vm1253_vm8, %v1221_v13, 0.0  ;;  %v1265_v10 = vsel %vm1253_vm8, %v1223_v62, 0.0  ;;  %v1435_v46 = vmul.f32 %v12699_v24, %v12945_v32  ;;  %v1437_v41 = vmul.f32 %v12699_v24, %v12953_v14 }
 0x310   : > { %v1267_v9 = vsel %vm1253_vm8, %v1225_v35, 0.0  ;;  %v1293_v33 = vadd.f32 %v1263_v30, %v1130_v27  ;;  %v1295_v47 = vadd.f32 %v1265_v10, %v1132_v16  ;;  %v3179_v59 = vadd.f32 %v3120_v8, %v3083_v18 }
 0x311   : > { %v13057_v39 = vadd.f32 %v1267_v9, %v1134_v1  ;;  %v1439_v23 = vmul.f32 %v12699_v24, %v12961_v29  ;;  %v1395_v15 = vadd.f32 %v1331_v52, %v12680_v55  ;;  %v1537_v27 = vmul.f32 %v12712_v51, %v12428_v22 }
 0x312   : > { %v1397_v63 = vadd.f32 %v1333_v31, %v1293_v33  ;;  %v1399_v13 = vadd.f32 %v1335_v2, %v1295_v47  ;;  %8744 = vmatprep.mubr.msk.f32.mxu0 %vm3220_vm7, %v3179_v59  ;;  %v1539_v8 = vmul.f32 %v12712_v51, %v12431_v5  ;;  %v1607_v16 = vmul.f32 %v12735_v38, %v12981_v28 }
 0x313   : > { %v1609_v1 = vmul.f32 %v12735_v38, %v12989_v56  ;;  %v1611_v62 = vmul.f32 %v12735_v38, %v12997_v50  ;;  %v1711_v52 = vmul.f32 %v12748_v11, %v13011_v45  ;;  %v1713_v31 = vmul.f32 %v12748_v11, %v13023_v6 }
 0x314   : > { %v1501_v55 = vadd.f32 %v1437_v41, %v1397_v63  ;;  %v1503_v35 = vadd.f32 %v1439_v23, %v1399_v13  ;;  %v13081_v2 = vmul.f32 %v12885_v53, %v12670_v54  ;;  %v1715_v10 = vmul.f32 %v12748_v11, %v13033_v4 }
 0x315   : > { %v1641_v18 = vsel %vm1090_vm6, %v1609_v1, 0.0  ;;  %v1643_v30 = vsel %vm1090_vm6, %v1611_v62, 0.0  ;;  %v13090_v9 = vadd.f32 %v12871_v37, %v2365_v21  ;;  %v13092_v33 = vadd.f32 %v1435_v46, %v1395_v15 }
 0x316   : > { %v1569_v47 = vadd.f32 %v1537_v27, %v1501_v55  ;;  %v1571_v59 = vadd.f32 %v1539_v8, %v1503_v35  ;;  %v13096_v54 = vsel %vm1090_vm6, %v1607_v16, 0.0  ;;  %v13100_v41 = vsel %vm1253_vm8, %v1711_v52, 0.0 }
 0x317   : > { %17338 = vst [vmem:[#allocation102_spill] sm:$0xff] %v13090_v9  ;;  %17339 = vst [vmem:[#allocation103_spill] sm:$0xff] %v13096_v54  ;;  %v1745_v23 = vsel %vm1253_vm8, %v1713_v31, 0.0  ;;  %v1814_v63 = vmul.f32 %v12757_v44, %v12913_v7  ;;  %v1818_v46 = vmul.f32 %v12757_v44, %v12931_v3  ;;  %v1919_v15 = vmul.f32 %v12771_v25, %v12945_v32 }
 0x318   : > { %17340 = vst [vmem:[#allocation104_spill] sm:$0xff] %v13100_v41  ;;  %v1673_v37 = vadd.f32 %v1641_v18, %v1569_v47  ;;  %v1675_v21 = vadd.f32 %v1643_v30, %v1571_v59  ;;  %v1747_v13 = vsel %vm1253_vm8, %v1715_v10, 0.0  ;;  %v13114_v27 = vmul.f32 %v12757_v44, %v12923_v19  ;;  %v17362_v41 = vld [vmem:[#allocation99_spill] sm:$0xff] }
 0x319   : > { %v1878_v8 = vadd.f32 %v1814_v63, %v12833_v48  ;;  %v2020_v7 = vmul.f32 %v12795_v36, %v12420_v17  ;;  %v13121_v1 = vmul.f32 %v12771_v25, %v12953_v14  ;;  %v1923_v32 = vmul.f32 %v12771_v25, %v12961_v29 }
 0x31a   : > { %17341 = vst [vmem:[#allocation105_spill] sm:$0xff] %v13114_v27  ;;  %v1777_v16 = vadd.f32 %v1745_v23, %v1673_v37  ;;  %v2093_v62 = vmul.f32 %v12805_v57, %v12981_v28  ;;  %v2024_v35 = vmul.f32 %v12795_v36, %v12431_v5  ;;  %v2097_v48 = vmul.f32 %v12805_v57, %v12997_v50 }
 0x31b   : > { %17342 = vst [vmem:[#allocation106_spill] sm:$0xff] %v13121_v1  ;;  %v1983_v55 = vadd.f32 %v1919_v15, %v1878_v8  ;;  %v2198_v52 = vmul.f32 %v12813_v60, %v13011_v45  ;;  %v13133_v31 = vadd.f32 %v1747_v13, %v1675_v21  ;;  %v2202_v10 = vmul.f32 %v12813_v60, %v13033_v4 }
 0x31c   : > { %v1882_v18 = vadd.f32 %v1818_v46, %v1777_v16  ;;  %v2125_v30 = vsel %vm1090_vm6, %v2093_v62, 0.0  ;;  %v13141_v47 = vmul.f32 %v12805_v57, %v12989_v56  ;;  %v13145_v59 = vmul.f32 %v12813_v60, %v13023_v6  ;;  %v17346_v16 = vld [vmem:[#allocation101_spill] sm:$0xff]  ;;  %v17347_v62 = vld [vmem:[#allocation64_spill] sm:$0xff] }
 0x31d   : > { %17343 = vst [vmem:[#allocation107_spill] sm:$0xff] %v13133_v31  ;;  %v2052_v28 = vadd.f32 %v2020_v7, %v1983_v55  ;;  %v2299_v45 = vmul.f32 %v12829_v42, %v12923_v19  ;;  %v2129_v63 = vsel %vm1090_vm6, %v2097_v48, 0.0  ;;  %v2230_v37 = vsel %vm1253_vm8, %v2198_v52, 0.0  ;;  %v17348_v52 = vld [vmem:[#allocation92_spill] sm:$0xff] }
 0x31e   : > { %17344 = vst [vmem:[#allocation108_spill] sm:$0xff] %v13141_v47  ;;  %17345 = vst [vmem:[#allocation109_spill] sm:$0xff] %v13145_v59  ;;  %v1987_v23 = vadd.f32 %v1923_v32, %v1882_v18  ;;  %v2567_v21 = vmul.f32 %v12873_v49, %v12989_v56  ;;  %v2234_v15 = vsel %vm1253_vm8, %v2202_v10, 0.0  ;;  %v2399_v13 = vmul.f32 %v12837_v40, %v12953_v14  ;;  %v17349_v18 = vld [vmem:[#allocation42_spill] sm:$0xff]  ;;  %v17351_v10 = vld [vmem:[#allocation69_spill] sm:$0xff] }
 0x31f   : > { %v2157_v46 = vadd.f32 %v2125_v30, %v2052_v28  ;;  %v2667_v19 = vmul.f32 %v12885_v53, %v13023_v6  ;;  %v2499_v7 = vmul.f32 %v12865_v61, %v12428_v22  ;;  %v2767_v32 = vmul.f32 %v17346_v16, %v12931_v3  ;;  %v17350_v30 = vld [vmem:[#allocation70_spill] sm:$0xff]  ;;  %v17353_v53 = vld [vmem:[#allocation93_spill] sm:$0xff] }
 0x320   : > { %v2056_v8 = vadd.f32 %v2024_v35, %v1987_v23  ;;  %v2863_v56 = vmul.f32 %v17347_v62, %v12961_v29  ;;  %v2598_v48 = vsel %vm1090_vm6, %v2567_v21, 0.0  ;;  %v2959_v14 = vmul.f32 %v17348_v52, %v12431_v5  ;;  %v17352_v23 = vld [vmem:[#allocation33_spill] sm:$0xff]  ;;  %v17356_v5 = vld [vmem:[#allocation68_spill] sm:$0xff]  ;;  %v17357_v29 = vld [vmem:[#allocation94_spill] sm:$0xff] }
 0x321   : > { %v2262_v55 = vadd.f32 %v2230_v37, %v2157_v46  ;;  %v673_v6 = vmul.f32 %v17350_v30, %v17349_v18  ;;  %v2698_v35 = vsel %vm1253_vm8, %v2667_v19, 0.0  ;;  %v3025_v28 = vmul.f32 %v17351_v10, %v12997_v50  ;;  %v17354_v37 = vld [vmem:[#allocation58_spill] sm:$0xff] }
 0x322   : > { %v3121_v9 = vmul.f32 %v17352_v23, %v13033_v4  ;;  %v836_v46 = vmul.f32 %v17354_v37, %v17353_v53  ;;  %v942_v42 = vmul.f32 %v17357_v29, %v17356_v5  ;;  %v997_v3 = vrot.slane %v17356_v5, 1  ;;  %v17359_v50 = vld [vmem:[#allocation74_spill] sm:$0xff] }
 0x323   : > { %v2362_v49 = vadd.f32 %v2299_v45, %v2262_v55  ;;  %v715_v40 = vsel %vm697_vm2, %v673_v6, 0.0  ;;  %v2161_v1 = vadd.f32 %v2129_v63, %v2056_v8  ;;  %v1011_v47 = vrot.slane %v17359_v50, 1  ;;  %v17360_v55 = vld [vmem:[#allocation60_spill] sm:$0xff]  ;;  %v17361_v63 = vld [vmem:[#allocation63_spill] sm:$0xff] }
 0x324   : > { %v878_v59 = vsel %vm860_vm3, %v836_v46, 0.0  ;;  %v1160_v4 = vrot.slane %v17356_v5, 2  ;;  %v1174_v45 = vrot.slane %v17359_v50, 2  ;;  %v2331_v6 = vsel %vm697_vm2, %v17360_v55, 0.0 }
 0x325   : > { %v2462_v22 = vadd.f32 %v2399_v13, %v2362_v49  ;;  %v908_v27 = vadd.f32 %v878_v59, %v715_v40  ;;  %v13196_v36 = vsel %vm1022_vm4, %v997_v3, %v1011_v47  ;;  %v2363_v8 = vadd.f32 %v2331_v6, %v17361_v63 }
 0x326   : > { %v2431_v46 = vsel %vm860_vm3, %v17362_v41, 0.0  ;;  %v2500_v49 = vmul.f32 %v12865_v61, %v12409_v26  ;;  %v1063_v13 = vmul.f32 %v12593_v20, %v13196_v36  ;;  %v13208_v55 = vsel %vm1185_vm5, %v1160_v4, %v1174_v45  ;;  %v17364_v61 = vld [vmem:[#allocation79_spill] sm:$0xff] }
 0x327   : > { %v2530_v40 = vadd.f32 %v2499_v7, %v2462_v22  ;;  %v972_v59 = vadd.f32 %v942_v42, %v908_v27  ;;  %v3054_v25 = vsel %vm1090_vm6, %v3025_v28, 0.0  ;;  %v1226_v6 = vmul.f32 %v12645_v12, %v13208_v55 }
 0x328   : > { %v1612_v41 = vmul.f32 %v12735_v38, %v13196_v36  ;;  %v1716_v26 = vmul.f32 %v12748_v11, %v13208_v55  ;;  %v3150_v42 = vsel %vm1253_vm8, %v3121_v9, 0.0  ;;  %v2463_v7 = vadd.f32 %v2431_v46, %v2363_v8 }
 0x329   : > { %v2630_v22 = vadd.f32 %v2598_v48, %v2530_v40  ;;  %v1135_v27 = vadd.f32 %v1063_v13, %v972_v59  ;;  %v13220_v63 = vadd.f32 %v2234_v15, %v2161_v1  ;;  %v2768_v28 = vmul.f32 %v17346_v16, %v17349_v18 }
 0x32a   : > { %v1676_v31 = vadd.f32 %v1612_v41, %v17364_v61  ;;  %v2864_v54 = vmul.f32 %v17347_v62, %v17353_v53  ;;  %v2098_v48 = vmul.f32 %v12805_v57, %v13196_v36  ;;  %v2531_v40 = vadd.f32 %v2500_v49, %v2463_v7  ;;  %v17365_v53 = vld [vmem:[#allocation73_spill] sm:$0xff] }
 0x32b   : > { %17363 = vst [vmem:[#allocation101_spill] sm:$0xff] %v13220_v63  ;;  %v2730_v60 = vadd.f32 %v2698_v35, %v2630_v22  ;;  %v13227_v44 = vadd.f32 %v1226_v6, %v1135_v27  ;;  %v2797_v1 = vsel %vm697_vm2, %v2768_v28, 0.0  ;;  %v2960_v15 = vmul.f32 %v17348_v52, %v17356_v5 }
 0x32c   : > { %v13231_v9 = vadd.f32 %v1716_v26, %v1676_v31  ;;  %v2893_v61 = vsel %vm860_vm3, %v2864_v54, 0.0  ;;  %v2631_v35 = vadd.f32 %v17365_v53, %v2531_v40  ;;  %v3026_v8 = vmul.f32 %v17351_v10, %v13196_v36 }
 0x32d   : > { %v2826_v18 = vadd.f32 %v2767_v32, %v2730_v60  ;;  %v3122_v46 = vmul.f32 %v17352_v23, %v13208_v55  ;;  %v17366_v31 = vrot.slane %v17359_v50, 6  ;;  %v17367_v49 = vrot.slane %v17356_v5, 6 }
 0x32e   : > { %v17369_v54 = vrot.slane %v17359_v50, 7  ;;  %v17370_v60 = vrot.slane %v17356_v5, 7  ;;  %v943_v13 = vmul.f32 %v17357_v29, %v17359_v50  ;;  %v13264_v6 = vsel %vm1022_vm4, %v1011_v47, %v997_v3 }
 0x32f   : > { %v13250_v59 = vsel %vm632_vm0, %v17367_v49, %v17366_v31  ;;  %17372 = vst [vmem:[#allocation42_spill] sm:$0xff] %v13264_v6  ;;  %v2922_v41 = vadd.f32 %v2863_v56, %v2826_v18  ;;  %v2731_v26 = vadd.f32 %v13081_v2, %v2631_v35  ;;  %v1064_v27 = vmul.f32 %v12593_v20, %v13264_v6 }
 0x330   : > { %17368 = vst [vmem:[#allocation64_spill] sm:$0xff] %v13250_v59  ;;  %v13258_v32 = vsel %vm795_vm1, %v17370_v60, %v17369_v54  ;;  %v674_v22 = vmul.f32 %v17350_v30, %v13250_v59  ;;  %v13275_v7 = vsel %vm1185_vm5, %v1174_v45, %v1160_v4  ;;  %v1337_v3 = vmul.f32 %v12658_v34, %v13250_v59 }
 0x331   : > { %17371 = vst [vmem:[#allocation92_spill] sm:$0xff] %v13258_v32  ;;  %v837_v5 = vmul.f32 %v17354_v37, %v13258_v32  ;;  %17373 = vst [vmem:[#allocation70_spill] sm:$0xff] %v13275_v7  ;;  %v1441_v47 = vmul.f32 %v12699_v24, %v13258_v32  ;;  %v2988_v2 = vadd.f32 %v2959_v14, %v2922_v41  ;;  %v1106_v18 = vsel %vm1090_vm6, %v1064_v27, 0.0  ;;  %v17377_v27 = vld [vmem:[#allocation103_spill] sm:$0xff] }
 0x332   : > { %v2827_v56 = vadd.f32 %v2797_v1, %v2731_v26  ;;  %v1227_v40 = vmul.f32 %v12645_v12, %v13275_v7  ;;  %v1401_v53 = vadd.f32 %v1337_v3, %v13057_v39  ;;  %v1535_v4 = vmul.f32 %v12712_v51, %v12420_v17 }
 0x333   : > { %v909_v28 = vadd.f32 %v837_v5, %v674_v22  ;;  %v1541_v45 = vmul.f32 %v12712_v51, %v17359_v50  ;;  %v3084_v35 = vadd.f32 %v3054_v25, %v2988_v2  ;;  %v1613_v60 = vmul.f32 %v12735_v38, %v13264_v6  ;;  %v17374_v22 = vld [vmem:[#allocation71_spill] sm:$0xff] }
 0x334   : > { %v2923_v31 = vadd.f32 %v2893_v61, %v2827_v56  ;;  %v1269_v14 = vsel %vm1253_vm8, %v1227_v40, 0.0  ;;  %v1505_v1 = vadd.f32 %v1441_v47, %v1401_v53  ;;  %v1567_v54 = vadd.f32 %v1535_v4, %v13092_v33  ;;  %v17375_v61 = vld [vmem:[#allocation96_spill] sm:$0xff]  ;;  %v17379_v56 = vld [vmem:[#allocation66_spill] sm:$0xff] }
 0x335   : > { %v973_v49 = vadd.f32 %v943_v13, %v909_v28  ;;  %v1717_v39 = vmul.f32 %v12748_v11, %v13275_v7  ;;  %v3180_v41 = vadd.f32 %v3150_v42, %v3084_v35  ;;  %v1820_v25 = vmul.f32 %v17374_v22, %v13250_v59  ;;  %v17378_v42 = vld [vmem:[#allocation107_spill] sm:$0xff]  ;;  %v17380_v53 = vld [vmem:[#allocation104_spill] sm:$0xff] }
 0x336   : > { %v2989_v17 = vadd.f32 %v2960_v15, %v2923_v31  ;;  %v13301_v13 = vmul.f32 %v17375_v61, %v13208_v55  ;;  %v1573_v5 = vadd.f32 %v1541_v45, %v1505_v1  ;;  %v1645_v33 = vsel %vm1090_vm6, %v1613_v60, 0.0  ;;  %v17381_v45 = vld [vmem:[#allocation72_spill] sm:$0xff]  ;;  %v17382_v31 = vld [vmem:[#allocation62_spill] sm:$0xff] }
 0x337   : > { %v1136_v26 = vadd.f32 %v1106_v18, %v973_v49  ;;  %v1671_v3 = vadd.f32 %v17377_v27, %v1567_v54  ;;  %8745 = vmatmul.mubr.msk.f32.vlgmr.msra.gmra.mrb[0].mxu0 %vm3220_vm7, %v3180_v41  ;;  %v1884_v15 = vadd.f32 %v1820_v25, %v17378_v42  ;;  %v1925_v28 = vmul.f32 %v17379_v56, %v13258_v32  ;;  %v17384_v54 = vld [vmem:[#allocation105_spill] sm:$0xff]  ;;  %v17385_v41 = vld [vmem:[#allocation67_spill] sm:$0xff] }
 0x338   : > { %17376 = vst [vmem:[#allocation69_spill] sm:$0xff] %v13301_v13  ;;  %v3085_v47 = vadd.f32 %v3026_v8, %v2989_v17  ;;  %v1677_v40 = vadd.f32 %v1645_v33, %v1573_v5  ;;  %v1749_v18 = vsel %vm1253_vm8, %v1717_v39, 0.0  ;;  %v2026_v35 = vmul.f32 %v17381_v45, %v17359_v50  ;;  %v17386_v39 = vld [vmem:[#allocation108_spill] sm:$0xff]  ;;  %v17388_v33 = vld [vmem:[#allocation109_spill] sm:$0xff] }
 0x339   : > { %v13307_v2 = vadd.f32 %v1269_v14, %v1136_v26  ;;  %v1775_v4 = vadd.f32 %v17380_v53, %v1671_v3  ;;  %v13318_v49 = vadd.f32 %v2098_v48, %v17382_v31  ;;  %v1989_v14 = vadd.f32 %v1925_v28, %v1884_v15  ;;  %v17389_v3 = vld [vmem:[#allocation106_spill] sm:$0xff]  ;;  %v17390_v42 = vld [vmem:[#allocation41_spill] sm:$0xff]  ;;  %v17391_v15 = vld [vmem:[#allocation100_spill] sm:$0xff] }
 0x33a   : > { %v3181_v8 = vadd.f32 %v3122_v46, %v3085_v47  ;;  %v2099_v1 = vmul.f32 %v12805_v57, %v13264_v6  ;;  %v2022_v17 = vmul.f32 %v17381_v45, %v17385_v41  ;;  %v2127_v26 = vsel %vm1090_vm6, %v17386_v39, 0.0  ;;  %v17392_v53 = vld [vmem:[#allocation95_spill] sm:$0xff]  ;;  %v17399_v41 = vld [vmem:[#allocation97_spill] sm:$0xff] }
 0x33b   : > { %17383 = vst [vmem:[#allocation33_spill] sm:$0xff] %v13318_v49  ;;  %v1880_v60 = vadd.f32 %v17384_v54, %v1775_v4  ;;  %v2204_v48 = vmul.f32 %v17375_v61, %v13275_v7  ;;  %v13331_v46 = vadd.f32 %v1749_v18, %v1677_v40  ;;  %v2058_v25 = vadd.f32 %v2026_v35, %v1989_v14  ;;  %v17393_v4 = vld [vmem:[#allocation98_spill] sm:$0xff]  ;;  %v17400_v39 = vld [vmem:[#allocation35_spill] sm:$0xff] }
 0x33c   : > { %8747 = vmatprep.mubr.msk.f32.mxu0 %vm3220_vm7, %v3181_v8  ;;  %v2131_v5 = vsel %vm1090_vm6, %v2099_v1, 0.0  ;;  %v2232_v27 = vsel %vm1253_vm8, %v17388_v33, 0.0  ;;  %v2301_v28 = vmul.f32 %v17391_v15, %v17390_v42  ;;  %v2401_v31 = vmul.f32 %v17393_v4, %v17392_v53  ;;  %v17394_v54 = vld [vmem:[#allocation34_spill] sm:$0xff]  ;;  %v17395_v8 = vld [vmem:[#allocation61_spill] sm:$0xff]  ;;  %v17398_v1 = vld [vmem:[#allocation52_spill] sm:$0xff] }
 0x33d   : > { %17387 = vst [vmem:[#allocation93_spill] sm:$0xff] %v13331_v46  ;;  %v1985_v47 = vadd.f32 %v17389_v3, %v1880_v60  ;;  %v2569_v40 = vmul.f32 %v17395_v8, %v17394_v54  ;;  %v13346_v18 = vld [vmem:[%s9937_s11 + $0x40] sm:$0xff]  ;;  %v13348_v35 = vadd.f32 %v2131_v5, %v2058_v25  ;;  %v13352_v14 = vsel %vm1253_vm8, %v2204_v48, 0.0  ;;  %v13359_v42 = vld [vmem:[%s9937_s11 + $0x48] sm:$0xff] }
 0x33e   : > { %17397 = vst [vmem:[#allocation31_spill] sm:$0xff] %v13352_v14  ;;  %v2501_v60 = vmul.f32 %v17399_v41, %v17398_v1  ;;  %v17401_v33 = vld [vmem:[#allocation65_spill] sm:$0xff]  ;;  %17402 = vst [vmem:[#allocation68_spill] sm:$0xff] %v13359_v42  ;;  %v13363_v54 = vmul.f32 %v17346_v16, %v13250_v59  ;;  %v13367_v25 = vmul.f32 %v17347_v62, %v13258_v32  ;;  %vm8309_vm15 = vcmask 130112  }
 0x33f   : > { %17396 = vst [vmem:[#allocation58_spill] sm:$0xff] %v13348_v35  ;;  %v2669_v3 = vmul.f32 %v17401_v33, %v17400_v39  ;;  %v2054_v53 = vadd.f32 %v2022_v17, %v1985_v47  ;;  %v3027_v48 = vmul.f32 %v17351_v10, %v13264_v6  ;;  %v2600_v5 = vsel %vm1090_vm6, %v2569_v40, 0.0 }
 0x340   : > { %v13375_v1 = vmul.f32 %v17348_v52, %v17359_v50  ;;  %v3123_v17 = vmul.f32 %v17352_v23, %v13275_v7  ;;  %v16871_v35 = vrot.slane %v13359_v42, 6  ;;  %v17404_v7 = vrot.slane %v13346_v18, 7 }
 0x341   : > { %v2159_v39 = vadd.f32 %v2127_v26, %v2054_v53  ;;  %v2700_v14 = vsel %vm1253_vm8, %v2669_v3, 0.0  ;;  %v13386_v40 = vsel %vm1090_vm6, %v3027_v48, 0.0  ;;  %v17403_v53 = vrot.slane %v13346_v18, 6 }
 0x342   : > { %v13390_v50 = vsel %vm1253_vm8, %v3123_v17, 0.0  ;;  %v16872_v48 = vrot.slane %v13359_v42, 1  ;;  %v17405_v47 = vrot.slane %v13359_v42, 7 }
 0x343   : > { %v2264_v26 = vadd.f32 %v2232_v27, %v2159_v39  ;;  %v13400_v3 = vsel %vm632_vm0, %v16871_v35, %v17403_v53  ;;  %v16874_v39 = vrot.slane %v13359_v42, 2 }
 0x344   : > { %v675_v17 = vmul.f32 %v17350_v30, %v13400_v3  ;;  %v13412_v27 = vsel %vm795_vm1, %v17405_v47, %v17404_v7  ;;  %v1338_v53 = vmul.f32 %v12658_v34, %v13400_v3  ;;  %v17406_v30 = vrot.slane %v13346_v18, 1 }
 0x345   : > { %v2364_v35 = vadd.f32 %v2301_v28, %v2264_v26  ;;  %v838_v6 = vmul.f32 %v17354_v37, %v13412_v27  ;;  %v1442_v7 = vmul.f32 %v12699_v24, %v13412_v27  ;;  %v944_v28 = vmul.f32 %v17357_v29, %v13346_v18 }
 0x346   : > { %v13425_v63 = vsel %vm1022_vm4, %v17406_v30, %v16872_v48  ;;  %v717_v47 = vsel %vm697_vm2, %v675_v17, 0.0  ;;  %v17407_v37 = vrot.slane %v13346_v18, 2  ;;  %v1370_v30 = vsel %vm697_vm2, %v1338_v53, 0.0 }
 0x347   : > { %v2464_v48 = vadd.f32 %v2401_v31, %v2364_v35  ;;  %v880_v13 = vsel %vm860_vm3, %v838_v6, 0.0  ;;  %v1065_v17 = vmul.f32 %v12593_v20, %v13425_v63  ;;  %v1402_v49 = vadd.f32 %v1370_v30, %v13227_v44 }
 0x348   : > { %v13439_v26 = vsel %vm1185_vm5, %v17407_v37, %v16874_v39  ;;  %v910_v4 = vadd.f32 %v880_v13, %v717_v47  ;;  %v1474_v37 = vsel %vm860_vm3, %v1442_v7, 0.0  ;;  %v1542_v39 = vmul.f32 %v12712_v51, %v13346_v18 }
 0x349   : > { %v1228_v32 = vmul.f32 %v12645_v12, %v13439_v26  ;;  %v2532_v31 = vadd.f32 %v2501_v60, %v2464_v48  ;;  %v1506_v35 = vadd.f32 %v1474_v37, %v1402_v49  ;;  %v1614_v6 = vmul.f32 %v12735_v38, %v13425_v63  ;;  %v9020_v37 = vld [vmem:[%s9937_s11 + $0x30] sm:$0xff] }
 0x34a   : > { %v1821_v53 = vmul.f32 %v17374_v22, %v13400_v3  ;;  %v974_v44 = vadd.f32 %v944_v28, %v910_v4  ;;  %v1718_v13 = vmul.f32 %v12748_v11, %v13439_v26  ;;  %v1926_v47 = vmul.f32 %v17379_v56, %v13412_v27 }
 0x34b   : > { %v2027_v7 = vmul.f32 %v17381_v45, %v13346_v18  ;;  %v2632_v30 = vadd.f32 %v2600_v5, %v2532_v31  ;;  %v1574_v15 = vadd.f32 %v1542_v39, %v1506_v35  ;;  %v2100_v60 = vmul.f32 %v12805_v57, %v13425_v63 }
 0x34c   : > { %v1853_v49 = vsel %vm697_vm2, %v1821_v53, 0.0  ;;  %v1137_v48 = vadd.f32 %v1065_v17, %v974_v44  ;;  %v1958_v28 = vsel %vm860_vm3, %v1926_v47, 0.0  ;;  %v2502_v59 = vmul.f32 %v9020_v37, %v17399_v41  ;;  %v17408_v17 = vld [vmem:[#allocation102_spill] sm:$0xff] }
 0x34d   : > { %v1885_v4 = vadd.f32 %v1853_v49, %v13231_v9  ;;  %v2732_v46 = vadd.f32 %v2700_v14, %v2632_v30  ;;  %v1678_v56 = vadd.f32 %v1614_v6, %v1574_v15  ;;  %v2570_v5 = vmul.f32 %v17395_v8, %v13196_v36 }
 0x34e   : > { %v2670_v39 = vmul.f32 %v17401_v33, %v13208_v55  ;;  %v13477_v31 = vadd.f32 %v1228_v32, %v1137_v48  ;;  %v2533_v53 = vadd.f32 %v2502_v59, %v17408_v17  ;;  %v2770_v9 = vmul.f32 %v17346_v16, %v13400_v3  ;;  %v13510_v48 = vld [vmem:[#allocation7] ss:$0 sm:$0xff] }
 0x34f   : > { %v1990_v35 = vadd.f32 %v1958_v28, %v1885_v4  ;;  %v2828_v44 = vadd.f32 %v13363_v54, %v2732_v46  ;;  %v13483_v47 = vadd.f32 %v1718_v13, %v1678_v56  ;;  %v13487_v15 = vmul.f32 %v17375_v61, %v13439_v26 }
 0x350   : > { %v2866_v36 = vmul.f32 %v17347_v62, %v13412_v27  ;;  %v2633_v32 = vadd.f32 %v2570_v5, %v2533_v53  ;;  %v2799_v14 = vsel %vm697_vm2, %v2770_v9, 0.0  ;;  %v2962_v59 = vmul.f32 %v17348_v52, %v13346_v18 }
 0x351   : > { %v2059_v55 = vadd.f32 %v2027_v7, %v1990_v35  ;;  %v2924_v6 = vadd.f32 %v13367_v25, %v2828_v44  ;;  %v3028_v46 = vmul.f32 %v17351_v10, %v13425_v63  ;;  %v17409_v54 = vrot.slane %v13359_v42, 6  ;;  %v13523_v35 = vld [vmem:[#allocation7 + $0x1] ss:$0 sm:$0xff] }
 0x352   : > { %v2895_v56 = vsel %vm860_vm3, %v2866_v36, 0.0  ;;  %v17410_v13 = vrot.slane %v13346_v18, 6  ;;  %v2733_v30 = vadd.f32 %v2670_v39, %v2633_v32  ;;  %v3124_v49 = vmul.f32 %v17352_v23, %v13439_v26 }
 0x353   : > { %v17412_v4 = vrot.slane %v13359_v42, 7  ;;  %v17413_v28 = vrot.slane %v13346_v18, 7  ;;  %v2990_v5 = vadd.f32 %v13375_v1, %v2924_v6  ;;  %v945_v17 = vmul.f32 %v17357_v29, %v13359_v42 }
 0x354   : > { %v13506_v7 = vsel %vm632_vm0, %v17410_v13, %v17409_v54  ;;  %v17415_v53 = vrot.slane %v13346_v18, 1  ;;  %v17416_v9 = vrot.slane %v13359_v42, 1  ;;  %v2164_v36 = vadd.f32 %v2100_v60, %v2059_v55 }
 0x355   : > { %17411 = vst [vmem:[#allocation94_spill] sm:$0xff] %v13506_v7  ;;  %v676_v25 = vmul.f32 %v13510_v48, %v13506_v7  ;;  %v13520_v37 = vsel %vm795_vm1, %v17413_v28, %v17412_v4  ;;  %v2829_v32 = vadd.f32 %v2799_v14, %v2733_v30  ;;  %v17418_v6 = vrot.slane %v13346_v18, 2 }
 0x356   : > { %17414 = vst [vmem:[#allocation74_spill] sm:$0xff] %v13520_v37  ;;  %v839_v39 = vmul.f32 %v13523_v35, %v13520_v37  ;;  %v13535_v44 = vsel %vm1022_vm4, %v17416_v9, %v17415_v53  ;;  %v17419_v54 = vrot.slane %v13359_v42, 2  ;;  %v3086_v13 = vadd.f32 %v13386_v40, %v2990_v5 }
 0x357   : > { %17417 = vst [vmem:[#allocation60_spill] sm:$0xff] %v13535_v44  ;;  %v1066_v1 = vmul.f32 %v12593_v20, %v13535_v44  ;;  %v1339_v60 = vmul.f32 %v12658_v34, %v13506_v7  ;;  %v2925_v55 = vadd.f32 %v2895_v56, %v2829_v32  ;;  %v1443_v14 = vmul.f32 %v12699_v24, %v13520_v37  ;;  %v17422_v32 = vld [vmem:[#allocation93_spill] sm:$0xff] }
 0x358   : > { %v13545_v29 = vsel %vm1185_vm5, %v17419_v54, %v17418_v6  ;;  %v911_v4 = vadd.f32 %v839_v39, %v676_v25  ;;  %v1543_v30 = vmul.f32 %v12712_v51, %v13359_v42  ;;  %v3182_v53 = vadd.f32 %v13390_v50, %v3086_v13  ;;  %v17421_v39 = vld [vmem:[#allocation66_spill] sm:$0xff] }
 0x359   : > { %17420 = vst [vmem:[#allocation63_spill] sm:$0xff] %v13545_v29  ;;  %v1229_v28 = vmul.f32 %v12645_v12, %v13545_v29  ;;  %v1108_v20 = vsel %vm1090_vm6, %v1066_v1, 0.0  ;;  %v1403_v12 = vadd.f32 %v1339_v60, %v13307_v2  ;;  %v2991_v5 = vadd.f32 %v2962_v59, %v2925_v55  ;;  %v17423_v60 = vld [vmem:[#allocation64_spill] sm:$0xff] }
 0x35a   : > { %v975_v40 = vadd.f32 %v945_v17, %v911_v4  ;;  %v1615_v34 = vmul.f32 %v12735_v38, %v13535_v44  ;;  %v1719_v56 = vmul.f32 %v12748_v11, %v13545_v29  ;;  %v1822_v24 = vmul.f32 %v17374_v22, %v13506_v7  ;;  %8748 = vmatmul.mubr.msk.f32.gmra.mrb[2].mxu0 %vm3220_vm7, %v3182_v53  ;;  %v17424_v55 = vld [vmem:[#allocation100_spill] sm:$0xff]  ;;  %v17426_v53 = vld [vmem:[#allocation98_spill] sm:$0xff] }
 0x35b   : > { %v1271_v25 = vsel %vm1253_vm8, %v1229_v28, 0.0  ;;  %v1507_v50 = vadd.f32 %v1443_v14, %v1403_v12  ;;  %v1927_v17 = vmul.f32 %v17421_v39, %v13520_v37  ;;  %v2028_v2 = vmul.f32 %v17381_v45, %v13359_v42  ;;  %v17425_v14 = vld [vmem:[#allocation92_spill] sm:$0xff]  ;;  %v17427_v12 = vld [vmem:[#allocation33_spill] sm:$0xff] }
 0x35c   : > { %v1138_v51 = vadd.f32 %v1108_v20, %v975_v40  ;;  %v3087_v59 = vadd.f32 %v3028_v46, %v2991_v5  ;;  %v1647_v38 = vsel %vm1090_vm6, %v1615_v34, 0.0  ;;  %v1751_v9 = vsel %vm1253_vm8, %v1719_v56, 0.0  ;;  %v9023_v56 = vld [vmem:[%s9937_s11 + $0x38] sm:$0xff] }
 0x35d   : > { %v1886_v1 = vadd.f32 %v1822_v24, %v17422_v32  ;;  %v1575_v54 = vadd.f32 %v1543_v30, %v1507_v50  ;;  %v2101_v13 = vmul.f32 %v12805_v57, %v13535_v44  ;;  %v2206_v4 = vmul.f32 %v17375_v61, %v13545_v29  ;;  %v17431_v32 = vld [vmem:[#allocation70_spill] sm:$0xff] }
 0x35e   : > { %v13578_v6 = vadd.f32 %v1271_v25, %v1138_v51  ;;  %v3183_v46 = vadd.f32 %v3124_v49, %v3087_v59  ;;  %v2303_v20 = vmul.f32 %v17424_v55, %v17423_v60  ;;  %v2403_v40 = vmul.f32 %v17426_v53, %v17425_v14  ;;  %v17428_v25 = vld [vmem:[#allocation69_spill] sm:$0xff]  ;;  %v13603_v60 = vld [vmem:[%s9937_s11 + $0x50] sm:$0xff] }
 0x35f   : > { %v1991_v28 = vadd.f32 %v1927_v17, %v1886_v1  ;;  %v13590_v5 = vadd.f32 %v17428_v25, %v17427_v12  ;;  %v1679_v30 = vadd.f32 %v1647_v38, %v1575_v54  ;;  %v2133_v34 = vsel %vm1090_vm6, %v2101_v13, 0.0  ;;  %v17429_v51 = vld [vmem:[#allocation101_spill] sm:$0xff]  ;;  %v17430_v17 = vld [vmem:[#allocation42_spill] sm:$0xff]  ;;  %v17434_v13 = vld [vmem:[#allocation31_spill] sm:$0xff] }
 0x360   : > { %v2503_v24 = vmul.f32 %v9023_v56, %v17399_v41  ;;  %8750 = vmatprep.mubr.msk.f32.mxu0 %vm3220_vm7, %v3183_v46  ;;  %v2366_v50 = vadd.f32 %v2303_v20, %v17429_v51  ;;  %v2571_v59 = vmul.f32 %v17395_v8, %v17430_v17  ;;  %v2671_v1 = vmul.f32 %v17401_v33, %v17431_v32  ;;  %v13606_v38 = vld [vmem:[%s9937_s11 + $0x58] sm:$0xff]  ;;  %v17433_v54 = vld [vmem:[#allocation58_spill] sm:$0xff] }
 0x361   : > { %v2060_v49 = vadd.f32 %v2028_v2, %v1991_v28  ;;  %17432 = vst [vmem:[#allocation99_spill] sm:$0xff] %v13606_v38  ;;  %v13610_v14 = vadd.f32 %v17434_v13, %v17433_v54  ;;  %v13613_v12 = vadd.f32 %v13487_v15, %v2164_v36  ;;  %v13615_v2 = vadd.f32 %v1751_v9, %v1679_v30 }
 0x362   : > { %v13619_v46 = vsel %vm1253_vm8, %v2206_v4, 0.0  ;;  %v2466_v28 = vadd.f32 %v2403_v40, %v2366_v50  ;;  %v2771_v20 = vmul.f32 %v17346_v16, %v13506_v7  ;;  %v2867_v25 = vmul.f32 %v17347_v62, %v13520_v37  ;;  %v13720_v7 = vld [vmem:[#allocation7 + $0x8] ss:$0 sm:$0xff] }
 0x363   : > { %17435 = vst [vmem:[#allocation79_spill] sm:$0xff] %v13610_v14  ;;  %17436 = vst [vmem:[#allocation73_spill] sm:$0xff] %v13613_v12  ;;  %v2963_v56 = vmul.f32 %v17348_v52, %v13359_v42  ;;  %v13627_v51 = vadd.f32 %v2133_v34, %v2060_v49  ;;  %v2602_v15 = vsel %vm1090_vm6, %v2571_v59, 0.0  ;;  %v16877_v36 = vrot.slane %v13603_v60, 6  ;;  %v13649_v49 = vld [vmem:[#allocation7 + $0x2] ss:$0 sm:$0xff] }
 0x364   : > { %17437 = vst [vmem:[#allocation71_spill] sm:$0xff] %v13615_v2  ;;  %17438 = vst [vmem:[#allocation96_spill] sm:$0xff] %v13619_v46  ;;  %v16878_v9 = vrot.slane %v13606_v38, 6  ;;  %v2534_v4 = vadd.f32 %v2503_v24, %v2466_v28  ;;  %v2702_v40 = vsel %vm1253_vm8, %v2671_v1, 0.0  ;;  %v16879_v30 = vrot.slane %v13603_v60, 7 }
 0x365   : > { %17439 = vst [vmem:[#allocation103_spill] sm:$0xff] %v13627_v51  ;;  %v16880_v50 = vrot.slane %v13606_v38, 7  ;;  %v3029_v17 = vmul.f32 %v17351_v10, %v13535_v44  ;;  %v3125_v34 = vmul.f32 %v17352_v23, %v13545_v29  ;;  %v946_v59 = vmul.f32 %v13649_v49, %v13603_v60  ;;  %v13671_v46 = vld [vmem:[#allocation7 + $0x5] ss:$0 sm:$0xff]  ;;  %v13701_v42 = vld [vmem:[#allocation7 + $0x3] ss:$0 sm:$0xff] }
 0x366   : > { %v13647_v24 = vsel %vm632_vm0, %v16878_v9, %v16877_v36  ;;  %v2634_v32 = vadd.f32 %v2602_v15, %v2534_v4  ;;  %v16885_v4 = vrot.slane %v13606_v38, 2  ;;  %v17442_v51 = vrot.slane %v13603_v60, 2  ;;  %17445 = vst [vmem:[#allocation72_spill] sm:$0xff] %v13720_v7 }
 0x367   : > { %v677_v1 = vmul.f32 %v13510_v48, %v13647_v24  ;;  %v13661_v54 = vsel %vm795_vm1, %v16880_v50, %v16879_v30  ;;  %v1340_v30 = vmul.f32 %v13671_v46, %v13647_v24  ;;  %v13675_v50 = vld [vmem:[#allocation7 + $0x6] ss:$0 sm:$0xff]  ;;  %v3058_v36 = vsel %vm1090_vm6, %v3029_v17, 0.0 }
 0x368   : > { %v840_v28 = vmul.f32 %v13523_v35, %v13661_v54  ;;  %v2734_v9 = vadd.f32 %v2702_v40, %v2634_v32  ;;  %v1444_v13 = vmul.f32 %v13675_v50, %v13661_v54  ;;  %v17440_v40 = vrot.slane %v13606_v38, 1 }
 0x369   : > { %v719_v12 = vsel %vm697_vm2, %v677_v1, 0.0  ;;  %v17441_v32 = vrot.slane %v13603_v60, 1  ;;  %v13697_v29 = vsel %vm1185_vm5, %v17442_v51, %v16885_v4  ;;  %v1372_v37 = vsel %vm697_vm2, %v1340_v30, 0.0  ;;  %v13713_v51 = vld [vmem:[#allocation7 + $0x7] ss:$0 sm:$0xff] }
 0x36a   : > { %v882_v15 = vsel %vm860_vm3, %v840_v28, 0.0  ;;  %v2830_v17 = vadd.f32 %v2771_v20, %v2734_v9  ;;  %v3154_v28 = vsel %vm1253_vm8, %v3125_v34, 0.0  ;;  %v1476_v20 = vsel %vm860_vm3, %v1444_v13, 0.0  ;;  %17444 = vst [vmem:[#allocation104_spill] sm:$0xff] %v13713_v51 }
 0x36b   : > { %v13689_v1 = vsel %vm1022_vm4, %v17441_v32, %v17440_v40  ;;  %v912_v44 = vadd.f32 %v882_v15, %v719_v12  ;;  %v13705_v40 = vld [vmem:[#allocation7 + $0x4] ss:$0 sm:$0xff]  ;;  %v1544_v12 = vmul.f32 %v13713_v51, %v13603_v60  ;;  %v1404_v15 = vadd.f32 %v1372_v37, %v13477_v31 }
 0x36c   : > { %v1067_v14 = vmul.f32 %v13701_v42, %v13689_v1  ;;  %17443 = vst [vmem:[#allocation107_spill] sm:$0xff] %v13705_v40  ;;  %v1230_v32 = vmul.f32 %v13705_v40, %v13697_v29  ;;  %v2926_v9 = vadd.f32 %v2867_v25, %v2830_v17  ;;  %v1823_v4 = vmul.f32 %v17374_v22, %v13647_v24 }
 0x36d   : > { %v976_v34 = vadd.f32 %v946_v59, %v912_v44  ;;  %v1616_v30 = vmul.f32 %v13720_v7, %v13689_v1  ;;  %v1720_v13 = vmul.f32 %v12748_v11, %v13697_v29  ;;  %v1928_v2 = vmul.f32 %v17421_v39, %v13661_v54 }
 0x36e   : > { %v2029_v25 = vmul.f32 %v17381_v45, %v13603_v60  ;;  %v2992_v44 = vadd.f32 %v2963_v56, %v2926_v9  ;;  %v1508_v31 = vadd.f32 %v1476_v20, %v1404_v15  ;;  %v1855_v22 = vsel %vm697_vm2, %v1823_v4, 0.0 }
 0x36f   : > { %v1139_v59 = vadd.f32 %v1067_v14, %v976_v34  ;;  %v1887_v37 = vadd.f32 %v1855_v22, %v13483_v47  ;;  %v1960_v17 = vsel %vm860_vm3, %v1928_v2, 0.0  ;;  %v2304_v11 = vmul.f32 %v17424_v55, %v13400_v3 }
 0x370   : > { %v2404_v39 = vmul.f32 %v17426_v53, %v13412_v27  ;;  %v3088_v43 = vadd.f32 %v3058_v36, %v2992_v44  ;;  %v1576_v45 = vadd.f32 %v1544_v12, %v1508_v31  ;;  %v2102_v14 = vmul.f32 %v12805_v57, %v13689_v1 }
 0x371   : > { %v13739_v51 = vadd.f32 %v1230_v32, %v1139_v59  ;;  %v1992_v56 = vadd.f32 %v1960_v17, %v1887_v37  ;;  %v13745_v47 = vmul.f32 %v17375_v61, %v13697_v29  ;;  %v2335_v2 = vsel %vm697_vm2, %v2304_v11, 0.0 }
 0x372   : > { %v2435_v3 = vsel %vm860_vm3, %v2404_v39, 0.0  ;;  %v3184_v55 = vadd.f32 %v3154_v28, %v3088_v43  ;;  %v1680_v27 = vadd.f32 %v1616_v30, %v1576_v45  ;;  %v2367_v53 = vadd.f32 %v2335_v2, %v13590_v5 }
 0x373   : > { %v2504_v36 = vmul.f32 %v17399_v41, %v13346_v18  ;;  %v2061_v4 = vadd.f32 %v2029_v25, %v1992_v56  ;;  %v2572_v57 = vmul.f32 %v17395_v8, %v13425_v63  ;;  %v2672_v61 = vmul.f32 %v17401_v33, %v13439_v26 }
 0x374   : > { %v2772_v32 = vmul.f32 %v17346_v16, %v13647_v24  ;;  %8751 = vmatmul.mubr.msk.f32.gmra.mrb[4].mxu0 %vm3220_vm7, %v3184_v55  ;;  %v13761_v20 = vadd.f32 %v1720_v13, %v1680_v27  ;;  %v2467_v43 = vadd.f32 %v2435_v3, %v2367_v53  ;;  %v2868_v5 = vmul.f32 %v17347_v62, %v13661_v54  ;;  %v17458_v55 = vld [vmem:[#allocation104_spill] sm:$0xff] }
 0x375   : > { %v2964_v18 = vmul.f32 %v17348_v52, %v13603_v60  ;;  %v13767_v41 = vadd.f32 %v2102_v14, %v2061_v4  ;;  %v13771_v63 = vmul.f32 %v17351_v10, %v13689_v1  ;;  %v13775_v16 = vmul.f32 %v17352_v23, %v13697_v29 }
 0x376   : > { %v17446_v8 = vrot.slane %v13606_v38, 6  ;;  %v17447_v33 = vrot.slane %v13603_v60, 6  ;;  %v2535_v26 = vadd.f32 %v2504_v36, %v2467_v43  ;;  %v2801_v52 = vsel %vm697_vm2, %v2772_v32, 0.0  ;;  %v13840_v43 = vld [vmem:[#allocation7 + $0xa] ss:$0 sm:$0xff] }
 0x377   : > { %v17449_v28 = vrot.slane %v13606_v38, 7  ;;  %v17450_v23 = vrot.slane %v13603_v60, 7  ;;  %v947_v34 = vmul.f32 %v13649_v49, %v13606_v38  ;;  %v17452_v15 = vrot.slane %v13603_v60, 1 }
 0x378   : > { %v13783_v62 = vsel %vm632_vm0, %v17447_v33, %v17446_v8  ;;  %v17453_v30 = vrot.slane %v13606_v38, 1  ;;  %v17455_v25 = vrot.slane %v13603_v60, 2  ;;  %v17456_v44 = vrot.slane %v13606_v38, 2  ;;  %v13846_v33 = vld [vmem:[#allocation7 + $0xb] ss:$0 sm:$0xff] }
 0x379   : > { %17448 = vst [vmem:[#allocation62_spill] sm:$0xff] %v13783_v62  ;;  %v678_v10 = vmul.f32 %v13510_v48, %v13783_v62  ;;  %v13795_v12 = vsel %vm795_vm1, %v17450_v23, %v17449_v28  ;;  %v2635_v31 = vadd.f32 %v2572_v57, %v2535_v26  ;;  %v1341_v17 = vmul.f32 %v13671_v46, %v13783_v62  ;;  %v13836_v57 = vld [vmem:[#allocation7 + $0x9] ss:$0 sm:$0xff]  ;;  %v17461_v28 = vld [vmem:[#allocation71_spill] sm:$0xff] }
 0x37a   : > { %17451 = vst [vmem:[#allocation105_spill] sm:$0xff] %v13795_v12  ;;  %v841_v9 = vmul.f32 %v13523_v35, %v13795_v12  ;;  %v13807_v13 = vsel %vm1022_vm4, %v17453_v30, %v17452_v15  ;;  %v13815_v59 = vsel %vm1185_vm5, %v17456_v44, %v17455_v25  ;;  %v2897_v11 = vsel %vm860_vm3, %v2868_v5, 0.0  ;;  %17460 = vst [vmem:[#allocation109_spill] sm:$0xff] %v13846_v33  ;;  %v13855_v15 = vld [vmem:[#allocation7 + $0xd] ss:$0 sm:$0xff] }
 0x37b   : > { %17454 = vst [vmem:[#allocation67_spill] sm:$0xff] %v13807_v13  ;;  %17457 = vst [vmem:[#allocation108_spill] sm:$0xff] %v13815_v59  ;;  %v1068_v22 = vmul.f32 %v13701_v42, %v13807_v13  ;;  %v1231_v37 = vmul.f32 %v13705_v40, %v13815_v59  ;;  %v1445_v45 = vmul.f32 %v13675_v50, %v13795_v12 }
 0x37c   : > { %v913_v39 = vadd.f32 %v841_v9, %v678_v10  ;;  %v1617_v14 = vmul.f32 %v13720_v7, %v13807_v13  ;;  %v2735_v56 = vadd.f32 %v2672_v61, %v2635_v31  ;;  %v1405_v3 = vadd.f32 %v1341_v17, %v13578_v6  ;;  %v13851_v9 = vld [vmem:[#allocation7 + $0xc] ss:$0 sm:$0xff]  ;;  %v13861_v31 = vld [vmem:[#allocation7 + $0xf] ss:$0 sm:$0xff] }
 0x37d   : > { %v1110_v2 = vsel %vm1090_vm6, %v1068_v22, 0.0  ;;  %v1545_v27 = vmul.f32 %v17458_v55, %v13606_v38  ;;  %v1273_v4 = vsel %vm1253_vm8, %v1231_v37, 0.0  ;;  %v1721_v32 = vmul.f32 %v13836_v57, %v13815_v59  ;;  %17462 = vst [vmem:[#allocation106_spill] sm:$0xff] %v13861_v31  ;;  %v17463_v22 = vld [vmem:[#allocation94_spill] sm:$0xff] }
 0x37e   : > { %v977_v53 = vadd.f32 %v947_v34, %v913_v39  ;;  %v1824_v61 = vmul.f32 %v13840_v43, %v13783_v62  ;;  %v2831_v5 = vadd.f32 %v2801_v52, %v2735_v56  ;;  %v1509_v8 = vadd.f32 %v1445_v45, %v1405_v3  ;;  %v13867_v45 = vld [vmem:[#allocation7 + $0xe] ss:$0 sm:$0xff]  ;;  %v13871_v56 = vld [vmem:[#allocation7 + $0x10] ss:$0 sm:$0xff] }
 0x37f   : > { %v1649_v6 = vsel %vm1090_vm6, %v1617_v14, 0.0  ;;  %v1929_v26 = vmul.f32 %v13846_v33, %v13795_v12  ;;  %v2030_v34 = vmul.f32 %v13851_v9, %v13606_v38  ;;  %v2103_v52 = vmul.f32 %v13855_v15, %v13807_v13  ;;  %17464 = vst [vmem:[#allocation41_spill] sm:$0xff] %v13867_v45  ;;  %17465 = vst [vmem:[#allocation95_spill] sm:$0xff] %v13871_v56 }
 0x380   : > { %v1140_v10 = vadd.f32 %v1110_v2, %v977_v53  ;;  %v1888_v23 = vadd.f32 %v1824_v61, %v17461_v28  ;;  %v2927_v30 = vadd.f32 %v2897_v11, %v2831_v5  ;;  %v1577_v25 = vadd.f32 %v1545_v27, %v1509_v8  ;;  %v17466_v11 = vld [vmem:[#allocation74_spill] sm:$0xff]  ;;  %v13878_v5 = vld [vmem:[#allocation7 + $0x11] ss:$0 sm:$0xff]  ;;  %v17468_v8 = vld [vmem:[#allocation68_spill] sm:$0xff] }
 0x381   : > { %v1753_v44 = vsel %vm1253_vm8, %v1721_v32, 0.0  ;;  %v2305_v37 = vmul.f32 %v13861_v31, %v17463_v22  ;;  %v2208_v14 = vmul.f32 %v13867_v45, %v13815_v59  ;;  %v2405_v2 = vmul.f32 %v13871_v56, %v17466_v11  ;;  %v17469_v28 = vld [vmem:[#allocation60_spill] sm:$0xff]  ;;  %v13886_v22 = vld [vmem:[#allocation7 + $0x13] ss:$0 sm:$0xff]  ;;  %v13898_v11 = vld [vmem:[%s9937_s11 + $0x60] sm:$0xff] }
 0x382   : > { %v13865_v17 = vadd.f32 %v1273_v4, %v1140_v10  ;;  %v1993_v39 = vadd.f32 %v1929_v26, %v1888_v23  ;;  %v2993_v3 = vadd.f32 %v2964_v18, %v2927_v30  ;;  %v1681_v27 = vadd.f32 %v1649_v6, %v1577_v25  ;;  %v17467_v4 = vld [vmem:[#allocation79_spill] sm:$0xff]  ;;  %17475 = vst [vmem:[#allocation52_spill] sm:$0xff] %v13898_v11 }
 0x383   : > { %v2135_v53 = vsel %vm1090_vm6, %v2103_v52, 0.0  ;;  %v2368_v32 = vadd.f32 %v2305_v37, %v17467_v4  ;;  %v2505_v26 = vmul.f32 %v13878_v5, %v17468_v8  ;;  %v13882_v10 = vld [vmem:[#allocation7 + $0x12] ss:$0 sm:$0xff]  ;;  %v17472_v52 = vld [vmem:[#allocation96_spill] sm:$0xff]  ;;  %v13901_v4 = vld [vmem:[%s9937_s11 + $0x68] sm:$0xff]  ;;  %v13905_v8 = vadd.f32 %v13745_v47, %v13767_v41 }
 0x384   : > { %v2062_v61 = vadd.f32 %v2030_v34, %v1993_v39  ;;  %v2573_v23 = vmul.f32 %v13882_v10, %v17469_v28  ;;  %v17470_v18 = vld [vmem:[#allocation63_spill] sm:$0xff]  ;;  %v3089_v34 = vadd.f32 %v13771_v63, %v2993_v3  ;;  %v13895_v37 = vadd.f32 %v1753_v44, %v1681_v27  ;;  %17476 = vst [vmem:[#allocation97_spill] sm:$0xff] %v13901_v4  ;;  %v13926_v27 = vld [vmem:[#allocation7 + $0x16] ss:$0 sm:$0xff] }
 0x385   : > { %v2673_v6 = vmul.f32 %v13886_v22, %v17470_v18  ;;  %v17471_v30 = vld [vmem:[#allocation103_spill] sm:$0xff]  ;;  %v2468_v39 = vadd.f32 %v2405_v2, %v2368_v32  ;;  %17477 = vst [vmem:[#allocation35_spill] sm:$0xff] %v13905_v8  ;;  %v13909_v28 = vsel %vm1253_vm8, %v2208_v14, 0.0  ;;  %v2965_v32 = vmul.f32 %v13926_v27, %v13606_v38 }
 0x386   : > { %v13892_v25 = vadd.f32 %v17472_v52, %v17471_v30  ;;  %17474 = vst [vmem:[#allocation61_spill] sm:$0xff] %v13895_v37  ;;  %17478 = vst [vmem:[#allocation65_spill] sm:$0xff] %v13909_v28  ;;  %v2604_v18 = vsel %vm1090_vm6, %v2573_v23, 0.0  ;;  %v13913_v30 = vld [vmem:[#allocation7 + $0x14] ss:$0 sm:$0xff]  ;;  %v3185_v44 = vadd.f32 %v13775_v16, %v3089_v34  ;;  %v13918_v2 = vadd.f32 %v2135_v53, %v2062_v61 }
 0x387   : > { %v2773_v63 = vmul.f32 %v13913_v30, %v13783_v62  ;;  %v2536_v3 = vadd.f32 %v2505_v26, %v2468_v39  ;;  %v2704_v47 = vsel %vm1253_vm8, %v2673_v6, 0.0  ;;  %v13922_v41 = vld [vmem:[#allocation7 + $0x15] ss:$0 sm:$0xff]  ;;  %v16891_v23 = vrot.slane %v13898_v11, 6  ;;  %v13933_v61 = vld [vmem:[#allocation7 + $0x17] ss:$0 sm:$0xff] }
 0x388   : > { %17473 = vst [vmem:[#allocation34_spill] sm:$0xff] %v13892_v25  ;;  %17479 = vst [vmem:[#allocation102_spill] sm:$0xff] %v13918_v2  ;;  %v2869_v14 = vmul.f32 %v13922_v41, %v13795_v12  ;;  %v16892_v16 = vrot.slane %v13901_v4, 6  ;;  %8753 = vmatprep.mubr.msk.f32.mxu0 %vm3220_vm7, %v3185_v44  ;;  %v3031_v26 = vmul.f32 %v13933_v61, %v13807_v13  ;;  %v13939_v34 = vld [vmem:[#allocation7 + $0x18] ss:$0 sm:$0xff]  ;;  %v17482_v8 = vrot.slane %v13898_v11, 7 }
 0x389   : > { %v2636_v53 = vadd.f32 %v2604_v18, %v2536_v3  ;;  %17480 = vst [vmem:[#allocation66_spill] sm:$0xff] %v13939_v34  ;;  %v3127_v39 = vmul.f32 %v13939_v34, %v13815_v59  ;;  %v948_v44 = vmul.f32 %v13649_v49, %v13898_v11  ;;  %v17483_v59 = vrot.slane %v13901_v4, 7 }
 0x38a   : > { %v13949_v18 = vsel %vm632_vm0, %v16892_v16, %v16891_v23  ;;  %v16895_v23 = vrot.slane %v13901_v4, 1 }
 0x38b   : > { %17481 = vst [vmem:[#allocation93_spill] sm:$0xff] %v13949_v18  ;;  %v2736_v6 = vadd.f32 %v2704_v47, %v2636_v53  ;;  %v679_v52 = vmul.f32 %v13510_v48, %v13949_v18  ;;  %v13962_v28 = vsel %vm795_vm1, %v17483_v59, %v17482_v8  ;;  %v1342_v53 = vmul.f32 %v13671_v46, %v13949_v18 }
 0x38c   : > { %17484 = vst [vmem:[#allocation64_spill] sm:$0xff] %v13962_v28  ;;  %v842_v16 = vmul.f32 %v13523_v35, %v13962_v28  ;;  %v17485_v59 = vrot.slane %v13898_v11, 1  ;;  %v1446_v2 = vmul.f32 %v13675_v50, %v13962_v28  ;;  %v3060_v47 = vsel %vm1090_vm6, %v3031_v26, 0.0 }
 0x38d   : > { %v2832_v3 = vadd.f32 %v2773_v63, %v2736_v6  ;;  %v721_v13 = vsel %vm697_vm2, %v679_v52, 0.0  ;;  %v17487_v6 = vrot.slane %v13901_v4, 2  ;;  %v17488_v52 = vrot.slane %v13898_v11, 2 }
 0x38e   : > { %v13979_v8 = vsel %vm1022_vm4, %v17485_v59, %v16895_v23  ;;  %v884_v63 = vsel %vm860_vm3, %v842_v16, 0.0  ;;  %v1374_v59 = vsel %vm697_vm2, %v1342_v53, 0.0  ;;  %v1478_v12 = vsel %vm860_vm3, %v1446_v2, 0.0 }
 0x38f   : > { %17486 = vst [vmem:[#allocation100_spill] sm:$0xff] %v13979_v8  ;;  %v13993_v38 = vsel %vm1185_vm5, %v17488_v52, %v17487_v6  ;;  %v2928_v23 = vadd.f32 %v2869_v14, %v2832_v3  ;;  %v914_v25 = vadd.f32 %v884_v63, %v721_v13  ;;  %v1069_v34 = vmul.f32 %v13701_v42, %v13979_v8 }
 0x390   : > { %17489 = vst [vmem:[#allocation92_spill] sm:$0xff] %v13993_v38  ;;  %v1406_v26 = vadd.f32 %v1374_v59, %v13739_v51  ;;  %v1232_v16 = vmul.f32 %v13705_v40, %v13993_v38  ;;  %v1546_v6 = vmul.f32 %v17458_v55, %v13898_v11  ;;  %v1618_v52 = vmul.f32 %v13720_v7, %v13979_v8 }
 0x391   : > { %v2994_v53 = vadd.f32 %v2965_v32, %v2928_v23  ;;  %v978_v14 = vadd.f32 %v948_v44, %v914_v25  ;;  %v1825_v3 = vmul.f32 %v13840_v43, %v13949_v18  ;;  %v3156_v51 = vsel %vm1253_vm8, %v3127_v39, 0.0 }
 0x392   : > { %v1510_v13 = vadd.f32 %v1478_v12, %v1406_v26  ;;  %v1722_v63 = vmul.f32 %v13836_v57, %v13993_v38  ;;  %v1930_v2 = vmul.f32 %v13846_v33, %v13962_v28  ;;  %v2031_v59 = vmul.f32 %v13851_v9, %v13898_v11 }
 0x393   : > { %v3090_v62 = vadd.f32 %v3060_v47, %v2994_v53  ;;  %v1141_v37 = vadd.f32 %v1069_v34, %v978_v14  ;;  %v1857_v12 = vsel %vm697_vm2, %v1825_v3, 0.0  ;;  %v2306_v39 = vmul.f32 %v13861_v31, %v13647_v24 }
 0x394   : > { %v1578_v32 = vadd.f32 %v1546_v6, %v1510_v13  ;;  %v1889_v25 = vadd.f32 %v1857_v12, %v13761_v20  ;;  %v1962_v23 = vsel %vm860_vm3, %v1930_v2, 0.0  ;;  %v2406_v44 = vmul.f32 %v13871_v56, %v13661_v54 }
 0x395   : > { %v3186_v26 = vadd.f32 %v3156_v51, %v3090_v62  ;;  %v14027_v33 = vadd.f32 %v1232_v16, %v1141_v37  ;;  %v2104_v34 = vmul.f32 %v13855_v15, %v13979_v8  ;;  %v14033_v20 = vmul.f32 %v13867_v45, %v13993_v38  ;;  %v17490_v62 = vld [vmem:[#allocation73_spill] sm:$0xff] }
 0x396   : > { %v1682_v47 = vadd.f32 %v1618_v52, %v1578_v32  ;;  %v1994_v6 = vadd.f32 %v1962_v23, %v1889_v25  ;;  %v2337_v53 = vsel %vm697_vm2, %v2306_v39, 0.0  ;;  %v2437_v24 = vsel %vm860_vm3, %v2406_v44, 0.0 }
 0x397   : > { %8754 = vmatmul.mubr.msk.f32.gmra.mrb[6].mxu0 %vm3220_vm7, %v3186_v26  ;;  %v2369_v37 = vadd.f32 %v2337_v53, %v17490_v62  ;;  %v2506_v16 = vmul.f32 %v13878_v5, %v13603_v60  ;;  %v2774_v52 = vmul.f32 %v13913_v30, %v13949_v18  ;;  %v2574_v13 = vmul.f32 %v13882_v10, %v13689_v1 }
 0x398   : > { %v14040_v54 = vadd.f32 %v1722_v63, %v1682_v47  ;;  %v2063_v14 = vadd.f32 %v2031_v59, %v1994_v6  ;;  %v2674_v3 = vmul.f32 %v13886_v22, %v13697_v29  ;;  %v2870_v51 = vmul.f32 %v13922_v41, %v13962_v28 }
 0x399   : > { %v2469_v63 = vadd.f32 %v2437_v24, %v2369_v37  ;;  %v2966_v2 = vmul.f32 %v13926_v27, %v13898_v11  ;;  %v3032_v60 = vmul.f32 %v13933_v61, %v13979_v8  ;;  %v17491_v32 = vrot.slane %v13901_v4, 6 }
 0x39a   : > { %v17492_v59 = vrot.slane %v13898_v11, 6  ;;  %v2168_v12 = vadd.f32 %v2104_v34, %v2063_v14  ;;  %v2803_v29 = vsel %vm697_vm2, %v2774_v52, 0.0  ;;  %v17493_v23 = vrot.slane %v13901_v4, 7 }
 0x39b   : > { %v17494_v39 = vrot.slane %v13898_v11, 7  ;;  %v2537_v26 = vadd.f32 %v2506_v16, %v2469_v63  ;;  %v949_v34 = vmul.f32 %v13649_v49, %v13901_v4  ;;  %v17495_v6 = vrot.slane %v13898_v11, 1 }
 0x39c   : > { %v14063_v1 = vsel %vm632_vm0, %v17492_v59, %v17491_v32  ;;  %v17496_v53 = vrot.slane %v13901_v4, 1  ;;  %v2899_v62 = vsel %vm860_vm3, %v2870_v51, 0.0  ;;  %v17498_v16 = vrot.slane %v13898_v11, 2 }
 0x39d   : > { %v680_v25 = vmul.f32 %v13510_v48, %v14063_v1  ;;  %v14075_v44 = vsel %vm795_vm1, %v17494_v39, %v17493_v23  ;;  %v17499_v52 = vrot.slane %v13901_v4, 2  ;;  %v1343_v63 = vmul.f32 %v13671_v46, %v14063_v1 }
 0x39e   : > { %v843_v47 = vmul.f32 %v13523_v35, %v14075_v44  ;;  %v14087_v24 = vsel %vm1022_vm4, %v17496_v53, %v17495_v6  ;;  %v2637_v32 = vadd.f32 %v2574_v13, %v2537_v26  ;;  %v1447_v51 = vmul.f32 %v13675_v50, %v14075_v44 }
 0x39f   : > { %17497 = vst [vmem:[#allocation98_spill] sm:$0xff] %v14087_v24  ;;  %v1070_v37 = vmul.f32 %v13701_v42, %v14087_v24  ;;  %v14099_v14 = vsel %vm1185_vm5, %v17499_v52, %v17498_v16  ;;  %v1407_v6 = vadd.f32 %v1343_v63, %v13865_v17  ;;  %v1547_v53 = vmul.f32 %v17458_v55, %v13901_v4  ;;  %v17501_v63 = vld [vmem:[#allocation109_spill] sm:$0xff] }
 0x3a0   : > { %17500 = vst [vmem:[#allocation33_spill] sm:$0xff] %v14099_v14  ;;  %v915_v59 = vadd.f32 %v843_v47, %v680_v25  ;;  %v1233_v23 = vmul.f32 %v13705_v40, %v14099_v14  ;;  %v1619_v16 = vmul.f32 %v13720_v7, %v14087_v24  ;;  %v2737_v52 = vadd.f32 %v2674_v3, %v2637_v32 }
 0x3a1   : > { %v1112_v39 = vsel %vm1090_vm6, %v1070_v37, 0.0  ;;  %v1723_v26 = vmul.f32 %v13836_v57, %v14099_v14  ;;  %v1511_v47 = vadd.f32 %v1447_v51, %v1407_v6  ;;  %v1826_v17 = vmul.f32 %v13840_v43, %v14063_v1 }
 0x3a2   : > { %v979_v13 = vadd.f32 %v949_v34, %v915_v59  ;;  %v1275_v25 = vsel %vm1253_vm8, %v1233_v23, 0.0  ;;  %v1651_v37 = vsel %vm1090_vm6, %v1619_v16, 0.0  ;;  %v1931_v8 = vmul.f32 %v17501_v63, %v14075_v44  ;;  %v17502_v59 = vld [vmem:[#allocation61_spill] sm:$0xff] }
 0x3a3   : > { %v2833_v11 = vadd.f32 %v2803_v29, %v2737_v52  ;;  %v1755_v3 = vsel %vm1253_vm8, %v1723_v26, 0.0  ;;  %v2032_v34 = vmul.f32 %v13851_v9, %v13901_v4  ;;  %v1579_v32 = vadd.f32 %v1547_v53, %v1511_v47  ;;  %v17504_v29 = vld [vmem:[#allocation62_spill] sm:$0xff]  ;;  %v17505_v52 = vld [vmem:[#allocation105_spill] sm:$0xff] }
 0x3a4   : > { %v1142_v28 = vadd.f32 %v1112_v39, %v979_v13  ;;  %v1890_v23 = vadd.f32 %v1826_v17, %v17502_v59  ;;  %v2105_v51 = vmul.f32 %v13855_v15, %v14087_v24  ;;  %v2210_v6 = vmul.f32 %v13867_v45, %v14099_v14  ;;  %v17506_v53 = vld [vmem:[#allocation66_spill] sm:$0xff] }
 0x3a5   : > { %v2929_v16 = vadd.f32 %v2899_v62, %v2833_v11  ;;  %v2307_v39 = vmul.f32 %v13861_v31, %v17504_v29  ;;  %v2407_v13 = vmul.f32 %v13871_v56, %v17505_v52  ;;  %v3128_v26 = vmul.f32 %v17506_v53, %v13993_v38  ;;  %v17507_v11 = vld [vmem:[#allocation34_spill] sm:$0xff]  ;;  %v17511_v52 = vld [vmem:[#allocation65_spill] sm:$0xff] }
 0x3a6   : > { %v14133_v18 = vadd.f32 %v1275_v25, %v1142_v28  ;;  %v1683_v47 = vadd.f32 %v1651_v37, %v1579_v32  ;;  %v1995_v17 = vadd.f32 %v1931_v8, %v1890_v23  ;;  %v2137_v59 = vsel %vm1090_vm6, %v2105_v51, 0.0  ;;  %v17508_v28 = vld [vmem:[#allocation99_spill] sm:$0xff]  ;;  %v17510_v31 = vld [vmem:[#allocation102_spill] sm:$0xff]  ;;  %v17513_v8 = vld [vmem:[#allocation108_spill] sm:$0xff] }
 0x3a7   : > { %v2995_v45 = vadd.f32 %v2966_v2, %v2929_v16  ;;  %v2370_v62 = vadd.f32 %v2307_v39, %v17507_v11  ;;  %v2507_v25 = vmul.f32 %v13878_v5, %v17508_v28  ;;  %v14150_v56 = vadd.f32 %v17511_v52, %v17510_v31  ;;  %v14157_v23 = vld [vmem:[%s9937_s11 + $0x70] sm:$0xff]  ;;  %v14165_v39 = vld [vmem:[%s9937_s11 + $0x78] sm:$0xff] }
 0x3a8   : > { %17503 = vst [vmem:[#allocation69_spill] sm:$0xff] %v14133_v18  ;;  %v17509_v18 = vld [vmem:[#allocation67_spill] sm:$0xff]  ;;  %v14152_v38 = vadd.f32 %v1755_v3, %v1683_v47  ;;  %v2064_v37 = vadd.f32 %v2032_v34, %v1995_v17  ;;  %v2675_v32 = vmul.f32 %v13886_v22, %v17513_v8  ;;  %17514 = vst [vmem:[#allocation42_spill] sm:$0xff] %v14157_v23  ;;  %v2242_v16 = vsel %vm1253_vm8, %v2210_v6, 0.0 }
 0x3a9   : > { %v2575_v29 = vmul.f32 %v13882_v10, %v17509_v18  ;;  %17512 = vst [vmem:[#allocation101_spill] sm:$0xff] %v14150_v56  ;;  %v14160_v2 = vadd.f32 %v14033_v20, %v2168_v12  ;;  %v3091_v51 = vadd.f32 %v3032_v60, %v2995_v45  ;;  %v2470_v18 = vadd.f32 %v2407_v13, %v2370_v62 }
 0x3aa   : > { %17516 = vst [vmem:[#allocation58_spill] sm:$0xff] %v14165_v39  ;;  %v2169_v31 = vadd.f32 %v2137_v59, %v2064_v37  ;;  %v2775_v34 = vmul.f32 %v13913_v30, %v14063_v1  ;;  %v2871_v47 = vmul.f32 %v13922_v41, %v14075_v44  ;;  %v2706_v45 = vsel %vm1253_vm8, %v2675_v32, 0.0 }
 0x3ab   : > { %17515 = vst [vmem:[#allocation70_spill] sm:$0xff] %v14160_v2  ;;  %v2606_v3 = vsel %vm1090_vm6, %v2575_v29, 0.0  ;;  %v3187_v17 = vadd.f32 %v3128_v26, %v3091_v51  ;;  %v2538_v20 = vadd.f32 %v2507_v25, %v2470_v18  ;;  %v16917_v60 = vrot.slane %v14157_v23, 6 }
 0x3ac   : > { %v2967_v12 = vmul.f32 %v13926_v27, %v13901_v4  ;;  %v3033_v6 = vmul.f32 %v13933_v61, %v14087_v24  ;;  %v16920_v13 = vrot.slane %v14165_v39, 6  ;;  %v16915_v59 = vrot.slane %v14157_v23, 7  ;;  %v17525_v24 = vld [vmem:[#allocation95_spill] sm:$0xff] }
 0x3ad   : > { %8756 = vmatprep.mubr.msk.f32.mxu0 %vm3220_vm7, %v3187_v17  ;;  %v14183_v11 = vadd.f32 %v2242_v16, %v2169_v31  ;;  %v2638_v26 = vadd.f32 %v2606_v3, %v2538_v20  ;;  %v3129_v62 = vmul.f32 %v17506_v53, %v14099_v14  ;;  %v16916_v28 = vrot.slane %v14165_v39, 7  ;;  %v17524_v14 = vld [vmem:[#allocation64_spill] sm:$0xff] }
 0x3ae   : > { %v14194_v25 = vsel %vm632_vm0, %v16920_v13, %v16917_v60  ;;  %v16914_v29 = vrot.slane %v14157_v23, 1  ;;  %v16913_v52 = vrot.slane %v14165_v39, 1  ;;  %v16919_v37 = vrot.slane %v14157_v23, 2 }
 0x3af   : > { %17517 = vst [vmem:[#allocation31_spill] sm:$0xff] %v14183_v11  ;;  %17518 = vst [vmem:[#allocation47_spill] sm:$0xff] %v14194_v25  ;;  %v2738_v8 = vadd.f32 %v2706_v45, %v2638_v26  ;;  %v681_v32 = vmul.f32 %v13510_v48, %v14194_v25  ;;  %v14207_v51 = vsel %vm795_vm1, %v16916_v28, %v16915_v59  ;;  %v16918_v16 = vrot.slane %v14165_v39, 2 }
 0x3b0   : > { %17519 = vst [vmem:[#allocation71_spill] sm:$0xff] %v14207_v51  ;;  %v844_v18 = vmul.f32 %v13523_v35, %v14207_v51  ;;  %v14218_v31 = vsel %vm1022_vm4, %v16914_v29, %v16913_v52  ;;  %v1344_v3 = vmul.f32 %v13671_v46, %v14194_v25  ;;  %v1448_v17 = vmul.f32 %v13675_v50, %v14207_v51 }
 0x3b1   : > { %17520 = vst [vmem:[#allocation94_spill] sm:$0xff] %v14218_v31  ;;  %v2834_v20 = vadd.f32 %v2775_v34, %v2738_v8  ;;  %v723_v45 = vsel %vm697_vm2, %v681_v32, 0.0  ;;  %v950_v26 = vmul.f32 %v13649_v49, %v14157_v23  ;;  %v14234_v52 = vsel %vm1185_vm5, %v16919_v37, %v16918_v16 }
 0x3b2   : > { %17521 = vst [vmem:[#allocation74_spill] sm:$0xff] %v14234_v52  ;;  %v886_v29 = vsel %vm860_vm3, %v844_v18, 0.0  ;;  %v1071_v34 = vmul.f32 %v13701_v42, %v14218_v31  ;;  %v1376_v8 = vsel %vm697_vm2, %v1344_v3, 0.0  ;;  %v1480_v32 = vsel %vm860_vm3, %v1448_v17, 0.0 }
 0x3b3   : > { %v2930_v59 = vadd.f32 %v2871_v47, %v2834_v20  ;;  %v916_v28 = vadd.f32 %v886_v29, %v723_v45  ;;  %v1408_v60 = vadd.f32 %v1376_v8, %v14027_v33  ;;  %v1548_v16 = vmul.f32 %v17458_v55, %v14157_v23 }
 0x3b4   : > { %v3062_v37 = vsel %vm1090_vm6, %v3033_v6, 0.0  ;;  %v1234_v18 = vmul.f32 %v13705_v40, %v14234_v52  ;;  %v1827_v13 = vmul.f32 %v13840_v43, %v14194_v25  ;;  %v1932_v3 = vmul.f32 %v17501_v63, %v14207_v51 }
 0x3b5   : > { %v2996_v17 = vadd.f32 %v2967_v12, %v2930_v59  ;;  %v980_v47 = vadd.f32 %v950_v26, %v916_v28  ;;  %v1512_v29 = vadd.f32 %v1480_v32, %v1408_v60  ;;  %v1620_v33 = vmul.f32 %v13720_v7, %v14218_v31  ;;  %v17522_v28 = vld [vmem:[#allocation93_spill] sm:$0xff]  ;;  %v17523_v26 = vld [vmem:[#allocation106_spill] sm:$0xff] }
 0x3b6   : > { %v3158_v20 = vsel %vm1253_vm8, %v3129_v62, 0.0  ;;  %v1724_v6 = vmul.f32 %v13836_v57, %v14234_v52  ;;  %v1859_v45 = vsel %vm697_vm2, %v1827_v13, 0.0  ;;  %v1964_v8 = vsel %vm860_vm3, %v1932_v3, 0.0 }
 0x3b7   : > { %v3092_v11 = vadd.f32 %v3062_v37, %v2996_v17  ;;  %v1143_v2 = vadd.f32 %v1071_v34, %v980_v47  ;;  %v1580_v12 = vadd.f32 %v1548_v16, %v1512_v29  ;;  %v1891_v60 = vadd.f32 %v1859_v45, %v14040_v54  ;;  %v17526_v16 = vld [vmem:[#allocation41_spill] sm:$0xff]  ;;  %v14286_v29 = vpop.f32.mrb[0].mxu1 }
 0x3b8   : > { %v2033_v59 = vmul.f32 %v13851_v9, %v14157_v23  ;;  %v2106_v62 = vmul.f32 %v13855_v15, %v14218_v31  ;;  %v2308_v32 = vmul.f32 %v17523_v26, %v17522_v28  ;;  %v2408_v13 = vmul.f32 %v17525_v24, %v17524_v14  ;;  %17527 = vst [vmem:[#allocation79_spill] sm:$0xff] %v14286_v29 }
 0x3b9   : > { %v3188_v4 = vadd.f32 %v3158_v20, %v3092_v11  ;;  %v14274_v56 = vadd.f32 %v1234_v18, %v1143_v2  ;;  %v1684_v37 = vadd.f32 %v1620_v33, %v1580_v12  ;;  %v1996_v34 = vadd.f32 %v1964_v8, %v1891_v60  ;;  %v17529_v2 = vld [vmem:[#allocation35_spill] sm:$0xff]  ;;  %v17530_v18 = vld [vmem:[#allocation52_spill] sm:$0xff] }
 0x3ba   : > { %v14278_v54 = vmul.f32 %v17526_v16, %v14234_v52  ;;  %v2339_v3 = vsel %vm697_vm2, %v2308_v32, 0.0  ;;  %v2439_v17 = vsel %vm860_vm3, %v2408_v13, 0.0  ;;  %v2776_v47 = vmul.f32 %v13913_v30, %v14194_v25  ;;  %v17531_v20 = vld [vmem:[#allocation100_spill] sm:$0xff] }
 0x3bb   : > { %8757 = vmatmul.mubr.msk.f32.gmra.mrb[8].mxu0 %vm3220_vm7, %v3188_v4  ;;  %v14289_v14 = vadd.f32 %v1724_v6, %v1684_v37  ;;  %v2371_v11 = vadd.f32 %v2339_v3, %v17529_v2  ;;  %v2508_v33 = vmul.f32 %v13878_v5, %v17530_v18  ;;  %v2576_v45 = vmul.f32 %v13882_v10, %v17531_v20  ;;  %v17532_v12 = vld [vmem:[#allocation92_spill] sm:$0xff] }
 0x3bc   : > { %v2065_v8 = vadd.f32 %v2033_v59, %v1996_v34  ;;  %v2676_v60 = vmul.f32 %v13886_v22, %v17532_v12  ;;  %v2805_v28 = vsel %vm697_vm2, %v2776_v47, 0.0  ;;  %v2872_v4 = vmul.f32 %v13922_v41, %v14207_v51 }
 0x3bd   : > { %17528 = vst [vmem:[#allocation68_spill] sm:$0xff] %v14289_v14  ;;  %v2471_v6 = vadd.f32 %v2439_v17, %v2371_v11  ;;  %v2968_v32 = vmul.f32 %v13926_v27, %v14157_v23  ;;  %v3034_v13 = vmul.f32 %v13933_v61, %v14218_v31  ;;  %v17533_v37 = vrot.slane %v14165_v39, 6 }
 0x3be   : > { %v17534_v59 = vrot.slane %v14157_v23, 6  ;;  %v14316_v3 = vmul.f32 %v17506_v53, %v14234_v52  ;;  %v17535_v47 = vrot.slane %v14165_v39, 7  ;;  %v17536_v2 = vrot.slane %v14157_v23, 7 }
 0x3bf   : > { %v17538_v18 = vrot.slane %v14157_v23, 1  ;;  %v17539_v20 = vrot.slane %v14165_v39, 1  ;;  %v951_v29 = vmul.f32 %v13649_v49, %v14165_v39  ;;  %v17542_v31 = vrot.slane %v14165_v39, 2 }
 0x3c0   : > { %v14312_v34 = vsel %vm632_vm0, %v17534_v59, %v17533_v37  ;;  %v14326_v11 = vsel %vm795_vm1, %v17536_v2, %v17535_v47  ;;  %v2539_v37 = vadd.f32 %v2508_v33, %v2471_v6  ;;  %v2170_v47 = vadd.f32 %v2106_v62, %v2065_v8  ;;  %v14358_v8 = vpop.f32.mrb[1].mxu1 }
 0x3c1   : > { %v682_v17 = vmul.f32 %v13510_v48, %v14312_v34  ;;  %17537 = vst [vmem:[#allocation60_spill] sm:$0xff] %v14326_v11  ;;  %v14334_v12 = vsel %vm1022_vm4, %v17539_v20, %v17538_v18  ;;  %v845_v59 = vmul.f32 %v13523_v35, %v14326_v11  ;;  %v17541_v2 = vrot.slane %v14157_v23, 2  ;;  %17544 = vst [vmem:[#allocation96_spill] sm:$0xff] %v14358_v8 }
 0x3c2   : > { %17540 = vst [vmem:[#allocation63_spill] sm:$0xff] %v14334_v12  ;;  %v1072_v52 = vmul.f32 %v13701_v42, %v14334_v12  ;;  %v1345_v33 = vmul.f32 %v13671_v46, %v14312_v34  ;;  %v1449_v6 = vmul.f32 %v13675_v50, %v14326_v11  ;;  %v2639_v18 = vadd.f32 %v2576_v45, %v2539_v37 }
 0x3c3   : > { %v14348_v51 = vsel %vm1185_vm5, %v17542_v31, %v17541_v2  ;;  %v917_v20 = vadd.f32 %v845_v59, %v682_v17  ;;  %v1549_v62 = vmul.f32 %v17458_v55, %v14165_v39  ;;  %v17545_v2 = vld [vmem:[#allocation69_spill] sm:$0xff]  ;;  %v1621_v14 = vmul.f32 %v13720_v7, %v14334_v12 }
 0x3c4   : > { %17543 = vst [vmem:[#allocation103_spill] sm:$0xff] %v14348_v51  ;;  %v1114_v25 = vsel %vm1090_vm6, %v1072_v52, 0.0  ;;  %v1235_v31 = vmul.f32 %v13705_v40, %v14348_v51  ;;  %v1409_v23 = vadd.f32 %v1345_v33, %v17545_v2  ;;  %v1828_v45 = vmul.f32 %v13840_v43, %v14312_v34 }
 0x3c5   : > { %v2739_v17 = vadd.f32 %v2676_v60, %v2639_v18  ;;  %v981_v37 = vadd.f32 %v951_v29, %v917_v20  ;;  %v1725_v52 = vmul.f32 %v13836_v57, %v14348_v51  ;;  %v1933_v59 = vmul.f32 %v17501_v63, %v14326_v11 }
 0x3c6   : > { %v2901_v8 = vsel %vm860_vm3, %v2872_v4, 0.0  ;;  %v1513_v40 = vadd.f32 %v1449_v6, %v1409_v23  ;;  %v1653_v33 = vsel %vm1090_vm6, %v1621_v14, 0.0  ;;  %v1892_v2 = vadd.f32 %v1828_v45, %v14152_v38 }
 0x3c7   : > { %v2835_v7 = vadd.f32 %v2805_v28, %v2739_v17  ;;  %v1144_v55 = vadd.f32 %v1114_v25, %v981_v37  ;;  %v2034_v29 = vmul.f32 %v13851_v9, %v14165_v39  ;;  %v2107_v60 = vmul.f32 %v13855_v15, %v14334_v12  ;;  %v17548_v17 = vld [vmem:[#allocation98_spill] sm:$0xff]  ;;  %v17549_v37 = vld [vmem:[#allocation33_spill] sm:$0xff] }
 0x3c8   : > { %v1581_v18 = vadd.f32 %v1549_v62, %v1513_v40  ;;  %v1997_v20 = vadd.f32 %v1933_v59, %v1892_v2  ;;  %v2212_v63 = vmul.f32 %v17526_v16, %v14348_v51  ;;  %v2309_v23 = vmul.f32 %v17523_v26, %v14063_v1  ;;  %v17546_v62 = vld [vmem:[#allocation101_spill] sm:$0xff] }
 0x3c9   : > { %v2931_v4 = vadd.f32 %v2901_v8, %v2835_v7  ;;  %v1277_v38 = vsel %vm1253_vm8, %v1235_v31, 0.0  ;;  %v1757_v25 = vsel %vm1253_vm8, %v1725_v52, 0.0  ;;  %v2409_v14 = vmul.f32 %v17525_v24, %v14075_v44  ;;  %v17547_v7 = vld [vmem:[#allocation97_spill] sm:$0xff] }
 0x3ca   : > { %v1685_v40 = vadd.f32 %v1653_v33, %v1581_v18  ;;  %v2066_v28 = vadd.f32 %v2034_v29, %v1997_v20  ;;  %v2139_v6 = vsel %vm1090_vm6, %v2107_v60, 0.0  ;;  %v2372_v45 = vadd.f32 %v2309_v23, %v17546_v62  ;;  %v14412_v29 = vld [vmem:[%s9937_s11 + $0x88] sm:$0xff] }
 0x3cb   : > { %v2997_v1 = vadd.f32 %v2968_v32, %v2931_v4  ;;  %v2509_v8 = vmul.f32 %v13878_v5, %v17547_v7  ;;  %v2577_v31 = vmul.f32 %v13882_v10, %v17548_v17  ;;  %v2677_v52 = vmul.f32 %v13886_v22, %v17549_v37  ;;  %v14409_v32 = vld [vmem:[%s9937_s11 + $0x80] sm:$0xff] }
 0x3cc   : > { %v14400_v59 = vadd.f32 %v14278_v54, %v2170_v47  ;;  %v14402_v44 = vadd.f32 %v1277_v38, %v1144_v55  ;;  %v14406_v33 = vsel %vm1253_vm8, %v2212_v63, 0.0  ;;  %v2472_v2 = vadd.f32 %v2409_v14, %v2372_v45  ;;  %17551 = vst [vmem:[#allocation61_spill] sm:$0xff] %v14409_v32  ;;  %v14418_v54 = vpop.f32.mrb[2].mxu1 }
 0x3cd   : > { %v3093_v60 = vadd.f32 %v3034_v13, %v2997_v1  ;;  %v14414_v18 = vadd.f32 %v1757_v25, %v1685_v40  ;;  %v2171_v20 = vadd.f32 %v2139_v6, %v2066_v28  ;;  %v2608_v23 = vsel %vm1090_vm6, %v2577_v31, 0.0  ;;  %17552 = vst [vmem:[#allocation62_spill] sm:$0xff] %v14418_v54 }
 0x3ce   : > { %17550 = vst [vmem:[#allocation73_spill] sm:$0xff] %v14400_v59  ;;  %v2540_v55 = vadd.f32 %v2509_v8, %v2472_v2  ;;  %v2708_v47 = vsel %vm1253_vm8, %v2677_v52, 0.0  ;;  %v2777_v63 = vmul.f32 %v13913_v30, %v14312_v34  ;;  %v2873_v4 = vmul.f32 %v13922_v41, %v14326_v11 }
 0x3cf   : > { %v3189_v13 = vadd.f32 %v14316_v3, %v3093_v60  ;;  %v2969_v38 = vmul.f32 %v13926_v27, %v14165_v39  ;;  %v16939_v25 = vrot.slane %v14409_v32, 6  ;;  %v16942_v14 = vrot.slane %v14412_v29, 6 }
 0x3d0   : > { %v2640_v40 = vadd.f32 %v2608_v23, %v2540_v55  ;;  %v3035_v28 = vmul.f32 %v13933_v61, %v14334_v12  ;;  %v16935_v6 = vrot.slane %v14409_v32, 7  ;;  %v16938_v62 = vrot.slane %v14412_v29, 7  ;;  %v17563_v12 = vld [vmem:[#allocation71_spill] sm:$0xff] }
 0x3d1   : > { %8759 = vmatprep.mubr.msk.f32.mxu0 %vm3220_vm7, %v3189_v13  ;;  %v3131_v3 = vmul.f32 %v17506_v53, %v14348_v51  ;;  %v14444_v45 = vsel %vm632_vm0, %v16942_v14, %v16939_v25  ;;  %v952_v1 = vmul.f32 %v13649_v49, %v14409_v32  ;;  %v16937_v7 = vrot.slane %v14409_v32, 1 }
 0x3d2   : > { %v2740_v8 = vadd.f32 %v2708_v47, %v2640_v40  ;;  %v683_v17 = vmul.f32 %v13510_v48, %v14444_v45  ;;  %v14457_v31 = vsel %vm795_vm1, %v16938_v62, %v16935_v6  ;;  %v16936_v37 = vrot.slane %v14412_v29, 1 }
 0x3d3   : > { %17553 = vst [vmem:[#allocation105_spill] sm:$0xff] %v14457_v31  ;;  %v846_v52 = vmul.f32 %v13523_v35, %v14457_v31  ;;  %v16941_v2 = vrot.slane %v14409_v32, 2  ;;  %v16940_v60 = vrot.slane %v14412_v29, 2  ;;  %v1346_v48 = vmul.f32 %v13671_v46, %v14444_v45 }
 0x3d4   : > { %v2836_v23 = vadd.f32 %v2777_v63, %v2740_v8  ;;  %v725_v55 = vsel %vm697_vm2, %v683_v17, 0.0  ;;  %v14474_v47 = vsel %vm1022_vm4, %v16937_v7, %v16936_v37  ;;  %v1450_v35 = vmul.f32 %v13675_v50, %v14457_v31 }
 0x3d5   : > { %17554 = vst [vmem:[#allocation66_spill] sm:$0xff] %v14474_v47  ;;  %v3064_v13 = vsel %vm1090_vm6, %v3035_v28, 0.0  ;;  %v888_v63 = vsel %vm860_vm3, %v846_v52, 0.0  ;;  %v1073_v40 = vmul.f32 %v13701_v42, %v14474_v47  ;;  %v1378_v8 = vsel %vm697_vm2, %v1346_v48, 0.0  ;;  %v17556_v48 = vld [vmem:[#allocation104_spill] sm:$0xff] }
 0x3d6   : > { %v2932_v17 = vadd.f32 %v2873_v4, %v2836_v23  ;;  %v918_v6 = vadd.f32 %v888_v63, %v725_v55  ;;  %v14492_v37 = vsel %vm1185_vm5, %v16941_v2, %v16940_v60  ;;  %v1410_v28 = vadd.f32 %v1378_v8, %v14274_v56  ;;  %v17557_v23 = vld [vmem:[#allocation72_spill] sm:$0xff]  ;;  %v14503_v63 = vpop.f32.mrb[3].mxu1  ;;  %v17559_v8 = vld [vmem:[#allocation107_spill] sm:$0xff]  ;;  %v17560_v2 = vld [vmem:[#allocation109_spill] sm:$0xff] }
 0x3d7   : > { %17555 = vst [vmem:[#allocation34_spill] sm:$0xff] %v14492_v37  ;;  %v3160_v52 = vsel %vm1253_vm8, %v3131_v3, 0.0  ;;  %v1482_v7 = vsel %vm860_vm3, %v1450_v35, 0.0  ;;  %v1550_v4 = vmul.f32 %v17556_v48, %v14409_v32  ;;  %v1622_v55 = vmul.f32 %v17557_v23, %v14474_v47  ;;  %17558 = vst [vmem:[#allocation99_spill] sm:$0xff] %v14503_v63 }
 0x3d8   : > { %v2998_v62 = vadd.f32 %v2969_v38, %v2932_v17  ;;  %v982_v25 = vadd.f32 %v952_v1, %v918_v6  ;;  %v1514_v60 = vadd.f32 %v1482_v7, %v1410_v28  ;;  %v1829_v56 = vmul.f32 %v13840_v43, %v14444_v45  ;;  %v17561_v1 = vld [vmem:[#allocation68_spill] sm:$0xff]  ;;  %v17562_v28 = vld [vmem:[#allocation47_spill] sm:$0xff] }
 0x3d9   : > { %v1236_v3 = vmul.f32 %v17559_v8, %v14492_v37  ;;  %v1726_v35 = vmul.f32 %v13836_v57, %v14492_v37  ;;  %v1934_v14 = vmul.f32 %v17560_v2, %v14457_v31  ;;  %v2035_v54 = vmul.f32 %v13851_v9, %v14409_v32 }
 0x3da   : > { %v3094_v59 = vadd.f32 %v3064_v13, %v2998_v62  ;;  %v1145_v63 = vadd.f32 %v1073_v40, %v982_v25  ;;  %v1582_v38 = vadd.f32 %v1550_v4, %v1514_v60  ;;  %v1861_v6 = vsel %vm697_vm2, %v1829_v56, 0.0 }
 0x3db   : > { %v1893_v7 = vadd.f32 %v1861_v6, %v17561_v1  ;;  %v1966_v17 = vsel %vm860_vm3, %v1934_v14, 0.0  ;;  %v2310_v51 = vmul.f32 %v17523_v26, %v17562_v28  ;;  %v2410_v39 = vmul.f32 %v17525_v24, %v17563_v12  ;;  %v17567_v6 = vld [vmem:[#allocation94_spill] sm:$0xff] }
 0x3dc   : > { %v14525_v11 = vadd.f32 %v14406_v33, %v2171_v20  ;;  %v3190_v62 = vadd.f32 %v3160_v52, %v3094_v59  ;;  %v1686_v25 = vadd.f32 %v1622_v55, %v1582_v38  ;;  %v2108_v60 = vmul.f32 %v13855_v15, %v14474_v47  ;;  %v17565_v59 = vld [vmem:[#allocation70_spill] sm:$0xff] }
 0x3dd   : > { %v1998_v13 = vadd.f32 %v1966_v17, %v1893_v7  ;;  %v14531_v40 = vmul.f32 %v17526_v16, %v14492_v37  ;;  %v2341_v14 = vsel %vm697_vm2, %v2310_v51, 0.0  ;;  %v2441_v4 = vsel %vm860_vm3, %v2410_v39, 0.0  ;;  %v17566_v20 = vld [vmem:[#allocation42_spill] sm:$0xff] }
 0x3de   : > { %17564 = vst [vmem:[#allocation67_spill] sm:$0xff] %v14525_v11  ;;  %8760 = vmatmul.mubr.msk.f32.gmra.mrb[10].mxu0 %vm3220_vm7, %v3190_v62  ;;  %v14538_v12 = vadd.f32 %v1236_v3, %v1145_v63  ;;  %v2373_v33 = vadd.f32 %v2341_v14, %v17565_v59  ;;  %v2510_v52 = vmul.f32 %v13878_v5, %v17566_v20  ;;  %v17568_v1 = vld [vmem:[#allocation74_spill] sm:$0xff]  ;;  %v17569_v17 = vrot.slane %v14412_v29, 6  ;;  %v14579_v20 = vld [vmem:[#allocation7 + $0x1] ss:$0 sm:$0xff] }
 0x3df   : > { %v2778_v55 = vmul.f32 %v13913_v30, %v14444_v45  ;;  %v14545_v56 = vadd.f32 %v1726_v35, %v1686_v25  ;;  %v2067_v38 = vadd.f32 %v2035_v54, %v1998_v13  ;;  %v2578_v51 = vmul.f32 %v13882_v10, %v17567_v6  ;;  %v14567_v25 = vld [vmem:[#allocation7] ss:$0 sm:$0xff] }
 0x3e0   : > { %v2678_v39 = vmul.f32 %v13886_v22, %v17568_v1  ;;  %v2473_v7 = vadd.f32 %v2441_v4, %v2373_v33  ;;  %v2874_v63 = vmul.f32 %v13922_v41, %v14457_v31  ;;  %v2970_v3 = vmul.f32 %v13926_v27, %v14409_v32 }
 0x3e1   : > { %v17570_v28 = vrot.slane %v14409_v32, 6  ;;  %v2807_v35 = vsel %vm697_vm2, %v2778_v55, 0.0  ;;  %v3036_v62 = vmul.f32 %v13933_v61, %v14474_v47  ;;  %v17571_v14 = vrot.slane %v14412_v29, 7  ;;  %v14607_v47 = vpop.f32.mrb[4].mxu1 }
 0x3e2   : > { %v17572_v4 = vrot.slane %v14409_v32, 7  ;;  %v2541_v33 = vadd.f32 %v2510_v52, %v2473_v7  ;;  %v953_v6 = vmul.f32 %v13649_v49, %v14412_v29  ;;  %v17573_v1 = vrot.slane %v14409_v32, 1  ;;  %17577 = vst [vmem:[#allocation102_spill] sm:$0xff] %v14607_v47  ;;  %v17615_v47 = vld [vmem:[#allocation73_spill] sm:$0xff] }
 0x3e3   : > { %v14561_v54 = vsel %vm632_vm0, %v17570_v28, %v17569_v17  ;;  %v17574_v17 = vrot.slane %v14412_v29, 1  ;;  %v17575_v7 = vrot.slane %v14409_v32, 2 }
 0x3e4   : > { %v684_v13 = vmul.f32 %v14567_v25, %v14561_v54  ;;  %v14577_v59 = vsel %vm795_vm1, %v17572_v4, %v17571_v14  ;;  %v3132_v14 = vmul.f32 %v17506_v53, %v14492_v37  ;;  %v17576_v4 = vrot.slane %v14412_v29, 2 }
 0x3e5   : > { %v847_v55 = vmul.f32 %v14579_v20, %v14577_v59  ;;  %v14591_v28 = vsel %vm1022_vm4, %v17574_v17, %v17573_v1  ;;  %v1347_v11 = vmul.f32 %v13671_v46, %v14561_v54  ;;  %v2641_v1 = vadd.f32 %v2578_v51, %v2541_v33 }
 0x3e6   : > { %v1074_v52 = vmul.f32 %v13701_v42, %v14591_v28  ;;  %v14603_v49 = vsel %vm1185_vm5, %v17576_v4, %v17575_v7  ;;  %v1451_v42 = vmul.f32 %v13675_v50, %v14577_v59  ;;  %v1551_v7 = vmul.f32 %v17556_v48, %v14412_v29 }
 0x3e7   : > { %v919_v17 = vadd.f32 %v847_v55, %v684_v13  ;;  %v1237_v37 = vmul.f32 %v17559_v8, %v14603_v49  ;;  %v1411_v31 = vadd.f32 %v1347_v11, %v14402_v44  ;;  %v1623_v46 = vmul.f32 %v17557_v23, %v14591_v28 }
 0x3e8   : > { %v1116_v32 = vsel %vm1090_vm6, %v1074_v52, 0.0  ;;  %v2172_v4 = vadd.f32 %v2108_v60, %v2067_v38  ;;  %v2741_v51 = vadd.f32 %v2678_v39, %v2641_v1  ;;  %v2903_v13 = vsel %vm860_vm3, %v2874_v63, 0.0  ;;  %v17579_v52 = vld [vmem:[#allocation31_spill] sm:$0xff] }
 0x3e9   : > { %v983_v8 = vadd.f32 %v953_v6, %v919_v17  ;;  %v1515_v33 = vadd.f32 %v1451_v42, %v1411_v31  ;;  %v1727_v50 = vmul.f32 %v13836_v57, %v14603_v49  ;;  %v1830_v55 = vmul.f32 %v13840_v43, %v14561_v54  ;;  %v17581_v42 = vld [vmem:[#allocation63_spill] sm:$0xff] }
 0x3ea   : > { %v1935_v11 = vmul.f32 %v17560_v2, %v14577_v59  ;;  %v2837_v44 = vadd.f32 %v2807_v35, %v2741_v51  ;;  %v1279_v23 = vsel %vm1253_vm8, %v1237_v37, 0.0  ;;  %v1655_v60 = vsel %vm1090_vm6, %v1623_v46, 0.0  ;;  %v17578_v37 = vld [vmem:[#allocation60_spill] sm:$0xff]  ;;  %v17584_v51 = vld [vmem:[#allocation103_spill] sm:$0xff] }
 0x3eb   : > { %v1146_v48 = vadd.f32 %v1116_v32, %v983_v8  ;;  %v1583_v38 = vadd.f32 %v1551_v7, %v1515_v33  ;;  %v1894_v31 = vadd.f32 %v1830_v55, %v14414_v18  ;;  %v2036_v57 = vmul.f32 %v13851_v9, %v14412_v29  ;;  %v14671_v55 = vld [vmem:[%s9937_s11 + $0x98] sm:$0xff] }
 0x3ec   : > { %v2109_v43 = vmul.f32 %v13855_v15, %v14591_v28  ;;  %v2933_v39 = vadd.f32 %v2903_v13, %v2837_v44  ;;  %v2214_v2 = vmul.f32 %v17526_v16, %v14603_v49  ;;  %v2311_v32 = vmul.f32 %v17523_v26, %v14312_v34  ;;  %v17580_v16 = vld [vmem:[#allocation58_spill] sm:$0xff]  ;;  %v14652_v34 = vpop.f32.mrb[5].mxu1 }
 0x3ed   : > { %v2411_v63 = vmul.f32 %v17525_v24, %v17578_v37  ;;  %v1687_v35 = vadd.f32 %v1655_v60, %v1583_v38  ;;  %v1759_v18 = vsel %vm1253_vm8, %v1727_v50, 0.0  ;;  %v1999_v6 = vadd.f32 %v1935_v11, %v1894_v31  ;;  %17582 = vst [vmem:[#allocation65_spill] sm:$0xff] %v14652_v34  ;;  %v14664_v8 = vpop.f32.mrb[6].mxu1 }
 0x3ee   : > { %v2141_v9 = vsel %vm1090_vm6, %v2109_v43, 0.0  ;;  %v2999_v15 = vadd.f32 %v2970_v3, %v2933_v39  ;;  %v2374_v1 = vadd.f32 %v2311_v32, %v17579_v52  ;;  %v2511_v17 = vmul.f32 %v13878_v5, %v17580_v16  ;;  %v14662_v3 = vld [vmem:[%s9937_s11 + $0x90] sm:$0xff]  ;;  %17586 = vst [vmem:[#allocation106_spill] sm:$0xff] %v14664_v8  ;;  %v14845_v8 = vld [vmem:[#allocation7 + $0xc] ss:$0 sm:$0xff] }
 0x3ef   : > { %v2579_v26 = vmul.f32 %v13882_v10, %v17581_v42  ;;  %v14655_v24 = vadd.f32 %v14531_v40, %v2172_v4  ;;  %v14657_v7 = vadd.f32 %v1279_v23, %v1146_v48  ;;  %v2068_v46 = vadd.f32 %v2036_v57, %v1999_v6  ;;  %17585 = vst [vmem:[#allocation93_spill] sm:$0xff] %v14662_v3  ;;  %v14673_v40 = vpop.f32.mrb[7].mxu1  ;;  %v14740_v42 = vld [vmem:[#allocation7 + $0x5] ss:$0 sm:$0xff] }
 0x3f0   : > { %v2679_v13 = vmul.f32 %v13886_v22, %v17584_v51  ;;  %v3095_v33 = vadd.f32 %v3036_v62, %v2999_v15  ;;  %v14666_v5 = vadd.f32 %v1759_v18, %v1687_v35  ;;  %v2246_v10 = vsel %vm1253_vm8, %v2214_v2, 0.0  ;;  %17587 = vst [vmem:[#allocation64_spill] sm:$0xff] %v14673_v40  ;;  %v14681_v44 = vpop.f32.mrb[8].mxu1 }
 0x3f1   : > { %17583 = vst [vmem:[#allocation108_spill] sm:$0xff] %v14655_v24  ;;  %v2474_v50 = vadd.f32 %v2411_v63, %v2374_v1  ;;  %v2173_v4 = vadd.f32 %v2141_v9, %v2068_v46  ;;  %v2610_v11 = vsel %vm1090_vm6, %v2579_v26, 0.0  ;;  %v2779_v22 = vmul.f32 %v13913_v30, %v14561_v54  ;;  %17588 = vst [vmem:[#allocation95_spill] sm:$0xff] %v14681_v44  ;;  %v14686_v31 = vpop.f32.mrb[9].mxu1  ;;  %v17596_v46 = vld [vmem:[#allocation36_spill] sm:$0xff] }
 0x3f2   : > { %v2875_v62 = vmul.f32 %v13922_v41, %v14577_v59  ;;  %v3191_v48 = vadd.f32 %v3132_v14, %v3095_v33  ;;  %v2710_v60 = vsel %vm1253_vm8, %v2679_v13, 0.0  ;;  %v16957_v38 = vrot.slane %v14662_v3, 6  ;;  %17589 = vst [vmem:[#allocation41_spill] sm:$0xff] %v14686_v31  ;;  %v14694_v39 = vpop.f32.mrb[10].mxu1  ;;  %v14830_v31 = vld [vmem:[#allocation7 + $0xb] ss:$0 sm:$0xff] }
 0x3f3   : > { %v2542_v23 = vadd.f32 %v2511_v17, %v2474_v50  ;;  %v2971_v57 = vmul.f32 %v13926_v27, %v14412_v29  ;;  %v3037_v30 = vmul.f32 %v13933_v61, %v14591_v28  ;;  %v16958_v43 = vrot.slane %v14671_v55, 6  ;;  %17590 = vst [vmem:[#allocation35_spill] sm:$0xff] %v14694_v39  ;;  %v14702_v27 = vpop.f32.mrb[11].mxu1  ;;  %v14750_v50 = vld [vmem:[#allocation7 + $0x2] ss:$0 sm:$0xff]  ;;  %17609 = vst [vmem:[#allocation70_spill] sm:$0xff] %v14830_v31 }
 0x3f4   : > { %v16955_v41 = vrot.slane %v14662_v3, 7  ;;  %8762 = vmatprep.mubr.msk.f32.mxu0 %vm3220_vm7, %v3191_v48  ;;  %v14697_v14 = vadd.f32 %v2246_v10, %v2173_v4  ;;  %v3133_v32 = vmul.f32 %v17506_v53, %v14603_v49  ;;  %v16956_v37 = vrot.slane %v14671_v55, 7  ;;  %17592 = vst [vmem:[#allocation100_spill] sm:$0xff] %v14702_v27  ;;  %v14715_v6 = vpop.f32.mrb[12].mxu1  ;;  %v14826_v27 = vld [vmem:[#allocation7 + $0x9] ss:$0 sm:$0xff] }
 0x3f5   : > { %v2642_v2 = vadd.f32 %v2610_v11, %v2542_v23  ;;  %v14710_v61 = vsel %vm632_vm0, %v16958_v43, %v16957_v38  ;;  %v16954_v63 = vrot.slane %v14662_v3, 1  ;;  %v16953_v35 = vrot.slane %v14671_v55, 1  ;;  %17593 = vst [vmem:[#allocation92_spill] sm:$0xff] %v14715_v6  ;;  %v14728_v1 = vpop.f32.mrb[13].mxu1  ;;  %v17603_v38 = vld [vmem:[#allocation43_spill] sm:$0xff] }
 0x3f6   : > { %17591 = vst [vmem:[#allocation52_spill] sm:$0xff] %v14697_v14  ;;  %v16952_v18 = vrot.slane %v14662_v3, 2  ;;  %v685_v9 = vmul.f32 %v14567_v25, %v14710_v61  ;;  %v14725_v15 = vsel %vm795_vm1, %v16956_v37, %v16955_v41  ;;  %v16951_v52 = vrot.slane %v14671_v55, 2  ;;  %17594 = vst [vmem:[#allocation69_spill] sm:$0xff] %v14728_v1  ;;  %v14746_v13 = vpop.f32.mrb[14].mxu1 }
 0x3f7   : > { %v2742_v53 = vadd.f32 %v2710_v60, %v2642_v2  ;;  %v848_v16 = vmul.f32 %v14579_v20, %v14725_v15  ;;  %v14738_v17 = vsel %vm1022_vm4, %v16954_v63, %v16953_v35  ;;  %v1348_v26 = vmul.f32 %v14740_v42, %v14710_v61  ;;  %17597 = vst [vmem:[#allocation97_spill] sm:$0xff] %v14746_v13  ;;  %v14762_v48 = vpop.f32.mrb[15].mxu1  ;;  %v14768_v60 = vld [vmem:[#allocation7 + $0x3] ss:$0 sm:$0xff]  ;;  %v14777_v63 = vld [vmem:[#allocation7 + $0x6] ss:$0 sm:$0xff] }
 0x3f8   : > { %17595 = vst [vmem:[#allocation101_spill] sm:$0xff] %v14738_v17  ;;  %v1350_v51 = vmul.f32 %v14740_v42, %v17596_v46  ;;  %v727_v10 = vsel %vm697_vm2, %v685_v9, 0.0  ;;  %v954_v4 = vmul.f32 %v14750_v50, %v14662_v3  ;;  %v14760_v11 = vsel %vm1185_vm5, %v16952_v18, %v16951_v52  ;;  %17599 = vst [vmem:[#allocation33_spill] sm:$0xff] %v14762_v48  ;;  %v14774_v9 = vpop.f32.mrb[16].mxu1  ;;  %v14785_v37 = vld [vmem:[#allocation7 + $0x4] ss:$0 sm:$0xff] }
 0x3f9   : > { %v2838_v33 = vadd.f32 %v2779_v22, %v2742_v53  ;;  %17598 = vst [vmem:[#allocation98_spill] sm:$0xff] %v14760_v11  ;;  %v3066_v22 = vsel %vm1090_vm6, %v3037_v30, 0.0  ;;  %v890_v23 = vsel %vm860_vm3, %v848_v16, 0.0  ;;  %v1075_v2 = vmul.f32 %v14768_v60, %v14738_v17  ;;  %17600 = vst [vmem:[#allocation104_spill] sm:$0xff] %v14774_v9  ;;  %v14781_v16 = vpop.f32.mrb[17].mxu1  ;;  %v14804_v48 = vld [vmem:[%s9937_s11 + $0xa0] sm:$0xff] }
 0x3fa   : > { %v1380_v53 = vsel %vm697_vm2, %v1348_v26, 0.0  ;;  %v920_v18 = vadd.f32 %v890_v23, %v727_v10  ;;  %v1452_v30 = vmul.f32 %v14777_v63, %v14725_v15  ;;  %17601 = vst [vmem:[#allocation72_spill] sm:$0xff] %v14781_v16  ;;  %v3162_v41 = vsel %vm1253_vm8, %v3133_v32, 0.0  ;;  %v14795_v10 = vpop.f32.mrb[18].mxu1  ;;  %17605 = vst [vmem:[#allocation68_spill] sm:$0xff] %v14804_v48 }
 0x3fb   : > { %v2934_v52 = vadd.f32 %v2875_v62, %v2838_v33  ;;  %v1412_v35 = vadd.f32 %v1380_v53, %v14538_v12  ;;  %v1238_v26 = vmul.f32 %v14785_v37, %v14760_v11  ;;  %v1382_v62 = vsel %vm697_vm2, %v1350_v51, 0.0  ;;  %v14791_v12 = vld [vmem:[#allocation7 + $0x7] ss:$0 sm:$0xff]  ;;  %17602 = vst [vmem:[#allocation107_spill] sm:$0xff] %v14795_v10  ;;  %v14801_v16 = vpop.f32.mrb[19].mxu1 }
 0x3fc   : > { %v1552_v33 = vmul.f32 %v14791_v12, %v14662_v3  ;;  %v984_v53 = vadd.f32 %v954_v4, %v920_v18  ;;  %v1454_v32 = vmul.f32 %v14777_v63, %v17603_v38  ;;  %v1484_v43 = vsel %vm860_vm3, %v1452_v30, 0.0  ;;  %17604 = vst [vmem:[#allocation109_spill] sm:$0xff] %v14801_v16  ;;  %v14808_v13 = vld [vmem:[#allocation7 + $0x8] ss:$0 sm:$0xff]  ;;  %v17606_v18 = vld [vmem:[#allocation48_spill] sm:$0xff]  ;;  %v14816_v4 = vpop.f32.mrb[20].mxu1 }
 0x3fd   : > { %v3000_v23 = vadd.f32 %v2971_v57, %v2934_v52  ;;  %v1516_v9 = vadd.f32 %v1484_v43, %v1412_v35  ;;  %v1554_v51 = vmul.f32 %v14804_v48, %v14791_v12  ;;  %v1624_v57 = vmul.f32 %v14808_v13, %v14738_v17  ;;  %17607 = vst [vmem:[#allocation47_spill] sm:$0xff] %v14816_v4  ;;  %v14818_v16 = vld [vmem:[#allocation7 + $0xa] ss:$0 sm:$0xff]  ;;  %v14824_v1 = vpop.f32.mrb[21].mxu1  ;;  %v14883_v14 = vld [vmem:[#allocation7 + $0x14] ss:$0 sm:$0xff] }
 0x3fe   : > { %v14814_v52 = vmul.f32 %v14808_v13, %v17606_v18  ;;  %v1147_v10 = vadd.f32 %v1075_v2, %v984_v53  ;;  %v1831_v43 = vmul.f32 %v14818_v16, %v14710_v61  ;;  %v1833_v35 = vmul.f32 %v14818_v16, %v17596_v46  ;;  %17608 = vst [vmem:[#allocation71_spill] sm:$0xff] %v14824_v1 }
 0x3ff   : > { %v3096_v30 = vadd.f32 %v3066_v22, %v3000_v23  ;;  %v1584_v6 = vadd.f32 %v1552_v33, %v1516_v9  ;;  %v1728_v39 = vmul.f32 %v14826_v27, %v14760_v11  ;;  %v1936_v22 = vmul.f32 %v14830_v31, %v14725_v15  ;;  %v14840_v33 = vpop.f32.mrb[22].mxu1 }
 0x400   : > { %v1938_v2 = vmul.f32 %v14830_v31, %v17603_v38  ;;  %v1310_v53 = vadd.f32 %v1238_v26, %v1147_v10  ;;  %v1486_v4 = vsel %vm860_vm3, %v1454_v32, 0.0  ;;  %v1863_v9 = vsel %vm697_vm2, %v1831_v43, 0.0  ;;  %17610 = vst [vmem:[#allocation42_spill] sm:$0xff] %v14840_v33  ;;  %v17611_v10 = vld [vmem:[#allocation54_spill] sm:$0xff]  ;;  %v14858_v43 = vld [vmem:[#allocation7 + $0xf] ss:$0 sm:$0xff] }
 0x401   : > { %v3192_v23 = vadd.f32 %v3162_v41, %v3096_v30  ;;  %v1688_v1 = vadd.f32 %v1624_v57, %v1584_v6  ;;  %v1895_v44 = vadd.f32 %v1863_v9, %v14545_v56  ;;  %v1968_v40 = vsel %vm860_vm3, %v1936_v22, 0.0  ;;  %v14862_v9 = vld [vmem:[#allocation7 + $0x10] ss:$0 sm:$0xff]  ;;  %v14903_v38 = vld [vmem:[#allocation7 + $0x16] ss:$0 sm:$0xff] }
 0x402   : > { %v2037_v41 = vmul.f32 %v14845_v8, %v14662_v3  ;;  %v1414_v26 = vadd.f32 %v1382_v62, %v1310_v53  ;;  %v14852_v32 = vmul.f32 %v14826_v27, %v17611_v10  ;;  %v1865_v6 = vsel %vm697_vm2, %v1833_v35, 0.0  ;;  %v17612_v62 = vld [vmem:[#allocation105_spill] sm:$0xff]  ;;  %v14868_v35 = vld [vmem:[#allocation7 + $0xd] ss:$0 sm:$0xff]  ;;  %v17694_v36 = vld [vmem:[#allocation72_spill] sm:$0xff] }
 0x403   : > { %8763 = vmatmul.mubr.msk.f32.gmra.mrb[12].mxu0 %vm3220_vm7, %v3192_v23  ;;  %v1970_v56 = vsel %vm860_vm3, %v1938_v2, 0.0  ;;  %v1792_v57 = vadd.f32 %v1728_v39, %v1688_v1  ;;  %v2000_v30 = vadd.f32 %v1968_v40, %v1895_v44  ;;  %v2312_v22 = vmul.f32 %v14858_v43, %v14444_v45  ;;  %v14872_v40 = vld [vmem:[#allocation7 + $0x11] ss:$0 sm:$0xff]  ;;  %v17613_v44 = vld [vmem:[#allocation61_spill] sm:$0xff]  ;;  %v14876_v45 = vpop.f32.mrb[23].mxu1 }
 0x404   : > { %v2412_v23 = vmul.f32 %v14862_v9, %v17612_v62  ;;  %v1518_v53 = vadd.f32 %v1486_v4, %v1414_v26  ;;  %v2039_v33 = vmul.f32 %v14845_v8, %v14804_v48  ;;  %v2110_v39 = vmul.f32 %v14868_v35, %v14738_v17  ;;  %17614 = vst [vmem:[#allocation94_spill] sm:$0xff] %v14876_v45  ;;  %v14887_v48 = vld [vmem:[#allocation7 + $0x15] ss:$0 sm:$0xff] }
 0x405   : > { %v2512_v1 = vmul.f32 %v14872_v40, %v17613_v44  ;;  %v1897_v2 = vadd.f32 %v1865_v6, %v1792_v57  ;;  %v2069_v34 = vadd.f32 %v2037_v41, %v2000_v30  ;;  %v2343_v4 = vsel %vm697_vm2, %v2312_v22, 0.0  ;;  %v14891_v57 = vld [vmem:[#allocation7 + $0xe] ss:$0 sm:$0xff]  ;;  %v14895_v22 = vld [vmem:[#allocation7 + $0x12] ss:$0 sm:$0xff] }
 0x406   : > { %v2443_v26 = vsel %vm860_vm3, %v2412_v23, 0.0  ;;  %v1586_v62 = vadd.f32 %v1554_v51, %v1518_v53  ;;  %v2375_v10 = vadd.f32 %v2343_v4, %v17615_v47  ;;  %v2780_v18 = vmul.f32 %v14883_v14, %v14710_v61  ;;  %v17616_v51 = vld [vmem:[#allocation66_spill] sm:$0xff]  ;;  %v14899_v23 = vld [vmem:[#allocation7 + $0x13] ss:$0 sm:$0xff] }
 0x407   : > { %v2876_v6 = vmul.f32 %v14887_v48, %v14725_v15  ;;  %v2002_v41 = vadd.f32 %v1970_v56, %v1897_v2  ;;  %v2215_v30 = vmul.f32 %v14891_v57, %v14760_v11  ;;  %v2580_v47 = vmul.f32 %v14895_v22, %v17616_v51  ;;  %v17617_v53 = vld [vmem:[#allocation34_spill] sm:$0xff]  ;;  %v14907_v2 = vld [vmem:[#allocation7 + $0x17] ss:$0 sm:$0xff] }
 0x408   : > { %v2680_v44 = vmul.f32 %v14899_v23, %v17617_v53  ;;  %v2174_v4 = vadd.f32 %v2110_v39, %v2069_v34  ;;  %v2475_v45 = vadd.f32 %v2443_v26, %v2375_v10  ;;  %v2972_v56 = vmul.f32 %v14903_v38, %v14662_v3 }
 0x409   : > { %v3038_v46 = vmul.f32 %v14907_v2, %v14738_v17  ;;  %v14912_v24 = vadd.f32 %v14814_v52, %v1586_v62  ;;  %v2809_v51 = vsel %vm697_vm2, %v2780_v18, 0.0  ;;  %v2905_v34 = vsel %vm860_vm3, %v2876_v6, 0.0 }
 0x40a   : > { %v17618_v10 = vrot.slane %v14671_v55, 6  ;;  %v17619_v39 = vrot.slane %v14662_v3, 6  ;;  %v14926_v53 = vadd.f32 %v2039_v33, %v2002_v41  ;;  %v2543_v17 = vadd.f32 %v2512_v1, %v2475_v45 }
 0x40b   : > { %v17621_v62 = vrot.slane %v14671_v55, 7  ;;  %v17622_v18 = vrot.slane %v14662_v3, 7  ;;  %v17623_v33 = vrot.slane %v14662_v3, 1  ;;  %v17624_v1 = vrot.slane %v14671_v55, 1 }
 0x40c   : > { %v14924_v26 = vsel %vm632_vm0, %v17619_v39, %v17618_v10  ;;  %17620 = vst [vmem:[#allocation74_spill] sm:$0xff] %v14926_v53  ;;  %v955_v10 = vmul.f32 %v14750_v50, %v14671_v55  ;;  %v17625_v45 = vrot.slane %v14662_v3, 2  ;;  %v17626_v41 = vrot.slane %v14671_v55, 2  ;;  %v14994_v3 = vld [vmem:[%s9937_s11 + $0xa8] sm:$0xff] }
 0x40d   : > { %v686_v52 = vmul.f32 %v14567_v25, %v14924_v26  ;;  %v14936_v6 = vsel %vm795_vm1, %v17622_v18, %v17621_v62  ;;  %v14948_v25 = vsel %vm1022_vm4, %v17624_v1, %v17623_v33  ;;  %v1349_v18 = vmul.f32 %v14740_v42, %v14924_v26  ;;  %v14966_v1 = vld [vmem:[#allocation7 + $0x18] ss:$0 sm:$0xff] }
 0x40e   : > { %v849_v19 = vmul.f32 %v14579_v20, %v14936_v6  ;;  %v14956_v39 = vsel %vm1185_vm5, %v17626_v41, %v17625_v45  ;;  %v2643_v20 = vadd.f32 %v2580_v47, %v2543_v17  ;;  %v1076_v50 = vmul.f32 %v14768_v60, %v14948_v25  ;;  %v17628_v45 = vld [vmem:[#allocation75_spill] sm:$0xff] }
 0x40f   : > { %v1239_v62 = vmul.f32 %v14785_v37, %v14956_v39  ;;  %v14964_v33 = vadd.f32 %v2215_v30, %v2174_v4  ;;  %v3134_v53 = vmul.f32 %v14966_v1, %v14760_v11  ;;  %v1453_v17 = vmul.f32 %v14777_v63, %v14936_v6 }
 0x410   : > { %v921_v0 = vadd.f32 %v849_v19, %v686_v52  ;;  %v2743_v47 = vadd.f32 %v2680_v44, %v2643_v20  ;;  %v1118_v60 = vsel %vm1090_vm6, %v1076_v50, 0.0  ;;  %v1351_v37 = vmul.f32 %v14740_v42, %v17628_v45 }
 0x411   : > { %17627 = vst [vmem:[#allocation60_spill] sm:$0xff] %v14964_v33  ;;  %v1413_v30 = vadd.f32 %v1349_v18, %v14657_v7  ;;  %v1281_v41 = vsel %vm1253_vm8, %v1239_v62, 0.0  ;;  %v1553_v19 = vmul.f32 %v14791_v12, %v14671_v55  ;;  %v1625_v52 = vmul.f32 %v14808_v13, %v14948_v25  ;;  %v17629_v33 = vld [vmem:[#allocation84_spill] sm:$0xff] }
 0x412   : > { %v985_v4 = vadd.f32 %v955_v10, %v921_v0  ;;  %v2839_v44 = vadd.f32 %v2809_v51, %v2743_v47  ;;  %v1627_v50 = vmul.f32 %v14808_v13, %v17629_v33  ;;  %v1729_v42 = vmul.f32 %v14826_v27, %v14956_v39  ;;  %v17630_v7 = vld [vmem:[#allocation80_spill] sm:$0xff] }
 0x413   : > { %v1517_v20 = vadd.f32 %v1453_v17, %v1413_v30  ;;  %v1455_v0 = vmul.f32 %v14777_v63, %v17630_v7  ;;  %v1657_v10 = vsel %vm1090_vm6, %v1625_v52, 0.0  ;;  %v1832_v62 = vmul.f32 %v14818_v16, %v14924_v26  ;;  %v17631_v17 = vld [vmem:[#allocation88_spill] sm:$0xff] }
 0x414   : > { %v1148_v11 = vadd.f32 %v1118_v60, %v985_v4  ;;  %v2935_v18 = vadd.f32 %v2905_v34, %v2839_v44  ;;  %v1555_v51 = vmul.f32 %v14994_v3, %v14791_v12  ;;  %v1731_v47 = vmul.f32 %v14826_v27, %v17631_v17 }
 0x415   : > { %v1585_v13 = vadd.f32 %v1553_v19, %v1517_v20  ;;  %v1659_v63 = vsel %vm1090_vm6, %v1627_v50, 0.0  ;;  %v1761_v30 = vsel %vm1253_vm8, %v1729_v42, 0.0  ;;  %v1896_v4 = vadd.f32 %v1832_v62, %v14666_v5 }
 0x416   : > { %v1311_v60 = vadd.f32 %v1281_v41, %v1148_v11  ;;  %v3001_v52 = vadd.f32 %v2972_v56, %v2935_v18  ;;  %v1834_v44 = vmul.f32 %v14818_v16, %v17628_v45  ;;  %v1937_v12 = vmul.f32 %v14830_v31, %v14936_v6 }
 0x417   : > { %v1689_v34 = vadd.f32 %v1657_v10, %v1585_v13  ;;  %v1939_v27 = vmul.f32 %v14830_v31, %v17630_v7  ;;  %v2038_v11 = vmul.f32 %v14845_v8, %v14671_v55  ;;  %v2111_v41 = vmul.f32 %v14868_v35, %v14948_v25  ;;  %v17632_v31 = vld [vmem:[#allocation67_spill] sm:$0xff] }
 0x418   : > { %v1415_v19 = vadd.f32 %v1351_v37, %v1311_v60  ;;  %v3097_v20 = vadd.f32 %v3038_v46, %v3001_v52  ;;  %v2001_v56 = vadd.f32 %v1937_v12, %v1896_v4  ;;  %v2313_v50 = vmul.f32 %v14858_v43, %v14561_v54 }
 0x419   : > { %v1793_v5 = vadd.f32 %v1761_v30, %v1689_v34  ;;  %v2143_v10 = vsel %vm1090_vm6, %v2111_v41, 0.0  ;;  %v2216_v37 = vmul.f32 %v14891_v57, %v14956_v39  ;;  %v2413_v62 = vmul.f32 %v14862_v9, %v14577_v59 }
 0x41a   : > { %v1519_v42 = vadd.f32 %v1455_v0, %v1415_v19  ;;  %v3193_v18 = vadd.f32 %v3134_v53, %v3097_v20  ;;  %v2070_v60 = vadd.f32 %v2038_v11, %v2001_v56  ;;  %v2376_v46 = vadd.f32 %v2313_v50, %v17632_v31 }
 0x41b   : > { %v1898_v13 = vadd.f32 %v1834_v44, %v1793_v5  ;;  %v2513_v4 = vmul.f32 %v14872_v40, %v14412_v29  ;;  %v2581_v54 = vmul.f32 %v14895_v22, %v14591_v28  ;;  %v2681_v0 = vmul.f32 %v14899_v23, %v14603_v49 }
 0x41c   : > { %v1587_v30 = vadd.f32 %v1555_v51, %v1519_v42  ;;  %v15032_v52 = vadd.f32 %v14852_v32, %v14912_v24  ;;  %8765 = vmatprep.mubr.msk.f32.mxu0 %vm3220_vm7, %v3193_v18  ;;  %v1763_v59 = vsel %vm1253_vm8, %v1731_v47, 0.0  ;;  %v2175_v31 = vadd.f32 %v2143_v10, %v2070_v60  ;;  %v17635_v42 = vld [vmem:[#allocation93_spill] sm:$0xff] }
 0x41d   : > { %v2476_v53 = vadd.f32 %v2413_v62, %v2376_v46  ;;  %v15037_v34 = vadd.f32 %v1939_v27, %v1898_v13  ;;  %v2248_v29 = vsel %vm1253_vm8, %v2216_v37, 0.0  ;;  %v2612_v28 = vsel %vm1090_vm6, %v2581_v54, 0.0  ;;  %v17636_v62 = vld [vmem:[#allocation108_spill] sm:$0xff]  ;;  %v17637_v13 = vld [vmem:[#allocation101_spill] sm:$0xff]  ;;  %v17638_v46 = vld [vmem:[#allocation98_spill] sm:$0xff] }
 0x41e   : > { %v1691_v51 = vadd.f32 %v1659_v63, %v1587_v30  ;;  %v2712_v24 = vsel %vm1253_vm8, %v2681_v0, 0.0  ;;  %v2781_v32 = vmul.f32 %v14883_v14, %v14924_v26  ;;  %v3039_v47 = vmul.f32 %v14907_v2, %v14948_v25  ;;  %v17640_v0 = vld [vmem:[#allocation43_spill] sm:$0xff] }
 0x41f   : > { %v2544_v49 = vadd.f32 %v2513_v4, %v2476_v53  ;;  %v2877_v63 = vmul.f32 %v14887_v48, %v14936_v6  ;;  %v3135_v44 = vmul.f32 %v14966_v1, %v14956_v39  ;;  %v2314_v12 = vmul.f32 %v14858_v43, %v14710_v61  ;;  %v17639_v4 = vld [vmem:[#allocation36_spill] sm:$0xff] }
 0x420   : > { %v2414_v19 = vmul.f32 %v14862_v9, %v14725_v15  ;;  %v15057_v27 = vadd.f32 %v1763_v59, %v1691_v51  ;;  %v15059_v11 = vadd.f32 %v2248_v29, %v2175_v31  ;;  %v2973_v20 = vmul.f32 %v14903_v38, %v14671_v55  ;;  %v17641_v29 = vld [vmem:[#allocation68_spill] sm:$0xff] }
 0x421   : > { %v2644_v41 = vadd.f32 %v2612_v28, %v2544_v49  ;;  %v3068_v5 = vsel %vm1090_vm6, %v3039_v47, 0.0  ;;  %v2345_v56 = vsel %vm697_vm2, %v2314_v12, 0.0  ;;  %v2514_v15 = vmul.f32 %v14872_v40, %v17635_v42  ;;  %v17642_v49 = vld [vmem:[#allocation48_spill] sm:$0xff] }
 0x422   : > { %17633 = vst [vmem:[#allocation31_spill] sm:$0xff] %v15057_v27  ;;  %v2445_v61 = vsel %vm860_vm3, %v2414_v19, 0.0  ;;  %v3164_v37 = vsel %vm1253_vm8, %v3135_v44, 0.0  ;;  %v2377_v18 = vadd.f32 %v2345_v56, %v17636_v62  ;;  %v2582_v60 = vmul.f32 %v14895_v22, %v17637_v13  ;;  %v17643_v47 = vld [vmem:[#allocation52_spill] sm:$0xff]  ;;  %v17644_v56 = vld [vmem:[#allocation54_spill] sm:$0xff] }
 0x423   : > { %v2744_v10 = vadd.f32 %v2712_v24, %v2644_v41  ;;  %v2682_v30 = vmul.f32 %v14899_v23, %v17638_v46  ;;  %v2782_v54 = vmul.f32 %v14883_v14, %v17639_v4  ;;  %v2878_v59 = vmul.f32 %v14887_v48, %v17640_v0 }
 0x424   : > { %v2315_v31 = vmul.f32 %v14858_v43, %v14924_v26  ;;  %v2477_v51 = vadd.f32 %v2445_v61, %v2377_v18  ;;  %v2974_v28 = vmul.f32 %v14903_v38, %v17641_v29  ;;  %v3040_v24 = vmul.f32 %v14907_v2, %v17642_v49 }
 0x425   : > { %v2840_v53 = vadd.f32 %v2781_v32, %v2744_v10  ;;  %v2415_v12 = vmul.f32 %v14862_v9, %v14936_v6  ;;  %v2515_v19 = vmul.f32 %v14872_v40, %v14671_v55  ;;  %v2583_v41 = vmul.f32 %v14895_v22, %v14948_v25 }
 0x426   : > { %v2378_v44 = vadd.f32 %v2315_v31, %v17643_v47  ;;  %v2545_v32 = vadd.f32 %v2514_v15, %v2477_v51  ;;  %v3136_v61 = vmul.f32 %v14966_v1, %v17644_v56  ;;  %v2683_v42 = vmul.f32 %v14899_v23, %v14956_v39 }
 0x427   : > { %v2936_v26 = vadd.f32 %v2877_v63, %v2840_v53  ;;  %v2811_v10 = vsel %vm697_vm2, %v2782_v54, 0.0  ;;  %v2907_v6 = vsel %vm860_vm3, %v2878_v59, 0.0  ;;  %v2783_v55 = vmul.f32 %v14883_v14, %v17628_v45 }
 0x428   : > { %v2478_v62 = vadd.f32 %v2415_v12, %v2378_v44  ;;  %v2645_v25 = vadd.f32 %v2582_v60, %v2545_v32  ;;  %v2614_v63 = vsel %vm1090_vm6, %v2583_v41, 0.0  ;;  %v3041_v15 = vmul.f32 %v14907_v2, %v17629_v33  ;;  %v17646_v32 = vld [vmem:[#allocation37_spill] sm:$0xff] }
 0x429   : > { %v3002_v18 = vadd.f32 %v2973_v20, %v2936_v26  ;;  %v3137_v39 = vmul.f32 %v14966_v1, %v17631_v17  ;;  %v2316_v46 = vmul.f32 %v14858_v43, %v17639_v4  ;;  %v2416_v54 = vmul.f32 %v14862_v9, %v17640_v0 }
 0x42a   : > { %v2546_v13 = vadd.f32 %v2515_v19, %v2478_v62  ;;  %v2745_v31 = vadd.f32 %v2682_v30, %v2645_v25  ;;  %v2714_v20 = vsel %vm1253_vm8, %v2683_v42, 0.0  ;;  %v2879_v60 = vmul.f32 %v14887_v48, %v17630_v7  ;;  %v17645_v30 = vld [vmem:[#allocation60_spill] sm:$0xff]  ;;  %v15134_v62 = vld [vmem:[#allocation10] ss:$0 sm:$0xff] }
 0x42b   : > { %v3098_v59 = vadd.f32 %v3068_v5, %v3002_v18  ;;  %v2975_v51 = vmul.f32 %v14994_v3, %v14903_v38  ;;  %v2347_v47 = vsel %vm697_vm2, %v2316_v46, 0.0  ;;  %v2447_v4 = vsel %vm860_vm3, %v2416_v54, 0.0  ;;  %v17648_v46 = vld [vmem:[#allocation49_spill] sm:$0xff] }
 0x42c   : > { %v2646_v53 = vadd.f32 %v2614_v63, %v2546_v13  ;;  %v2841_v5 = vadd.f32 %v2811_v10, %v2745_v31  ;;  %v2379_v0 = vadd.f32 %v2347_v47, %v17645_v30  ;;  %v2516_v12 = vmul.f32 %v14872_v40, %v17641_v29  ;;  %v17647_v63 = vld [vmem:[#allocation44_spill] sm:$0xff] }
 0x42d   : > { %v3194_v44 = vadd.f32 %v3164_v37, %v3098_v59  ;;  %v3070_v41 = vsel %vm1090_vm6, %v3041_v15, 0.0  ;;  %v3166_v26 = vsel %vm1253_vm8, %v3137_v39, 0.0  ;;  %v2784_v42 = vmul.f32 %v14883_v14, %v17646_v32  ;;  %v15144_v13 = vld [vmem:[%s9937_s11 + $0xb0] sm:$0xff] }
 0x42e   : > { %v2746_v19 = vadd.f32 %v2714_v20, %v2646_v53  ;;  %v2937_v37 = vadd.f32 %v2907_v6, %v2841_v5  ;;  %v2479_v10 = vadd.f32 %v2447_v4, %v2379_v0  ;;  %v2584_v18 = vmul.f32 %v14895_v22, %v17642_v49  ;;  %v17649_v20 = vld [vmem:[#allocation79_spill] sm:$0xff] }
 0x42f   : > { %8766 = vmatmul.mubr.msk.f32.gmra.mrb[14].mxu0 %vm3220_vm7, %v3194_v44  ;;  %v2684_v29 = vmul.f32 %v14899_v23, %v17644_v56  ;;  %v2880_v15 = vmul.f32 %v14887_v48, %v17647_v63  ;;  %v2976_v39 = vmul.f32 %v15144_v13, %v14903_v38  ;;  %v3042_v54 = vmul.f32 %v14907_v2, %v17648_v46 }
 0x430   : > { %v2842_v25 = vadd.f32 %v2783_v55, %v2746_v19  ;;  %v3003_v6 = vadd.f32 %v2974_v28, %v2937_v37  ;;  %v2547_v59 = vadd.f32 %v2516_v12, %v2479_v10  ;;  %v2813_v31 = vsel %vm697_vm2, %v2784_v42, 0.0  ;;  %v17650_v37 = vld [vmem:[#allocation55_spill] sm:$0xff] }
 0x431   : > { %v3509_v53 = vadd.f32 %v17649_v20, %v15134_v62  ;;  %v2317_v47 = vmul.f32 %v14858_v43, %v17628_v45  ;;  %v2417_v4 = vmul.f32 %v14862_v9, %v17630_v7  ;;  %v2585_v28 = vmul.f32 %v14895_v22, %v17629_v33  ;;  %v17654_v20 = vld [vmem:[#allocation96_spill] sm:$0xff] }
 0x432   : > { %v2938_v55 = vadd.f32 %v2879_v60, %v2842_v25  ;;  %v3099_v44 = vadd.f32 %v3040_v24, %v3003_v6  ;;  %v2647_v5 = vadd.f32 %v2584_v18, %v2547_v59  ;;  %v2909_v12 = vsel %vm860_vm3, %v2880_v15, 0.0  ;;  %v17651_v18 = vld [vmem:[#allocation76_spill] sm:$0xff]  ;;  %v17652_v25 = vld [vmem:[#allocation85_spill] sm:$0xff] }
 0x433   : > { %v3567_v30 = vmax.f32 %v3509_v53, 0.0  ;;  %v2380_v19 = vadd.f32 %v2317_v47, %v15059_v11  ;;  %v2517_v60 = vmul.f32 %v14994_v3, %v14872_v40  ;;  %v3138_v7 = vmul.f32 %v14966_v1, %v17650_v37  ;;  %v17653_v6 = vld [vmem:[#allocation89_spill] sm:$0xff] }
 0x434   : > { %v3004_v0 = vadd.f32 %v2975_v51, %v2938_v55  ;;  %v3195_v42 = vadd.f32 %v3136_v61, %v3099_v44  ;;  %v2747_v45 = vadd.f32 %v2684_v29, %v2647_v5  ;;  %v2685_v24 = vmul.f32 %v14899_v23, %v17631_v17  ;;  %v17655_v5 = vld [vmem:[#allocation81_spill] sm:$0xff] }
 0x435   : > { %7534 = vst.msk [vmem:[%s15169_s25 + $0xc8] sm:$0xff] %vm7508_vm11, %v3567_v30  ;;  %v2480_v10 = vadd.f32 %v2417_v4, %v2380_v19  ;;  %v2616_v11 = vsel %vm1090_vm6, %v2585_v28, 0.0  ;;  %v2785_v61 = vmul.f32 %v14883_v14, %v17651_v18  ;;  %v3043_v15 = vmul.f32 %v14907_v2, %v17652_v25 }
 0x436   : > { %v3100_v51 = vadd.f32 %v3070_v41, %v3004_v0  ;;  %8768 = vmatprep.mubr.msk.f32.mxu0 %vm3220_vm7, %v3195_v42  ;;  %v2843_v29 = vadd.f32 %v2813_v31, %v2747_v45  ;;  %v3139_v59 = vmul.f32 %v14966_v1, %v17653_v6  ;;  %v3504_v41 = vadd.f32 %v15134_v62, %v17654_v20 }
 0x437   : > { %v2548_v55 = vadd.f32 %v2517_v60, %v2480_v10  ;;  %v2112_v47 = vmul.f32 %v14868_v35, %v17642_v49  ;;  %v2217_v4 = vmul.f32 %v14891_v57, %v17644_v56  ;;  %v2716_v44 = vsel %vm1253_vm8, %v2685_v24, 0.0 }
 0x438   : > { %v3196_v53 = vadd.f32 %v3166_v26, %v3100_v51  ;;  %v2939_v31 = vadd.f32 %v2909_v12, %v2843_v29  ;;  %v2881_v30 = vmul.f32 %v14887_v48, %v17655_v5  ;;  %v3566_v28 = vmax.f32 %v3504_v41, 0.0  ;;  %v17656_v26 = vld [vmem:[#allocation74_spill] sm:$0xff]  ;;  %v15201_v12 = vld [vmem:[%s9937_s11 + $0xb8] sm:$0xff]  ;;  %v17658_v41 = vld [vmem:[#allocation39_spill] sm:$0xff] }
 0x439   : > { %v2648_v0 = vadd.f32 %v2616_v11, %v2548_v55  ;;  %v2176_v19 = vadd.f32 %v2112_v47, %v17656_v26  ;;  %v2318_v49 = vmul.f32 %v14858_v43, %v17646_v32  ;;  %v2418_v60 = vmul.f32 %v14862_v9, %v17647_v63  ;;  %17657 = vst [vmem:[#allocation58_spill] sm:$0xff] %v15201_v12 }
 0x43a   : > { %8769 = vmatmul.mubr.msk.f32.gmra.mrb[16].mxu0 %vm3220_vm7, %v3196_v53  ;;  %v3005_v56 = vadd.f32 %v2976_v39, %v2939_v31  ;;  %v2977_v42 = vmul.f32 %v15201_v12, %v14903_v38  ;;  %v3072_v45 = vsel %vm1090_vm6, %v3043_v15, 0.0  ;;  %v3168_v24 = vsel %vm1253_vm8, %v3139_v59, 0.0  ;;  %7533 = vst.msk [vmem:[%s15169_s25 + $0xc0] sm:$0xff] %vm7508_vm11, %v3566_v28  ;;  %v9076_v28 = vld [vmem:[%s9937_s11 + $0xc0] sm:$0xff] }
 0x43b   : > { %v2748_v51 = vadd.f32 %v2716_v44, %v2648_v0  ;;  %v2281_v10 = vadd.f32 %v2217_v4, %v2176_v19  ;;  %v2349_v11 = vsel %vm697_vm2, %v2318_v49, 0.0  ;;  %v2518_v39 = vmul.f32 %v15144_v13, %v14872_v40  ;;  %v17659_v4 = vld [vmem:[#allocation45_spill] sm:$0xff]  ;;  %v17660_v0 = vld [vmem:[#allocation50_spill] sm:$0xff] }
 0x43c   : > { %v3101_v29 = vadd.f32 %v3042_v54, %v3005_v56  ;;  %v2449_v20 = vsel %vm860_vm3, %v2418_v60, 0.0  ;;  %v2586_v15 = vmul.f32 %v14895_v22, %v17648_v46  ;;  %v2786_v59 = vmul.f32 %v14883_v14, %v17658_v41  ;;  %v17661_v19 = vld [vmem:[#allocation62_spill] sm:$0xff] }
 0x43d   : > { %v2844_v53 = vadd.f32 %v2785_v61, %v2748_v51  ;;  %v2381_v55 = vadd.f32 %v2349_v11, %v2281_v10  ;;  %v2686_v47 = vmul.f32 %v14899_v23, %v17650_v37  ;;  %v2882_v31 = vmul.f32 %v14887_v48, %v17659_v4  ;;  %v17662_v10 = vld [vmem:[#allocation56_spill] sm:$0xff] }
 0x43e   : > { %v3197_v44 = vadd.f32 %v3138_v7, %v3101_v29  ;;  %v2978_v54 = vmul.f32 %v9076_v28, %v14903_v38  ;;  %v15229_v26 = vmul.f32 %v14907_v2, %v17660_v0  ;;  %v3519_v49 = vadd.f32 %v17661_v19, %v15134_v62 }
 0x43f   : > { %v2940_v61 = vadd.f32 %v2881_v30, %v2844_v53  ;;  %v2481_v60 = vadd.f32 %v2449_v20, %v2381_v55  ;;  %v2040_v56 = vmul.f32 %v14994_v3, %v14845_v8  ;;  %v2113_v51 = vmul.f32 %v14868_v35, %v17629_v33 }
 0x440   : > { %8771 = vmatprep.mubr.msk.f32.mxu0 %vm3220_vm7, %v3197_v44  ;;  %v2815_v7 = vsel %vm697_vm2, %v2786_v59, 0.0  ;;  %v15242_v11 = vmul.f32 %v14966_v1, %v17662_v10  ;;  %v3569_v29 = vmax.f32 %v3519_v49, 0.0  ;;  %v2218_v30 = vmul.f32 %v14891_v57, %v17631_v17 }
 0x441   : > { %v3006_v20 = vadd.f32 %v2977_v42, %v2940_v61  ;;  %v2549_v53 = vadd.f32 %v2518_v39, %v2481_v60  ;;  %v2072_v3 = vadd.f32 %v2040_v56, %v15037_v34  ;;  %v2145_v33 = vsel %vm1090_vm6, %v2113_v51, 0.0  ;;  %v17663_v60 = vld [vmem:[#allocation77_spill] sm:$0xff] }
 0x442   : > { %v2911_v55 = vsel %vm860_vm3, %v2882_v31, 0.0  ;;  %7536 = vst.msk [vmem:[%s15169_s25 + $0xd8] sm:$0xff] %vm7508_vm11, %v3569_v29  ;;  %v2250_v59 = vsel %vm1253_vm8, %v2218_v30, 0.0  ;;  %v2319_v44 = vmul.f32 %v14858_v43, %v17651_v18  ;;  %v2587_v17 = vmul.f32 %v14895_v22, %v17652_v25  ;;  %v17664_v29 = vld [vmem:[#allocation86_spill] sm:$0xff] }
 0x443   : > { %v3102_v42 = vadd.f32 %v3072_v45, %v3006_v20  ;;  %v2649_v39 = vadd.f32 %v2586_v15, %v2549_v53  ;;  %v2177_v34 = vadd.f32 %v2145_v33, %v2072_v3  ;;  %v2687_v19 = vmul.f32 %v14899_v23, %v17653_v6  ;;  %v17665_v20 = vld [vmem:[#allocation90_spill] sm:$0xff]  ;;  %v17666_v3 = vld [vmem:[#allocation99_spill] sm:$0xff] }
 0x444   : > { %v2419_v31 = vmul.f32 %v14862_v9, %v17655_v5  ;;  %v2519_v49 = vmul.f32 %v15201_v12, %v14872_v40  ;;  %v2618_v61 = vsel %vm1090_vm6, %v2587_v17, 0.0  ;;  %v2787_v56 = vmul.f32 %v14883_v14, %v17663_v60  ;;  %v17667_v17 = vld [vmem:[#allocation70_spill] sm:$0xff] }
 0x445   : > { %v3198_v51 = vadd.f32 %v3168_v24, %v3102_v42  ;;  %v2749_v45 = vadd.f32 %v2686_v47, %v2649_v39  ;;  %v2282_v15 = vadd.f32 %v2250_v59, %v2177_v34  ;;  %v3045_v30 = vmul.f32 %v14907_v2, %v17664_v29  ;;  %v17668_v42 = vld [vmem:[#allocation82_spill] sm:$0xff] }
 0x446   : > { %v3141_v53 = vmul.f32 %v14966_v1, %v17665_v20  ;;  %v3514_v33 = vadd.f32 %v15134_v62, %v17666_v3  ;;  %v1835_v12 = vmul.f32 %v14818_v16, %v17646_v32  ;;  %v1940_v27 = vmul.f32 %v17667_v17, %v17647_v63  ;;  %v9077_v34 = vld [vmem:[%s9937_s11 + $0xc8] sm:$0xff] }
 0x447   : > { %8772 = vmatmul.mubr.msk.f32.gmra.mrb[18].mxu0 %vm3220_vm7, %v3198_v51  ;;  %v2845_v24 = vadd.f32 %v2815_v7, %v2749_v45  ;;  %v2382_v47 = vadd.f32 %v2319_v44, %v2282_v15  ;;  %v2718_v59 = vsel %vm1253_vm8, %v2687_v19, 0.0  ;;  %v2883_v39 = vmul.f32 %v14887_v48, %v17668_v42 }
 0x448   : > { %v2979_v3 = vmul.f32 %v9077_v34, %v14903_v38  ;;  %v3568_v20 = vmax.f32 %v3514_v33, 0.0  ;;  %v1867_v32 = vsel %vm697_vm2, %v1835_v12, 0.0  ;;  %v1972_v63 = vsel %vm860_vm3, %v1940_v27, 0.0 }
 0x449   : > { %v2941_v51 = vadd.f32 %v2911_v55, %v2845_v24  ;;  %v2482_v29 = vadd.f32 %v2419_v31, %v2382_v47  ;;  %v1899_v7 = vadd.f32 %v1867_v32, %v15032_v52  ;;  %v2041_v44 = vmul.f32 %v15144_v13, %v14845_v8  ;;  %v9078_v47 = vld [vmem:[%s9937_s11 + $0xd0] sm:$0xff] }
 0x44a   : > { %v3074_v19 = vsel %vm1090_vm6, %v3045_v30, 0.0  ;;  %v15297_v45 = vsel %vm1253_vm8, %v3141_v53, 0.0  ;;  %7535 = vst.msk [vmem:[%s15169_s25 + $0xd0] sm:$0xff] %vm7508_vm11, %v3568_v20  ;;  %v2320_v12 = vmul.f32 %v14858_v43, %v17658_v41  ;;  %v2420_v27 = vmul.f32 %v14862_v9, %v17659_v4  ;;  %v17669_v53 = vld [vmem:[#allocation40_spill] sm:$0xff] }
 0x44b   : > { %v3007_v55 = vadd.f32 %v2978_v54, %v2941_v51  ;;  %v2550_v52 = vadd.f32 %v2519_v49, %v2482_v29  ;;  %v2004_v31 = vadd.f32 %v1972_v63, %v1899_v7  ;;  %v2114_v13 = vmul.f32 %v14868_v35, %v17648_v46  ;;  %v17671_v63 = vld [vmem:[#allocation51_spill] sm:$0xff] }
 0x44c   : > { %v2219_v15 = vmul.f32 %v14891_v57, %v17650_v37  ;;  %v2520_v30 = vmul.f32 %v9076_v28, %v14872_v40  ;;  %v2588_v20 = vmul.f32 %v14895_v22, %v17660_v0  ;;  %v2788_v41 = vmul.f32 %v14883_v14, %v17669_v53  ;;  %v17670_v0 = vld [vmem:[#allocation46_spill] sm:$0xff] }
 0x44d   : > { %v3103_v4 = vadd.f32 %v15229_v26, %v3007_v55  ;;  %v2650_v54 = vadd.f32 %v2618_v61, %v2550_v52  ;;  %v2073_v49 = vadd.f32 %v2041_v44, %v2004_v31  ;;  %v2351_v29 = vsel %vm697_vm2, %v2320_v12, 0.0  ;;  %v17673_v55 = vld [vmem:[#allocation57_spill] sm:$0xff] }
 0x44e   : > { %v2451_v46 = vsel %vm860_vm3, %v2420_v27, 0.0  ;;  %v2688_v37 = vmul.f32 %v14899_v23, %v17662_v10  ;;  %v15323_v28 = vsel %vm697_vm2, %v2788_v41, 0.0  ;;  %v2884_v33 = vmul.f32 %v14887_v48, %v17670_v0  ;;  %v17672_v10 = vld [vmem:[#allocation102_spill] sm:$0xff] }
 0x44f   : > { %v3199_v26 = vadd.f32 %v15242_v11, %v3103_v4  ;;  %v2750_v61 = vadd.f32 %v2718_v59, %v2650_v54  ;;  %v2178_v24 = vadd.f32 %v2114_v13, %v2073_v49  ;;  %v15330_v32 = vmul.f32 %v9078_v47, %v14903_v38  ;;  %v17674_v13 = vld [vmem:[#allocation31_spill] sm:$0xff]  ;;  %v17677_v41 = vld [vmem:[#allocation90_spill] sm:$0xff] }
 0x450   : > { %v15334_v51 = vmul.f32 %v14907_v2, %v17671_v63  ;;  %v3529_v21 = vadd.f32 %v17672_v10, %v15134_v62  ;;  %v1836_v7 = vmul.f32 %v14818_v16, %v17651_v18  ;;  %v1941_v11 = vmul.f32 %v17667_v17, %v17655_v5  ;;  %v17675_v18 = vld [vmem:[#allocation58_spill] sm:$0xff]  ;;  %v17684_v63 = vld [vmem:[#allocation91_spill] sm:$0xff] }
 0x451   : > { %8774 = vmatprep.mubr.msk.f32.mxu0 %vm3220_vm7, %v3199_v26  ;;  %v2846_v59 = vadd.f32 %v2787_v56, %v2750_v61  ;;  %v2283_v44 = vadd.f32 %v2219_v15, %v2178_v24  ;;  %v2115_v12 = vmul.f32 %v14868_v35, %v17652_v25  ;;  %v2220_v27 = vmul.f32 %v14891_v57, %v17653_v6  ;;  %v17676_v6 = vld [vmem:[#allocation86_spill] sm:$0xff]  ;;  %v17682_v26 = vld [vmem:[#allocation64_spill] sm:$0xff]  ;;  %v17683_v24 = vld [vmem:[#allocation87_spill] sm:$0xff] }
 0x452   : > { %v15349_v52 = vmul.f32 %v14966_v1, %v17673_v55  ;;  %v3571_v31 = vmax.f32 %v3529_v21, 0.0  ;;  %v1900_v16 = vadd.f32 %v1836_v7, %v17674_v13  ;;  %v2042_v5 = vmul.f32 %v17675_v18, %v14845_v8  ;;  %v17678_v49 = vld [vmem:[#allocation78_spill] sm:$0xff]  ;;  %v17687_v55 = vld [vmem:[#allocation35_spill] sm:$0xff]  ;;  %v17689_v13 = vld [vmem:[#allocation92_spill] sm:$0xff] }
 0x453   : > { %v2942_v17 = vadd.f32 %v2883_v39, %v2846_v59  ;;  %v2383_v53 = vadd.f32 %v2351_v29, %v2283_v44  ;;  %v2913_v56 = vsel %vm860_vm3, %v2884_v33, 0.0  ;;  %v2321_v35 = vmul.f32 %v14858_v43, %v17663_v60  ;;  %v17680_v33 = vld [vmem:[#allocation65_spill] sm:$0xff]  ;;  %v17685_v44 = vld [vmem:[#allocation95_spill] sm:$0xff] }
 0x454   : > { %7538 = vst.msk [vmem:[%s15169_s25 + $0xe8] sm:$0xff] %vm7508_vm11, %v3571_v31  ;;  %v2005_v57 = vadd.f32 %v1941_v11, %v1900_v16  ;;  %v2421_v25 = vmul.f32 %v14862_v9, %v17668_v42  ;;  %v2589_v15 = vmul.f32 %v14895_v22, %v17676_v6  ;;  %v2689_v8 = vmul.f32 %v14899_v23, %v17677_v41  ;;  %v17679_v42 = vld [vmem:[#allocation83_spill] sm:$0xff]  ;;  %v17690_v18 = vld [vmem:[#allocation69_spill] sm:$0xff] }
 0x455   : > { %v3008_v39 = vadd.f32 %v2979_v3, %v2942_v17  ;;  %v2483_v4 = vadd.f32 %v2451_v46, %v2383_v53  ;;  %v2147_v50 = vsel %vm1090_vm6, %v2115_v12, 0.0  ;;  %v2252_v43 = vsel %vm1253_vm8, %v2220_v27, 0.0  ;;  %v17686_v27 = vld [vmem:[#allocation41_spill] sm:$0xff] }
 0x456   : > { %v2074_v60 = vadd.f32 %v2042_v5, %v2005_v57  ;;  %v2521_v54 = vmul.f32 %v9077_v34, %v14872_v40  ;;  %v15373_v9 = vmul.f32 %v14883_v14, %v17678_v49  ;;  %v15377_v22 = vmul.f32 %v14887_v48, %v17679_v42  ;;  %v17681_v34 = vld [vmem:[#allocation106_spill] sm:$0xff]  ;;  %v8635_v48 = vld [vmem:[#allocation14] ss:$0 sm:$0xff]  ;;  %v9079_v53 = vld [vmem:[%s9937_s11 + $0xd8] sm:$0xff] }
 0x457   : > { %v3104_v23 = vadd.f32 %v3074_v19, %v3008_v39  ;;  %v2551_v3 = vadd.f32 %v2520_v30, %v2483_v4  ;;  %v2620_v29 = vsel %vm1090_vm6, %v2589_v15, 0.0  ;;  %v2720_v46 = vsel %vm1253_vm8, %v2689_v8, 0.0 }
 0x458   : > { %v2179_v0 = vadd.f32 %v2147_v50, %v2074_v60  ;;  %v3524_v40 = vadd.f32 %v15134_v62, %v17680_v33  ;;  %v3539_v14 = vadd.f32 %v17681_v34, %v15134_v62  ;;  %v3534_v61 = vadd.f32 %v15134_v62, %v17682_v26  ;;  %v17691_v50 = vld [vmem:[#allocation97_spill] sm:$0xff]  ;;  %v17696_v26 = vld [vmem:[#allocation107_spill] sm:$0xff] }
 0x459   : > { %v3200_v19 = vadd.f32 %v15297_v45, %v3104_v23  ;;  %v2651_v30 = vadd.f32 %v2588_v20, %v2551_v3  ;;  %v3047_v47 = vmul.f32 %v14907_v2, %v17683_v24  ;;  %v3143_v10 = vmul.f32 %v14966_v1, %v17684_v63  ;;  %v17688_v2 = vld [vmem:[#allocation100_spill] sm:$0xff]  ;;  %v17692_v60 = vld [vmem:[#allocation33_spill] sm:$0xff] }
 0x45a   : > { %v2284_v21 = vadd.f32 %v2252_v43, %v2179_v0  ;;  %v3570_v7 = vmax.f32 %v3524_v40, 0.0  ;;  %v3573_v11 = vmax.f32 %v3539_v14, 0.0  ;;  %v3572_v59 = vmax.f32 %v3534_v61, 0.0  ;;  %v17695_v14 = vld [vmem:[#allocation30_spill] sm:$0xff] }
 0x45b   : > { %8775 = vmatmul.mubr.msk.f32.gmra.mrb[20].mxu0 %vm3220_vm7, %v3200_v19  ;;  %v2751_v62 = vadd.f32 %v2688_v37, %v2651_v30  ;;  %v3948_v12 = vadd.f32 %v17685_v44, %v8635_v48  ;;  %v3943_v45 = vadd.f32 %v8635_v48, %v17686_v27  ;;  %v3958_v20 = vadd.f32 %v17687_v55, %v8635_v48  ;;  %v15409_v37 = vld [vmem:[#allocation19] ss:$0 sm:$0xff] }
 0x45c   : > { %v2384_v31 = vadd.f32 %v2321_v35, %v2284_v21  ;;  %7537 = vst.msk [vmem:[%s15169_s25 + $0xe0] sm:$0xff] %vm7508_vm11, %v3570_v7  ;;  %7540 = vst.msk [vmem:[%s15169_s25 + $0xf8] sm:$0xff] %vm7508_vm11, %v3573_v11  ;;  %v3953_v1 = vadd.f32 %v8635_v48, %v17688_v2  ;;  %v3968_v16 = vadd.f32 %v17689_v13, %v8635_v48  ;;  %v3076_v57 = vsel %vm1090_vm6, %v3047_v47, 0.0  ;;  %v17699_v47 = vld [vmem:[#allocation71_spill] sm:$0xff] }
 0x45d   : > { %7539 = vst.msk [vmem:[%s15169_s25 + $0xf0] sm:$0xff] %vm7508_vm11, %v3572_v59  ;;  %v15407_v5 = vadd.f32 %v8635_v48, %v17690_v18  ;;  %v2847_v17 = vadd.f32 %v15323_v28, %v2751_v62  ;;  %v2981_v35 = vmul.f32 %v9079_v53, %v14903_v38  ;;  %v15418_v6 = vsel %vm1253_vm8, %v3143_v10, 0.0  ;;  %v17693_v38 = vld [vmem:[#allocation104_spill] sm:$0xff] }
 0x45e   : > { %v2484_v15 = vadd.f32 %v2421_v25, %v2384_v31  ;;  %v3982_v41 = vmax.f32 %v3948_v12, 0.0  ;;  %v3981_v8 = vmax.f32 %v3943_v45, 0.0  ;;  %v3984_v39 = vmax.f32 %v3958_v20, 0.0 }
 0x45f   : > { %v2943_v4 = vadd.f32 %v2913_v56, %v2847_v17  ;;  %v15421_v43 = vadd.f32 %v17691_v50, %v8635_v48  ;;  %v15424_v28 = vadd.f32 %v8635_v48, %v17692_v60  ;;  %v4780_v49 = vadd.f32 %v17693_v38, %v15409_v37 }
 0x460   : > { %v2552_v58 = vadd.f32 %v2521_v54, %v2484_v15  ;;  %v3983_v42 = vmax.f32 %v3953_v1, 0.0  ;;  %v3986_v23 = vmax.f32 %v3968_v16, 0.0  ;;  %v4775_v3 = vadd.f32 %v15409_v37, %v17694_v36  ;;  %v17697_v54 = vld [vmem:[#allocation109_spill] sm:$0xff] }
 0x461   : > { %v3009_v25 = vadd.f32 %v15330_v32, %v2943_v4  ;;  %v3985_v0 = vmax.f32 %v15407_v5, 0.0  ;;  %v3988_v56 = vmax.f32 %v15421_v43, 0.0  ;;  %v4814_v33 = vmax.f32 %v4780_v49, 0.0  ;;  %v17698_v32 = vld [vmem:[#allocation47_spill] sm:$0xff] }
 0x462   : > { %v2652_v40 = vadd.f32 %v2620_v29, %v2552_v58  ;;  %v4813_v34 = vmax.f32 %v4775_v3, 0.0  ;;  %vm4862_vm12 = vcmp.eq.s32.totalorder %v17695_v14, 7  ;;  %v4790_v61 = vadd.f32 %v17696_v26, %v15409_v37 }
 0x463   : > { %v4785_v48 = vadd.f32 %v15409_v37, %v17697_v54  ;;  %v3105_v19 = vadd.f32 %v15334_v51, %v3009_v25  ;;  %v4822_v30 = vadd.f32 %v4814_v33, %v3982_v41  ;;  %vm4861_vm13 = vcmp.eq.s32.totalorder %v17695_v14, 0 }
 0x464   : > { %v4800_v24 = vadd.f32 %v17698_v32, %v15409_v37  ;;  %v15444_v29 = vadd.f32 %v15409_v37, %v17699_v47  ;;  %v2752_v63 = vadd.f32 %v2720_v46, %v2652_v40  ;;  %v4821_v10 = vadd.f32 %v4813_v34, %v3981_v8  ;;  %v17700_v46 = vld [vmem:[#allocation42_spill] sm:$0xff] }
 0x465   : > { %v4816_v21 = vmax.f32 %v4790_v61, 0.0  ;;  %v4815_v7 = vmax.f32 %v4785_v48, 0.0  ;;  %v3201_v11 = vadd.f32 %v15349_v52, %v3105_v19  ;;  %v4830_v59 = vmul.f32 0.25, %v4822_v30 }
 0x466   : > { %v4837_v62 = vmul.f32 0.75, %v4822_v30  ;;  %v4818_v44 = vmax.f32 %v4800_v24, 0.0  ;;  %v2848_v51 = vadd.f32 %v15373_v9, %v2752_v63  ;;  %v4829_v12 = vmul.f32 0.25, %v4821_v10 }
 0x467   : > { %v4836_v27 = vmul.f32 0.75, %v4821_v10  ;;  %v4824_v45 = vadd.f32 %v4816_v21, %v3984_v39  ;;  %8777 = vmatprep.mubr.msk.f32.mxu0 %vm3220_vm7, %v3201_v11  ;;  %v3987_v55 = vmax.f32 %v15424_v28, 0.0  ;;  %v4823_v20 = vadd.f32 %v4815_v7, %v3983_v42 }
 0x468   : > { %v4826_v31 = vadd.f32 %v4818_v44, %v3986_v23  ;;  %v15452_v2 = vadd.f32 %v17700_v46, %v15409_v37  ;;  %v2944_v52 = vadd.f32 %v15377_v22, %v2848_v51  ;;  %v15457_v13 = vadd.f32 %v4837_v62, %v4829_v12 }
 0x469   : > { %v15455_v1 = vadd.f32 %v4836_v27, %v4829_v12  ;;  %v4853_v9 = vadd.f32 %v4836_v27, %v4830_v59  ;;  %v15459_v16 = vmul.f32 0.25, %v4824_v45  ;;  %v15461_v18 = vmul.f32 0.75, %v4824_v45 }
 0x46a   : > { %v4831_v17 = vmul.f32 0.25, %v4823_v20  ;;  %v4838_v53 = vmul.f32 0.75, %v4823_v20  ;;  %v3010_v15 = vadd.f32 %v2981_v35, %v2944_v52  ;;  %v4864_v8 = vrot.slane %v15457_v13, 7 }
 0x46b   : > { %v4863_v41 = vrot.slane %v15455_v1, 7  ;;  %v4817_v39 = vmax.f32 %v15444_v29, 0.0  ;;  %v4881_v22 = vrot.slane %v15455_v1, 1  ;;  %v4882_v4 = vrot.slane %v15457_v13, 1 }
 0x46c   : > { %v4939_v50 = vrot.slane %v4853_v9, 7  ;;  %v4846_v60 = vadd.f32 %v4838_v53, %v4830_v59  ;;  %v3106_v38 = vadd.f32 %v3076_v57, %v3010_v15  ;;  %v4955_v49 = vrot.slane %v4853_v9, 1  ;;  %v17701_v15 = vld [vmem:[#allocation94_spill] sm:$0xff] }
 0x46d   : > { %v4847_v58 = vadd.f32 %v15461_v18, %v4831_v17  ;;  %v4854_v42 = vadd.f32 %v4837_v62, %v4831_v17  ;;  %v4892_v35 = vsel %vm4862_vm12, %v15457_v13, %v4882_v4  ;;  %v4855_v23 = vadd.f32 %v4838_v53, %v15459_v16 }
 0x46e   : > { %v4865_v36 = vrot.slane %v4846_v60, 7  ;;  %v4883_v3 = vrot.slane %v4846_v60, 1  ;;  %v3202_v25 = vadd.f32 %v15418_v6, %v3106_v38  ;;  %v15477_v33 = vsel %vm4861_vm13, %v15457_v13, %v4864_v8 }
 0x46f   : > { %v4866_v57 = vrot.slane %v4847_v58, 7  ;;  %v4884_v40 = vrot.slane %v4847_v58, 1  ;;  %v15479_v34 = vmul.f32 0.25, %v4892_v35  ;;  %v15485_v54 = vmul.f32 0.75, %v4846_v60 }
 0x470   : > { %v4875_v26 = vsel %vm4861_vm13, %v4846_v60, %v4865_v36  ;;  %v4893_v61 = vsel %vm4862_vm12, %v4846_v60, %v4883_v3  ;;  %8778 = vmatmul.mubr.msk.f32.gmra.mrb[22].mxu0 %vm3220_vm7, %v3202_v25  ;;  %v15494_v30 = vmul.f32 0.75, %v4847_v58  ;;  %v4940_v47 = vrot.slane %v4854_v42, 7 }
 0x471   : > { %v4876_v6 = vsel %vm4861_vm13, %v4847_v58, %v4866_v57  ;;  %v4894_v48 = vsel %vm4862_vm12, %v4847_v58, %v4884_v40  ;;  %v15492_v19 = vmul.f32 0.25, %v4875_v26  ;;  %v15498_v24 = vmul.f32 0.25, %v4893_v61 }
 0x472   : > { %v15496_v32 = vmul.f32 0.25, %v4876_v6  ;;  %v4941_v29 = vrot.slane %v4855_v23, 7  ;;  %v15500_v63 = vmul.f32 0.25, %v4894_v48  ;;  %v4956_v10 = vrot.slane %v4854_v42, 1 }
 0x473   : > { %v4957_v21 = vrot.slane %v4855_v23, 1  ;;  %v15502_v7 = vmul.f32 0.75, %v4854_v42  ;;  %v4948_v11 = vsel %vm4861_vm13, %v4854_v42, %v4940_v47  ;;  %v15508_v62 = vmul.f32 0.75, %v4855_v23 }
 0x474   : > { %v4949_v59 = vsel %vm4861_vm13, %v4855_v23, %v4941_v29  ;;  %v15510_v44 = vmul.f32 0.25, %v4826_v31  ;;  %v4964_v51 = vsel %vm4862_vm12, %v4854_v42, %v4956_v10  ;;  %v15516_v27 = vmul.f32 0.25, %v4948_v11 }
 0x475   : > { %v4965_v12 = vsel %vm4862_vm12, %v4855_v23, %v4957_v21  ;;  %v4841_v45 = vmul.f32 0.75, %v4826_v31  ;;  %v15518_v20 = vmul.f32 0.25, %v4949_v59  ;;  %v15520_v46 = vmul.f32 0.25, %v4964_v51 }
 0x476   : > { %v4825_v52 = vadd.f32 %v4817_v39, %v3985_v0  ;;  %v4820_v17 = vmax.f32 %v15452_v2, 0.0  ;;  %v15525_v53 = vmul.f32 0.25, %v4965_v12  ;;  %v4805_v8 = vadd.f32 %v15409_v37, %v17701_v15 }
 0x477   : > { %v4947_v4 = vsel %vm4861_vm13, %v4853_v9, %v4939_v50  ;;  %v4963_v31 = vsel %vm4862_vm12, %v4853_v9, %v4955_v49  ;;  %v4979_v39 = vmul.f32 0.75, %v4853_v9  ;;  %v15538_v42 = vsel %vm4861_vm13, %v15455_v1, %v4863_v41 }
 0x478   : > { %v4833_v60 = vmul.f32 0.25, %v4825_v52  ;;  %v4840_v38 = vmul.f32 0.75, %v4825_v52  ;;  %v4828_v58 = vadd.f32 %v4820_v17, %v3988_v56  ;;  %v4971_v5 = vmul.f32 0.25, %v4947_v4 }
 0x479   : > { %v4819_v0 = vmax.f32 %v4805_v8, 0.0  ;;  %v4995_v2 = vmul.f32 0.25, %v4963_v31  ;;  %v4900_v14 = vmul.f32 0.25, %v15477_v33 }
 0x47a   : > { %v4848_v37 = vadd.f32 %v4840_v38, %v15459_v16  ;;  %v4849_v50 = vadd.f32 %v4841_v45, %v4833_v60  ;;  %v4856_v35 = vadd.f32 %v15461_v18, %v4833_v60  ;;  %v4857_v49 = vadd.f32 %v4840_v38, %v15510_v44 }
 0x47b   : > { %v4843_v23 = vmul.f32 0.75, %v4828_v58  ;;  %v4852_v36 = vmul.f32 0.25, %v4828_v58  ;;  %v4827_v43 = vadd.f32 %v4819_v0, %v3987_v55  ;;  %v15545_v56 = vadd.f32 %v4979_v39, %v4971_v5 }
 0x47c   : > { %v4867_v9 = vrot.slane %v4848_v37, 7  ;;  %v4868_v3 = vrot.slane %v4849_v50, 7  ;;  %v4885_v25 = vrot.slane %v4848_v37, 1  ;;  %v4886_v57 = vrot.slane %v4849_v50, 1 }
 0x47d   : > { %v15547_v41 = vmul.f32 0.75, %v4848_v37  ;;  %v15549_v40 = vmul.f32 0.75, %v4849_v50  ;;  %v4942_v16 = vrot.slane %v4856_v35, 7  ;;  %v4943_v26 = vrot.slane %v4857_v49, 7 }
 0x47e   : > { %v4877_v18 = vsel %vm4861_vm13, %v4848_v37, %v4867_v9  ;;  %v4878_v61 = vsel %vm4861_vm13, %v4849_v50, %v4868_v3  ;;  %v4895_v28 = vsel %vm4862_vm12, %v4848_v37, %v4885_v25  ;;  %v4896_v55 = vsel %vm4862_vm12, %v4849_v50, %v4886_v57  ;;  %v17703_v57 = vld [vmem:[#allocation53_spill] sm:$0xff] }
 0x47f   : > { %v15559_v6 = vmul.f32 0.25, %v4877_v18  ;;  %v15561_v48 = vmul.f32 0.25, %v4878_v61  ;;  %v15563_v47 = vmul.f32 0.25, %v4895_v28  ;;  %v15565_v29 = vmul.f32 0.25, %v4896_v55 }
 0x480   : > { %v4950_v10 = vsel %vm4861_vm13, %v4856_v35, %v4942_v16  ;;  %v4951_v21 = vsel %vm4861_vm13, %v4857_v49, %v4943_v26  ;;  %v4958_v11 = vrot.slane %v4856_v35, 1  ;;  %v4959_v59 = vrot.slane %v4857_v49, 1 }
 0x481   : > { %v15571_v51 = vmul.f32 0.25, %v4950_v10  ;;  %v15573_v12 = vmul.f32 0.25, %v4951_v21  ;;  %v15575_v52 = vmul.f32 0.75, %v4856_v35  ;;  %v15577_v17 = vmul.f32 0.75, %v4857_v49 }
 0x482   : > { %v4966_v15 = vsel %vm4862_vm12, %v4856_v35, %v4958_v11  ;;  %v4967_v8 = vsel %vm4862_vm12, %v4857_v49, %v4959_v59  ;;  %v4860_v4 = vadd.f32 %v4852_v36, %v4843_v23  ;;  %v4835_v31 = vmul.f32 0.25, %v4827_v43 }
 0x483   : > { %v15583_v60 = vmul.f32 0.25, %v4966_v15  ;;  %v15585_v38 = vmul.f32 0.25, %v4967_v8  ;;  %v4842_v58 = vmul.f32 0.75, %v4827_v43  ;;  %v5003_v5 = vadd.f32 %v4995_v2, %v4979_v39 }
 0x484   : > { %v4946_v0 = vrot.slane %v4860_v4, 7  ;;  %v4962_v37 = vrot.slane %v4860_v4, 1  ;;  %v15587_v50 = vmul.f32 0.75, %v4860_v4  ;;  %v4851_v9 = vadd.f32 %v4843_v23, %v4835_v31 }
 0x485   : > { %v4850_v3 = vadd.f32 %v4842_v58, %v15510_v44  ;;  %v4858_v25 = vadd.f32 %v4841_v45, %v4835_v31  ;;  %v4859_v35 = vadd.f32 %v4852_v36, %v4842_v58  ;;  %v6275_v49 = vrot.slane %v15545_v56, %v17703_v57 }
 0x486   : > { %17702 = vst [vmem:[#allocation63_spill] sm:$0xff] %v15587_v50  ;;  %v4954_v16 = vsel %vm4861_vm13, %v4860_v4, %v4946_v0  ;;  %v4970_v26 = vsel %vm4862_vm12, %v4860_v4, %v4962_v37  ;;  %v4870_v43 = vrot.slane %v4851_v9, 7  ;;  %v4888_v39 = vrot.slane %v4851_v9, 1 }
 0x487   : > { %v15596_v2 = vmul.f32 0.25, %v4954_v16  ;;  %v15598_v18 = vmul.f32 0.25, %v4970_v26  ;;  %v4869_v23 = vrot.slane %v4850_v3, 7  ;;  %v4887_v61 = vrot.slane %v4850_v3, 1 }
 0x488   : > { %v4880_v44 = vsel %vm4861_vm13, %v4851_v9, %v4870_v43  ;;  %v4898_v45 = vsel %vm4862_vm12, %v4851_v9, %v4888_v39  ;;  %v15604_v36 = vmul.f32 0.75, %v4850_v3  ;;  %v15606_v28 = vmul.f32 0.75, %v4851_v9 }
 0x489   : > { %17704 = vst [vmem:[#allocation103_spill] sm:$0xff] %v15596_v2  ;;  %17705 = vst [vmem:[#allocation105_spill] sm:$0xff] %v15598_v18  ;;  %v4879_v55 = vsel %vm4861_vm13, %v4850_v3, %v4869_v23  ;;  %v4897_v10 = vsel %vm4862_vm12, %v4850_v3, %v4887_v61  ;;  %v15612_v21 = vmul.f32 0.25, %v4880_v44  ;;  %v15614_v11 = vmul.f32 0.25, %v4898_v45 }
 0x48a   : > { %17706 = vst [vmem:[#allocation61_spill] sm:$0xff] %v15606_v28  ;;  %v15616_v59 = vmul.f32 0.25, %v4879_v55  ;;  %v15618_v15 = vmul.f32 0.25, %v4897_v10  ;;  %v4944_v8 = vrot.slane %v4858_v25, 7  ;;  %v4945_v4 = vrot.slane %v4859_v35, 7 }
 0x48b   : > { %17707 = vst [vmem:[#allocation73_spill] sm:$0xff] %v15612_v21  ;;  %17708 = vst [vmem:[#allocation66_spill] sm:$0xff] %v15614_v11  ;;  %v4960_v31 = vrot.slane %v4858_v25, 1  ;;  %v4961_v58 = vrot.slane %v4859_v35, 1  ;;  %v15620_v0 = vmul.f32 0.75, %v4858_v25  ;;  %v15622_v37 = vmul.f32 0.75, %v4859_v35 }
 0x48c   : > { %17709 = vst [vmem:[#allocation34_spill] sm:$0xff] %v15618_v15  ;;  %v4952_v9 = vsel %vm4861_vm13, %v4858_v25, %v4944_v8  ;;  %v4953_v3 = vsel %vm4861_vm13, %v4859_v35, %v4945_v4  ;;  %v6283_v16 = vcombine.high %v6275_v49, %v6275_v49  ;;  %v6291_v26 = vrot.slane %v6275_v49, %v17703_v57 }
 0x48d   : > { %17710 = vst [vmem:[#allocation75_spill] sm:$0xff] %v15622_v37  ;;  %v4968_v43 = vsel %vm4862_vm12, %v4858_v25, %v4960_v31  ;;  %v4969_v39 = vsel %vm4862_vm12, %v4859_v35, %v4961_v58  ;;  %v15633_v23 = vmul.f32 0.25, %v4952_v9  ;;  %v15635_v61 = vmul.f32 0.25, %v4953_v3 }
 0x48e   : > { %v15637_v44 = vmul.f32 0.25, %v4968_v43  ;;  %v15639_v45 = vmul.f32 0.25, %v4969_v39  ;;  %v6305_v55 = vrot.slane %v6283_v16, %v17703_v57  ;;  %v6313_v10 = vcombine.high %v6291_v26, %v6291_v26 }
 0x48f   : > { %17711 = vst [vmem:[#allocation84_spill] sm:$0xff] %v15635_v61  ;;  %v6732_v8 = vcombine.high %v5003_v5, %v5003_v5  ;;  %v6739_v49 = vrot.slane %v5003_v5, %v17703_v57  ;;  %v6268_v25 = vcombine.high %v15545_v56, %v15545_v56  ;;  %v4891_v35 = vsel %vm4862_vm12, %v15455_v1, %v4881_v22  ;;  %v17714_v61 = vld [vmem:[#allocation38_spill] sm:$0xff] }
 0x490   : > { %17712 = vst [vmem:[#allocation80_spill] sm:$0xff] %v15639_v45  ;;  %v6315_v4 = vcombine.high %v6305_v55, %v6305_v55  ;;  %v4899_v31 = vmul.f32 0.25, %v15538_v42  ;;  %v4907_v58 = vmul.f32 0.75, %v15455_v1  ;;  %v4923_v9 = vmul.f32 0.25, %v4891_v35  ;;  %v17713_v1 = vld [vmem:[#allocation59_spill] sm:$0xff] }
 0x491   : > { %v6747_v3 = vcombine.high %v6739_v49, %v6739_v49  ;;  %v6755_v16 = vrot.slane %v6739_v49, %v17703_v57  ;;  %v6282_v5 = vrot.slane %v6268_v25, %v17703_v57  ;;  %v6746_v43 = vrot.slane %v6732_v8, %v17703_v57 }
 0x492   : > { %v15655_v56 = vadd.f32 %v4907_v58, %v4899_v31  ;;  %v15657_v39 = vadd.f32 %v4923_v9, %v4907_v58  ;;  %v4908_v22 = vmul.f32 0.75, %v15457_v13 }
 0x493   : > { %v6769_v42 = vrot.slane %v6747_v3, %v17703_v57  ;;  %v6777_v18 = vcombine.high %v6755_v16, %v6755_v16  ;;  %v7127_v35 = vrot.slane %v6755_v16, %v17713_v1  ;;  %v6284_v50 = vcombine.high %v6282_v5, %v6282_v5 }
 0x494   : > { %v5026_v49 = vrot.slane %v15655_v56, %v17703_v57  ;;  %v5490_v25 = vrot.slane %v15657_v39, %v17703_v57  ;;  %v6298_v33 = vrot.slane %v6282_v5, %v17703_v57 }
 0x495   : > { %v6779_v31 = vcombine.high %v6769_v42, %v6769_v42  ;;  %v7131_v13 = vrot.slane %v6769_v42, %v17713_v1  ;;  %v7135_v58 = vrot.slane %v6777_v18, %v17713_v1  ;;  %v7444_v9 = vsel %vm6195_vm14, %v6291_v26, %v7127_v35 }
 0x496   : > { %v5034_v3 = vcombine.high %v5026_v49, %v5026_v49  ;;  %v5042_v16 = vrot.slane %v5026_v49, %v17703_v57  ;;  %v5498_v2 = vcombine.high %v5490_v25, %v5490_v25  ;;  %v5506_v11 = vrot.slane %v5490_v25, %v17703_v57 }
 0x497   : > { %v7139_v8 = vrot.slane %v6779_v31, %v17713_v1  ;;  %v7445_v28 = vsel %vm6195_vm14, %v6305_v55, %v7131_v13  ;;  %v7446_v21 = vsel %vm6195_vm14, %v6313_v10, %v7135_v58  ;;  %v6312_v25 = vrot.slane %v6284_v50, %v17703_v57 }
 0x498   : > { %v7703_v45 = vcombine.low %v7444_v9, %v7445_v28  ;;  %v5056_v42 = vrot.slane %v5034_v3, %v17703_v57  ;;  %v5064_v18 = vcombine.high %v5042_v16, %v5042_v16  ;;  %v5520_v26 = vrot.slane %v5498_v2, %v17703_v57 }
 0x499   : > { %v7447_v35 = vsel %vm6195_vm14, %v6315_v4, %v7139_v8  ;;  %v5528_v49 = vcombine.high %v5506_v11, %v5506_v11  ;;  %v5878_v37 = vrot.slane %v5506_v11, %v17713_v1  ;;  %v6314_v9 = vcombine.high %v6298_v33, %v6298_v33 }
 0x49a   : > { %v7704_v31 = vcombine.low %v7446_v21, %v7447_v35  ;;  %v7711_v55 = vrot.slane %v7703_v45, %v17714_v61  ;;  %v5066_v13 = vcombine.high %v5056_v42, %v5056_v42  ;;  %v5530_v10 = vcombine.high %v5520_v26, %v5520_v26 }
 0x49b   : > { %v5882_v5 = vrot.slane %v5520_v26, %v17713_v1  ;;  %v5886_v28 = vrot.slane %v5528_v49, %v17713_v1  ;;  %v6196_v58 = vsel %vm6195_vm14, %v5042_v16, %v5878_v37  ;;  %v6316_v8 = vcombine.high %v6312_v25, %v6312_v25 }
 0x49c   : > { %v7718_v2 = vrot.slane %v7704_v31, %v17714_v61  ;;  %v5890_v4 = vrot.slane %v5530_v10, %v17713_v1  ;;  %v6748_v11 = vcombine.high %v6746_v43, %v6746_v43  ;;  %v6762_v45 = vrot.slane %v6746_v43, %v17703_v57 }
 0x49d   : > { %v6197_v50 = vsel %vm6195_vm14, %v5056_v42, %v5882_v5  ;;  %v6198_v21 = vsel %vm6195_vm14, %v5064_v18, %v5886_v28  ;;  %v4916_v3 = vadd.f32 %v4908_v22, %v4900_v14  ;;  %v4932_v10 = vadd.f32 %v15479_v34, %v4908_v22 }
 0x49e   : > { %v7719_v35 = vcombine.low %v7711_v55, %v7718_v2  ;;  %v6199_v26 = vsel %vm6195_vm14, %v5066_v13, %v5890_v4  ;;  %v7669_v49 = vcombine.low %v6196_v58, %v6197_v50  ;;  %v6776_v37 = vrot.slane %v6748_v11, %v17703_v57 }
 0x49f   : > { %v7670_v16 = vcombine.low %v6198_v21, %v6199_v26  ;;  %v6778_v15 = vcombine.high %v6762_v45, %v6762_v45  ;;  %v7143_v31 = vrot.slane %v6762_v45, %v17713_v1  ;;  %v5075_v14 = vrot.slane %v4916_v3, %v17703_v57 }
 0x4a0   : > { %8217 = vrot.lane.b32.xlu1 %v7719_v35, %s9500_s13  ;;  %v7677_v42 = vrot.slane %v7669_v49, %v17714_v61  ;;  %v6780_v18 = vcombine.high %v6776_v37, %v6776_v37  ;;  %v7147_v43 = vrot.slane %v6776_v37, %v17713_v1  ;;  %v5539_v28 = vrot.slane %v4932_v10, %v17703_v57 }
 0x4a1   : > { %v7684_v55 = vrot.slane %v7670_v16, %v17714_v61  ;;  %v7151_v13 = vrot.slane %v6778_v15, %v17713_v1  ;;  %v7448_v5 = vsel %vm6195_vm14, %v6298_v33, %v7143_v31  ;;  %v5083_v58 = vcombine.high %v5075_v14, %v5075_v14 }
 0x4a2   : > { %v7155_v34 = vrot.slane %v6780_v18, %v17713_v1  ;;  %v7449_v22 = vsel %vm6195_vm14, %v6312_v25, %v7147_v43  ;;  %v5091_v2 = vrot.slane %v5075_v14, %v17703_v57  ;;  %v5547_v21 = vcombine.high %v5539_v28, %v5539_v28 }
 0x4a3   : > { %v7685_v4 = vcombine.low %v7677_v42, %v7684_v55  ;;  %v7450_v11 = vsel %vm6195_vm14, %v6314_v9, %v7151_v13  ;;  %v7720_v50 = vcombine.low %v7448_v5, %v7449_v22  ;;  %v5105_v15 = vrot.slane %v5083_v58, %v17703_v57 }
 0x4a4   : > { %v7451_v45 = vsel %vm6195_vm14, %v6316_v8, %v7155_v34  ;;  %v5113_v35 = vcombine.high %v5091_v2, %v5091_v2  ;;  %v5555_v33 = vrot.slane %v5539_v28, %v17703_v57  ;;  %v5569_v49 = vrot.slane %v5547_v21, %v17703_v57 }
 0x4a5   : > { %8213 = vrot.lane.b32.xlu0 %v7685_v4, %s9500_s13  ;;  %v7721_v26 = vcombine.low %v7450_v11, %v7451_v45  ;;  %v7728_v25 = vrot.slane %v7720_v50, %v17714_v61  ;;  %v5068_v37 = vcombine.high %v4916_v3, %v4916_v3  ;;  %v5115_v16 = vcombine.high %v5105_v15, %v5105_v15 }
 0x4a6   : > { %v5577_v31 = vcombine.high %v5555_v33, %v5555_v33  ;;  %v5910_v9 = vrot.slane %v5555_v33, %v17713_v1  ;;  %v5532_v42 = vcombine.high %v4932_v10, %v4932_v10  ;;  %v5579_v18 = vcombine.high %v5569_v49, %v5569_v49 }
 0x4a7   : > { %v7735_v8 = vrot.slane %v7721_v26, %v17714_v61  ;;  %v5914_v43 = vrot.slane %v5569_v49, %v17713_v1  ;;  %v5082_v14 = vrot.slane %v5068_v37, %v17703_v57  ;;  %v17715_v3 = vcombine.high %v15655_v56, %v15655_v56 }
 0x4a8   : > { %v5918_v55 = vrot.slane %v5577_v31, %v17713_v1  ;;  %v6204_v13 = vsel %vm6195_vm14, %v5091_v2, %v5910_v9  ;;  %v5546_v5 = vrot.slane %v5532_v42, %v17703_v57  ;;  %v5922_v10 = vrot.slane %v5579_v18, %v17713_v1 }
 0x4a9   : > { %v5033_v28 = vrot.slane %v17715_v3, %v17703_v57  ;;  %v7736_v34 = vcombine.low %v7728_v25, %v7735_v8  ;;  %v6205_v22 = vsel %vm6195_vm14, %v5105_v15, %v5914_v43  ;;  %v5084_v58 = vcombine.high %v5082_v14, %v5082_v14 }
 0x4aa   : > { %v6206_v4 = vsel %vm6195_vm14, %v5113_v35, %v5918_v55  ;;  %v7737_v11 = vcombine.low %v6204_v13, %v6205_v22  ;;  %v5098_v50 = vrot.slane %v5082_v14, %v17703_v57  ;;  %v5548_v21 = vcombine.high %v5546_v5, %v5546_v5 }
 0x4ab   : > { %8219 = vrot.lane.b32.xlu1 %v7736_v34, %s9500_s13  ;;  %v6207_v2 = vsel %vm6195_vm14, %v5115_v16, %v5922_v10  ;;  %v5112_v45 = vrot.slane %v5084_v58, %v17703_v57  ;;  %v5562_v56 = vrot.slane %v5546_v5, %v17703_v57  ;;  %v5035_v33 = vcombine.high %v5033_v28, %v5033_v28 }
 0x4ac   : > { %v7738_v26 = vcombine.low %v6206_v4, %v6207_v2  ;;  %v7745_v25 = vrot.slane %v7737_v11, %v17714_v61  ;;  %v5114_v15 = vcombine.high %v5098_v50, %v5098_v50  ;;  %v5576_v49 = vrot.slane %v5548_v21, %v17703_v57 }
 0x4ad   : > { %v5116_v35 = vcombine.high %v5112_v45, %v5112_v45  ;;  %v5578_v37 = vcombine.high %v5562_v56, %v5562_v56  ;;  %v5926_v31 = vrot.slane %v5562_v56, %v17713_v1  ;;  %v5049_v9 = vrot.slane %v5033_v28, %v17703_v57 }
 0x4ae   : > { %v7752_v42 = vrot.slane %v7738_v26, %v17714_v61  ;;  %v5580_v16 = vcombine.high %v5576_v49, %v5576_v49  ;;  %v5930_v8 = vrot.slane %v5576_v49, %v17713_v1  ;;  %v5063_v18 = vrot.slane %v5035_v33, %v17703_v57 }
 0x4af   : > { %v5934_v43 = vrot.slane %v5578_v37, %v17713_v1  ;;  %v6208_v14 = vsel %vm6195_vm14, %v5098_v50, %v5926_v31  ;;  %v5065_v55 = vcombine.high %v5049_v9, %v5049_v9  ;;  %v17716_v13 = vcombine.high %v15657_v39, %v15657_v39 }
 0x4b0   : > { %v7753_v3 = vcombine.low %v7745_v25, %v7752_v42  ;;  %v5938_v28 = vrot.slane %v5580_v16, %v17713_v1  ;;  %v6209_v34 = vsel %vm6195_vm14, %v5112_v45, %v5930_v8  ;;  %v5067_v10 = vcombine.high %v5063_v18, %v5063_v18 }
 0x4b1   : > { %v5497_v5 = vrot.slane %v17716_v13, %v17703_v57  ;;  %v6210_v22 = vsel %vm6195_vm14, %v5114_v15, %v5934_v43  ;;  %v7754_v58 = vcombine.low %v6208_v14, %v6209_v34  ;;  %v4988_v39 = vadd.f32 %v15502_v7, %v15516_v27 }
 0x4b2   : > { %8221 = vrot.lane.b32.xlu0 %v7753_v3, %s9500_s13  ;;  %v6211_v50 = vsel %vm6195_vm14, %v5116_v35, %v5938_v28  ;;  %v5004_v21 = vadd.f32 %v15520_v46, %v15502_v7  ;;  %v4917_v2 = vadd.f32 %v15485_v54, %v15492_v19 }
 0x4b3   : > { %v5499_v4 = vcombine.high %v5497_v5, %v5497_v5  ;;  %v5513_v11 = vrot.slane %v5497_v5, %v17703_v57  ;;  %v7755_v45 = vcombine.low %v6210_v22, %v6211_v50  ;;  %v7762_v56 = vrot.slane %v7754_v58, %v17714_v61 }
 0x4b4   : > { %v6317_v15 = vcombine.high %v4988_v39, %v4988_v39  ;;  %v6781_v49 = vcombine.high %v5004_v21, %v5004_v21  ;;  %v6324_v35 = vrot.slane %v4988_v39, %v17703_v57 }
 0x4b5   : > { %v5527_v33 = vrot.slane %v5499_v4, %v17703_v57  ;;  %v5529_v26 = vcombine.high %v5513_v11, %v5513_v11  ;;  %v5894_v25 = vrot.slane %v5513_v11, %v17713_v1  ;;  %v7769_v27 = vrot.slane %v7755_v45, %v17714_v61 }
 0x4b6   : > { %v6331_v31 = vrot.slane %v6317_v15, %v17703_v57  ;;  %v6795_v42 = vrot.slane %v6781_v49, %v17703_v57  ;;  %v6332_v16 = vcombine.high %v6324_v35, %v6324_v35  ;;  %v6340_v58 = vrot.slane %v6324_v35, %v17703_v57 }
 0x4b7   : > { %v5531_v37 = vcombine.high %v5527_v33, %v5527_v33  ;;  %v5898_v7 = vrot.slane %v5527_v33, %v17713_v1  ;;  %v5902_v46 = vrot.slane %v5529_v26, %v17713_v1  ;;  %v6200_v19 = vsel %vm6195_vm14, %v5049_v9, %v5894_v25 }
 0x4b8   : > { %v7770_v8 = vcombine.low %v7762_v56, %v7769_v27  ;;  %v6333_v3 = vcombine.high %v6331_v31, %v6331_v31  ;;  %v6347_v28 = vrot.slane %v6331_v31, %v17703_v57  ;;  %v6797_v34 = vcombine.high %v6795_v42, %v6795_v42 }
 0x4b9   : > { %v5906_v43 = vrot.slane %v5531_v37, %v17713_v1  ;;  %v6201_v14 = vsel %vm6195_vm14, %v5063_v18, %v5898_v7  ;;  %v6202_v13 = vsel %vm6195_vm14, %v5065_v55, %v5902_v46  ;;  %v6811_v22 = vrot.slane %v6795_v42, %v17703_v57 }
 0x4ba   : > { %v7686_v5 = vcombine.low %v6200_v19, %v6201_v14  ;;  %8223 = vrot.lane.b32.xlu1 %v7770_v8, %s9500_s13  ;;  %v6354_v4 = vrot.slane %v6332_v16, %v17703_v57  ;;  %v6361_v55 = vrot.slane %v6333_v3, %v17703_v57  ;;  %v6363_v50 = vcombine.high %v6347_v28, %v6347_v28 }
 0x4bb   : > { %v6203_v9 = vsel %vm6195_vm14, %v5067_v10, %v5906_v43  ;;  %v6825_v39 = vrot.slane %v6797_v34, %v17703_v57  ;;  %v6827_v45 = vcombine.high %v6811_v22, %v6811_v22  ;;  %v7175_v56 = vrot.slane %v6811_v22, %v17713_v1 }
 0x4bc   : > { %v7687_v11 = vcombine.low %v6202_v13, %v6203_v9  ;;  %v7694_v18 = vrot.slane %v7686_v5, %v17714_v61  ;;  %v6362_v33 = vcombine.high %v6340_v58, %v6340_v58  ;;  %v6365_v26 = vcombine.high %v6361_v55, %v6361_v55 }
 0x4bd   : > { %v6364_v25 = vcombine.high %v6354_v4, %v6354_v4  ;;  %v6788_v15 = vrot.slane %v5004_v21, %v17703_v57  ;;  %v6829_v49 = vcombine.high %v6825_v39, %v6825_v39  ;;  %v7179_v35 = vrot.slane %v6825_v39, %v17713_v1 }
 0x4be   : > { %v7701_v10 = vrot.slane %v7687_v11, %v17714_v61  ;;  %v7183_v27 = vrot.slane %v6827_v45, %v17713_v1  ;;  %v7456_v37 = vsel %vm6195_vm14, %v6347_v28, %v7175_v56  ;;  %v4933_v31 = vadd.f32 %v15498_v24, %v15485_v54 }
 0x4bf   : > { %v6796_v46 = vcombine.high %v6788_v15, %v6788_v15  ;;  %v6804_v19 = vrot.slane %v6788_v15, %v17703_v57  ;;  %v7187_v42 = vrot.slane %v6829_v49, %v17713_v1  ;;  %v7457_v16 = vsel %vm6195_vm14, %v6361_v55, %v7179_v35 }
 0x4c0   : > { %v7702_v7 = vcombine.low %v7694_v18, %v7701_v10  ;;  %v7458_v21 = vsel %vm6195_vm14, %v6363_v50, %v7183_v27  ;;  %v5117_v8 = vcombine.high %v4917_v2, %v4917_v2  ;;  %v7788_v43 = vcombine.low %v7456_v37, %v7457_v16 }
 0x4c1   : > { %v6818_v14 = vrot.slane %v6796_v46, %v17703_v57  ;;  %v6826_v13 = vcombine.high %v6804_v19, %v6804_v19  ;;  %v7159_v5 = vrot.slane %v6804_v19, %v17713_v1  ;;  %v7459_v3 = vsel %vm6195_vm14, %v6365_v26, %v7187_v42 }
 0x4c2   : > { %8215 = vrot.lane.b32.xlu0 %v7702_v7, %s9500_s13  ;;  %v5131_v28 = vrot.slane %v5117_v8, %v17703_v57  ;;  %v5581_v54 = vcombine.high %v4933_v31, %v4933_v31  ;;  %v5124_v24 = vrot.slane %v4917_v2, %v17703_v57  ;;  %v7789_v34 = vcombine.low %v7458_v21, %v7459_v3 }
 0x4c3   : > { %v7796_v9 = vrot.slane %v7788_v43, %v17714_v61  ;;  %v6828_v22 = vcombine.high %v6818_v14, %v6818_v14  ;;  %v7163_v11 = vrot.slane %v6818_v14, %v17713_v1  ;;  %v7167_v18 = vrot.slane %v6826_v13, %v17713_v1 }
 0x4c4   : > { %v7452_v55 = vsel %vm6195_vm14, %v6340_v58, %v7159_v5  ;;  %v5133_v50 = vcombine.high %v5131_v28, %v5131_v28  ;;  %v5147_v39 = vrot.slane %v5131_v28, %v17703_v57  ;;  %v7803_v45 = vrot.slane %v7789_v34, %v17714_v61 }
 0x4c5   : > { %v7171_v56 = vrot.slane %v6828_v22, %v17713_v1  ;;  %v7453_v10 = vsel %vm6195_vm14, %v6354_v4, %v7163_v11  ;;  %v5595_v2 = vrot.slane %v5581_v54, %v17703_v57  ;;  %v7454_v26 = vsel %vm6195_vm14, %v6362_v33, %v7167_v18 }
 0x4c6   : > { %v7771_v15 = vcombine.low %v7452_v55, %v7453_v10  ;;  %v5161_v49 = vrot.slane %v5133_v50, %v17703_v57  ;;  %v5163_v35 = vcombine.high %v5147_v39, %v5147_v39  ;;  %v7804_v27 = vcombine.low %v7796_v9, %v7803_v45 }
 0x4c7   : > { %v7455_v58 = vsel %vm6195_vm14, %v6364_v25, %v7171_v56  ;;  %v5597_v37 = vcombine.high %v5595_v2, %v5595_v2  ;;  %v5611_v7 = vrot.slane %v5595_v2, %v17703_v57  ;;  %v5132_v16 = vcombine.high %v5124_v24, %v5124_v24 }
 0x4c8   : > { %v7772_v46 = vcombine.low %v7454_v26, %v7455_v58  ;;  %v7779_v19 = vrot.slane %v7771_v15, %v17714_v61  ;;  %v5165_v42 = vcombine.high %v5161_v49, %v5161_v49  ;;  %8227 = vrot.lane.b32.xlu1 %v7804_v27, %s9500_s13  ;;  %v5140_v8 = vrot.slane %v5124_v24, %v17703_v57 }
 0x4c9   : > { %v5625_v4 = vrot.slane %v5597_v37, %v17703_v57  ;;  %v5627_v33 = vcombine.high %v5611_v7, %v5611_v7  ;;  %v5958_v21 = vrot.slane %v5611_v7, %v17713_v1  ;;  %v5154_v25 = vrot.slane %v5132_v16, %v17703_v57 }
 0x4ca   : > { %v7786_v43 = vrot.slane %v7772_v46, %v17714_v61  ;;  %v5588_v14 = vrot.slane %v4933_v31, %v17703_v57  ;;  %v4989_v13 = vadd.f32 %v15508_v62, %v15518_v20  ;;  %v5162_v9 = vcombine.high %v5140_v8, %v5140_v8 }
 0x4cb   : > { %v5629_v5 = vcombine.high %v5625_v4, %v5625_v4  ;;  %v5962_v3 = vrot.slane %v5625_v4, %v17713_v1  ;;  %v5966_v28 = vrot.slane %v5627_v33, %v17713_v1  ;;  %v6216_v54 = vsel %vm6195_vm14, %v5147_v39, %v5958_v21 }
 0x4cc   : > { %v7787_v34 = vcombine.low %v7779_v19, %v7786_v43  ;;  %v5164_v22 = vcombine.high %v5154_v25, %v5154_v25  ;;  %v5596_v24 = vcombine.high %v5588_v14, %v5588_v14  ;;  %v5604_v55 = vrot.slane %v5588_v14, %v17703_v57 }
 0x4cd   : > { %v5970_v11 = vrot.slane %v5629_v5, %v17713_v1  ;;  %v6217_v18 = vsel %vm6195_vm14, %v5161_v49, %v5962_v3  ;;  %v6218_v31 = vsel %vm6195_vm14, %v5163_v35, %v5966_v28  ;;  %v5005_v39 = vadd.f32 %v15525_v53, %v15508_v62 }
 0x4ce   : > { %8225 = vrot.lane.b32.xlu0 %v7787_v34, %s9500_s13  ;;  %v7822_v20 = vcombine.low %v6216_v54, %v6217_v18  ;;  %v5618_v50 = vrot.slane %v5596_v24, %v17703_v57  ;;  %v6366_v45 = vcombine.high %v4989_v13, %v4989_v13  ;;  %v5626_v10 = vcombine.high %v5604_v55, %v5604_v55 }
 0x4cf   : > { %v6219_v56 = vsel %vm6195_vm14, %v5165_v42, %v5970_v11  ;;  %v5942_v2 = vrot.slane %v5604_v55, %v17713_v1  ;;  %v6373_v26 = vrot.slane %v4989_v13, %v17703_v57  ;;  %v6830_v53 = vcombine.high %v5005_v39, %v5005_v39 }
 0x4d0   : > { %v7823_v15 = vcombine.low %v6218_v31, %v6219_v56  ;;  %v7830_v49 = vrot.slane %v7822_v20, %v17714_v61  ;;  %v5628_v35 = vcombine.high %v5618_v50, %v5618_v50  ;;  %v5946_v27 = vrot.slane %v5618_v50, %v17713_v1 }
 0x4d1   : > { %v5950_v58 = vrot.slane %v5626_v10, %v17713_v1  ;;  %v6212_v37 = vsel %vm6195_vm14, %v5140_v8, %v5942_v2  ;;  %v6380_v62 = vrot.slane %v6366_v45, %v17703_v57  ;;  %v6381_v42 = vcombine.high %v6373_v26, %v6373_v26 }
 0x4d2   : > { %v7837_v7 = vrot.slane %v7823_v15, %v17714_v61  ;;  %v5954_v46 = vrot.slane %v5628_v35, %v17713_v1  ;;  %v6213_v19 = vsel %vm6195_vm14, %v5154_v25, %v5946_v27  ;;  %v6844_v8 = vrot.slane %v6830_v53, %v17703_v57 }
 0x4d3   : > { %v6214_v16 = vsel %vm6195_vm14, %v5162_v9, %v5950_v58  ;;  %v7805_v4 = vcombine.low %v6212_v37, %v6213_v19  ;;  %v6382_v33 = vcombine.high %v6380_v62, %v6380_v62  ;;  %v6396_v21 = vrot.slane %v6380_v62, %v17703_v57 }
 0x4d4   : > { %v7838_v43 = vcombine.low %v7830_v49, %v7837_v7  ;;  %v6215_v14 = vsel %vm6195_vm14, %v5164_v22, %v5954_v46  ;;  %v6389_v13 = vrot.slane %v6373_v26, %v17703_v57  ;;  %v6846_v54 = vcombine.high %v6844_v8, %v6844_v8 }
 0x4d5   : > { %v7806_v5 = vcombine.low %v6214_v16, %v6215_v14  ;;  %v7813_v3 = vrot.slane %v7805_v4, %v17714_v61  ;;  %v6410_v28 = vrot.slane %v6382_v33, %v17703_v57  ;;  %v6412_v25 = vcombine.high %v6396_v21, %v6396_v21 }
 0x4d6   : > { %8231 = vrot.lane.b32.xlu1 %v7838_v43, %s9500_s13  ;;  %v6860_v34 = vrot.slane %v6844_v8, %v17703_v57  ;;  %v6403_v9 = vrot.slane %v6381_v42, %v17703_v57  ;;  %v6411_v24 = vcombine.high %v6389_v13, %v6389_v13  ;;  %v6837_v18 = vrot.slane %v5005_v39, %v17703_v57 }
 0x4d7   : > { %v7820_v22 = vrot.slane %v7806_v5, %v17714_v61  ;;  %v6414_v11 = vcombine.high %v6410_v28, %v6410_v28  ;;  %v4918_v31 = vadd.f32 %v15494_v30, %v15496_v32  ;;  %v6874_v55 = vrot.slane %v6846_v54, %v17703_v57 }
 0x4d8   : > { %v6876_v20 = vcombine.high %v6860_v34, %v6860_v34  ;;  %v7207_v50 = vrot.slane %v6860_v34, %v17713_v1  ;;  %v6413_v45 = vcombine.high %v6403_v9, %v6403_v9  ;;  %v6845_v10 = vcombine.high %v6837_v18, %v6837_v18 }
 0x4d9   : > { %v7821_v56 = vcombine.low %v7813_v3, %v7820_v22  ;;  %v6853_v2 = vrot.slane %v6837_v18, %v17703_v57  ;;  %v4934_v26 = vadd.f32 %v15500_v63, %v15494_v30  ;;  %v6878_v15 = vcombine.high %v6874_v55, %v6874_v55 }
 0x4da   : > { %v7211_v49 = vrot.slane %v6874_v55, %v17713_v1  ;;  %v7215_v39 = vrot.slane %v6876_v20, %v17713_v1  ;;  %v7464_v32 = vsel %vm6195_vm14, %v6396_v21, %v7207_v50  ;;  %v6867_v35 = vrot.slane %v6845_v10, %v17703_v57 }
 0x4db   : > { %8229 = vrot.lane.b32.xlu0 %v7821_v56, %s9500_s13  ;;  %v6875_v27 = vcombine.high %v6853_v2, %v6853_v2  ;;  %v7191_v58 = vrot.slane %v6853_v2, %v17713_v1  ;;  %v5166_v37 = vcombine.high %v4918_v31, %v4918_v31  ;;  %v7219_v62 = vrot.slane %v6878_v15, %v17713_v1 }
 0x4dc   : > { %v7465_v53 = vsel %vm6195_vm14, %v6410_v28, %v7211_v49  ;;  %v7466_v30 = vsel %vm6195_vm14, %v6412_v25, %v7215_v39  ;;  %v5630_v63 = vcombine.high %v4934_v26, %v4934_v26  ;;  %v6877_v46 = vcombine.high %v6867_v35, %v6867_v35 }
 0x4dd   : > { %v7856_v7 = vcombine.low %v7464_v32, %v7465_v53  ;;  %v7195_v19 = vrot.slane %v6867_v35, %v17713_v1  ;;  %v7199_v42 = vrot.slane %v6875_v27, %v17713_v1  ;;  %v7467_v16 = vsel %vm6195_vm14, %v6414_v11, %v7219_v62 }
 0x4de   : > { %v7460_v4 = vsel %vm6195_vm14, %v6389_v13, %v7191_v58  ;;  %v5180_v33 = vrot.slane %v5166_v37, %v17703_v57  ;;  %v5644_v21 = vrot.slane %v5630_v63, %v17703_v57  ;;  %v7857_v43 = vcombine.low %v7466_v30, %v7467_v16 }
 0x4df   : > { %v7864_v14 = vrot.slane %v7856_v7, %v17714_v61  ;;  %v7203_v8 = vrot.slane %v6877_v46, %v17713_v1  ;;  %v7461_v5 = vsel %vm6195_vm14, %v6403_v9, %v7195_v19  ;;  %v7462_v3 = vsel %vm6195_vm14, %v6411_v24, %v7199_v42 }
 0x4e0   : > { %v7839_v28 = vcombine.low %v7460_v4, %v7461_v5  ;;  %v5182_v25 = vcombine.high %v5180_v33, %v5180_v33  ;;  %v5196_v54 = vrot.slane %v5180_v33, %v17703_v57  ;;  %v7871_v34 = vrot.slane %v7857_v43, %v17714_v61 }
 0x4e1   : > { %v7463_v13 = vsel %vm6195_vm14, %v6413_v45, %v7203_v8  ;;  %v5646_v22 = vcombine.high %v5644_v21, %v5644_v21  ;;  %v5660_v11 = vrot.slane %v5644_v21, %v17703_v57  ;;  %v5173_v45 = vrot.slane %v4918_v31, %v17703_v57 }
 0x4e2   : > { %v7840_v18 = vcombine.low %v7462_v3, %v7463_v13  ;;  %v7847_v55 = vrot.slane %v7839_v28, %v17714_v61  ;;  %v5210_v20 = vrot.slane %v5182_v25, %v17703_v57  ;;  %v5212_v50 = vcombine.high %v5196_v54, %v5196_v54 }
 0x4e3   : > { %v7872_v9 = vcombine.low %v7864_v14, %v7871_v34  ;;  %v5674_v24 = vrot.slane %v5646_v22, %v17703_v57  ;;  %v5676_v56 = vcombine.high %v5660_v11, %v5660_v11  ;;  %v5990_v10 = vrot.slane %v5660_v11, %v17713_v1 }
 0x4e4   : > { %v7854_v2 = vrot.slane %v7840_v18, %v17714_v61  ;;  %v5214_v15 = vcombine.high %v5210_v20, %v5210_v20  ;;  %v5637_v49 = vrot.slane %v4934_v26, %v17703_v57  ;;  %v5181_v37 = vcombine.high %v5173_v45, %v5173_v45 }
 0x4e5   : > { %8235 = vrot.lane.b32.xlu1 %v7872_v9, %s9500_s13  ;;  %v5678_v39 = vcombine.high %v5674_v24, %v5674_v24  ;;  %v5994_v32 = vrot.slane %v5674_v24, %v17713_v1  ;;  %v5998_v35 = vrot.slane %v5676_v56, %v17713_v1  ;;  %v6224_v27 = vsel %vm6195_vm14, %v5196_v54, %v5990_v10 }
 0x4e6   : > { %v7855_v58 = vcombine.low %v7847_v55, %v7854_v2  ;;  %v5189_v62 = vrot.slane %v5173_v45, %v17703_v57  ;;  %v5645_v53 = vcombine.high %v5637_v49, %v5637_v49  ;;  %v5653_v63 = vrot.slane %v5637_v49, %v17703_v57 }
 0x4e7   : > { %v6002_v30 = vrot.slane %v5678_v39, %v17713_v1  ;;  %v6225_v31 = vsel %vm6195_vm14, %v5210_v20, %v5994_v32  ;;  %v6226_v26 = vsel %vm6195_vm14, %v5212_v50, %v5998_v35  ;;  %v5203_v46 = vrot.slane %v5181_v37, %v17703_v57 }
 0x4e8   : > { %8233 = vrot.lane.b32.xlu0 %v7855_v58, %s9500_s13  ;;  %v7890_v7 = vcombine.low %v6224_v27, %v6225_v31  ;;  %v5211_v19 = vcombine.high %v5189_v62, %v5189_v62  ;;  %v5667_v42 = vrot.slane %v5645_v53, %v17703_v57  ;;  %v5675_v4 = vcombine.high %v5653_v63, %v5653_v63 }
 0x4e9   : > { %v6227_v16 = vsel %vm6195_vm14, %v5214_v15, %v6002_v30  ;;  %v5974_v33 = vrot.slane %v5653_v63, %v17713_v1  ;;  %v4990_v21 = vadd.f32 %v15575_v52, %v15571_v51  ;;  %v5213_v8 = vcombine.high %v5203_v46, %v5203_v46 }
 0x4ea   : > { %v7891_v43 = vcombine.low %v6226_v26, %v6227_v16  ;;  %v7898_v14 = vrot.slane %v7890_v7, %v17714_v61  ;;  %v5677_v5 = vcombine.high %v5667_v42, %v5667_v42  ;;  %v5978_v3 = vrot.slane %v5667_v42, %v17713_v1 }
 0x4eb   : > { %v5982_v28 = vrot.slane %v5675_v4, %v17713_v1  ;;  %v6220_v25 = vsel %vm6195_vm14, %v5189_v62, %v5974_v33  ;;  %v5006_v54 = vadd.f32 %v15583_v60, %v15575_v52  ;;  %v6415_v22 = vcombine.high %v4990_v21, %v4990_v21  ;;  %v15924_v60 = vpop.f32.mrb[0].mxu0 }
 0x4ec   : > { %v7905_v34 = vrot.slane %v7891_v43, %v17714_v61  ;;  %v5986_v13 = vrot.slane %v5677_v5, %v17713_v1  ;;  %v6422_v51 = vrot.slane %v4990_v21, %v17703_v57  ;;  %v6221_v11 = vsel %vm6195_vm14, %v5203_v46, %v5978_v3  ;;  %v15928_v45 = vpop.f32.mrb[1].mxu0 }
 0x4ed   : > { %v6222_v18 = vsel %vm6195_vm14, %v5211_v19, %v5982_v28  ;;  %v6879_v55 = vcombine.high %v5006_v54, %v5006_v54  ;;  %v6886_v20 = vrot.slane %v5006_v54, %v17703_v57  ;;  %v7873_v24 = vcombine.low %v6220_v25, %v6221_v11  ;;  %v15933_v27 = vpop.f32.mrb[2].mxu0 }
 0x4ee   : > { %v7906_v50 = vcombine.low %v7898_v14, %v7905_v34  ;;  %v6223_v9 = vsel %vm6195_vm14, %v5213_v8, %v5986_v13  ;;  %v6429_v52 = vrot.slane %v6415_v22, %v17703_v57  ;;  %v6430_v2 = vcombine.high %v6422_v51, %v6422_v51  ;;  %v15938_v30 = vpop.f32.mrb[3].mxu0 }
 0x4ef   : > { %v7874_v56 = vcombine.low %v6222_v18, %v6223_v9  ;;  %v6893_v10 = vrot.slane %v6879_v55, %v17703_v57  ;;  %v6438_v15 = vrot.slane %v6422_v51, %v17703_v57  ;;  %v7881_v49 = vrot.slane %v7873_v24, %v17714_v61  ;;  %v15942_v46 = vpop.f32.mrb[4].mxu0 }
 0x4f0   : > { %8239 = vrot.lane.b32.xlu1 %v7906_v50, %s9500_s13  ;;  %v6431_v39 = vcombine.high %v6429_v52, %v6429_v52  ;;  %v6445_v32 = vrot.slane %v6429_v52, %v17703_v57  ;;  %v6894_v35 = vcombine.high %v6886_v20, %v6886_v20  ;;  %v6452_v53 = vrot.slane %v6430_v2, %v17703_v57  ;;  %v15946_v33 = vpop.f32.mrb[5].mxu0 }
 0x4f1   : > { %v7888_v58 = vrot.slane %v7874_v56, %v17714_v61  ;;  %v6895_v37 = vcombine.high %v6893_v10, %v6893_v10  ;;  %v6909_v62 = vrot.slane %v6893_v10, %v17703_v57  ;;  %v6460_v63 = vcombine.high %v6438_v15, %v6438_v15  ;;  %v15949_v5 = vpop.f32.mrb[6].mxu0 }
 0x4f2   : > { %v6459_v31 = vrot.slane %v6431_v39, %v17703_v57  ;;  %v6461_v26 = vcombine.high %v6445_v32, %v6445_v32  ;;  %v6902_v7 = vrot.slane %v6886_v20, %v17703_v57  ;;  %v6462_v43 = vcombine.high %v6452_v53, %v6452_v53  ;;  %v15955_v34 = vpop.f32.mrb[7].mxu0 }
 0x4f3   : > { %v7889_v19 = vcombine.low %v7881_v49, %v7888_v58  ;;  %v6923_v42 = vrot.slane %v6895_v37, %v17703_v57  ;;  %v6925_v16 = vcombine.high %v6909_v62, %v6909_v62  ;;  %v7239_v4 = vrot.slane %v6909_v62, %v17713_v1  ;;  %v15960_v18 = vpop.f32.mrb[8].mxu0 }
 0x4f4   : > { %v6463_v21 = vcombine.high %v6459_v31, %v6459_v31  ;;  %v6916_v14 = vrot.slane %v6894_v35, %v17703_v57  ;;  %v6924_v8 = vcombine.high %v6902_v7, %v6902_v7  ;;  %v7223_v22 = vrot.slane %v6902_v7, %v17713_v1  ;;  %v15967_v24 = vpop.f32.mrb[9].mxu0 }
 0x4f5   : > { %8237 = vrot.lane.b32.xlu0 %v7889_v19, %s9500_s13  ;;  %v6927_v3 = vcombine.high %v6923_v42, %v6923_v42  ;;  %v7243_v28 = vrot.slane %v6923_v42, %v17713_v1  ;;  %v7247_v25 = vrot.slane %v6925_v16, %v17713_v1  ;;  %v7472_v54 = vsel %vm6195_vm14, %v6445_v32, %v7239_v4  ;;  %v15972_v49 = vpop.f32.mrb[10].mxu0 }
 0x4f6   : > { %v6926_v13 = vcombine.high %v6916_v14, %v6916_v14  ;;  %v7227_v51 = vrot.slane %v6916_v14, %v17713_v1  ;;  %v7231_v11 = vrot.slane %v6924_v8, %v17713_v1  ;;  %v4919_v9 = vadd.f32 %v15547_v41, %v15559_v6  ;;  %v15978_v6 = vpop.f32.mrb[11].mxu0 }
 0x4f7   : > { %v7251_v55 = vrot.slane %v6927_v3, %v17713_v1  ;;  %v7473_v20 = vsel %vm6195_vm14, %v6459_v31, %v7243_v28  ;;  %v7474_v50 = vsel %vm6195_vm14, %v6461_v26, %v7247_v25  ;;  %v7468_v10 = vsel %vm6195_vm14, %v6438_v15, %v7223_v22  ;;  %v15982_v26 = vpop.f32.mrb[12].mxu0 }
 0x4f8   : > { %v7924_v52 = vcombine.low %v7472_v54, %v7473_v20  ;;  %v7235_v56 = vrot.slane %v6926_v13, %v17713_v1  ;;  %v7469_v2 = vsel %vm6195_vm14, %v6452_v53, %v7227_v51  ;;  %v7470_v32 = vsel %vm6195_vm14, %v6460_v63, %v7231_v11  ;;  %v15986_v42 = vpop.f32.mrb[13].mxu0 }
 0x4f9   : > { %v7475_v39 = vsel %vm6195_vm14, %v6463_v21, %v7251_v55  ;;  %v7907_v35 = vcombine.low %v7468_v10, %v7469_v2  ;;  %v4935_v58 = vadd.f32 %v15563_v47, %v15547_v41  ;;  %v5215_v15 = vcombine.high %v4919_v9, %v4919_v9 }
 0x4fa   : > { %v7925_v37 = vcombine.low %v7474_v50, %v7475_v39  ;;  %v7932_v62 = vrot.slane %v7924_v52, %v17714_v61  ;;  %v7471_v31 = vsel %vm6195_vm14, %v6462_v43, %v7235_v56  ;;  %v5222_v63 = vrot.slane %v4919_v9, %v17703_v57 }
 0x4fb   : > { %v7908_v53 = vcombine.low %v7470_v32, %v7471_v31  ;;  %v7915_v7 = vrot.slane %v7907_v35, %v17714_v61  ;;  %v5679_v19 = vcombine.high %v4935_v58, %v4935_v58  ;;  %v5229_v47 = vrot.slane %v5215_v15, %v17703_v57 }
 0x4fc   : > { %v7939_v41 = vrot.slane %v7925_v37, %v17714_v61  ;;  %v5686_v16 = vrot.slane %v4935_v58, %v17703_v57  ;;  %v4991_v4 = vadd.f32 %v15577_v17, %v15573_v12  ;;  %v5230_v14 = vcombine.high %v5222_v63, %v5222_v63 }
 0x4fd   : > { %v7922_v21 = vrot.slane %v7908_v53, %v17714_v61  ;;  %v5693_v43 = vrot.slane %v5679_v19, %v17703_v57  ;;  %v5238_v8 = vrot.slane %v5222_v63, %v17703_v57  ;;  %v5231_v28 = vcombine.high %v5229_v47, %v5229_v47 }
 0x4fe   : > { %v7940_v3 = vcombine.low %v7932_v62, %v7939_v41  ;;  %v5245_v25 = vrot.slane %v5229_v47, %v17703_v57  ;;  %v5694_v54 = vcombine.high %v5686_v16, %v5686_v16  ;;  %v5252_v11 = vrot.slane %v5230_v14, %v17703_v57 }
 0x4ff   : > { %v7923_v13 = vcombine.low %v7915_v7, %v7922_v21  ;;  %v5695_v22 = vcombine.high %v5693_v43, %v5693_v43  ;;  %v5709_v51 = vrot.slane %v5693_v43, %v17703_v57  ;;  %v5259_v12 = vrot.slane %v5231_v28, %v17703_v57 }
 0x500   : > { %8243 = vrot.lane.b32.xlu1 %v7940_v3, %s9500_s13  ;;  %v5261_v55 = vcombine.high %v5245_v25, %v5245_v25  ;;  %v5260_v20 = vcombine.high %v5238_v8, %v5238_v8  ;;  %v5702_v50 = vrot.slane %v5686_v16, %v17703_v57  ;;  %v5262_v10 = vcombine.high %v5252_v11, %v5252_v11 }
 0x501   : > { %8241 = vrot.lane.b32.xlu0 %v7923_v13, %s9500_s13  ;;  %v5723_v9 = vrot.slane %v5695_v22, %v17703_v57  ;;  %v5725_v52 = vcombine.high %v5709_v51, %v5709_v51  ;;  %v6022_v56 = vrot.slane %v5709_v51, %v17713_v1  ;;  %v5263_v2 = vcombine.high %v5259_v12, %v5259_v12 }
 0x502   : > { %v5716_v39 = vrot.slane %v5694_v54, %v17703_v57  ;;  %v5724_v32 = vcombine.high %v5702_v50, %v5702_v50  ;;  %v6006_v35 = vrot.slane %v5702_v50, %v17713_v1  ;;  %v16010_v15 = vpop.f32.mrb[14].mxu0  ;;  %v5007_v43 = vadd.f32 %v15585_v38, %v15577_v17 }
 0x503   : > { %v5727_v58 = vcombine.high %v5723_v9, %v5723_v9  ;;  %v6026_v37 = vrot.slane %v5723_v9, %v17713_v1  ;;  %v6030_v62 = vrot.slane %v5725_v52, %v17713_v1  ;;  %v6232_v31 = vsel %vm6195_vm14, %v5245_v25, %v6022_v56  ;;  %v16015_v41 = vpop.f32.mrb[15].mxu0 }
 0x504   : > { %v5726_v53 = vcombine.high %v5716_v39, %v5716_v39  ;;  %v6010_v7 = vrot.slane %v5716_v39, %v17713_v1  ;;  %v6014_v19 = vrot.slane %v5724_v32, %v17713_v1  ;;  %v6228_v63 = vsel %vm6195_vm14, %v5238_v8, %v6006_v35 }
 0x505   : > { %v6034_v47 = vrot.slane %v5727_v58, %v17713_v1  ;;  %v6233_v16 = vsel %vm6195_vm14, %v5259_v12, %v6026_v37  ;;  %v6234_v21 = vsel %vm6195_vm14, %v5261_v55, %v6030_v62  ;;  %v6464_v13 = vcombine.high %v4991_v4, %v4991_v4 }
 0x506   : > { %v7958_v14 = vcombine.low %v6232_v31, %v6233_v16  ;;  %v6018_v3 = vrot.slane %v5726_v53, %v17713_v1  ;;  %v6229_v28 = vsel %vm6195_vm14, %v5252_v11, %v6010_v7  ;;  %v6230_v25 = vsel %vm6195_vm14, %v5260_v20, %v6014_v19 }
 0x507   : > { %v6235_v8 = vsel %vm6195_vm14, %v5263_v2, %v6034_v47  ;;  %v7941_v54 = vcombine.low %v6228_v63, %v6229_v28  ;;  %v6928_v22 = vcombine.high %v5007_v43, %v5007_v43  ;;  %v6471_v50 = vrot.slane %v4991_v4, %v17703_v57 }
 0x508   : > { %v7959_v51 = vcombine.low %v6234_v21, %v6235_v8  ;;  %v7966_v12 = vrot.slane %v7958_v14, %v17714_v61  ;;  %v6231_v55 = vsel %vm6195_vm14, %v5262_v10, %v6018_v3  ;;  %v6478_v9 = vrot.slane %v6464_v13, %v17703_v57 }
 0x509   : > { %v7942_v17 = vcombine.low %v6230_v25, %v6231_v55  ;;  %v7949_v38 = vrot.slane %v7941_v54, %v17714_v61  ;;  %v6942_v11 = vrot.slane %v6928_v22, %v17703_v57  ;;  %v6479_v52 = vcombine.high %v6471_v50, %v6471_v50 }
 0x50a   : > { %v7973_v20 = vrot.slane %v7959_v51, %v17714_v61  ;;  %v6487_v56 = vrot.slane %v6471_v50, %v17703_v57  ;;  %v6935_v2 = vrot.slane %v5007_v43, %v17703_v57  ;;  %v6480_v32 = vcombine.high %v6478_v9, %v6478_v9 }
 0x50b   : > { %v7956_v39 = vrot.slane %v7942_v17, %v17714_v61  ;;  %v6494_v10 = vrot.slane %v6478_v9, %v17703_v57  ;;  %v6944_v4 = vcombine.high %v6942_v11, %v6942_v11  ;;  %v6958_v58 = vrot.slane %v6942_v11, %v17703_v57 }
 0x50c   : > { %v7974_v35 = vcombine.low %v7966_v12, %v7973_v20  ;;  %v6501_v37 = vrot.slane %v6479_v52, %v17703_v57  ;;  %v6509_v62 = vcombine.high %v6487_v56, %v6487_v56  ;;  %v6508_v53 = vrot.slane %v6480_v32, %v17703_v57 }
 0x50d   : > { %v7957_v31 = vcombine.low %v7949_v38, %v7956_v39  ;;  %v6510_v7 = vcombine.high %v6494_v10, %v6494_v10  ;;  %v6972_v19 = vrot.slane %v6944_v4, %v17703_v57  ;;  %v6974_v63 = vcombine.high %v6958_v58, %v6958_v58  ;;  %v16043_v43 = vpop.f32.mrb[16].mxu0 }
 0x50e   : > { %8247 = vrot.lane.b32.xlu1 %v7974_v35, %s9500_s13  ;;  %v7271_v47 = vrot.slane %v6958_v58, %v17713_v1  ;;  %v6511_v16 = vcombine.high %v6501_v37, %v6501_v37  ;;  %v6943_v21 = vcombine.high %v6935_v2, %v6935_v2  ;;  %v6512_v14 = vcombine.high %v6508_v53, %v6508_v53  ;;  %v16048_v8 = vpop.f32.mrb[17].mxu0 }
 0x50f   : > { %8245 = vrot.lane.b32.xlu0 %v7957_v31, %s9500_s13  ;;  %v6976_v3 = vcombine.high %v6972_v19, %v6972_v19  ;;  %v7275_v28 = vrot.slane %v6972_v19, %v17713_v1  ;;  %v6951_v25 = vrot.slane %v6935_v2, %v17703_v57  ;;  %v7279_v54 = vrot.slane %v6974_v63, %v17713_v1 }
 0x510   : > { %v7480_v13 = vsel %vm6195_vm14, %v6494_v10, %v7271_v47  ;;  %v6965_v22 = vrot.slane %v6943_v21, %v17703_v57  ;;  %v4920_v51 = vadd.f32 %v15549_v40, %v15561_v48  ;;  %v4936_v48 = vadd.f32 %v15565_v29, %v15549_v40 }
 0x511   : > { %v7283_v12 = vrot.slane %v6976_v3, %v17713_v1  ;;  %v7481_v55 = vsel %vm6195_vm14, %v6508_v53, %v7275_v28  ;;  %v6973_v50 = vcombine.high %v6951_v25, %v6951_v25  ;;  %v7255_v17 = vrot.slane %v6951_v25, %v17713_v1 }
 0x512   : > { %v7482_v38 = vsel %vm6195_vm14, %v6510_v7, %v7279_v54  ;;  %v7992_v9 = vcombine.low %v7480_v13, %v7481_v55  ;;  %v6975_v11 = vcombine.high %v6965_v22, %v6965_v22  ;;  %v7259_v20 = vrot.slane %v6965_v22, %v17713_v1 }
 0x513   : > { %v7483_v52 = vsel %vm6195_vm14, %v6512_v14, %v7283_v12  ;;  %v7263_v2 = vrot.slane %v6973_v50, %v17713_v1  ;;  %v7476_v39 = vsel %vm6195_vm14, %v6487_v56, %v7255_v17  ;;  %v5264_v53 = vcombine.high %v4920_v51, %v4920_v51 }
 0x514   : > { %v7993_v32 = vcombine.low %v7482_v38, %v7483_v52  ;;  %v8000_v10 = vrot.slane %v7992_v9, %v17714_v61  ;;  %v7267_v4 = vrot.slane %v6975_v11, %v17713_v1  ;;  %v7477_v35 = vsel %vm6195_vm14, %v6501_v37, %v7259_v20 }
 0x515   : > { %v7478_v58 = vsel %vm6195_vm14, %v6509_v62, %v7263_v2  ;;  %v7975_v31 = vcombine.low %v7476_v39, %v7477_v35  ;;  %v5728_v7 = vcombine.high %v4936_v48, %v4936_v48  ;;  %v5271_v56 = vrot.slane %v4920_v51, %v17703_v57 }
 0x516   : > { %v8007_v19 = vrot.slane %v7993_v32, %v17714_v61  ;;  %v7479_v63 = vsel %vm6195_vm14, %v6511_v16, %v7267_v4  ;;  %v5735_v40 = vrot.slane %v4936_v48, %v17703_v57  ;;  %v5278_v21 = vrot.slane %v5264_v53, %v17703_v57 }
 0x517   : > { %v7976_v29 = vcombine.low %v7478_v58, %v7479_v63  ;;  %v7983_v47 = vrot.slane %v7975_v31, %v17714_v61  ;;  %v5742_v37 = vrot.slane %v5728_v7, %v17703_v57  ;;  %v5279_v62 = vcombine.high %v5271_v56, %v5271_v56 }
 0x518   : > { %v8008_v14 = vcombine.low %v8000_v10, %v8007_v19  ;;  %v5287_v3 = vrot.slane %v5271_v56, %v17703_v57  ;;  %v5743_v28 = vcombine.high %v5735_v40, %v5735_v40  ;;  %v5280_v54 = vcombine.high %v5278_v21, %v5278_v21 }
 0x519   : > { %v7990_v25 = vrot.slane %v7976_v29, %v17714_v61  ;;  %v5294_v16 = vrot.slane %v5278_v21, %v17703_v57  ;;  %v5744_v13 = vcombine.high %v5742_v37, %v5742_v37  ;;  %v5758_v22 = vrot.slane %v5742_v37, %v17703_v57 }
 0x51a   : > { %8251 = vrot.lane.b32.xlu1 %v8008_v14, %s9500_s13  ;;  %v5301_v51 = vrot.slane %v5279_v62, %v17703_v57  ;;  %v5309_v12 = vcombine.high %v5287_v3, %v5287_v3  ;;  %v5751_v55 = vrot.slane %v5735_v40, %v17703_v57  ;;  %v5308_v17 = vrot.slane %v5280_v54, %v17703_v57  ;;  %v16087_v39 = vpop.f32.mrb[18].mxu0 }
 0x51b   : > { %v7991_v50 = vcombine.low %v7983_v47, %v7990_v25  ;;  %v5310_v38 = vcombine.high %v5294_v16, %v5294_v16  ;;  %v5772_v9 = vrot.slane %v5744_v13, %v17703_v57  ;;  %v5774_v11 = vcombine.high %v5758_v22, %v5758_v22  ;;  %v16091_v35 = vpop.f32.mrb[19].mxu0 }
 0x51c   : > { %v6054_v20 = vrot.slane %v5758_v22, %v17713_v1  ;;  %v5311_v52 = vcombine.high %v5301_v51, %v5301_v51  ;;  %v5765_v2 = vrot.slane %v5743_v28, %v17703_v57  ;;  %v5312_v48 = vcombine.high %v5308_v17, %v5308_v17 }
 0x51d   : > { %8249 = vrot.lane.b32.xlu0 %v7991_v50, %s9500_s13  ;;  %v5776_v32 = vcombine.high %v5772_v9, %v5772_v9  ;;  %v6058_v10 = vrot.slane %v5772_v9, %v17713_v1  ;;  %v5773_v4 = vcombine.high %v5751_v55, %v5751_v55  ;;  %v6062_v58 = vrot.slane %v5774_v11, %v17713_v1 }
 0x51e   : > { %v6240_v31 = vsel %vm6195_vm14, %v5294_v16, %v6054_v20  ;;  %v5775_v53 = vcombine.high %v5765_v2, %v5765_v2  ;;  %v6038_v7 = vrot.slane %v5751_v55, %v17713_v1  ;;  %v6042_v56 = vrot.slane %v5765_v2, %v17713_v1 }
 0x51f   : > { %v6066_v19 = vrot.slane %v5776_v32, %v17713_v1  ;;  %v6241_v63 = vsel %vm6195_vm14, %v5308_v17, %v6058_v10  ;;  %v6046_v40 = vrot.slane %v5773_v4, %v17713_v1  ;;  %v6242_v29 = vsel %vm6195_vm14, %v5310_v38, %v6062_v58  ;;  %v17717_v38 = vld [vmem:[#allocation34_spill] sm:$0xff] }
 0x520   : > { %v8026_v47 = vcombine.low %v6240_v31, %v6241_v63  ;;  %v6050_v21 = vrot.slane %v5775_v53, %v17713_v1  ;;  %v6236_v37 = vsel %vm6195_vm14, %v5287_v3, %v6038_v7  ;;  %v6237_v62 = vsel %vm6195_vm14, %v5301_v51, %v6042_v56 }
 0x521   : > { %v6243_v14 = vsel %vm6195_vm14, %v5312_v48, %v6066_v19  ;;  %v6238_v28 = vsel %vm6195_vm14, %v5309_v12, %v6046_v40  ;;  %v4992_v25 = vadd.f32 %v15620_v0, %v15633_v23  ;;  %v8009_v22 = vcombine.low %v6236_v37, %v6237_v62 }
 0x522   : > { %v8027_v54 = vcombine.low %v6242_v29, %v6243_v14  ;;  %v8034_v16 = vrot.slane %v8026_v47, %v17714_v61  ;;  %v6239_v13 = vsel %vm6195_vm14, %v5311_v52, %v6050_v21  ;;  %v5008_v50 = vadd.f32 %v15637_v44, %v15620_v0 }
 0x523   : > { %v8010_v55 = vcombine.low %v6238_v28, %v6239_v13  ;;  %v6513_v3 = vcombine.high %v4992_v25, %v4992_v25  ;;  %v6520_v17 = vrot.slane %v4992_v25, %v17703_v57  ;;  %v8017_v12 = vrot.slane %v8009_v22, %v17714_v61 }
 0x524   : > { %v8041_v51 = vrot.slane %v8027_v54, %v17714_v61  ;;  %v16117_v23 = vadd.f32 %v15604_v36, %v15616_v59  ;;  %v16121_v9 = vadd.f32 %v17717_v38, %v15604_v36  ;;  %v6977_v0 = vcombine.high %v5008_v50, %v5008_v50 }
 0x525   : > { %v8024_v11 = vrot.slane %v8010_v55, %v17714_v61  ;;  %v6527_v20 = vrot.slane %v6513_v3, %v17703_v57  ;;  %v6528_v44 = vcombine.high %v6520_v17, %v6520_v17  ;;  %v6536_v2 = vrot.slane %v6520_v17, %v17703_v57 }
 0x526   : > { %v8042_v52 = vcombine.low %v8034_v16, %v8041_v51  ;;  %v6984_v48 = vrot.slane %v5008_v50, %v17703_v57  ;;  %v5313_v32 = vcombine.high %v16117_v23, %v16117_v23  ;;  %v6991_v36 = vrot.slane %v6977_v0, %v17703_v57 }
 0x527   : > { %v8025_v59 = vcombine.low %v8017_v12, %v8024_v11  ;;  %v6529_v10 = vcombine.high %v6527_v20, %v6527_v20  ;;  %v6543_v4 = vrot.slane %v6527_v20, %v17703_v57  ;;  %v6550_v58 = vrot.slane %v6528_v44, %v17703_v57 }
 0x528   : > { %8255 = vrot.lane.b32.xlu1 %v8042_v52, %s9500_s13  ;;  %v6558_v31 = vcombine.high %v6536_v2, %v6536_v2  ;;  %v6992_v53 = vcombine.high %v6984_v48, %v6984_v48  ;;  %v7000_v7 = vrot.slane %v6984_v48, %v17703_v57  ;;  %v6993_v56 = vcombine.high %v6991_v36, %v6991_v36 }
 0x529   : > { %8253 = vrot.lane.b32.xlu0 %v8025_v59, %s9500_s13  ;;  %v6557_v19 = vrot.slane %v6529_v10, %v17703_v57  ;;  %v6559_v63 = vcombine.high %v6543_v4, %v6543_v4  ;;  %v7007_v40 = vrot.slane %v6991_v36, %v17703_v57  ;;  %v6560_v29 = vcombine.high %v6550_v58, %v6550_v58 }
 0x52a   : > { %v7014_v47 = vrot.slane %v6992_v53, %v17703_v57  ;;  %v7022_v21 = vcombine.high %v7000_v7, %v7000_v7  ;;  %v7287_v37 = vrot.slane %v7000_v7, %v17713_v1  ;;  %v7021_v62 = vrot.slane %v6993_v56, %v17703_v57 }
 0x52b   : > { %v6561_v14 = vcombine.high %v6557_v19, %v6557_v19  ;;  %v7023_v28 = vcombine.high %v7007_v40, %v7007_v40  ;;  %v7303_v25 = vrot.slane %v7007_v40, %v17713_v1  ;;  %v5327_v11 = vrot.slane %v5313_v32, %v17703_v57 }
 0x52c   : > { %v7024_v54 = vcombine.high %v7014_v47, %v7014_v47  ;;  %v7291_v16 = vrot.slane %v7014_v47, %v17713_v1  ;;  %v7295_v13 = vrot.slane %v7022_v21, %v17713_v1  ;;  %v7484_v22 = vsel %vm6195_vm14, %v6536_v2, %v7287_v37 }
 0x52d   : > { %v7025_v55 = vcombine.high %v7021_v62, %v7021_v62  ;;  %v7307_v50 = vrot.slane %v7021_v62, %v17713_v1  ;;  %v7311_v3 = vrot.slane %v7023_v28, %v17713_v1  ;;  %v7488_v17 = vsel %vm6195_vm14, %v6543_v4, %v7303_v25  ;;  %v17718_v62 = vld [vmem:[#allocation84_spill] sm:$0xff]  ;;  %v17719_v28 = vld [vmem:[#allocation75_spill] sm:$0xff] }
 0x52e   : > { %v7299_v51 = vrot.slane %v7024_v54, %v17713_v1  ;;  %v7485_v12 = vsel %vm6195_vm14, %v6550_v58, %v7291_v16  ;;  %v7486_v38 = vsel %vm6195_vm14, %v6558_v31, %v7295_v13  ;;  %v5329_v59 = vcombine.high %v5327_v11, %v5327_v11  ;;  %v16156_v4 = vpop.f32.mrb[20].mxu0  ;;  %v17720_v54 = vld [vmem:[#allocation80_spill] sm:$0xff] }
 0x52f   : > { %v7315_v20 = vrot.slane %v7025_v55, %v17713_v1  ;;  %v7489_v0 = vsel %vm6195_vm14, %v6557_v19, %v7307_v50  ;;  %v7490_v44 = vsel %vm6195_vm14, %v6559_v63, %v7311_v3  ;;  %v8043_v52 = vcombine.low %v7484_v22, %v7485_v12  ;;  %v16162_v53 = vpop.f32.mrb[21].mxu0 }
 0x530   : > { %v8060_v2 = vcombine.low %v7488_v17, %v7489_v0  ;;  %v7487_v48 = vsel %vm6195_vm14, %v6560_v29, %v7299_v51  ;;  %v5343_v10 = vrot.slane %v5327_v11, %v17703_v57  ;;  %v5777_v31 = vcombine.high %v16121_v9, %v16121_v9 }
 0x531   : > { %v7491_v36 = vsel %vm6195_vm14, %v6561_v14, %v7315_v20  ;;  %v8044_v58 = vcombine.low %v7486_v38, %v7487_v48  ;;  %v8051_v32 = vrot.slane %v8043_v52, %v17714_v61  ;;  %v5357_v63 = vrot.slane %v5329_v59, %v17703_v57 }
 0x532   : > { %v8061_v7 = vcombine.low %v7490_v44, %v7491_v36  ;;  %v8068_v19 = vrot.slane %v8060_v2, %v17714_v61  ;;  %v5359_v56 = vcombine.high %v5343_v10, %v5343_v10  ;;  %v5791_v29 = vrot.slane %v5777_v31, %v17703_v57 }
 0x533   : > { %v8058_v40 = vrot.slane %v8044_v58, %v17714_v61  ;;  %v5320_v47 = vrot.slane %v16117_v23, %v17703_v57  ;;  %v5784_v21 = vrot.slane %v16121_v9, %v17703_v57  ;;  %v5361_v14 = vcombine.high %v5357_v63, %v5357_v63 }
 0x534   : > { %v8075_v37 = vrot.slane %v8061_v7, %v17714_v61  ;;  %v4993_v25 = vadd.f32 %v17719_v28, %v17718_v62  ;;  %v5009_v16 = vadd.f32 %v17720_v54, %v17719_v28  ;;  %v5793_v22 = vcombine.high %v5791_v29, %v5791_v29 }
 0x535   : > { %v8059_v13 = vcombine.low %v8051_v32, %v8058_v40  ;;  %v5807_v55 = vrot.slane %v5791_v29, %v17703_v57  ;;  %v5328_v50 = vcombine.high %v5320_v47, %v5320_v47  ;;  %v5336_v23 = vrot.slane %v5320_v47, %v17703_v57 }
 0x536   : > { %v8076_v3 = vcombine.low %v8068_v19, %v8075_v37  ;;  %v5792_v17 = vcombine.high %v5784_v21, %v5784_v21  ;;  %v5800_v9 = vrot.slane %v5784_v21, %v17703_v57  ;;  %v5821_v51 = vrot.slane %v5793_v22, %v17703_v57 }
 0x537   : > { %8257 = vrot.lane.b32.xlu0 %v8059_v13, %s9500_s13  ;;  %v5823_v12 = vcombine.high %v5807_v55, %v5807_v55  ;;  %v6086_v38 = vrot.slane %v5807_v55, %v17713_v1  ;;  %v5350_v11 = vrot.slane %v5328_v50, %v17703_v57  ;;  %v5358_v20 = vcombine.high %v5336_v23, %v5336_v23 }
 0x538   : > { %8259 = vrot.lane.b32.xlu1 %v8076_v3, %s9500_s13  ;;  %v5814_v0 = vrot.slane %v5792_v17, %v17703_v57  ;;  %v5822_v44 = vcombine.high %v5800_v9, %v5800_v9  ;;  %v6070_v52 = vrot.slane %v5800_v9, %v17713_v1  ;;  %v5825_v2 = vcombine.high %v5821_v51, %v5821_v51 }
 0x539   : > { %v6090_v48 = vrot.slane %v5821_v51, %v17713_v1  ;;  %v6094_v59 = vrot.slane %v5823_v12, %v17713_v1  ;;  %v6248_v36 = vsel %vm6195_vm14, %v5343_v10, %v6086_v38  ;;  %v5360_v58 = vcombine.high %v5350_v11, %v5350_v11 }
 0x53a   : > { %v5824_v32 = vcombine.high %v5814_v0, %v5814_v0  ;;  %v6074_v31 = vrot.slane %v5814_v0, %v17713_v1  ;;  %v6078_v7 = vrot.slane %v5822_v44, %v17713_v1  ;;  %v6098_v19 = vrot.slane %v5825_v2, %v17713_v1 }
 0x53b   : > { %v6249_v40 = vsel %vm6195_vm14, %v5357_v63, %v6090_v48  ;;  %v6250_v29 = vsel %vm6195_vm14, %v5359_v56, %v6094_v59  ;;  %v6244_v47 = vsel %vm6195_vm14, %v5336_v23, %v6070_v52  ;;  %v6562_v13 = vcombine.high %v4993_v25, %v4993_v25 }
 0x53c   : > { %v8094_v21 = vcombine.low %v6248_v36, %v6249_v40  ;;  %v6082_v37 = vrot.slane %v5824_v32, %v17713_v1  ;;  %v6245_v62 = vsel %vm6195_vm14, %v5350_v11, %v6074_v31  ;;  %v6246_v10 = vsel %vm6195_vm14, %v5358_v20, %v6078_v7 }
 0x53d   : > { %v6251_v28 = vsel %vm6195_vm14, %v5361_v14, %v6098_v19  ;;  %v8077_v54 = vcombine.low %v6244_v47, %v6245_v62  ;;  %v7026_v22 = vcombine.high %v5009_v16, %v5009_v16  ;;  %v6569_v56 = vrot.slane %v4993_v25, %v17703_v57 }
 0x53e   : > { %v8095_v55 = vcombine.low %v6250_v29, %v6251_v28  ;;  %v8102_v50 = vrot.slane %v8094_v21, %v17714_v61  ;;  %v6247_v63 = vsel %vm6195_vm14, %v5360_v58, %v6082_v37  ;;  %v6576_v17 = vrot.slane %v6562_v13, %v17703_v57  ;;  %v17722_v13 = vld [vmem:[#allocation61_spill] sm:$0xff] }
 0x53f   : > { %v8078_v3 = vcombine.low %v6246_v10, %v6247_v63  ;;  %v8085_v23 = vrot.slane %v8077_v54, %v17714_v61  ;;  %v7040_v9 = vrot.slane %v7026_v22, %v17703_v57  ;;  %v6577_v14 = vcombine.high %v6569_v56, %v6569_v56  ;;  %v17721_v54 = vld [vmem:[#allocation73_spill] sm:$0xff] }
 0x540   : > { %v8109_v51 = vrot.slane %v8095_v55, %v17714_v61  ;;  %v6585_v12 = vrot.slane %v6569_v56, %v17703_v57  ;;  %v7033_v38 = vrot.slane %v5009_v16, %v17703_v57  ;;  %v6578_v20 = vcombine.high %v6576_v17, %v6576_v17 }
 0x541   : > { %v8092_v11 = vrot.slane %v8078_v3, %v17714_v61  ;;  %v6592_v0 = vrot.slane %v6576_v17, %v17703_v57  ;;  %v7042_v25 = vcombine.high %v7040_v9, %v7040_v9  ;;  %v7056_v52 = vrot.slane %v7040_v9, %v17703_v57 }
 0x542   : > { %v8110_v44 = vcombine.low %v8102_v50, %v8109_v51  ;;  %v6599_v2 = vrot.slane %v6577_v14, %v17703_v57  ;;  %v6607_v48 = vcombine.high %v6585_v12, %v6585_v12  ;;  %v6606_v36 = vrot.slane %v6578_v20, %v17703_v57  ;;  %v16234_v14 = vpop.permute.xlu1 %8217 }
 0x543   : > { %v8093_v59 = vcombine.low %v8085_v23, %v8092_v11  ;;  %v6608_v58 = vcombine.high %v6592_v0, %v6592_v0  ;;  %v7070_v32 = vrot.slane %v7042_v25, %v17703_v57  ;;  %v7072_v16 = vcombine.high %v7056_v52, %v7056_v52  ;;  %v16220_v37 = vpop.f32.mrb[22].mxu0 }
 0x544   : > { %8263 = vrot.lane.b32.xlu1 %v8110_v44, %s9500_s13  ;;  %v7335_v31 = vrot.slane %v7056_v52, %v17713_v1  ;;  %v6609_v7 = vcombine.high %v6599_v2, %v6599_v2  ;;  %v7041_v19 = vcombine.high %v7033_v38, %v7033_v38  ;;  %v6610_v40 = vcombine.high %v6606_v36, %v6606_v36  ;;  %v16227_v55 = vpop.f32.mrb[23].mxu0  ;;  %v16241_v44 = vpop.permute.xlu0 %8213 }
 0x545   : > { %8261 = vrot.lane.b32.xlu0 %v8093_v59, %s9500_s13  ;;  %v7074_v29 = vcombine.high %v7070_v32, %v7070_v32  ;;  %v7339_v47 = vrot.slane %v7070_v32, %v17713_v1  ;;  %v7049_v21 = vrot.slane %v7033_v38, %v17703_v57  ;;  %v7343_v62 = vrot.slane %v7072_v16, %v17713_v1 }
 0x546   : > { %v7496_v10 = vsel %vm6195_vm14, %v6592_v0, %v7335_v31  ;;  %v7063_v28 = vrot.slane %v7041_v19, %v17703_v57  ;;  %v4922_v22 = vadd.f32 %v17722_v13, %v17721_v54  ;;  %v17723_v0 = vld [vmem:[#allocation66_spill] sm:$0xff] }
 0x547   : > { %v7347_v50 = vrot.slane %v7074_v29, %v17713_v1  ;;  %v7497_v63 = vsel %vm6195_vm14, %v6606_v36, %v7339_v47  ;;  %v7071_v56 = vcombine.high %v7049_v21, %v7049_v21  ;;  %v7319_v3 = vrot.slane %v7049_v21, %v17713_v1 }
 0x548   : > { %v7498_v23 = vsel %vm6195_vm14, %v6608_v58, %v7343_v62  ;;  %v8128_v17 = vcombine.low %v7496_v10, %v7497_v63  ;;  %v7073_v9 = vcombine.high %v7063_v28, %v7063_v28  ;;  %v7323_v51 = vrot.slane %v7063_v28, %v17713_v1 }
 0x549   : > { %v7499_v38 = vsel %vm6195_vm14, %v6610_v40, %v7347_v50  ;;  %v7327_v11 = vrot.slane %v7071_v56, %v17713_v1  ;;  %v7492_v20 = vsel %vm6195_vm14, %v6585_v12, %v7319_v3  ;;  %v4938_v25 = vadd.f32 %v17723_v0, %v17722_v13  ;;  %v16255_v50 = vpop.permute.xlu1 %8219  ;;  %v16259_v3 = vpop.permute.xlu0 %8221 }
 0x54a   : > { %v8129_v52 = vcombine.low %v7498_v23, %v7499_v38  ;;  %v8136_v59 = vrot.slane %v8128_v17, %v17714_v61  ;;  %v7331_v36 = vrot.slane %v7073_v9, %v17713_v1  ;;  %v7493_v58 = vsel %vm6195_vm14, %v6599_v2, %v7323_v51 }
 0x54b   : > { %v7494_v32 = vsel %vm6195_vm14, %v6607_v48, %v7327_v11  ;;  %v8111_v16 = vcombine.low %v7492_v20, %v7493_v58  ;;  %v5362_v31 = vcombine.high %v4922_v22, %v4922_v22  ;;  %v5826_v19 = vcombine.high %v4938_v25, %v4938_v25 }
 0x54c   : > { %v8143_v40 = vrot.slane %v8129_v52, %v17714_v61  ;;  %v7495_v12 = vsel %vm6195_vm14, %v6609_v7, %v7331_v36  ;;  %v5369_v29 = vrot.slane %v4922_v22, %v17703_v57  ;;  %v5833_v47 = vrot.slane %v4938_v25, %v17703_v57 }
 0x54d   : > { %v8112_v21 = vcombine.low %v7494_v32, %v7495_v12  ;;  %v8119_v62 = vrot.slane %v8111_v16, %v17714_v61  ;;  %v5376_v10 = vrot.slane %v5362_v31, %v17703_v57  ;;  %v5840_v2 = vrot.slane %v5826_v19, %v17703_v57 }
 0x54e   : > { %v8144_v28 = vcombine.low %v8136_v59, %v8143_v40  ;;  %v5377_v48 = vcombine.high %v5369_v29, %v5369_v29  ;;  %v5385_v54 = vrot.slane %v5369_v29, %v17703_v57  ;;  %v5841_v13 = vcombine.high %v5833_v47, %v5833_v47 }
 0x54f   : > { %v8126_v7 = vrot.slane %v8112_v21, %v17714_v61  ;;  %v5378_v63 = vcombine.high %v5376_v10, %v5376_v10  ;;  %v5392_v22 = vrot.slane %v5376_v10, %v17703_v57  ;;  %v5842_v56 = vcombine.high %v5840_v2, %v5840_v2 }
 0x550   : > { %8267 = vrot.lane.b32.xlu1 %v8144_v28, %s9500_s13  ;;  %v5856_v23 = vrot.slane %v5840_v2, %v17703_v57  ;;  %v5399_v17 = vrot.slane %v5377_v48, %v17703_v57  ;;  %v5407_v9 = vcombine.high %v5385_v54, %v5385_v54  ;;  %v5849_v51 = vrot.slane %v5833_v47, %v17703_v57  ;;  %v16274_v47 = vpop.permute.xlu1 %8223  ;;  %v16280_v28 = vpop.permute.xlu0 %8215 }
 0x551   : > { %v8127_v38 = vcombine.low %v8119_v62, %v8126_v7  ;;  %v5406_v11 = vrot.slane %v5378_v63, %v17703_v57  ;;  %v5408_v20 = vcombine.high %v5392_v22, %v5392_v22  ;;  %v5870_v0 = vrot.slane %v5842_v56, %v17703_v57 }
 0x552   : > { %v5872_v25 = vcombine.high %v5856_v23, %v5856_v23  ;;  %v6118_v52 = vrot.slane %v5856_v23, %v17713_v1  ;;  %v5409_v59 = vcombine.high %v5399_v17, %v5399_v17  ;;  %v5863_v36 = vrot.slane %v5841_v13, %v17703_v57 }
 0x553   : > { %8265 = vrot.lane.b32.xlu0 %v8127_v38, %s9500_s13  ;;  %v5410_v58 = vcombine.high %v5406_v11, %v5406_v11  ;;  %v5874_v32 = vcombine.high %v5870_v0, %v5870_v0  ;;  %v6122_v16 = vrot.slane %v5870_v0, %v17713_v1  ;;  %v5871_v31 = vcombine.high %v5849_v51, %v5849_v51  ;;  %v17725_v38 = vld [vmem:[#allocation63_spill] sm:$0xff] }
 0x554   : > { %v6126_v19 = vrot.slane %v5872_v25, %v17713_v1  ;;  %v6256_v40 = vsel %vm6195_vm14, %v5392_v22, %v6118_v52  ;;  %v5873_v12 = vcombine.high %v5863_v36, %v5863_v36  ;;  %v6102_v29 = vrot.slane %v5849_v51, %v17713_v1  ;;  %v17724_v51 = vld [vmem:[#allocation103_spill] sm:$0xff] }
 0x555   : > { %v6130_v21 = vrot.slane %v5874_v32, %v17713_v1  ;;  %v6257_v62 = vsel %vm6195_vm14, %v5406_v11, %v6122_v16  ;;  %v6106_v10 = vrot.slane %v5863_v36, %v17713_v1  ;;  %v6110_v2 = vrot.slane %v5871_v31, %v17713_v1  ;;  %v17726_v32 = vld [vmem:[#allocation105_spill] sm:$0xff]  ;;  %v16297_v31 = vld [vmem:[#allocation10] ss:$0 sm:$0xff] }
 0x556   : > { %v6258_v48 = vsel %vm6195_vm14, %v5408_v20, %v6126_v19  ;;  %v8162_v13 = vcombine.low %v6256_v40, %v6257_v62  ;;  %v6114_v7 = vrot.slane %v5873_v12, %v17713_v1  ;;  %v6252_v63 = vsel %vm6195_vm14, %v5385_v54, %v6102_v29  ;;  %v16303_v40 = vpop.permute.xlu1 %8227 }
 0x557   : > { %v6259_v22 = vsel %vm6195_vm14, %v5410_v58, %v6130_v21  ;;  %v6253_v56 = vsel %vm6195_vm14, %v5399_v17, %v6106_v10  ;;  %v6254_v23 = vsel %vm6195_vm14, %v5407_v9, %v6110_v2  ;;  %v4994_v11 = vadd.f32 %v17725_v38, %v17724_v51  ;;  %v16307_v10 = vpop.permute.xlu0 %8225 }
 0x558   : > { %v8163_v0 = vcombine.low %v6258_v48, %v6259_v22  ;;  %v8170_v25 = vrot.slane %v8162_v13, %v17714_v61  ;;  %v6255_v52 = vsel %vm6195_vm14, %v5409_v59, %v6114_v7  ;;  %v8145_v20 = vcombine.low %v6252_v63, %v6253_v56 }
 0x559   : > { %v8146_v36 = vcombine.low %v6254_v23, %v6255_v52  ;;  %v5010_v16 = vadd.f32 %v17726_v32, %v17725_v38  ;;  %v6611_v54 = vcombine.high %v4994_v11, %v4994_v11  ;;  %v6618_v58 = vrot.slane %v4994_v11, %v17703_v57 }
 0x55a   : > { %v8177_v17 = vrot.slane %v8163_v0, %v17714_v61  ;;  %v8153_v9 = vrot.slane %v8145_v20, %v17714_v61  ;;  %v3389_v19 = vadd.f32 %v16297_v31, %v15924_v60  ;;  %v3384_v59 = vadd.f32 %v16297_v31, %v15928_v45 }
 0x55b   : > { %v8160_v12 = vrot.slane %v8146_v36, %v17714_v61  ;;  %v6625_v29 = vrot.slane %v6611_v54, %v17703_v57  ;;  %v7075_v21 = vcombine.high %v5010_v16, %v5010_v16  ;;  %v6626_v62 = vcombine.high %v6618_v58, %v6618_v58  ;;  %v16323_v54 = vpop.permute.xlu1 %8231 }
 0x55c   : > { %v8178_v2 = vcombine.low %v8170_v25, %v8177_v17  ;;  %v6634_v48 = vrot.slane %v6618_v58, %v17703_v57  ;;  %v7082_v13 = vrot.slane %v5010_v16, %v17703_v57  ;;  %v3543_v60 = vmax.f32 %v3389_v19, 0.0 }
 0x55d   : > { %v8161_v7 = vcombine.low %v8153_v9, %v8160_v12  ;;  %v6627_v63 = vcombine.high %v6625_v29, %v6625_v29  ;;  %v6641_v45 = vrot.slane %v6625_v29, %v17703_v57  ;;  %v7089_v22 = vrot.slane %v7075_v21, %v17703_v57  ;;  %v16327_v12 = vpop.permute.xlu0 %8229 }
 0x55e   : > { %8271 = vrot.lane.b32.xlu1 %v8178_v2, %s9500_s13  ;;  %v6648_v56 = vrot.slane %v6626_v62, %v17703_v57  ;;  %v6656_v23 = vcombine.high %v6634_v48, %v6634_v48  ;;  %v7090_v51 = vcombine.high %v7082_v13, %v7082_v13  ;;  %v7098_v38 = vrot.slane %v7082_v13, %v17703_v57 }
 0x55f   : > { %7510 = vst.msk [vmem:[%s15169_s25 + $0x8] sm:$0xff] %vm7508_vm11, %v3543_v60  ;;  %8269 = vrot.lane.b32.xlu0 %v8161_v7, %s9500_s13  ;;  %v6655_v11 = vrot.slane %v6627_v63, %v17703_v57  ;;  %v6657_v0 = vcombine.high %v6641_v45, %v6641_v45  ;;  %v7091_v25 = vcombine.high %v7089_v22, %v7089_v22 }
 0x560   : > { %v7105_v52 = vrot.slane %v7089_v22, %v17703_v57  ;;  %v6658_v20 = vcombine.high %v6648_v56, %v6648_v56  ;;  %v7112_v36 = vrot.slane %v7090_v51, %v17703_v57  ;;  %v7120_v32 = vcombine.high %v7098_v38, %v7098_v38  ;;  %8311 = vst.msk [vmem:[%s15169_s25 + $0x8] sm:$0xff] %vm8309_vm15, %v16280_v28 }
 0x561   : > { %v7351_v16 = vrot.slane %v7098_v38, %v17713_v1  ;;  %v6659_v58 = vcombine.high %v6655_v11, %v6655_v11  ;;  %v7119_v17 = vrot.slane %v7091_v25, %v17703_v57  ;;  %v3542_v38 = vmax.f32 %v3384_v59, 0.0  ;;  %v8236_v59 = vpop.permute.xlu1 %8235 }
 0x562   : > { %v7121_v9 = vcombine.high %v7105_v52, %v7105_v52  ;;  %v7367_v19 = vrot.slane %v7105_v52, %v17713_v1  ;;  %v7122_v29 = vcombine.high %v7112_v36, %v7112_v36  ;;  %v7355_v21 = vrot.slane %v7112_v36, %v17713_v1 }
 0x563   : > { %v7359_v62 = vrot.slane %v7120_v32, %v17713_v1  ;;  %v7500_v2 = vsel %vm6195_vm14, %v6634_v48, %v7351_v16  ;;  %v7123_v13 = vcombine.high %v7119_v17, %v7119_v17  ;;  %v7371_v60 = vrot.slane %v7119_v17, %v17713_v1  ;;  %7509 = vst.msk [vmem:[%s15169_s25] sm:$0xff] %vm7508_vm11, %v3542_v38 }
 0x564   : > { %v7375_v7 = vrot.slane %v7121_v9, %v17713_v1  ;;  %v7504_v57 = vsel %vm6195_vm14, %v6641_v45, %v7367_v19  ;;  %v7363_v63 = vrot.slane %v7122_v29, %v17713_v1  ;;  %v7501_v22 = vsel %vm6195_vm14, %v6648_v56, %v7355_v21  ;;  %8310 = vst.msk [vmem:[%s15169_s25] sm:$0xff] %vm8309_vm15, %v16241_v44 }
 0x565   : > { %v7502_v51 = vsel %vm6195_vm14, %v6656_v23, %v7359_v62  ;;  %v7379_v25 = vrot.slane %v7123_v13, %v17713_v1  ;;  %v7505_v52 = vsel %vm6195_vm14, %v6655_v11, %v7371_v60  ;;  %v8179_v36 = vcombine.low %v7500_v2, %v7501_v22  ;;  %v8240_v13 = vpop.permute.xlu1 %8239 }
 0x566   : > { %v7506_v48 = vsel %vm6195_vm14, %v6657_v0, %v7375_v7  ;;  %v8196_v32 = vcombine.low %v7504_v57, %v7505_v52  ;;  %v7503_v16 = vsel %vm6195_vm14, %v6658_v20, %v7363_v63  ;;  %v3399_v45 = vadd.f32 %v16297_v31, %v15933_v27  ;;  %v16352_v20 = vpop.permute.xlu0 %8233 }
 0x567   : > { %v3394_v56 = vadd.f32 %v16297_v31, %v15938_v30  ;;  %v7507_v1 = vsel %vm6195_vm14, %v6659_v58, %v7379_v25  ;;  %v8180_v23 = vcombine.low %v7502_v51, %v7503_v16  ;;  %v8187_v11 = vrot.slane %v8179_v36, %v17714_v61 }
 0x568   : > { %v3409_v0 = vadd.f32 %v16297_v31, %v15942_v46  ;;  %v8197_v17 = vcombine.low %v7506_v48, %v7507_v1  ;;  %v8204_v27 = vrot.slane %v8196_v32, %v17714_v61  ;;  %v3545_v30 = vmax.f32 %v3399_v45, 0.0 }
 0x569   : > { %v3544_v9 = vmax.f32 %v3394_v56, 0.0  ;;  %v8194_v19 = vrot.slane %v8180_v23, %v17714_v61  ;;  %v3404_v29 = vadd.f32 %v16297_v31, %v15946_v33  ;;  %v3419_v21 = vadd.f32 %v16297_v31, %v15949_v5 }
 0x56a   : > { %v3547_v58 = vmax.f32 %v3409_v0, 0.0  ;;  %v8211_v46 = vrot.slane %v8197_v17, %v17714_v61  ;;  %7512 = vst.msk [vmem:[%s15169_s25 + $0x18] sm:$0xff] %vm7508_vm11, %v3545_v30  ;;  %v3414_v62 = vadd.f32 %v16297_v31, %v15955_v34  ;;  %v3429_v61 = vadd.f32 %v16297_v31, %v15960_v18 }
 0x56b   : > { %7511 = vst.msk [vmem:[%s15169_s25 + $0x10] sm:$0xff] %vm7508_vm11, %v3544_v9  ;;  %v8195_v33 = vcombine.low %v8187_v11, %v8194_v19  ;;  %v3546_v2 = vmax.f32 %v3404_v29, 0.0  ;;  %v3424_v5 = vadd.f32 %v16297_v31, %v15967_v24  ;;  %v3439_v34 = vadd.f32 %v16297_v31, %v15972_v49 }
 0x56c   : > { %7514 = vst.msk [vmem:[%s15169_s25 + $0x28] sm:$0xff] %vm7508_vm11, %v3547_v58  ;;  %v8212_v44 = vcombine.low %v8204_v27, %v8211_v46  ;;  %v3549_v18 = vmax.f32 %v3419_v21, 0.0  ;;  %v3548_v28 = vmax.f32 %v3414_v62, 0.0  ;;  %v3449_v60 = vadd.f32 %v16297_v31, %v15982_v26 }
 0x56d   : > { %8312 = vst.msk [vmem:[%s15169_s25 + $0x10] sm:$0xff] %vm8309_vm15, %v16234_v14  ;;  %8313 = vst.msk [vmem:[%s15169_s25 + $0x18] sm:$0xff] %vm8309_vm15, %v16255_v50  ;;  %v3551_v14 = vmax.f32 %v3429_v61, 0.0  ;;  %8273 = vrot.lane.b32.xlu0 %v8195_v33, %s9500_s13  ;;  %v3550_v24 = vmax.f32 %v3424_v5, 0.0  ;;  %v3553_v49 = vmax.f32 %v3439_v34, 0.0  ;;  %v3434_v50 = vadd.f32 %v16297_v31, %v15978_v6 }
 0x56e   : > { %8315 = vst.msk [vmem:[%s15169_s25 + $0x28] sm:$0xff] %vm8309_vm15, %v16274_v47  ;;  %v8238_v47 = vpop.permute.xlu0 %8237  ;;  %8275 = vrot.lane.b32.xlu1 %v8212_v44, %s9500_s13  ;;  %v3444_v6 = vadd.f32 %v16297_v31, %v15986_v42  ;;  %v3459_v26 = vadd.f32 %v16297_v31, %v16010_v15  ;;  %v3454_v7 = vadd.f32 %v16297_v31, %v16015_v41  ;;  %v3555_v15 = vmax.f32 %v3449_v60, 0.0 }
 0x56f   : > { %7513 = vst.msk [vmem:[%s15169_s25 + $0x20] sm:$0xff] %vm7508_vm11, %v3546_v2  ;;  %7516 = vst.msk [vmem:[%s15169_s25 + $0x38] sm:$0xff] %vm7508_vm11, %v3549_v18  ;;  %v3552_v42 = vmax.f32 %v3434_v50, 0.0  ;;  %v3464_v41 = vadd.f32 %v16297_v31, %v16048_v8  ;;  %v3489_v63 = vadd.f32 %v16297_v31, %v16156_v4  ;;  %v3484_v4 = vadd.f32 %v16297_v31, %v16162_v53 }
 0x570   : > { %8314 = vst.msk [vmem:[%s15169_s25 + $0x20] sm:$0xff] %vm8309_vm15, %v16259_v3  ;;  %v3469_v3 = vadd.f32 %v16297_v31, %v16043_v43  ;;  %8317 = vst.msk [vmem:[%s15169_s25 + $0x38] sm:$0xff] %vm8309_vm15, %v16303_v40  ;;  %v3479_v43 = vadd.f32 %v16297_v31, %v16087_v39  ;;  %v3554_v40 = vmax.f32 %v3444_v6, 0.0  ;;  %v3499_v22 = vadd.f32 %v16297_v31, %v16220_v37 }
 0x571   : > { %7515 = vst.msk [vmem:[%s15169_s25 + $0x30] sm:$0xff] %vm7508_vm11, %v3548_v28  ;;  %7518 = vst.msk [vmem:[%s15169_s25 + $0x48] sm:$0xff] %vm7508_vm11, %v3551_v14  ;;  %v3558_v8 = vmax.f32 %v3464_v41, 0.0  ;;  %v3494_v51 = vadd.f32 %v16297_v31, %v16227_v55  ;;  %v3563_v25 = vmax.f32 %v3489_v63, 0.0  ;;  %v3562_v37 = vmax.f32 %v3484_v4, 0.0 }
 0x572   : > { %7517 = vst.msk [vmem:[%s15169_s25 + $0x40] sm:$0xff] %vm7508_vm11, %v3550_v24  ;;  %7520 = vst.msk [vmem:[%s15169_s25 + $0x58] sm:$0xff] %vm7508_vm11, %v3553_v49  ;;  %v3559_v57 = vmax.f32 %v3469_v3, 0.0  ;;  %v3561_v39 = vmax.f32 %v3479_v43, 0.0  ;;  %v3565_v55 = vmax.f32 %v3499_v22, 0.0 }
 0x573   : > { %8316 = vst.msk [vmem:[%s15169_s25 + $0x30] sm:$0xff] %vm8309_vm15, %v16307_v10  ;;  %8319 = vst.msk [vmem:[%s15169_s25 + $0x48] sm:$0xff] %vm8309_vm15, %v16323_v54  ;;  %v3557_v10 = vmax.f32 %v3459_v26, 0.0  ;;  %v3556_v54 = vmax.f32 %v3454_v7, 0.0  ;;  %v8242_v38 = vpop.permute.xlu0 %8241 }
 0x574   : > { %8318 = vst.msk [vmem:[%s15169_s25 + $0x40] sm:$0xff] %vm8309_vm15, %v16327_v12  ;;  %8321 = vst.msk [vmem:[%s15169_s25 + $0x58] sm:$0xff] %vm8309_vm15, %v8236_v59  ;;  %v3474_v12 = vadd.f32 %v16297_v31, %v16091_v35  ;;  %v8244_v35 = vpop.permute.xlu1 %8243  ;;  %v3564_v31 = vmax.f32 %v3494_v51, 0.0 }
 0x575   : > { %7519 = vst.msk [vmem:[%s15169_s25 + $0x50] sm:$0xff] %vm7508_vm11, %v3552_v42  ;;  %7522 = vst.msk [vmem:[%s15169_s25 + $0x68] sm:$0xff] %vm7508_vm11, %v3555_v15 }
 0x576   : > { %7521 = vst.msk [vmem:[%s15169_s25 + $0x60] sm:$0xff] %vm7508_vm11, %v3554_v40  ;;  %7524 = vst.msk [vmem:[%s15169_s25 + $0x78] sm:$0xff] %vm7508_vm11, %v3557_v10  ;;  %v3560_v53 = vmax.f32 %v3474_v12, 0.0 }
 0x577   : > { %8320 = vst.msk [vmem:[%s15169_s25 + $0x50] sm:$0xff] %vm8309_vm15, %v16352_v20  ;;  %8323 = vst.msk [vmem:[%s15169_s25 + $0x68] sm:$0xff] %vm8309_vm15, %v8240_v13 }
 0x578   : > { %7523 = vst.msk [vmem:[%s15169_s25 + $0x70] sm:$0xff] %vm7508_vm11, %v3556_v54  ;;  %7526 = vst.msk [vmem:[%s15169_s25 + $0x88] sm:$0xff] %vm7508_vm11, %v3559_v57 }
 0x579   : > { %8322 = vst.msk [vmem:[%s15169_s25 + $0x60] sm:$0xff] %vm8309_vm15, %v8238_v47  ;;  %8325 = vst.msk [vmem:[%s15169_s25 + $0x78] sm:$0xff] %vm8309_vm15, %v8244_v35 }
 0x57a   : > { %7525 = vst.msk [vmem:[%s15169_s25 + $0x80] sm:$0xff] %vm7508_vm11, %v3558_v8  ;;  %7528 = vst.msk [vmem:[%s15169_s25 + $0x98] sm:$0xff] %vm7508_vm11, %v3561_v39 }
 0x57b   : > { %8324 = vst.msk [vmem:[%s15169_s25 + $0x70] sm:$0xff] %vm8309_vm15, %v8242_v38 }
 0x57c   : > { %7527 = vst.msk [vmem:[%s15169_s25 + $0x90] sm:$0xff] %vm7508_vm11, %v3560_v53  ;;  %7530 = vst.msk [vmem:[%s15169_s25 + $0xa8] sm:$0xff] %vm7508_vm11, %v3563_v25 }
 0x57d   : > { %7529 = vst.msk [vmem:[%s15169_s25 + $0xa0] sm:$0xff] %vm7508_vm11, %v3562_v37  ;;  %7532 = vst.msk [vmem:[%s15169_s25 + $0xb8] sm:$0xff] %vm7508_vm11, %v3565_v55 }
 0x57e   : > { %7531 = vst.msk [vmem:[%s15169_s25 + $0xb0] sm:$0xff] %vm7508_vm11, %v3564_v31 }
 0x580   : > { %v8248_v52 = vpop.permute.xlu1 %8247 }
 0x581   : > { %8327 = vst.msk [vmem:[%s15169_s25 + $0x88] sm:$0xff] %vm8309_vm15, %v8248_v52  ;;  %v8246_v48 = vpop.permute.xlu0 %8245 }
 0x582   : > { %8326 = vst.msk [vmem:[%s15169_s25 + $0x80] sm:$0xff] %vm8309_vm15, %v8246_v48 }
 0x58c   : > { %v8252_v36 = vpop.permute.xlu1 %8251 }
 0x58d   : > { %8329 = vst.msk [vmem:[%s15169_s25 + $0x98] sm:$0xff] %vm8309_vm15, %v8252_v36 }
 0x58f   : > { %v8250_v32 = vpop.permute.xlu0 %8249 }
 0x590   : > { %8328 = vst.msk [vmem:[%s15169_s25 + $0x90] sm:$0xff] %vm8309_vm15, %v8250_v32 }
 0x59a   : > { %v8256_v16 = vpop.permute.xlu1 %8255 }
 0x59b   : > { %8331 = vst.msk [vmem:[%s15169_s25 + $0xa8] sm:$0xff] %vm8309_vm15, %v8256_v16  ;;  %v8254_v45 = vpop.permute.xlu0 %8253 }
 0x59c   : > { %8330 = vst.msk [vmem:[%s15169_s25 + $0xa0] sm:$0xff] %vm8309_vm15, %v8254_v45 }
 0x5a9   : > { %v8258_v56 = vpop.permute.xlu0 %8257 }
 0x5aa   : > { %v8260_v59 = vpop.permute.xlu1 %8259  ;;  %8332 = vst.msk [vmem:[%s15169_s25 + $0xb0] sm:$0xff] %vm8309_vm15, %v8258_v56 }
 0x5ab   : > { %8333 = vst.msk [vmem:[%s15169_s25 + $0xb8] sm:$0xff] %vm8309_vm15, %v8260_v59 }
 0x5b6   : > { %v8264_v1 = vpop.permute.xlu1 %8263 }
 0x5b7   : > { %8335 = vst.msk [vmem:[%s15169_s25 + $0xc8] sm:$0xff] %vm8309_vm15, %v8264_v1  ;;  %v8262_v23 = vpop.permute.xlu0 %8261 }
 0x5b8   : > { %8334 = vst.msk [vmem:[%s15169_s25 + $0xc0] sm:$0xff] %vm8309_vm15, %v8262_v23 }
 0x5c2   : > { %v8268_v11 = vpop.permute.xlu1 %8267 }
 0x5c3   : > { %8337 = vst.msk [vmem:[%s15169_s25 + $0xd8] sm:$0xff] %vm8309_vm15, %v8268_v11 }
 0x5c5   : > { %v8266_v0 = vpop.permute.xlu0 %8265 }
 0x5c6   : > { %8336 = vst.msk [vmem:[%s15169_s25 + $0xd0] sm:$0xff] %vm8309_vm15, %v8266_v0 }
 0x5d0   : > { %v8272_v20 = vpop.permute.xlu1 %8271 }
 0x5d1   : > { %8339 = vst.msk [vmem:[%s15169_s25 + $0xe8] sm:$0xff] %vm8309_vm15, %v8272_v20  ;;  %v8270_v17 = vpop.permute.xlu0 %8269 }
 0x5d2   : > { %8338 = vst.msk [vmem:[%s15169_s25 + $0xe0] sm:$0xff] %vm8309_vm15, %v8270_v17 }
 0x5df   : > { %v8274_v27 = vpop.permute.xlu0 %8273 }
 0x5e0   : > { %v8276_v30 = vpop.permute.xlu1 %8275  ;;  %8340 = vst.msk [vmem:[%s15169_s25 + $0xf0] sm:$0xff] %vm8309_vm15, %v8274_v27 }
 0x5e1   : > { %8341 = vst.msk [vmem:[%s15169_s25 + $0xf8] sm:$0xff] %vm8309_vm15, %v8276_v30 }
 0x5e2   : > { %9406 = shalt.err (!%p9403_p13)
}
 0x5e3   : > { %s9407_s11 = scalar_lea.hbm %s16517_s1, 4096  ;;  %s9411_s6 = scalar_lea.hbm %s17727_s5, 8192 }
 0x5e4   : > { %p9408_p1 = scmp.ne.s32.totalorder %s16517_s1, %s9407_s11  ;;  %p9412_p2 = scmp.lt.u32.totalorder %s16517_s1, %s17727_s5 }
 0x5e5   : > { %p9413_p6 = scmp.lt.u32.totalorder %s9411_s6, %s9407_s11  ;;  %p9415_p5 = scmp.lt.u32.totalorder %s9407_s11, %s16517_s1 }
 0x5e6   : > { %p9409_p3 = pnand %p9408_p1, %p17728_p9 }
 0x5e7   : > { %p9414_p10 = por %p9413_p6, %p9412_p2 }
 0x5e8   : > { %p9410_p7 = pneg %p9409_p3 }
 0x5e9   : > { %p9416_p4 = por %p9415_p5, %p9414_p10 }
 0x5eb   : > { %p9417_p8 = pnand %p9416_p4, %p9410_p7 }
 0x5ed   : > { %9420 = shalt.err (!%p9417_p8)
}
 0x5ee   : > { %s9502_s15 = smov 128  }
 0x5ef   : > { %8878 = dma.vmem_to_hbm [thread:$0]  (%p17728_p9), %s16519_s16, 4096, %s16517_s1, %s8343_s21, %s9502_s15, %s9502_s15, %s9500_s13  }
 0x5f0 PF: > { %s8371_s24 = sand.u32 1, %s9471_s17   ;;  %p17729_p11 = scmp.ne.s32.totalorder %s16996_s29, 0 }
 0x5f1   : > { %p17730_p0 = scmp.ge.s32.totalorder %s9483_s20, 2  ;;  %s8372_s3 = scalar_lea.sflag [#allocation4], %s8371_s24 }
 0x5f3   : > { %p8916_p12 = pnand %p17730_p0, %p17729_p11 }
 0x5f5   : > { %9466 = dma.done.wait (!%p8916_p12), %s8372_s3, 4096  }
 0x5f6   : > { %9468 = vsyncadd (!%p8916_p12), %s8372_s3, 4294963200  ;;  %p31_p13 = scmp.ge.s32.totalorder %s9811_s27, 4   ;;  %s17731_s17 = smov %s9475_s18 }
 0x5f7   : > { %s17732_s18 = smov %s9479_s19  ;;  %s17733_s19 = smov %s9823_s28 }
 0x5f8   : > { %s17734_s20 = smov %s9811_s27  ;;  %33 = sbr.rel (!%p31_p13) target bundleno = 21 (0x15), region = 158 }
 0x5ff   :  { %8377 = vsyncpa [#allocation3], 1 }
 0x600   :  { %8379 = vsyncpa [#allocation3 + $0x1], 1 }
 0x601   :  { %8380 = vsyncpa [#allocation6], 1 }
 0x602   :  { %8382 = vsyncpa [#allocation6 + $0x1], 1 }
 0x603   :  { %8383 = vsyncpa [#allocation9], 1 }
 0x604   :  { %8384 = vsyncpa [#allocation12], 1 }
 0x605   :  { %8385 = vsyncpa [#allocation15], 1 }
 0x606   :  { %8386 = vsyncpa [#allocation18], 1 }
 0x607   :  { %8387 = vsyncpa [#allocation4], 1 }
 0x608   :  { %8389 = vsyncpa [#allocation4 + $0x1], 1 }

</bundles_post_ra>
